<compile_context>
chip_gen: v7x
topology: tpu7x:2x2x1
jax: 0.10.0
libtpu: 0.0.40
codegen_flags: <defaults>
</compile_context>

<pallas_src>
import functools

import numpy as np
import jax
import jax.numpy as jnp
from jax.experimental import pallas as pl
from jax.experimental.pallas import tpu as pltpu


def _round_up(x, m):
    return (x + m - 1) // m * m


# --------------------------------------------------------------------------
# Fused Pallas kernel (one batch element per grid step)
# --------------------------------------------------------------------------
def _upblock_kernel(x1_ref, x2_ref, mask_ref, w1_ref, b1_ref, w2_ref,
                    o_ref, col1_ref, col2_ref, buf_ref,
                    *, offs, lc, shift, delta, c1p, c2p, cbp, inv_pv):
    """x1_ref : (1, c1p, Lin)   upsampled x1, spatially padded, flattened, ch-padded
       x2_ref : (1, c2p, Lin)   x2, spatially padded, flattened, ch-padded
       mask   : (1, lc)         1.0 at valid output flat positions, else 0.0
       w1_ref : (cbp, 27*c1p)   packed conv1 weights (zero rows/cols for padding)
       b1_ref : (cbp, 1)        packed conv1 bias
       w2_ref : (Cout, 27*(c2p+cbp)) packed conv2 weights ([x2 | conv1out] per tap)
       o_ref  : (1, Cout, lc)
       col1/col2 : im2col scratches ; buf : staged conv1 output (= conv2 padded input)
    """
    # ---- conv1: build im2col in VMEM (27 static lane-offset slices), one matmul ----
    for t, off in enumerate(offs):
        col1_ref[t * c1p:(t + 1) * c1p, :] = x1_ref[0, :, off:off + lc]
    y1 = jnp.dot(w1_ref[...], col1_ref[...], preferred_element_type=jnp.float32)
    y1 = (y1 + b1_ref[...]) * mask_ref[...]          # bias + zero garbage/pad lanes

    # Stage conv1 output as conv2's zero-padded input (lane-aligned placement).
    buf_ref[...] = jnp.zeros_like(buf_ref)
    buf_ref[:, shift:shift + lc] = y1

    # ---- conv2: im2col over concat([x2, conv1_out]) in VMEM, one matmul ----
    g = c2p + cbp
    for t, off in enumerate(offs):
        col2_ref[t * g:t * g + c2p, :] = x2_ref[0, :, off:off + lc]
        col2_ref[t * g + c2p:(t + 1) * g, :] = buf_ref[:, off + delta:off + delta + lc]
    y2 = jnp.dot(w2_ref[...], col2_ref[...], preferred_element_type=jnp.float32)

    # ---- InstanceNorm3d (biased var, eps=1e-5) + LeakyReLU(0.2) ----
    m = mask_ref[...]
    y2m = y2 * m
    s1 = jnp.sum(y2m, axis=1, keepdims=True)          # sum over valid positions
    s2 = jnp.sum(y2m * y2, axis=1, keepdims=True)     # sum of squares (mask in {0,1})
    mean = s1 * inv_pv
    var = jnp.maximum(s2 * inv_pv - mean * mean, 0.0)
    yn = (y2 - mean) * jax.lax.rsqrt(var + 1e-5)
    o_ref[0] = jnp.where(yn >= 0.0, yn, 0.2 * yn)


# --------------------------------------------------------------------------
# Wrapper: layout glue (pad / flatten / pack weights) + single pallas_call
# --------------------------------------------------------------------------
def up_block_forward(x1, x2, w1, b1, w2):
    """x1: (N, Cin, D, H, W); x2: (N, Cin-Cout, 2D, 2H, 2W);
       w1: (3,3,3,Cin,Cout); b1: (Cout,); w2: (3,3,3,Cin,Cout).
       Returns (N, Cout, 2D, 2H, 2W) in NCDHW, matching the PyTorch UpBlock."""
    N, Cin, D, H, W = x1.shape
    C2 = x2.shape[1]
    Cout = w1.shape[-1]
    Du, Hu, Wu = 2 * D, 2 * H, 2 * W
    assert x2.shape == (N, C2, Du, Hu, Wu)
    assert w2.shape[3] == C2 + Cout

    Dp, Hp, Wp = Du + 2, Hu + 2, Wu + 2
    Pp = Dp * Hp * Wp                       # flattened padded grid size
    Pv = Du * Hu * Wu                       # number of valid output positions
    Lc = _round_up(Pp, 128)                 # lane-dense compute width
    off_max = 2 * Hp * Wp + 2 * Wp + 2      # largest tap offset
    M = Hp * Wp + Wp + 1                    # (+1,+1,+1) shift of conv1 out -> conv2 pad
    SHIFT = _round_up(M, 128)               # aligned placement offset inside buf
    delta = SHIFT - M
    Lin = _round_up(Lc + off_max, 128)
    Lbuf = max(_round_up(Lc + off_max + delta, 128), _round_up(SHIFT + Lc, 128))

    C1p = _round_up(Cin, 8)                 # channel padding -> full sublane tiles
    C2p = _round_up(C2, 8)
    Cbp = _round_up(Cout, 8)
    K1 = 27 * C1p
    K2 = 27 * (C2p + Cbp)

    offs = tuple(dz * Hp * Wp + dy * Wp + dx
                 for dz in range(3) for dy in range(3) for dx in range(3))

    # --- glue: upsample (wrapper-side), pad, flatten, channel-pad ---
    x1u = jnp.repeat(jnp.repeat(jnp.repeat(x1, 2, axis=2), 2, axis=3), 2, axis=4)

    def to_flat(x, c_pad):
        n, c = x.shape[0], x.shape[1]
        xp = jnp.pad(x, ((0, 0), (0, 0), (1, 1), (1, 1), (1, 1)))
        xf = xp.reshape(n, c, Pp)
        xf = jnp.pad(xf, ((0, 0), (0, c_pad - c), (0, Lin - Pp)))
        return xf.astype(jnp.float32)

    x1f = to_flat(x1u, C1p)                 # (N, C1p, Lin)
    x2f = to_flat(x2, C2p)                  # (N, C2p, Lin)

    # Validity mask over flat output positions (static).
    mask3 = np.zeros((Dp, Hp, Wp), np.float32)
    mask3[:Du, :Hu, :Wu] = 1.0
    mask_np = np.zeros((1, Lc), np.float32)
    mask_np[0, :Pp] = mask3.reshape(-1)
    mask = jnp.asarray(mask_np)

    # --- pack weights host-side into (Cout_pad, 27*C_pad) layout ---
    w1t = jnp.transpose(w1.reshape(27, Cin, Cout), (2, 0, 1))          # (Cout,27,Cin)
    w1m = jnp.zeros((Cbp, 27, C1p), jnp.float32).at[:Cout, :, :Cin].set(w1t)
    w1m = w1m.reshape(Cbp, K1)
    b1m = jnp.zeros((Cbp, 1), jnp.float32).at[:Cout, 0].set(b1)

    w2t = jnp.transpose(w2.reshape(27, C2 + Cout, Cout), (2, 0, 1))    # (Cout,27,C2+Cout)
    w2m = jnp.zeros((Cout, 27, C2p + Cbp), jnp.float32)
    w2m = w2m.at[:, :, :C2].set(w2t[:, :, :C2])                        # x2 channels
    w2m = w2m.at[:, :, C2p:C2p + Cout].set(w2t[:, :, C2:])             # conv1-out channels
    w2m = w2m.reshape(Cout, K2)

    kernel = functools.partial(
        _upblock_kernel, offs=offs, lc=Lc, shift=SHIFT, delta=delta,
        c1p=C1p, c2p=C2p, cbp=Cbp, inv_pv=1.0 / Pv)

    out = pl.pallas_call(
        kernel,
        out_shape=jax.ShapeDtypeStruct((N, Cout, Lc), jnp.float32),
        grid=(N,),
        in_specs=[
            pl.BlockSpec((1, C1p, Lin), lambda n: (n, 0, 0)),   # x1 (upsampled, padded, flat)
            pl.BlockSpec((1, C2p, Lin), lambda n: (n, 0, 0)),   # x2 (padded, flat)
            pl.BlockSpec((1, Lc), lambda n: (0, 0)),            # validity mask
            pl.BlockSpec((Cbp, K1), lambda n: (0, 0)),          # packed w1
            pl.BlockSpec((Cbp, 1), lambda n: (0, 0)),           # packed b1
            pl.BlockSpec((Cout, K2), lambda n: (0, 0)),         # packed w2
        ],
        out_specs=pl.BlockSpec((1, Cout, Lc), lambda n: (n, 0, 0)),
        scratch_shapes=[
            pltpu.VMEM((K1, Lc), jnp.float32),   # im2col for conv1
            pltpu.VMEM((K2, Lc), jnp.float32),   # im2col for conv2
            pltpu.VMEM((Cbp, Lbuf), jnp.float32),  # staged conv1 output (padded layout)
        ],
        compiler_params=pltpu.CompilerParams(dimension_semantics=("parallel",)),
    )(x1f, x2f, mask, w1m, b1m, w2m)

    # Drop flat-layout garbage: keep valid interior positions only.
    out = out[:, :, :Pp].reshape(N, Cout, Dp, Hp, Wp)[:, :, :Du, :Hu, :Wu]
    return out


# --------------------------------------------------------------------------
# Pure-JAX reference (for correctness check only)
# --------------------------------------------------------------------------
def _ref_conv(x, w_dhwio, b=None):
    w_oidhw = jnp.transpose(w_dhwio, (4, 3, 0, 1, 2))
    y = jax.lax.conv_general_dilated(
        x, w_oidhw, window_strides=(1, 1, 1),
        padding=((1, 1), (1, 1), (1, 1)),
        dimension_numbers=('NCDHW', 'OIDHW', 'NCDHW'))
    if b is not None:
        y = y + b.reshape(1, -1, 1, 1, 1)
    return y


def ref_forward(x1, x2, w1, b1, w2):
    x1u = jnp.repeat(jnp.repeat(jnp.repeat(x1, 2, axis=2), 2, axis=3), 2, axis=4)
    x1c = _ref_conv(x1u, w1, b1)
    x = jnp.concatenate([x2, x1c], axis=1)
    y = _ref_conv(x, w2)
    mean = y.mean(axis=(2, 3, 4), keepdims=True)
    var = ((y - mean) ** 2).mean(axis=(2, 3, 4), keepdims=True)
    yn = (y - mean) * jax.lax.rsqrt(var + 1e-5)
    return jnp.where(yn >= 0, yn, 0.2 * yn)


# --------------------------------------------------------------------------
if __name__ == "__main__":
    in_channels, out_channels = 4, 2
    N, D, H, W = 2, 4, 4, 4          # x1 spatial; x2 lives at 2x resolution

    key = jax.random.PRNGKey(0)
    k1, k2, k3, k4, k5 = jax.random.split(key, 5)
    x1 = jax.random.normal(k1, (N, in_channels, D, H, W), jnp.float32)
    x2 = jax.random.normal(
        k2, (N, in_channels - out_channels, 2 * D, 2 * H, 2 * W), jnp.float32)

    # Synthetic parameters (shapes per nn.Conv3d(.., 3, padding=1)), laid out DHWIO.
    w1 = jax.random.normal(k3, (3, 3, 3, in_channels, out_channels), jnp.float32) * 0.1
    b1 = jax.random.normal(k4, (out_channels,), jnp.float32) * 0.1
    w2 = jax.random.normal(k5, (3, 3, 3, in_channels, out_channels), jnp.float32) * 0.1

    out = jax.block_until_ready(up_block_forward(x1, x2, w1, b1, w2))
    assert out.shape == (N, out_channels, 2 * D, 2 * H, 2 * W)

    ref = jax.block_until_ready(ref_forward(x1, x2, w1, b1, w2))
    np.testing.assert_allclose(np.asarray(out), np.asarray(ref), atol=1e-3, rtol=1e-3)
    print("KERNEL_OK")
</pallas_src>

<mosaic_0001>
module attributes {stable_mosaic.version = 11 : i64} {
  func.func @_upblock_kernel(%arg0: i32, %arg1: memref<1x8x1280xf32, #tpu.memory_space<vmem>>, %arg2: memref<1x8x1280xf32, #tpu.memory_space<vmem>>, %arg3: memref<1x1024xf32, #tpu.memory_space<vmem>>, %arg4: memref<8x216xf32, #tpu.memory_space<vmem>>, %arg5: memref<8x1xf32, #tpu.memory_space<vmem>>, %arg6: memref<2x432xf32, #tpu.memory_space<vmem>>, %arg7: memref<1x2x1024xf32, #tpu.memory_space<vmem>>, %arg8: memref<216x1024xf32, #tpu.memory_space<vmem>>, %arg9: memref<432x1024xf32, #tpu.memory_space<vmem>>, %arg10: memref<8x1280xf32, #tpu.memory_space<vmem>>) attributes {dimension_semantics = [#tpu.dimension_semantics<parallel>], iteration_bounds = array<i64: 2>, scalar_prefetch = 0 : i64, scratch_operands = 3 : i64, tpu.core_type = #tpu.core_type<tc>, window_params = [{transform_indices = @transform_0, window_bounds = array<i64: 1, 8, 1280>}, {transform_indices = @transform_1, window_bounds = array<i64: 1, 8, 1280>}, {pipeline_mode = #tpu.pipeline_mode<synchronous>, transform_indices = @transform_2, window_bounds = array<i64: 1, 1024>}, {pipeline_mode = #tpu.pipeline_mode<synchronous>, transform_indices = @transform_3, window_bounds = array<i64: 8, 216>}, {pipeline_mode = #tpu.pipeline_mode<synchronous>, transform_indices = @transform_4, window_bounds = array<i64: 8, 1>}, {pipeline_mode = #tpu.pipeline_mode<synchronous>, transform_indices = @transform_5, window_bounds = array<i64: 2, 432>}, {transform_indices = @transform_6, window_bounds = array<i64: 1, 2, 1024>}]} {
    %c0 = arith.constant 0 : index
    %c0_0 = arith.constant 0 : index
    %c0_1 = arith.constant 0 : index
    %0 = vector.load %arg1[%c0, %c0_0, %c0_1] : memref<1x8x1280xf32, #tpu.memory_space<vmem>>, vector<1x8x1024xf32>
    %1 = vector.shape_cast %0 : vector<1x8x1024xf32> to vector<8x1024xf32>
    %c0_2 = arith.constant 0 : index
    %c0_3 = arith.constant 0 : index
    %2 = vector.load %arg8[%c0_2, %c0_3] : memref<216x1024xf32, #tpu.memory_space<vmem>>, vector<8x1024xf32>
    tpu.vector_store %arg8[%c0_2, %c0_3], %1 {strides = array<i32>} : memref<216x1024xf32, #tpu.memory_space<vmem>>, vector<8x1024xf32>,
    %c0_4 = arith.constant 0 : index
    %c0_5 = arith.constant 0 : index
    %c1 = arith.constant 1 : index
    %3 = vector.load %arg1[%c0_4, %c0_5, %c1] : memref<1x8x1280xf32, #tpu.memory_space<vmem>>, vector<1x8x1024xf32>
    %4 = vector.shape_cast %3 : vector<1x8x1024xf32> to vector<8x1024xf32>
    %c8 = arith.constant 8 : index
    %c0_6 = arith.constant 0 : index
    %5 = vector.load %arg8[%c8, %c0_6] : memref<216x1024xf32, #tpu.memory_space<vmem>>, vector<8x1024xf32>
    tpu.vector_store %arg8[%c8, %c0_6], %4 {strides = array<i32>} : memref<216x1024xf32, #tpu.memory_space<vmem>>, vector<8x1024xf32>,
    %c0_7 = arith.constant 0 : index
    %c0_8 = arith.constant 0 : index
    %c2 = arith.constant 2 : index
    %6 = vector.load %arg1[%c0_7, %c0_8, %c2] : memref<1x8x1280xf32, #tpu.memory_space<vmem>>, vector<1x8x1024xf32>
    %7 = vector.shape_cast %6 : vector<1x8x1024xf32> to vector<8x1024xf32>
    %c16 = arith.constant 16 : index
    %c0_9 = arith.constant 0 : index
    %8 = vector.load %arg8[%c16, %c0_9] : memref<216x1024xf32, #tpu.memory_space<vmem>>, vector<8x1024xf32>
    tpu.vector_store %arg8[%c16, %c0_9], %7 {strides = array<i32>} : memref<216x1024xf32, #tpu.memory_space<vmem>>, vector<8x1024xf32>,
    %c0_10 = arith.constant 0 : index
    %c0_11 = arith.constant 0 : index
    %c10 = arith.constant 10 : index
    %9 = vector.load %arg1[%c0_10, %c0_11, %c10] : memref<1x8x1280xf32, #tpu.memory_space<vmem>>, vector<1x8x1024xf32>
    %10 = vector.shape_cast %9 : vector<1x8x1024xf32> to vector<8x1024xf32>
    %c24 = arith.constant 24 : index
    %c0_12 = arith.constant 0 : index
    %11 = vector.load %arg8[%c24, %c0_12] : memref<216x1024xf32, #tpu.memory_space<vmem>>, vector<8x1024xf32>
    tpu.vector_store %arg8[%c24, %c0_12], %10 {strides = array<i32>} : memref<216x1024xf32, #tpu.memory_space<vmem>>, vector<8x1024xf32>,
    %c0_13 = arith.constant 0 : index
    %c0_14 = arith.constant 0 : index
    %c11 = arith.constant 11 : index
    %12 = vector.load %arg1[%c0_13, %c0_14, %c11] : memref<1x8x1280xf32, #tpu.memory_space<vmem>>, vector<1x8x1024xf32>
    %13 = vector.shape_cast %12 : vector<1x8x1024xf32> to vector<8x1024xf32>
    %c32 = arith.constant 32 : index
    %c0_15 = arith.constant 0 : index
    %14 = vector.load %arg8[%c32, %c0_15] : memref<216x1024xf32, #tpu.memory_space<vmem>>, vector<8x1024xf32>
    tpu.vector_store %arg8[%c32, %c0_15], %13 {strides = array<i32>} : memref<216x1024xf32, #tpu.memory_space<vmem>>, vector<8x1024xf32>,
    %c0_16 = arith.constant 0 : index
    %c0_17 = arith.constant 0 : index
    %c12 = arith.constant 12 : index
    %15 = vector.load %arg1[%c0_16, %c0_17, %c12] : memref<1x8x1280xf32, #tpu.memory_space<vmem>>, vector<1x8x1024xf32>
    %16 = vector.shape_cast %15 : vector<1x8x1024xf32> to vector<8x1024xf32>
    %c40 = arith.constant 40 : index
    %c0_18 = arith.constant 0 : index
    %17 = vector.load %arg8[%c40, %c0_18] : memref<216x1024xf32, #tpu.memory_space<vmem>>, vector<8x1024xf32>
    tpu.vector_store %arg8[%c40, %c0_18], %16 {strides = array<i32>} : memref<216x1024xf32, #tpu.memory_space<vmem>>, vector<8x1024xf32>,
    %c0_19 = arith.constant 0 : index
    %c0_20 = arith.constant 0 : index
    %c20 = arith.constant 20 : index
    %18 = vector.load %arg1[%c0_19, %c0_20, %c20] : memref<1x8x1280xf32, #tpu.memory_space<vmem>>, vector<1x8x1024xf32>
    %19 = vector.shape_cast %18 : vector<1x8x1024xf32> to vector<8x1024xf32>
    %c48 = arith.constant 48 : index
    %c0_21 = arith.constant 0 : index
    %20 = vector.load %arg8[%c48, %c0_21] : memref<216x1024xf32, #tpu.memory_space<vmem>>, vector<8x1024xf32>
    tpu.vector_store %arg8[%c48, %c0_21], %19 {strides = array<i32>} : memref<216x1024xf32, #tpu.memory_space<vmem>>, vector<8x1024xf32>,
    %c0_22 = arith.constant 0 : index
    %c0_23 = arith.constant 0 : index
    %c21 = arith.constant 21 : index
    %21 = vector.load %arg1[%c0_22, %c0_23, %c21] : memref<1x8x1280xf32, #tpu.memory_space<vmem>>, vector<1x8x1024xf32>
    %22 = vector.shape_cast %21 : vector<1x8x1024xf32> to vector<8x1024xf32>
    %c56 = arith.constant 56 : index
    %c0_24 = arith.constant 0 : index
    %23 = vector.load %arg8[%c56, %c0_24] : memref<216x1024xf32, #tpu.memory_space<vmem>>, vector<8x1024xf32>
    tpu.vector_store %arg8[%c56, %c0_24], %22 {strides = array<i32>} : memref<216x1024xf32, #tpu.memory_space<vmem>>, vector<8x1024xf32>,
    %c0_25 = arith.constant 0 : index
    %c0_26 = arith.constant 0 : index
    %c22 = arith.constant 22 : index
    %24 = vector.load %arg1[%c0_25, %c0_26, %c22] : memref<1x8x1280xf32, #tpu.memory_space<vmem>>, vector<1x8x1024xf32>
    %25 = vector.shape_cast %24 : vector<1x8x1024xf32> to vector<8x1024xf32>
    %c64 = arith.constant 64 : index
    %c0_27 = arith.constant 0 : index
    %26 = vector.load %arg8[%c64, %c0_27] : memref<216x1024xf32, #tpu.memory_space<vmem>>, vector<8x1024xf32>
    tpu.vector_store %arg8[%c64, %c0_27], %25 {strides = array<i32>} : memref<216x1024xf32, #tpu.memory_space<vmem>>, vector<8x1024xf32>,
    %c0_28 = arith.constant 0 : index
    %c0_29 = arith.constant 0 : index
    %c100 = arith.constant 100 : index
    %27 = vector.load %arg1[%c0_28, %c0_29, %c100] : memref<1x8x1280xf32, #tpu.memory_space<vmem>>, vector<1x8x1024xf32>
    %28 = vector.shape_cast %27 : vector<1x8x1024xf32> to vector<8x1024xf32>
    %c72 = arith.constant 72 : index
    %c0_30 = arith.constant 0 : index
    %29 = vector.load %arg8[%c72, %c0_30] : memref<216x1024xf32, #tpu.memory_space<vmem>>, vector<8x1024xf32>
    tpu.vector_store %arg8[%c72, %c0_30], %28 {strides = array<i32>} : memref<216x1024xf32, #tpu.memory_space<vmem>>, vector<8x1024xf32>,
    %c0_31 = arith.constant 0 : index
    %c0_32 = arith.constant 0 : index
    %c101 = arith.constant 101 : index
    %30 = vector.load %arg1[%c0_31, %c0_32, %c101] : memref<1x8x1280xf32, #tpu.memory_space<vmem>>, vector<1x8x1024xf32>
    %31 = vector.shape_cast %30 : vector<1x8x1024xf32> to vector<8x1024xf32>
    %c80 = arith.constant 80 : index
    %c0_33 = arith.constant 0 : index
    %32 = vector.load %arg8[%c80, %c0_33] : memref<216x1024xf32, #tpu.memory_space<vmem>>, vector<8x1024xf32>
    tpu.vector_store %arg8[%c80, %c0_33], %31 {strides = array<i32>} : memref<216x1024xf32, #tpu.memory_space<vmem>>, vector<8x1024xf32>,
    %c0_34 = arith.constant 0 : index
    %c0_35 = arith.constant 0 : index
    %c102 = arith.constant 102 : index
    %33 = vector.load %arg1[%c0_34, %c0_35, %c102] : memref<1x8x1280xf32, #tpu.memory_space<vmem>>, vector<1x8x1024xf32>
    %34 = vector.shape_cast %33 : vector<1x8x1024xf32> to vector<8x1024xf32>
    %c88 = arith.constant 88 : index
    %c0_36 = arith.constant 0 : index
    %35 = vector.load %arg8[%c88, %c0_36] : memref<216x1024xf32, #tpu.memory_space<vmem>>, vector<8x1024xf32>
    tpu.vector_store %arg8[%c88, %c0_36], %34 {strides = array<i32>} : memref<216x1024xf32, #tpu.memory_space<vmem>>, vector<8x1024xf32>,
    %c0_37 = arith.constant 0 : index
    %c0_38 = arith.constant 0 : index
    %c110 = arith.constant 110 : index
    %36 = vector.load %arg1[%c0_37, %c0_38, %c110] : memref<1x8x1280xf32, #tpu.memory_space<vmem>>, vector<1x8x1024xf32>
    %37 = vector.shape_cast %36 : vector<1x8x1024xf32> to vector<8x1024xf32>
    %c96 = arith.constant 96 : index
    %c0_39 = arith.constant 0 : index
    %38 = vector.load %arg8[%c96, %c0_39] : memref<216x1024xf32, #tpu.memory_space<vmem>>, vector<8x1024xf32>
    tpu.vector_store %arg8[%c96, %c0_39], %37 {strides = array<i32>} : memref<216x1024xf32, #tpu.memory_space<vmem>>, vector<8x1024xf32>,
    %c0_40 = arith.constant 0 : index
    %c0_41 = arith.constant 0 : index
    %c111 = arith.constant 111 : index
    %39 = vector.load %arg1[%c0_40, %c0_41, %c111] : memref<1x8x1280xf32, #tpu.memory_space<vmem>>, vector<1x8x1024xf32>
    %40 = vector.shape_cast %39 : vector<1x8x1024xf32> to vector<8x1024xf32>
    %c104 = arith.constant 104 : index
    %c0_42 = arith.constant 0 : index
    %41 = vector.load %arg8[%c104, %c0_42] : memref<216x1024xf32, #tpu.memory_space<vmem>>, vector<8x1024xf32>
    tpu.vector_store %arg8[%c104, %c0_42], %40 {strides = array<i32>} : memref<216x1024xf32, #tpu.memory_space<vmem>>, vector<8x1024xf32>,
    %c0_43 = arith.constant 0 : index
    %c0_44 = arith.constant 0 : index
    %c112 = arith.constant 112 : index
    %42 = vector.load %arg1[%c0_43, %c0_44, %c112] : memref<1x8x1280xf32, #tpu.memory_space<vmem>>, vector<1x8x1024xf32>
    %43 = vector.shape_cast %42 : vector<1x8x1024xf32> to vector<8x1024xf32>
    %c112_45 = arith.constant 112 : index
    %c0_46 = arith.constant 0 : index
    %44 = vector.load %arg8[%c112_45, %c0_46] : memref<216x1024xf32, #tpu.memory_space<vmem>>, vector<8x1024xf32>
    tpu.vector_store %arg8[%c112_45, %c0_46], %43 {strides = array<i32>} : memref<216x1024xf32, #tpu.memory_space<vmem>>, vector<8x1024xf32>,
    %c0_47 = arith.constant 0 : index
    %c0_48 = arith.constant 0 : index
    %c120 = arith.constant 120 : index
    %45 = vector.load %arg1[%c0_47, %c0_48, %c120] : memref<1x8x1280xf32, #tpu.memory_space<vmem>>, vector<1x8x1024xf32>
    %46 = vector.shape_cast %45 : vector<1x8x1024xf32> to vector<8x1024xf32>
    %c120_49 = arith.constant 120 : index
    %c0_50 = arith.constant 0 : index
    %47 = vector.load %arg8[%c120_49, %c0_50] : memref<216x1024xf32, #tpu.memory_space<vmem>>, vector<8x1024xf32>
    tpu.vector_store %arg8[%c120_49, %c0_50], %46 {strides = array<i32>} : memref<216x1024xf32, #tpu.memory_space<vmem>>, vector<8x1024xf32>,
    %c0_51 = arith.constant 0 : index
    %c0_52 = arith.constant 0 : index
    %c121 = arith.constant 121 : index
    %48 = vector.load %arg1[%c0_51, %c0_52, %c121] : memref<1x8x1280xf32, #tpu.memory_space<vmem>>, vector<1x8x1024xf32>
    %49 = vector.shape_cast %48 : vector<1x8x1024xf32> to vector<8x1024xf32>
    %c128 = arith.constant 128 : index
    %c0_53 = arith.constant 0 : index
    %50 = vector.load %arg8[%c128, %c0_53] : memref<216x1024xf32, #tpu.memory_space<vmem>>, vector<8x1024xf32>
    tpu.vector_store %arg8[%c128, %c0_53], %49 {strides = array<i32>} : memref<216x1024xf32, #tpu.memory_space<vmem>>, vector<8x1024xf32>,
    %c0_54 = arith.constant 0 : index
    %c0_55 = arith.constant 0 : index
    %c122 = arith.constant 122 : index
    %51 = vector.load %arg1[%c0_54, %c0_55, %c122] : memref<1x8x1280xf32, #tpu.memory_space<vmem>>, vector<1x8x1024xf32>
    %52 = vector.shape_cast %51 : vector<1x8x1024xf32> to vector<8x1024xf32>
    %c136 = arith.constant 136 : index
    %c0_56 = arith.constant 0 : index
    %53 = vector.load %arg8[%c136, %c0_56] : memref<216x1024xf32, #tpu.memory_space<vmem>>, vector<8x1024xf32>
    tpu.vector_store %arg8[%c136, %c0_56], %52 {strides = array<i32>} : memref<216x1024xf32, #tpu.memory_space<vmem>>, vector<8x1024xf32>,
    %c0_57 = arith.constant 0 : index
    %c0_58 = arith.constant 0 : index
    %c200 = arith.constant 200 : index
    %54 = vector.load %arg1[%c0_57, %c0_58, %c200] : memref<1x8x1280xf32, #tpu.memory_space<vmem>>, vector<1x8x1024xf32>
    %55 = vector.shape_cast %54 : vector<1x8x1024xf32> to vector<8x1024xf32>
    %c144 = arith.constant 144 : index
    %c0_59 = arith.constant 0 : index
    %56 = vector.load %arg8[%c144, %c0_59] : memref<216x1024xf32, #tpu.memory_space<vmem>>, vector<8x1024xf32>
    tpu.vector_store %arg8[%c144, %c0_59], %55 {strides = array<i32>} : memref<216x1024xf32, #tpu.memory_space<vmem>>, vector<8x1024xf32>,
    %c0_60 = arith.constant 0 : index
    %c0_61 = arith.constant 0 : index
    %c201 = arith.constant 201 : index
    %57 = vector.load %arg1[%c0_60, %c0_61, %c201] : memref<1x8x1280xf32, #tpu.memory_space<vmem>>, vector<1x8x1024xf32>
    %58 = vector.shape_cast %57 : vector<1x8x1024xf32> to vector<8x1024xf32>
    %c152 = arith.constant 152 : index
    %c0_62 = arith.constant 0 : index
    %59 = vector.load %arg8[%c152, %c0_62] : memref<216x1024xf32, #tpu.memory_space<vmem>>, vector<8x1024xf32>
    tpu.vector_store %arg8[%c152, %c0_62], %58 {strides = array<i32>} : memref<216x1024xf32, #tpu.memory_space<vmem>>, vector<8x1024xf32>,
    %c0_63 = arith.constant 0 : index
    %c0_64 = arith.constant 0 : index
    %c202 = arith.constant 202 : index
    %60 = vector.load %arg1[%c0_63, %c0_64, %c202] : memref<1x8x1280xf32, #tpu.memory_space<vmem>>, vector<1x8x1024xf32>
    %61 = vector.shape_cast %60 : vector<1x8x1024xf32> to vector<8x1024xf32>
    %c160 = arith.constant 160 : index
    %c0_65 = arith.constant 0 : index
    %62 = vector.load %arg8[%c160, %c0_65] : memref<216x1024xf32, #tpu.memory_space<vmem>>, vector<8x1024xf32>
    tpu.vector_store %arg8[%c160, %c0_65], %61 {strides = array<i32>} : memref<216x1024xf32, #tpu.memory_space<vmem>>, vector<8x1024xf32>,
    %c0_66 = arith.constant 0 : index
    %c0_67 = arith.constant 0 : index
    %c210 = arith.constant 210 : index
    %63 = vector.load %arg1[%c0_66, %c0_67, %c210] : memref<1x8x1280xf32, #tpu.memory_space<vmem>>, vector<1x8x1024xf32>
    %64 = vector.shape_cast %63 : vector<1x8x1024xf32> to vector<8x1024xf32>
    %c168 = arith.constant 168 : index
    %c0_68 = arith.constant 0 : index
    %65 = vector.load %arg8[%c168, %c0_68] : memref<216x1024xf32, #tpu.memory_space<vmem>>, vector<8x1024xf32>
    tpu.vector_store %arg8[%c168, %c0_68], %64 {strides = array<i32>} : memref<216x1024xf32, #tpu.memory_space<vmem>>, vector<8x1024xf32>,
    %c0_69 = arith.constant 0 : index
    %c0_70 = arith.constant 0 : index
    %c211 = arith.constant 211 : index
    %66 = vector.load %arg1[%c0_69, %c0_70, %c211] : memref<1x8x1280xf32, #tpu.memory_space<vmem>>, vector<1x8x1024xf32>
    %67 = vector.shape_cast %66 : vector<1x8x1024xf32> to vector<8x1024xf32>
    %c176 = arith.constant 176 : index
    %c0_71 = arith.constant 0 : index
    %68 = vector.load %arg8[%c176, %c0_71] : memref<216x1024xf32, #tpu.memory_space<vmem>>, vector<8x1024xf32>
    tpu.vector_store %arg8[%c176, %c0_71], %67 {strides = array<i32>} : memref<216x1024xf32, #tpu.memory_space<vmem>>, vector<8x1024xf32>,
    %c0_72 = arith.constant 0 : index
    %c0_73 = arith.constant 0 : index
    %c212 = arith.constant 212 : index
    %69 = vector.load %arg1[%c0_72, %c0_73, %c212] : memref<1x8x1280xf32, #tpu.memory_space<vmem>>, vector<1x8x1024xf32>
    %70 = vector.shape_cast %69 : vector<1x8x1024xf32> to vector<8x1024xf32>
    %c184 = arith.constant 184 : index
    %c0_74 = arith.constant 0 : index
    %71 = vector.load %arg8[%c184, %c0_74] : memref<216x1024xf32, #tpu.memory_space<vmem>>, vector<8x1024xf32>
    tpu.vector_store %arg8[%c184, %c0_74], %70 {strides = array<i32>} : memref<216x1024xf32, #tpu.memory_space<vmem>>, vector<8x1024xf32>,
    %c0_75 = arith.constant 0 : index
    %c0_76 = arith.constant 0 : index
    %c220 = arith.constant 220 : index
    %72 = vector.load %arg1[%c0_75, %c0_76, %c220] : memref<1x8x1280xf32, #tpu.memory_space<vmem>>, vector<1x8x1024xf32>
    %73 = vector.shape_cast %72 : vector<1x8x1024xf32> to vector<8x1024xf32>
    %c192 = arith.constant 192 : index
    %c0_77 = arith.constant 0 : index
    %74 = vector.load %arg8[%c192, %c0_77] : memref<216x1024xf32, #tpu.memory_space<vmem>>, vector<8x1024xf32>
    tpu.vector_store %arg8[%c192, %c0_77], %73 {strides = array<i32>} : memref<216x1024xf32, #tpu.memory_space<vmem>>, vector<8x1024xf32>,
    %c0_78 = arith.constant 0 : index
    %c0_79 = arith.constant 0 : index
    %c221 = arith.constant 221 : index
    %75 = vector.load %arg1[%c0_78, %c0_79, %c221] : memref<1x8x1280xf32, #tpu.memory_space<vmem>>, vector<1x8x1024xf32>
    %76 = vector.shape_cast %75 : vector<1x8x1024xf32> to vector<8x1024xf32>
    %c200_80 = arith.constant 200 : index
    %c0_81 = arith.constant 0 : index
    %77 = vector.load %arg8[%c200_80, %c0_81] : memref<216x1024xf32, #tpu.memory_space<vmem>>, vector<8x1024xf32>
    tpu.vector_store %arg8[%c200_80, %c0_81], %76 {strides = array<i32>} : memref<216x1024xf32, #tpu.memory_space<vmem>>, vector<8x1024xf32>,
    %c0_82 = arith.constant 0 : index
    %c0_83 = arith.constant 0 : index
    %c222 = arith.constant 222 : index
    %78 = vector.load %arg1[%c0_82, %c0_83, %c222] : memref<1x8x1280xf32, #tpu.memory_space<vmem>>, vector<1x8x1024xf32>
    %79 = vector.shape_cast %78 : vector<1x8x1024xf32> to vector<8x1024xf32>
    %c208 = arith.constant 208 : index
    %c0_84 = arith.constant 0 : index
    %80 = vector.load %arg8[%c208, %c0_84] : memref<216x1024xf32, #tpu.memory_space<vmem>>, vector<8x1024xf32>
    tpu.vector_store %arg8[%c208, %c0_84], %79 {strides = array<i32>} : memref<216x1024xf32, #tpu.memory_space<vmem>>, vector<8x1024xf32>,
    %c0_85 = arith.constant 0 : index
    %c0_86 = arith.constant 0 : index
    %81 = vector.load %arg4[%c0_85, %c0_86] : memref<8x216xf32, #tpu.memory_space<vmem>>, vector<8x216xf32>
    %c0_87 = arith.constant 0 : index
    %c0_88 = arith.constant 0 : index
    %82 = vector.load %arg8[%c0_87, %c0_88] : memref<216x1024xf32, #tpu.memory_space<vmem>>, vector<216x1024xf32>
    %cst = arith.constant dense<0.000000e+00> : vector<8x1024xf32>
    %83 = tpu.matmul %81, %82, %cst {dimension_numbers = #tpu.dot_dimension_numbers<[1], [0], [0], [1], [0, 0, 1, 1], [], []>} : vector<8x216xf32>, vector<216x1024xf32>, vector<8x1024xf32> -> vector<8x1024xf32>
    %c0_89 = arith.constant 0 : index
    %c0_90 = arith.constant 0 : index
    %84 = vector.load %arg5[%c0_89, %c0_90] : memref<8x1xf32, #tpu.memory_space<vmem>>, vector<8x1xf32>
    %85 = vector.broadcast %84 : vector<8x1xf32> to vector<8x1024xf32>
    %86 = arith.addf %83, %85 : vector<8x1024xf32>
    %c0_91 = arith.constant 0 : index
    %c0_92 = arith.constant 0 : index
    %87 = vector.load %arg3[%c0_91, %c0_92] : memref<1x1024xf32, #tpu.memory_space<vmem>>, vector<1x1024xf32>
    %88 = vector.broadcast %87 : vector<1x1024xf32> to vector<8x1024xf32>
    %89 = arith.mulf %86, %88 : vector<8x1024xf32>
    %cst_93 = arith.constant 0.000000e+00 : f32
    %90 = vector.broadcast %cst_93 : f32 to vector<8x1280xf32>
    %c0_94 = arith.constant 0 : index
    %c0_95 = arith.constant 0 : index
    %91 = vector.load %arg10[%c0_94, %c0_95] : memref<8x1280xf32, #tpu.memory_space<vmem>>, vector<8x1280xf32>
    tpu.vector_store %arg10[%c0_94, %c0_95], %90 {strides = array<i32>} : memref<8x1280xf32, #tpu.memory_space<vmem>>, vector<8x1280xf32>,
    %c0_96 = arith.constant 0 : index
    %c128_97 = arith.constant 128 : index
    %92 = vector.load %arg10[%c0_96, %c128_97] : memref<8x1280xf32, #tpu.memory_space<vmem>>, vector<8x1024xf32>
    tpu.vector_store %arg10[%c0_96, %c128_97], %89 {strides = array<i32>} : memref<8x1280xf32, #tpu.memory_space<vmem>>, vector<8x1024xf32>,
    %c0_98 = arith.constant 0 : index
    %c0_99 = arith.constant 0 : index
    %c0_100 = arith.constant 0 : index
    %93 = vector.load %arg2[%c0_98, %c0_99, %c0_100] : memref<1x8x1280xf32, #tpu.memory_space<vmem>>, vector<1x8x1024xf32>
    %94 = vector.shape_cast %93 : vector<1x8x1024xf32> to vector<8x1024xf32>
    %c0_101 = arith.constant 0 : index
    %c0_102 = arith.constant 0 : index
    %95 = vector.load %arg9[%c0_101, %c0_102] : memref<432x1024xf32, #tpu.memory_space<vmem>>, vector<8x1024xf32>
    tpu.vector_store %arg9[%c0_101, %c0_102], %94 {strides = array<i32>} : memref<432x1024xf32, #tpu.memory_space<vmem>>, vector<8x1024xf32>,
    %c0_103 = arith.constant 0 : index
    %c17 = arith.constant 17 : index
    %96 = vector.load %arg10[%c0_103, %c17] : memref<8x1280xf32, #tpu.memory_space<vmem>>, vector<8x1024xf32>
    %c8_104 = arith.constant 8 : index
    %c0_105 = arith.constant 0 : index
    %97 = vector.load %arg9[%c8_104, %c0_105] : memref<432x1024xf32, #tpu.memory_space<vmem>>, vector<8x1024xf32>
    tpu.vector_store %arg9[%c8_104, %c0_105], %96 {strides = array<i32>} : memref<432x1024xf32, #tpu.memory_space<vmem>>, vector<8x1024xf32>,
    %c0_106 = arith.constant 0 : index
    %c0_107 = arith.constant 0 : index
    %c1_108 = arith.constant 1 : index
    %98 = vector.load %arg2[%c0_106, %c0_107, %c1_108] : memref<1x8x1280xf32, #tpu.memory_space<vmem>>, vector<1x8x1024xf32>
    %99 = vector.shape_cast %98 : vector<1x8x1024xf32> to vector<8x1024xf32>
    %c16_109 = arith.constant 16 : index
    %c0_110 = arith.constant 0 : index
    %100 = vector.load %arg9[%c16_109, %c0_110] : memref<432x1024xf32, #tpu.memory_space<vmem>>, vector<8x1024xf32>
    tpu.vector_store %arg9[%c16_109, %c0_110], %99 {strides = array<i32>} : memref<432x1024xf32, #tpu.memory_space<vmem>>, vector<8x1024xf32>,
    %c0_111 = arith.constant 0 : index
    %c18 = arith.constant 18 : index
    %101 = vector.load %arg10[%c0_111, %c18] : memref<8x1280xf32, #tpu.memory_space<vmem>>, vector<8x1024xf32>
    %c24_112 = arith.constant 24 : index
    %c0_113 = arith.constant 0 : index
    %102 = vector.load %arg9[%c24_112, %c0_113] : memref<432x1024xf32, #tpu.memory_space<vmem>>, vector<8x1024xf32>
    tpu.vector_store %arg9[%c24_112, %c0_113], %101 {strides = array<i32>} : memref<432x1024xf32, #tpu.memory_space<vmem>>, vector<8x1024xf32>,
    %c0_114 = arith.constant 0 : index
    %c0_115 = arith.constant 0 : index
    %c2_116 = arith.constant 2 : index
    %103 = vector.load %arg2[%c0_114, %c0_115, %c2_116] : memref<1x8x1280xf32, #tpu.memory_space<vmem>>, vector<1x8x1024xf32>
    %104 = vector.shape_cast %103 : vector<1x8x1024xf32> to vector<8x1024xf32>
    %c32_117 = arith.constant 32 : index
    %c0_118 = arith.constant 0 : index
    %105 = vector.load %arg9[%c32_117, %c0_118] : memref<432x1024xf32, #tpu.memory_space<vmem>>, vector<8x1024xf32>
    tpu.vector_store %arg9[%c32_117, %c0_118], %104 {strides = array<i32>} : memref<432x1024xf32, #tpu.memory_space<vmem>>, vector<8x1024xf32>,
    %c0_119 = arith.constant 0 : index
    %c19 = arith.constant 19 : index
    %106 = vector.load %arg10[%c0_119, %c19] : memref<8x1280xf32, #tpu.memory_space<vmem>>, vector<8x1024xf32>
    %c40_120 = arith.constant 40 : index
    %c0_121 = arith.constant 0 : index
    %107 = vector.load %arg9[%c40_120, %c0_121] : memref<432x1024xf32, #tpu.memory_space<vmem>>, vector<8x1024xf32>
    tpu.vector_store %arg9[%c40_120, %c0_121], %106 {strides = array<i32>} : memref<432x1024xf32, #tpu.memory_space<vmem>>, vector<8x1024xf32>,
    %c0_122 = arith.constant 0 : index
    %c0_123 = arith.constant 0 : index
    %c10_124 = arith.constant 10 : index
    %108 = vector.load %arg2[%c0_122, %c0_123, %c10_124] : memref<1x8x1280xf32, #tpu.memory_space<vmem>>, vector<1x8x1024xf32>
    %109 = vector.shape_cast %108 : vector<1x8x1024xf32> to vector<8x1024xf32>
    %c48_125 = arith.constant 48 : index
    %c0_126 = arith.constant 0 : index
    %110 = vector.load %arg9[%c48_125, %c0_126] : memref<432x1024xf32, #tpu.memory_space<vmem>>, vector<8x1024xf32>
    tpu.vector_store %arg9[%c48_125, %c0_126], %109 {strides = array<i32>} : memref<432x1024xf32, #tpu.memory_space<vmem>>, vector<8x1024xf32>,
    %c0_127 = arith.constant 0 : index
    %c27 = arith.constant 27 : index
    %111 = vector.load %arg10[%c0_127, %c27] : memref<8x1280xf32, #tpu.memory_space<vmem>>, vector<8x1024xf32>
    %c56_128 = arith.constant 56 : index
    %c0_129 = arith.constant 0 : index
    %112 = vector.load %arg9[%c56_128, %c0_129] : memref<432x1024xf32, #tpu.memory_space<vmem>>, vector<8x1024xf32>
    tpu.vector_store %arg9[%c56_128, %c0_129], %111 {strides = array<i32>} : memref<432x1024xf32, #tpu.memory_space<vmem>>, vector<8x1024xf32>,
    %c0_130 = arith.constant 0 : index
    %c0_131 = arith.constant 0 : index
    %c11_132 = arith.constant 11 : index
    %113 = vector.load %arg2[%c0_130, %c0_131, %c11_132] : memref<1x8x1280xf32, #tpu.memory_space<vmem>>, vector<1x8x1024xf32>
    %114 = vector.shape_cast %113 : vector<1x8x1024xf32> to vector<8x1024xf32>
    %c64_133 = arith.constant 64 : index
    %c0_134 = arith.constant 0 : index
    %115 = vector.load %arg9[%c64_133, %c0_134] : memref<432x1024xf32, #tpu.memory_space<vmem>>, vector<8x1024xf32>
    tpu.vector_store %arg9[%c64_133, %c0_134], %114 {strides = array<i32>} : memref<432x1024xf32, #tpu.memory_space<vmem>>, vector<8x1024xf32>,
    %c0_135 = arith.constant 0 : index
    %c28 = arith.constant 28 : index
    %116 = vector.load %arg10[%c0_135, %c28] : memref<8x1280xf32, #tpu.memory_space<vmem>>, vector<8x1024xf32>
    %c72_136 = arith.constant 72 : index
    %c0_137 = arith.constant 0 : index
    %117 = vector.load %arg9[%c72_136, %c0_137] : memref<432x1024xf32, #tpu.memory_space<vmem>>, vector<8x1024xf32>
    tpu.vector_store %arg9[%c72_136, %c0_137], %116 {strides = array<i32>} : memref<432x1024xf32, #tpu.memory_space<vmem>>, vector<8x1024xf32>,
    %c0_138 = arith.constant 0 : index
    %c0_139 = arith.constant 0 : index
    %c12_140 = arith.constant 12 : index
    %118 = vector.load %arg2[%c0_138, %c0_139, %c12_140] : memref<1x8x1280xf32, #tpu.memory_space<vmem>>, vector<1x8x1024xf32>
    %119 = vector.shape_cast %118 : vector<1x8x1024xf32> to vector<8x1024xf32>
    %c80_141 = arith.constant 80 : index
    %c0_142 = arith.constant 0 : index
    %120 = vector.load %arg9[%c80_141, %c0_142] : memref<432x1024xf32, #tpu.memory_space<vmem>>, vector<8x1024xf32>
    tpu.vector_store %arg9[%c80_141, %c0_142], %119 {strides = array<i32>} : memref<432x1024xf32, #tpu.memory_space<vmem>>, vector<8x1024xf32>,
    %c0_143 = arith.constant 0 : index
    %c29 = arith.constant 29 : index
    %121 = vector.load %arg10[%c0_143, %c29] : memref<8x1280xf32, #tpu.memory_space<vmem>>, vector<8x1024xf32>
    %c88_144 = arith.constant 88 : index
    %c0_145 = arith.constant 0 : index
    %122 = vector.load %arg9[%c88_144, %c0_145] : memref<432x1024xf32, #tpu.memory_space<vmem>>, vector<8x1024xf32>
    tpu.vector_store %arg9[%c88_144, %c0_145], %121 {strides = array<i32>} : memref<432x1024xf32, #tpu.memory_space<vmem>>, vector<8x1024xf32>,
    %c0_146 = arith.constant 0 : index
    %c0_147 = arith.constant 0 : index
    %c20_148 = arith.constant 20 : index
    %123 = vector.load %arg2[%c0_146, %c0_147, %c20_148] : memref<1x8x1280xf32, #tpu.memory_space<vmem>>, vector<1x8x1024xf32>
    %124 = vector.shape_cast %123 : vector<1x8x1024xf32> to vector<8x1024xf32>
    %c96_149 = arith.constant 96 : index
    %c0_150 = arith.constant 0 : index
    %125 = vector.load %arg9[%c96_149, %c0_150] : memref<432x1024xf32, #tpu.memory_space<vmem>>, vector<8x1024xf32>
    tpu.vector_store %arg9[%c96_149, %c0_150], %124 {strides = array<i32>} : memref<432x1024xf32, #tpu.memory_space<vmem>>, vector<8x1024xf32>,
    %c0_151 = arith.constant 0 : index
    %c37 = arith.constant 37 : index
    %126 = vector.load %arg10[%c0_151, %c37] : memref<8x1280xf32, #tpu.memory_space<vmem>>, vector<8x1024xf32>
    %c104_152 = arith.constant 104 : index
    %c0_153 = arith.constant 0 : index
    %127 = vector.load %arg9[%c104_152, %c0_153] : memref<432x1024xf32, #tpu.memory_space<vmem>>, vector<8x1024xf32>
    tpu.vector_store %arg9[%c104_152, %c0_153], %126 {strides = array<i32>} : memref<432x1024xf32, #tpu.memory_space<vmem>>, vector<8x1024xf32>,
    %c0_154 = arith.constant 0 : index
    %c0_155 = arith.constant 0 : index
    %c21_156 = arith.constant 21 : index
    %128 = vector.load %arg2[%c0_154, %c0_155, %c21_156] : memref<1x8x1280xf32, #tpu.memory_space<vmem>>, vector<1x8x1024xf32>
    %129 = vector.shape_cast %128 : vector<1x8x1024xf32> to vector<8x1024xf32>
    %c112_157 = arith.constant 112 : index
    %c0_158 = arith.constant 0 : index
    %130 = vector.load %arg9[%c112_157, %c0_158] : memref<432x1024xf32, #tpu.memory_space<vmem>>, vector<8x1024xf32>
    tpu.vector_store %arg9[%c112_157, %c0_158], %129 {strides = array<i32>} : memref<432x1024xf32, #tpu.memory_space<vmem>>, vector<8x1024xf32>,
    %c0_159 = arith.constant 0 : index
    %c38 = arith.constant 38 : index
    %131 = vector.load %arg10[%c0_159, %c38] : memref<8x1280xf32, #tpu.memory_space<vmem>>, vector<8x1024xf32>
    %c120_160 = arith.constant 120 : index
    %c0_161 = arith.constant 0 : index
    %132 = vector.load %arg9[%c120_160, %c0_161] : memref<432x1024xf32, #tpu.memory_space<vmem>>, vector<8x1024xf32>
    tpu.vector_store %arg9[%c120_160, %c0_161], %131 {strides = array<i32>} : memref<432x1024xf32, #tpu.memory_space<vmem>>, vector<8x1024xf32>,
    %c0_162 = arith.constant 0 : index
    %c0_163 = arith.constant 0 : index
    %c22_164 = arith.constant 22 : index
    %133 = vector.load %arg2[%c0_162, %c0_163, %c22_164] : memref<1x8x1280xf32, #tpu.memory_space<vmem>>, vector<1x8x1024xf32>
    %134 = vector.shape_cast %133 : vector<1x8x1024xf32> to vector<8x1024xf32>
    %c128_165 = arith.constant 128 : index
    %c0_166 = arith.constant 0 : index
    %135 = vector.load %arg9[%c128_165, %c0_166] : memref<432x1024xf32, #tpu.memory_space<vmem>>, vector<8x1024xf32>
    tpu.vector_store %arg9[%c128_165, %c0_166], %134 {strides = array<i32>} : memref<432x1024xf32, #tpu.memory_space<vmem>>, vector<8x1024xf32>,
    %c0_167 = arith.constant 0 : index
    %c39 = arith.constant 39 : index
    %136 = vector.load %arg10[%c0_167, %c39] : memref<8x1280xf32, #tpu.memory_space<vmem>>, vector<8x1024xf32>
    %c136_168 = arith.constant 136 : index
    %c0_169 = arith.constant 0 : index
    %137 = vector.load %arg9[%c136_168, %c0_169] : memref<432x1024xf32, #tpu.memory_space<vmem>>, vector<8x1024xf32>
    tpu.vector_store %arg9[%c136_168, %c0_169], %136 {strides = array<i32>} : memref<432x1024xf32, #tpu.memory_space<vmem>>, vector<8x1024xf32>,
    %c0_170 = arith.constant 0 : index
    %c0_171 = arith.constant 0 : index
    %c100_172 = arith.constant 100 : index
    %138 = vector.load %arg2[%c0_170, %c0_171, %c100_172] : memref<1x8x1280xf32, #tpu.memory_space<vmem>>, vector<1x8x1024xf32>
    %139 = vector.shape_cast %138 : vector<1x8x1024xf32> to vector<8x1024xf32>
    %c144_173 = arith.constant 144 : index
    %c0_174 = arith.constant 0 : index
    %140 = vector.load %arg9[%c144_173, %c0_174] : memref<432x1024xf32, #tpu.memory_space<vmem>>, vector<8x1024xf32>
    tpu.vector_store %arg9[%c144_173, %c0_174], %139 {strides = array<i32>} : memref<432x1024xf32, #tpu.memory_space<vmem>>, vector<8x1024xf32>,
    %c0_175 = arith.constant 0 : index
    %c117 = arith.constant 117 : index
    %141 = vector.load %arg10[%c0_175, %c117] : memref<8x1280xf32, #tpu.memory_space<vmem>>, vector<8x1024xf32>
    %c152_176 = arith.constant 152 : index
    %c0_177 = arith.constant 0 : index
    %142 = vector.load %arg9[%c152_176, %c0_177] : memref<432x1024xf32, #tpu.memory_space<vmem>>, vector<8x1024xf32>
    tpu.vector_store %arg9[%c152_176, %c0_177], %141 {strides = array<i32>} : memref<432x1024xf32, #tpu.memory_space<vmem>>, vector<8x1024xf32>,
    %c0_178 = arith.constant 0 : index
    %c0_179 = arith.constant 0 : index
    %c101_180 = arith.constant 101 : index
    %143 = vector.load %arg2[%c0_178, %c0_179, %c101_180] : memref<1x8x1280xf32, #tpu.memory_space<vmem>>, vector<1x8x1024xf32>
    %144 = vector.shape_cast %143 : vector<1x8x1024xf32> to vector<8x1024xf32>
    %c160_181 = arith.constant 160 : index
    %c0_182 = arith.constant 0 : index
    %145 = vector.load %arg9[%c160_181, %c0_182] : memref<432x1024xf32, #tpu.memory_space<vmem>>, vector<8x1024xf32>
    tpu.vector_store %arg9[%c160_181, %c0_182], %144 {strides = array<i32>} : memref<432x1024xf32, #tpu.memory_space<vmem>>, vector<8x1024xf32>,
    %c0_183 = arith.constant 0 : index
    %c118 = arith.constant 118 : index
    %146 = vector.load %arg10[%c0_183, %c118] : memref<8x1280xf32, #tpu.memory_space<vmem>>, vector<8x1024xf32>
    %c168_184 = arith.constant 168 : index
    %c0_185 = arith.constant 0 : index
    %147 = vector.load %arg9[%c168_184, %c0_185] : memref<432x1024xf32, #tpu.memory_space<vmem>>, vector<8x1024xf32>
    tpu.vector_store %arg9[%c168_184, %c0_185], %146 {strides = array<i32>} : memref<432x1024xf32, #tpu.memory_space<vmem>>, vector<8x1024xf32>,
    %c0_186 = arith.constant 0 : index
    %c0_187 = arith.constant 0 : index
    %c102_188 = arith.constant 102 : index
    %148 = vector.load %arg2[%c0_186, %c0_187, %c102_188] : memref<1x8x1280xf32, #tpu.memory_space<vmem>>, vector<1x8x1024xf32>
    %149 = vector.shape_cast %148 : vector<1x8x1024xf32> to vector<8x1024xf32>
    %c176_189 = arith.constant 176 : index
    %c0_190 = arith.constant 0 : index
    %150 = vector.load %arg9[%c176_189, %c0_190] : memref<432x1024xf32, #tpu.memory_space<vmem>>, vector<8x1024xf32>
    tpu.vector_store %arg9[%c176_189, %c0_190], %149 {strides = array<i32>} : memref<432x1024xf32, #tpu.memory_space<vmem>>, vector<8x1024xf32>,
    %c0_191 = arith.constant 0 : index
    %c119 = arith.constant 119 : index
    %151 = vector.load %arg10[%c0_191, %c119] : memref<8x1280xf32, #tpu.memory_space<vmem>>, vector<8x1024xf32>
    %c184_192 = arith.constant 184 : index
    %c0_193 = arith.constant 0 : index
    %152 = vector.load %arg9[%c184_192, %c0_193] : memref<432x1024xf32, #tpu.memory_space<vmem>>, vector<8x1024xf32>
    tpu.vector_store %arg9[%c184_192, %c0_193], %151 {strides = array<i32>} : memref<432x1024xf32, #tpu.memory_space<vmem>>, vector<8x1024xf32>,
    %c0_194 = arith.constant 0 : index
    %c0_195 = arith.constant 0 : index
    %c110_196 = arith.constant 110 : index
    %153 = vector.load %arg2[%c0_194, %c0_195, %c110_196] : memref<1x8x1280xf32, #tpu.memory_space<vmem>>, vector<1x8x1024xf32>
    %154 = vector.shape_cast %153 : vector<1x8x1024xf32> to vector<8x1024xf32>
    %c192_197 = arith.constant 192 : index
    %c0_198 = arith.constant 0 : index
    %155 = vector.load %arg9[%c192_197, %c0_198] : memref<432x1024xf32, #tpu.memory_space<vmem>>, vector<8x1024xf32>
    tpu.vector_store %arg9[%c192_197, %c0_198], %154 {strides = array<i32>} : memref<432x1024xf32, #tpu.memory_space<vmem>>, vector<8x1024xf32>,
    %c0_199 = arith.constant 0 : index
    %c127 = arith.constant 127 : index
    %156 = vector.load %arg10[%c0_199, %c127] : memref<8x1280xf32, #tpu.memory_space<vmem>>, vector<8x1024xf32>
    %c200_200 = arith.constant 200 : index
    %c0_201 = arith.constant 0 : index
    %157 = vector.load %arg9[%c200_200, %c0_201] : memref<432x1024xf32, #tpu.memory_space<vmem>>, vector<8x1024xf32>
    tpu.vector_store %arg9[%c200_200, %c0_201], %156 {strides = array<i32>} : memref<432x1024xf32, #tpu.memory_space<vmem>>, vector<8x1024xf32>,
    %c0_202 = arith.constant 0 : index
    %c0_203 = arith.constant 0 : index
    %c111_204 = arith.constant 111 : index
    %158 = vector.load %arg2[%c0_202, %c0_203, %c111_204] : memref<1x8x1280xf32, #tpu.memory_space<vmem>>, vector<1x8x1024xf32>
    %159 = vector.shape_cast %158 : vector<1x8x1024xf32> to vector<8x1024xf32>
    %c208_205 = arith.constant 208 : index
    %c0_206 = arith.constant 0 : index
    %160 = vector.load %arg9[%c208_205, %c0_206] : memref<432x1024xf32, #tpu.memory_space<vmem>>, vector<8x1024xf32>
    tpu.vector_store %arg9[%c208_205, %c0_206], %159 {strides = array<i32>} : memref<432x1024xf32, #tpu.memory_space<vmem>>, vector<8x1024xf32>,
    %c0_207 = arith.constant 0 : index
    %c128_208 = arith.constant 128 : index
    %161 = vector.load %arg10[%c0_207, %c128_208] : memref<8x1280xf32, #tpu.memory_space<vmem>>, vector<8x1024xf32>
    %c216 = arith.constant 216 : index
    %c0_209 = arith.constant 0 : index
    %162 = vector.load %arg9[%c216, %c0_209] : memref<432x1024xf32, #tpu.memory_space<vmem>>, vector<8x1024xf32>
    tpu.vector_store %arg9[%c216, %c0_209], %161 {strides = array<i32>} : memref<432x1024xf32, #tpu.memory_space<vmem>>, vector<8x1024xf32>,
    %c0_210 = arith.constant 0 : index
    %c0_211 = arith.constant 0 : index
    %c112_212 = arith.constant 112 : index
    %163 = vector.load %arg2[%c0_210, %c0_211, %c112_212] : memref<1x8x1280xf32, #tpu.memory_space<vmem>>, vector<1x8x1024xf32>
    %164 = vector.shape_cast %163 : vector<1x8x1024xf32> to vector<8x1024xf32>
    %c224 = arith.constant 224 : index
    %c0_213 = arith.constant 0 : index
    %165 = vector.load %arg9[%c224, %c0_213] : memref<432x1024xf32, #tpu.memory_space<vmem>>, vector<8x1024xf32>
    tpu.vector_store %arg9[%c224, %c0_213], %164 {strides = array<i32>} : memref<432x1024xf32, #tpu.memory_space<vmem>>, vector<8x1024xf32>,
    %c0_214 = arith.constant 0 : index
    %c129 = arith.constant 129 : index
    %166 = vector.load %arg10[%c0_214, %c129] : memref<8x1280xf32, #tpu.memory_space<vmem>>, vector<8x1024xf32>
    %c232 = arith.constant 232 : index
    %c0_215 = arith.constant 0 : index
    %167 = vector.load %arg9[%c232, %c0_215] : memref<432x1024xf32, #tpu.memory_space<vmem>>, vector<8x1024xf32>
    tpu.vector_store %arg9[%c232, %c0_215], %166 {strides = array<i32>} : memref<432x1024xf32, #tpu.memory_space<vmem>>, vector<8x1024xf32>,
    %c0_216 = arith.constant 0 : index
    %c0_217 = arith.constant 0 : index
    %c120_218 = arith.constant 120 : index
    %168 = vector.load %arg2[%c0_216, %c0_217, %c120_218] : memref<1x8x1280xf32, #tpu.memory_space<vmem>>, vector<1x8x1024xf32>
    %169 = vector.shape_cast %168 : vector<1x8x1024xf32> to vector<8x1024xf32>
    %c240 = arith.constant 240 : index
    %c0_219 = arith.constant 0 : index
    %170 = vector.load %arg9[%c240, %c0_219] : memref<432x1024xf32, #tpu.memory_space<vmem>>, vector<8x1024xf32>
    tpu.vector_store %arg9[%c240, %c0_219], %169 {strides = array<i32>} : memref<432x1024xf32, #tpu.memory_space<vmem>>, vector<8x1024xf32>,
    %c0_220 = arith.constant 0 : index
    %c137 = arith.constant 137 : index
    %171 = vector.load %arg10[%c0_220, %c137] : memref<8x1280xf32, #tpu.memory_space<vmem>>, vector<8x1024xf32>
    %c248 = arith.constant 248 : index
    %c0_221 = arith.constant 0 : index
    %172 = vector.load %arg9[%c248, %c0_221] : memref<432x1024xf32, #tpu.memory_space<vmem>>, vector<8x1024xf32>
    tpu.vector_store %arg9[%c248, %c0_221], %171 {strides = array<i32>} : memref<432x1024xf32, #tpu.memory_space<vmem>>, vector<8x1024xf32>,
    %c0_222 = arith.constant 0 : index
    %c0_223 = arith.constant 0 : index
    %c121_224 = arith.constant 121 : index
    %173 = vector.load %arg2[%c0_222, %c0_223, %c121_224] : memref<1x8x1280xf32, #tpu.memory_space<vmem>>, vector<1x8x1024xf32>
    %174 = vector.shape_cast %173 : vector<1x8x1024xf32> to vector<8x1024xf32>
    %c256 = arith.constant 256 : index
    %c0_225 = arith.constant 0 : index
    %175 = vector.load %arg9[%c256, %c0_225] : memref<432x1024xf32, #tpu.memory_space<vmem>>, vector<8x1024xf32>
    tpu.vector_store %arg9[%c256, %c0_225], %174 {strides = array<i32>} : memref<432x1024xf32, #tpu.memory_space<vmem>>, vector<8x1024xf32>,
    %c0_226 = arith.constant 0 : index
    %c138 = arith.constant 138 : index
    %176 = vector.load %arg10[%c0_226, %c138] : memref<8x1280xf32, #tpu.memory_space<vmem>>, vector<8x1024xf32>
    %c264 = arith.constant 264 : index
    %c0_227 = arith.constant 0 : index
    %177 = vector.load %arg9[%c264, %c0_227] : memref<432x1024xf32, #tpu.memory_space<vmem>>, vector<8x1024xf32>
    tpu.vector_store %arg9[%c264, %c0_227], %176 {strides = array<i32>} : memref<432x1024xf32, #tpu.memory_space<vmem>>, vector<8x1024xf32>,
    %c0_228 = arith.constant 0 : index
    %c0_229 = arith.constant 0 : index
    %c122_230 = arith.constant 122 : index
    %178 = vector.load %arg2[%c0_228, %c0_229, %c122_230] : memref<1x8x1280xf32, #tpu.memory_space<vmem>>, vector<1x8x1024xf32>
    %179 = vector.shape_cast %178 : vector<1x8x1024xf32> to vector<8x1024xf32>
    %c272 = arith.constant 272 : index
    %c0_231 = arith.constant 0 : index
    %180 = vector.load %arg9[%c272, %c0_231] : memref<432x1024xf32, #tpu.memory_space<vmem>>, vector<8x1024xf32>
    tpu.vector_store %arg9[%c272, %c0_231], %179 {strides = array<i32>} : memref<432x1024xf32, #tpu.memory_space<vmem>>, vector<8x1024xf32>,
    %c0_232 = arith.constant 0 : index
    %c139 = arith.constant 139 : index
    %181 = vector.load %arg10[%c0_232, %c139] : memref<8x1280xf32, #tpu.memory_space<vmem>>, vector<8x1024xf32>
    %c280 = arith.constant 280 : index
    %c0_233 = arith.constant 0 : index
    %182 = vector.load %arg9[%c280, %c0_233] : memref<432x1024xf32, #tpu.memory_space<vmem>>, vector<8x1024xf32>
    tpu.vector_store %arg9[%c280, %c0_233], %181 {strides = array<i32>} : memref<432x1024xf32, #tpu.memory_space<vmem>>, vector<8x1024xf32>,
    %c0_234 = arith.constant 0 : index
    %c0_235 = arith.constant 0 : index
    %c200_236 = arith.constant 200 : index
    %183 = vector.load %arg2[%c0_234, %c0_235, %c200_236] : memref<1x8x1280xf32, #tpu.memory_space<vmem>>, vector<1x8x1024xf32>
    %184 = vector.shape_cast %183 : vector<1x8x1024xf32> to vector<8x1024xf32>
    %c288 = arith.constant 288 : index
    %c0_237 = arith.constant 0 : index
    %185 = vector.load %arg9[%c288, %c0_237] : memref<432x1024xf32, #tpu.memory_space<vmem>>, vector<8x1024xf32>
    tpu.vector_store %arg9[%c288, %c0_237], %184 {strides = array<i32>} : memref<432x1024xf32, #tpu.memory_space<vmem>>, vector<8x1024xf32>,
    %c0_238 = arith.constant 0 : index
    %c217 = arith.constant 217 : index
    %186 = vector.load %arg10[%c0_238, %c217] : memref<8x1280xf32, #tpu.memory_space<vmem>>, vector<8x1024xf32>
    %c296 = arith.constant 296 : index
    %c0_239 = arith.constant 0 : index
    %187 = vector.load %arg9[%c296, %c0_239] : memref<432x1024xf32, #tpu.memory_space<vmem>>, vector<8x1024xf32>
    tpu.vector_store %arg9[%c296, %c0_239], %186 {strides = array<i32>} : memref<432x1024xf32, #tpu.memory_space<vmem>>, vector<8x1024xf32>,
    %c0_240 = arith.constant 0 : index
    %c0_241 = arith.constant 0 : index
    %c201_242 = arith.constant 201 : index
    %188 = vector.load %arg2[%c0_240, %c0_241, %c201_242] : memref<1x8x1280xf32, #tpu.memory_space<vmem>>, vector<1x8x1024xf32>
    %189 = vector.shape_cast %188 : vector<1x8x1024xf32> to vector<8x1024xf32>
    %c304 = arith.constant 304 : index
    %c0_243 = arith.constant 0 : index
    %190 = vector.load %arg9[%c304, %c0_243] : memref<432x1024xf32, #tpu.memory_space<vmem>>, vector<8x1024xf32>
    tpu.vector_store %arg9[%c304, %c0_243], %189 {strides = array<i32>} : memref<432x1024xf32, #tpu.memory_space<vmem>>, vector<8x1024xf32>,
    %c0_244 = arith.constant 0 : index
    %c218 = arith.constant 218 : index
    %191 = vector.load %arg10[%c0_244, %c218] : memref<8x1280xf32, #tpu.memory_space<vmem>>, vector<8x1024xf32>
    %c312 = arith.constant 312 : index
    %c0_245 = arith.constant 0 : index
    %192 = vector.load %arg9[%c312, %c0_245] : memref<432x1024xf32, #tpu.memory_space<vmem>>, vector<8x1024xf32>
    tpu.vector_store %arg9[%c312, %c0_245], %191 {strides = array<i32>} : memref<432x1024xf32, #tpu.memory_space<vmem>>, vector<8x1024xf32>,
    %c0_246 = arith.constant 0 : index
    %c0_247 = arith.constant 0 : index
    %c202_248 = arith.constant 202 : index
    %193 = vector.load %arg2[%c0_246, %c0_247, %c202_248] : memref<1x8x1280xf32, #tpu.memory_space<vmem>>, vector<1x8x1024xf32>
    %194 = vector.shape_cast %193 : vector<1x8x1024xf32> to vector<8x1024xf32>
    %c320 = arith.constant 320 : index
    %c0_249 = arith.constant 0 : index
    %195 = vector.load %arg9[%c320, %c0_249] : memref<432x1024xf32, #tpu.memory_space<vmem>>, vector<8x1024xf32>
    tpu.vector_store %arg9[%c320, %c0_249], %194 {strides = array<i32>} : memref<432x1024xf32, #tpu.memory_space<vmem>>, vector<8x1024xf32>,
    %c0_250 = arith.constant 0 : index
    %c219 = arith.constant 219 : index
    %196 = vector.load %arg10[%c0_250, %c219] : memref<8x1280xf32, #tpu.memory_space<vmem>>, vector<8x1024xf32>
    %c328 = arith.constant 328 : index
    %c0_251 = arith.constant 0 : index
    %197 = vector.load %arg9[%c328, %c0_251] : memref<432x1024xf32, #tpu.memory_space<vmem>>, vector<8x1024xf32>
    tpu.vector_store %arg9[%c328, %c0_251], %196 {strides = array<i32>} : memref<432x1024xf32, #tpu.memory_space<vmem>>, vector<8x1024xf32>,
    %c0_252 = arith.constant 0 : index
    %c0_253 = arith.constant 0 : index
    %c210_254 = arith.constant 210 : index
    %198 = vector.load %arg2[%c0_252, %c0_253, %c210_254] : memref<1x8x1280xf32, #tpu.memory_space<vmem>>, vector<1x8x1024xf32>
    %199 = vector.shape_cast %198 : vector<1x8x1024xf32> to vector<8x1024xf32>
    %c336 = arith.constant 336 : index
    %c0_255 = arith.constant 0 : index
    %200 = vector.load %arg9[%c336, %c0_255] : memref<432x1024xf32, #tpu.memory_space<vmem>>, vector<8x1024xf32>
    tpu.vector_store %arg9[%c336, %c0_255], %199 {strides = array<i32>} : memref<432x1024xf32, #tpu.memory_space<vmem>>, vector<8x1024xf32>,
    %c0_256 = arith.constant 0 : index
    %c227 = arith.constant 227 : index
    %201 = vector.load %arg10[%c0_256, %c227] : memref<8x1280xf32, #tpu.memory_space<vmem>>, vector<8x1024xf32>
    %c344 = arith.constant 344 : index
    %c0_257 = arith.constant 0 : index
    %202 = vector.load %arg9[%c344, %c0_257] : memref<432x1024xf32, #tpu.memory_space<vmem>>, vector<8x1024xf32>
    tpu.vector_store %arg9[%c344, %c0_257], %201 {strides = array<i32>} : memref<432x1024xf32, #tpu.memory_space<vmem>>, vector<8x1024xf32>,
    %c0_258 = arith.constant 0 : index
    %c0_259 = arith.constant 0 : index
    %c211_260 = arith.constant 211 : index
    %203 = vector.load %arg2[%c0_258, %c0_259, %c211_260] : memref<1x8x1280xf32, #tpu.memory_space<vmem>>, vector<1x8x1024xf32>
    %204 = vector.shape_cast %203 : vector<1x8x1024xf32> to vector<8x1024xf32>
    %c352 = arith.constant 352 : index
    %c0_261 = arith.constant 0 : index
    %205 = vector.load %arg9[%c352, %c0_261] : memref<432x1024xf32, #tpu.memory_space<vmem>>, vector<8x1024xf32>
    tpu.vector_store %arg9[%c352, %c0_261], %204 {strides = array<i32>} : memref<432x1024xf32, #tpu.memory_space<vmem>>, vector<8x1024xf32>,
    %c0_262 = arith.constant 0 : index
    %c228 = arith.constant 228 : index
    %206 = vector.load %arg10[%c0_262, %c228] : memref<8x1280xf32, #tpu.memory_space<vmem>>, vector<8x1024xf32>
    %c360 = arith.constant 360 : index
    %c0_263 = arith.constant 0 : index
    %207 = vector.load %arg9[%c360, %c0_263] : memref<432x1024xf32, #tpu.memory_space<vmem>>, vector<8x1024xf32>
    tpu.vector_store %arg9[%c360, %c0_263], %206 {strides = array<i32>} : memref<432x1024xf32, #tpu.memory_space<vmem>>, vector<8x1024xf32>,
    %c0_264 = arith.constant 0 : index
    %c0_265 = arith.constant 0 : index
    %c212_266 = arith.constant 212 : index
    %208 = vector.load %arg2[%c0_264, %c0_265, %c212_266] : memref<1x8x1280xf32, #tpu.memory_space<vmem>>, vector<1x8x1024xf32>
    %209 = vector.shape_cast %208 : vector<1x8x1024xf32> to vector<8x1024xf32>
    %c368 = arith.constant 368 : index
    %c0_267 = arith.constant 0 : index
    %210 = vector.load %arg9[%c368, %c0_267] : memref<432x1024xf32, #tpu.memory_space<vmem>>, vector<8x1024xf32>
    tpu.vector_store %arg9[%c368, %c0_267], %209 {strides = array<i32>} : memref<432x1024xf32, #tpu.memory_space<vmem>>, vector<8x1024xf32>,
    %c0_268 = arith.constant 0 : index
    %c229 = arith.constant 229 : index
    %211 = vector.load %arg10[%c0_268, %c229] : memref<8x1280xf32, #tpu.memory_space<vmem>>, vector<8x1024xf32>
    %c376 = arith.constant 376 : index
    %c0_269 = arith.constant 0 : index
    %212 = vector.load %arg9[%c376, %c0_269] : memref<432x1024xf32, #tpu.memory_space<vmem>>, vector<8x1024xf32>
    tpu.vector_store %arg9[%c376, %c0_269], %211 {strides = array<i32>} : memref<432x1024xf32, #tpu.memory_space<vmem>>, vector<8x1024xf32>,
    %c0_270 = arith.constant 0 : index
    %c0_271 = arith.constant 0 : index
    %c220_272 = arith.constant 220 : index
    %213 = vector.load %arg2[%c0_270, %c0_271, %c220_272] : memref<1x8x1280xf32, #tpu.memory_space<vmem>>, vector<1x8x1024xf32>
    %214 = vector.shape_cast %213 : vector<1x8x1024xf32> to vector<8x1024xf32>
    %c384 = arith.constant 384 : index
    %c0_273 = arith.constant 0 : index
    %215 = vector.load %arg9[%c384, %c0_273] : memref<432x1024xf32, #tpu.memory_space<vmem>>, vector<8x1024xf32>
    tpu.vector_store %arg9[%c384, %c0_273], %214 {strides = array<i32>} : memref<432x1024xf32, #tpu.memory_space<vmem>>, vector<8x1024xf32>,
    %c0_274 = arith.constant 0 : index
    %c237 = arith.constant 237 : index
    %216 = vector.load %arg10[%c0_274, %c237] : memref<8x1280xf32, #tpu.memory_space<vmem>>, vector<8x1024xf32>
    %c392 = arith.constant 392 : index
    %c0_275 = arith.constant 0 : index
    %217 = vector.load %arg9[%c392, %c0_275] : memref<432x1024xf32, #tpu.memory_space<vmem>>, vector<8x1024xf32>
    tpu.vector_store %arg9[%c392, %c0_275], %216 {strides = array<i32>} : memref<432x1024xf32, #tpu.memory_space<vmem>>, vector<8x1024xf32>,
    %c0_276 = arith.constant 0 : index
    %c0_277 = arith.constant 0 : index
    %c221_278 = arith.constant 221 : index
    %218 = vector.load %arg2[%c0_276, %c0_277, %c221_278] : memref<1x8x1280xf32, #tpu.memory_space<vmem>>, vector<1x8x1024xf32>
    %219 = vector.shape_cast %218 : vector<1x8x1024xf32> to vector<8x1024xf32>
    %c400 = arith.constant 400 : index
    %c0_279 = arith.constant 0 : index
    %220 = vector.load %arg9[%c400, %c0_279] : memref<432x1024xf32, #tpu.memory_space<vmem>>, vector<8x1024xf32>
    tpu.vector_store %arg9[%c400, %c0_279], %219 {strides = array<i32>} : memref<432x1024xf32, #tpu.memory_space<vmem>>, vector<8x1024xf32>,
    %c0_280 = arith.constant 0 : index
    %c238 = arith.constant 238 : index
    %221 = vector.load %arg10[%c0_280, %c238] : memref<8x1280xf32, #tpu.memory_space<vmem>>, vector<8x1024xf32>
    %c408 = arith.constant 408 : index
    %c0_281 = arith.constant 0 : index
    %222 = vector.load %arg9[%c408, %c0_281] : memref<432x1024xf32, #tpu.memory_space<vmem>>, vector<8x1024xf32>
    tpu.vector_store %arg9[%c408, %c0_281], %221 {strides = array<i32>} : memref<432x1024xf32, #tpu.memory_space<vmem>>, vector<8x1024xf32>,
    %c0_282 = arith.constant 0 : index
    %c0_283 = arith.constant 0 : index
    %c222_284 = arith.constant 222 : index
    %223 = vector.load %arg2[%c0_282, %c0_283, %c222_284] : memref<1x8x1280xf32, #tpu.memory_space<vmem>>, vector<1x8x1024xf32>
    %224 = vector.shape_cast %223 : vector<1x8x1024xf32> to vector<8x1024xf32>
    %c416 = arith.constant 416 : index
    %c0_285 = arith.constant 0 : index
    %225 = vector.load %arg9[%c416, %c0_285] : memref<432x1024xf32, #tpu.memory_space<vmem>>, vector<8x1024xf32>
    tpu.vector_store %arg9[%c416, %c0_285], %224 {strides = array<i32>} : memref<432x1024xf32, #tpu.memory_space<vmem>>, vector<8x1024xf32>,
    %c0_286 = arith.constant 0 : index
    %c239 = arith.constant 239 : index
    %226 = vector.load %arg10[%c0_286, %c239] : memref<8x1280xf32, #tpu.memory_space<vmem>>, vector<8x1024xf32>
    %c424 = arith.constant 424 : index
    %c0_287 = arith.constant 0 : index
    %227 = vector.load %arg9[%c424, %c0_287] : memref<432x1024xf32, #tpu.memory_space<vmem>>, vector<8x1024xf32>
    tpu.vector_store %arg9[%c424, %c0_287], %226 {strides = array<i32>} : memref<432x1024xf32, #tpu.memory_space<vmem>>, vector<8x1024xf32>,
    %c0_288 = arith.constant 0 : index
    %c0_289 = arith.constant 0 : index
    %228 = vector.load %arg6[%c0_288, %c0_289] : memref<2x432xf32, #tpu.memory_space<vmem>>, vector<2x432xf32>
    %c0_290 = arith.constant 0 : index
    %c0_291 = arith.constant 0 : index
    %229 = vector.load %arg9[%c0_290, %c0_291] : memref<432x1024xf32, #tpu.memory_space<vmem>>, vector<432x1024xf32>
    %cst_292 = arith.constant dense<0.000000e+00> : vector<2x1024xf32>
    %230 = tpu.matmul %228, %229, %cst_292 {dimension_numbers = #tpu.dot_dimension_numbers<[1], [0], [0], [1], [0, 0, 1, 1], [], []>} : vector<2x432xf32>, vector<432x1024xf32>, vector<2x1024xf32> -> vector<2x1024xf32>
    %c0_293 = arith.constant 0 : index
    %c0_294 = arith.constant 0 : index
    %231 = vector.load %arg3[%c0_293, %c0_294] : memref<1x1024xf32, #tpu.memory_space<vmem>>, vector<1x1024xf32>
    %232 = vector.broadcast %231 : vector<1x1024xf32> to vector<2x1024xf32>
    %233 = arith.mulf %230, %232 : vector<2x1024xf32>
    %cst_295 = arith.constant dense<0.000000e+00> : vector<2xf32>
    %234 = vector.multi_reduction <add>, %233, %cst_295 [1] : vector<2x1024xf32> to vector<2xf32>
    %235 = vector.shape_cast %234 : vector<2xf32> to vector<2x1xf32>
    %236 = arith.mulf %233, %230 : vector<2x1024xf32>
    %cst_296 = arith.constant dense<0.000000e+00> : vector<2xf32>
    %237 = vector.multi_reduction <add>, %236, %cst_296 [1] : vector<2x1024xf32> to vector<2xf32>
    %238 = vector.shape_cast %237 : vector<2xf32> to vector<2x1xf32>
    %cst_297 = arith.constant 0.001953125 : f32
    %239 = vector.broadcast %cst_297 : f32 to vector<2x1xf32>
    %240 = arith.mulf %235, %239 : vector<2x1xf32>
    %cst_298 = arith.constant 0.001953125 : f32
    %241 = vector.broadcast %cst_298 : f32 to vector<2x1xf32>
    %242 = arith.mulf %238, %241 : vector<2x1xf32>
    %243 = arith.mulf %240, %240 : vector<2x1xf32>
    %244 = arith.subf %242, %243 : vector<2x1xf32>
    %cst_299 = arith.constant 0.000000e+00 : f32
    %245 = vector.broadcast %cst_299 : f32 to vector<2x1xf32>
    %246 = arith.maximumf %244, %245 : vector<2x1xf32>
    %247 = vector.broadcast %240 : vector<2x1xf32> to vector<2x1024xf32>
    %248 = arith.subf %230, %247 : vector<2x1024xf32>
    %cst_300 = arith.constant 9.99999974E-6 : f32
    %249 = vector.broadcast %cst_300 : f32 to vector<2x1xf32>
    %250 = arith.addf %246, %249 : vector<2x1xf32>
    %251 = math.rsqrt %250 : vector<2x1xf32>
    %252 = vector.broadcast %251 : vector<2x1xf32> to vector<2x1024xf32>
    %253 = arith.mulf %248, %252 : vector<2x1024xf32>
    %cst_301 = arith.constant 0.000000e+00 : f32
    %254 = vector.broadcast %cst_301 : f32 to vector<2x1024xf32>
    %255 = arith.cmpf oge, %253, %254 : vector<2x1024xf32>
    %cst_302 = arith.constant 2.000000e-01 : f32
    %256 = vector.broadcast %cst_302 : f32 to vector<2x1024xf32>
    %257 = arith.mulf %256, %253 : vector<2x1024xf32>
    %258 = arith.select %255, %253, %257 : vector<2x1024xi1>, vector<2x1024xf32>
    %c0_303 = arith.constant 0 : index
    %c0_304 = arith.constant 0 : index
    %c0_305 = arith.constant 0 : index
    %259 = vector.load %arg7[%c0_303, %c0_304, %c0_305] : memref<1x2x1024xf32, #tpu.memory_space<vmem>>, vector<1x2x1024xf32>
    %260 = vector.shape_cast %259 : vector<1x2x1024xf32> to vector<2x1024xf32>
    %261 = vector.shape_cast %258 : vector<2x1024xf32> to vector<1x2x1024xf32>
    tpu.vector_store %arg7[%c0_303, %c0_304, %c0_305], %261 {strides = array<i32>} : memref<1x2x1024xf32, #tpu.memory_space<vmem>>, vector<1x2x1024xf32>,
    return
  }
  func.func @transform_0(%arg0: i32) -> (i32, i32, i32) {
    %c0_i32 = arith.constant 0 : i32
    %c0_i32_0 = arith.constant 0 : i32
    %c0_i32_1 = arith.constant 0 : i32
    return %arg0, %c0_i32, %c0_i32_0 : i32, i32, i32
  }
  func.func @transform_1(%arg0: i32) -> (i32, i32, i32) {
    %c0_i32 = arith.constant 0 : i32
    %c0_i32_0 = arith.constant 0 : i32
    %c0_i32_1 = arith.constant 0 : i32
    return %arg0, %c0_i32, %c0_i32_0 : i32, i32, i32
  }
  func.func @transform_2(%arg0: i32) -> (i32, i32) {
    %c0_i32 = arith.constant 0 : i32
    %c0_i32_0 = arith.constant 0 : i32
    %c0_i32_1 = arith.constant 0 : i32
    return %c0_i32, %c0_i32_0 : i32, i32
  }
  func.func @transform_3(%arg0: i32) -> (i32, i32) {
    %c0_i32 = arith.constant 0 : i32
    %c0_i32_0 = arith.constant 0 : i32
    %c0_i32_1 = arith.constant 0 : i32
    return %c0_i32, %c0_i32_0 : i32, i32
  }
  func.func @transform_4(%arg0: i32) -> (i32, i32) {
    %c0_i32 = arith.constant 0 : i32
    %c0_i32_0 = arith.constant 0 : i32
    %c0_i32_1 = arith.constant 0 : i32
    return %c0_i32, %c0_i32_0 : i32, i32
  }
  func.func @transform_5(%arg0: i32) -> (i32, i32) {
    %c0_i32 = arith.constant 0 : i32
    %c0_i32_0 = arith.constant 0 : i32
    %c0_i32_1 = arith.constant 0 : i32
    return %c0_i32, %c0_i32_0 : i32, i32
  }
  func.func @transform_6(%arg0: i32) -> (i32, i32, i32) {
    %c0_i32 = arith.constant 0 : i32
    %c0_i32_0 = arith.constant 0 : i32
    %c0_i32_1 = arith.constant 0 : i32
    return %arg0, %c0_i32, %c0_i32_0 : i32, i32, i32
  }
}

</mosaic_0001>

<bundles_post_ra>
// kernel: tpu_custom_call.1
= control target key start
LH: loop header
LB: loop body
LE: loop exit
PB: predicated region body
PF: predicated region fallthrough
CT: control target
= control target key end

     0   :  { %s13557_s0 = inlined_call_operand.hbm [shape: f32[2,8,1280], index: 0, kind: input, shape index: {}]   ;;  %s13558_s1 = inlined_call_operand.hbm [shape: f32[2,8,1280], index: 1, kind: input, shape index: {}]   ;;  %s13559_s2 = inlined_call_operand.hbm [shape: f32[1,1024], index: 2, kind: input, shape index: {}]   ;;  %s13560_s3 = inlined_call_operand.vmem [shape: f32[8,216], index: 3, kind: input, shape index: {}]   ;;  %s13561_s4 = inlined_call_operand.vmem [shape: f32[8,1], index: 4, kind: input, shape index: {}]   ;;  %s13562_s5 = inlined_call_operand.vmem [shape: f32[2,432], index: 5, kind: input, shape index: {}]   ;;  %s13563_s6 = inlined_call_operand.hbm [shape: f32[2,2,1024], index: 6, kind: output, shape index: {}]  }
   0x1   :  { %13913 = sst [smem:[#allocation95_spill]] %s13557_s0 }
   0x2   :  { %13914 = sst [smem:[#allocation96_spill]] %s13558_s1 }
   0x3   :  { %13915 = sst [smem:[#allocation97_spill]] %s13559_s2 }
   0x4   :  { %13916 = sst [smem:[#allocation98_spill]] %s13560_s3 }
   0x5   :  { %11 = vsyncpa [#allocation6], 0 }
   0x6   :  { %13 = vsyncpa [#allocation6 + $0x1], 0 }
   0x7   :  { %14 = vsyncpa [#allocation9], 0 }
   0x8   :  { %16 = vsyncpa [#allocation9 + $0x1], 0 }
   0x9   :  { %17 = vsyncpa [#allocation7], 0 }
   0xa   :  { %19 = vsyncpa [#allocation7 + $0x1], 0  ;;  %s9676_s21 = smov 0   ;;  %s9678_s22 = smov 0  }
   0xb   :  { %s9680_s23 = smov 0   ;;  %s9682_s24 = smov 0  }
   0xc LB: > { %s9697_s25 = sadd.s32 4294967295, %s9587_s24   ;;  %s6999_s26 = sadd.s32 4294967294, %s9587_s24   ;;  %s9587_s24 = sphi %s9682_s24, %s14780_s24   ;;  %s9583_s23 = sphi %s9680_s23, %s14779_s23   ;;  %s9579_s22 = sphi %s9678_s22, %s14778_s22   ;;  %s9575_s21 = sphi %s9676_s21, %s14777_s21  }
   0xd   : > { %p45_p0 = scmp.ne.s32.totalorder %s9579_s22, %s9575_s21  ;;  %p13564_p1 = scmp.eq.s32.totalorder %s9697_s25, 0 }
   0xe   : > { %p185_p3 = scmp.eq.s32.totalorder %s6999_s26, 1  ;;  %p7000_p5 = scmp.ge.s32.totalorder %s9587_s24, 1 }
   0xf   : > { %p9706_p4 = por %p13564_p1, %p45_p0  ;;  %p192_p7 = scmp.lt.s32.totalorder %s9587_s24, 3 }
  0x10   : > { %p9711_p6 = por %p185_p3, %p45_p0  ;;  %s9589_s30 = smov [#allocation10]  }
  0x11   : > { %s13917_s27 = scalar_select %p9706_p4, 1, 0 }
  0x12   : > { %s13918_s28 = scalar_select %p9711_p6, 1, 0 }
  0x13   : > { %p9716_p8 = pnand %p7000_p5, %p192_p7  ;;  %s205_s7 = sshll.u32 %s9589_s30, 4  ;;  %s206_s7 = int_to_ptr.vmem [resolvable:$true] %s205_s7 }
  0x14   : > { %s9724_s8 = sadd.s32 1, %s9587_s24   ;;  %s32_s12 = sadd.s32 1, %s9583_s23 }
  0x15   : > { %s13919_s29 = scalar_select %p9716_p8, 1, 0 }
  0x16   : > { %p7685_p10 = pneg %p9716_p8  ;;  %s29_s10 = ssub.s32 %s9587_s24, %s9724_s8 }
  0x17   : > { %p9734_p12 = scmp.eq.s32.totalorder %s29_s10, 0  ;;  %s13922_s2 = sld [smem:[#allocation97_spill]] }
  0x18   : > { %p9728_p11 = pnand %p7685_p10, %p13564_p1 }
  0x19   : > { %s13921_s11 = scalar_select %p9734_p12, 1, 0 }
  0x1a   : > { %p9427_p3 = pneg %p9728_p11 }
  0x1d   : > { %s9425_s15 = scalar_lea.hbm %s13922_s2, 128 }
  0x1e   : > { %p9426_p0 = scmp.ne.s32.totalorder %s13922_s2, %s9425_s15  ;;  %p9432_p10 = scmp.lt.u32.totalorder %s9425_s15, %s13922_s2 }
  0x20   : > { %p9428_p5 = pnand %p9427_p3, %p9426_p0 }
  0x22   : > { %p9429_p7 = pneg %p9428_p5 }
  0x24   : > { %p9434_p9 = pnand %p9432_p10, %p9429_p7 }
  0x26   : > { %9437 = shalt.err (!%p9434_p9)
}
  0x27   : > { %s9438_s20 = scalar_lea.vmem %s206_s7, 128  ;;  %p9446_p6 = scmp.lt.s32.totalorder %s206_s7, %s206_s7 }
  0x28   : > { %p9439_p1 = scmp.ne.s32.totalorder %s206_s7, %s9438_s20  ;;  %p9447_p4 = scmp.lt.s32.totalorder %s9438_s20, %s9438_s20 }
  0x2a   : > { %p9441_p2 = pnand %p9439_p1, %p9427_p3  ;;  %p9448_p8 = por %p9447_p4, %p9446_p6 }
  0x2c   : > { %p9442_p13 = pneg %p9441_p2 }
  0x2e   : > { %p9449_p12 = pnand %p9448_p8, %p9442_p13 }
  0x30   : > { %9452 = shalt.err (!%p9449_p12)
}
  0x31   : > { %7688 = dma.hbm_to_vmem [thread:$0]  (!%p9728_p11), %s13922_s2, 128, %s206_s7, [#allocation9]  }
  0x32   : > { %p13923_p1 = scmp.ne.s32.totalorder %s13921_s11, 0  ;;  %p40_p2 = scmp.eq.s32.totalorder %s9587_s24, 0 }
  0x33   : > { %p13924_p4 = scmp.ne.s32.totalorder %s9583_s23, %s9579_s22  ;;  %p13925_p6 = scmp.eq.s32.totalorder %s9697_s25, 1 }
  0x34   : > { %s9760_s10 = scalar_select %p13923_p1, %s9583_s23, %s32_s12  }
  0x35   : > { %p9768_p8 = por %p13925_p6, %p13924_p4  ;;  %p7701_p9 = scmp.lt.s32.totalorder %s9587_s24, 2 }
  0x36   : > { %s225_s13 = sand.u32 1, %s9583_s23   ;;  %p13927_p12 = pmov %p13924_p4 }
  0x37   : > { %s13926_s9 = scalar_select %p9768_p8, 1, 0 }
  0x38   : > { %p41_p13 = por %p40_p2, %p13927_p12  ;;  %s9777_s14 = smul.u32 80, %s225_s13 }
  0x39   : > { %s13567_s16 = smul.u32 1280, %s9587_s24  ;;  %s13929_s0 = sld [smem:[#allocation95_spill]] }
  0x3a   : > { %p9781_p11 = pnand %p7701_p9, %p41_p13  ;;  %s229_s18 = scalar_lea.vmem [#allocation5], %s9777_s14 }
  0x3b   : > { %s237_s19 = sshll.u32 %s229_s18, 4  ;;  %s226_s20 = scalar_lea.sflag [#allocation6], %s225_s13  ;;  %s9793_s19 = int_to_ptr.vmem [resolvable:$true] %s237_s19 }
  0x3c   : > { %p9455_p3 = pneg %p9781_p11 }
  0x3f   : > { %s9790_s17 = scalar_lea.hbm %s13929_s0, %s13567_s16  ;;  %s9458_s12 = scalar_lea.hbm %s13929_s0, 2560 }
  0x40   : > { %s9453_s26 = scalar_lea.hbm %s9790_s17, 1280  ;;  %p9459_p10 = scmp.lt.u32.totalorder %s9790_s17, %s13929_s0 }
  0x41   : > { %p9454_p0 = scmp.ne.s32.totalorder %s9790_s17, %s9453_s26  ;;  %p9460_p1 = scmp.lt.u32.totalorder %s9458_s12, %s9453_s26 }
  0x42   : > { %p9462_p4 = scmp.lt.u32.totalorder %s9453_s26, %s9790_s17 }
  0x43   : > { %p9456_p5 = pnand %p9455_p3, %p9454_p0  ;;  %p9461_p2 = por %p9460_p1, %p9459_p10 }
  0x45   : > { %p9457_p7 = pneg %p9456_p5  ;;  %p9463_p6 = por %p9462_p4, %p9461_p2 }
  0x47   : > { %p9464_p9 = pnand %p9463_p6, %p9457_p7 }
  0x49   : > { %9467 = shalt.err (!%p9464_p9)
}
  0x4a   : > { %s9468_s13 = scalar_lea.vmem %s9793_s19, 1280  ;;  %s9590_s18 = smov [#allocation5]  }
  0x4b   : > { %p9469_p12 = scmp.ne.s32.totalorder %s9793_s19, %s9468_s13  ;;  %s9473_s30 = sshll.u32 %s9590_s18, 4  ;;  %s9474_s30 = int_to_ptr.vmem [resolvable:$false] %s9473_s30 }
  0x4c   : > { %s9475_s15 = scalar_lea.vmem %s9474_s30, 2560  ;;  %p9476_p5 = scmp.lt.s32.totalorder %s9793_s19, %s9474_s30 }
  0x4d   : > { %p9471_p13 = pnand %p9469_p12, %p9455_p3  ;;  %p9477_p10 = scmp.lt.s32.totalorder %s9475_s15, %s9468_s13 }
  0x4f   : > { %p9472_p0 = pneg %p9471_p13  ;;  %p9478_p1 = por %p9477_p10, %p9476_p5 }
  0x51   : > { %p9479_p2 = pnand %p9478_p1, %p9472_p0 }
  0x53   : > { %9482 = shalt.err (!%p9479_p2)
}
  0x54   : > { %7692 = dma.hbm_to_vmem [thread:$0]  (!%p9781_p11), %s9790_s17, 1280, %s9793_s19, %s226_s20  }
  0x55   : > { %s13930_s16 = smul.u32 1280, %s9587_s24  ;;  %s13931_s1 = sld [smem:[#allocation96_spill]] }
  0x56   : > { %s248_s13 = scalar_lea.vmem [#allocation8], %s9777_s14  ;;  %s13932_s30 = sand.u32 1, %s9587_s24  }
  0x57   : > { %s256_s18 = sshll.u32 %s248_s13, 4  ;;  %s245_s15 = scalar_lea.sflag [#allocation9], %s13932_s30  ;;  %s257_s18 = int_to_ptr.vmem [resolvable:$true] %s256_s18 }
  0x5b   : > { %s9825_s12 = scalar_lea.hbm %s13931_s1, %s13930_s16  ;;  %s9488_s20 = scalar_lea.hbm %s13931_s1, 2560 }
  0x5c   : > { %s9483_s0 = scalar_lea.hbm %s9825_s12, 1280  ;;  %p9489_p9 = scmp.lt.u32.totalorder %s9825_s12, %s13931_s1 }
  0x5d   : > { %p9484_p7 = scmp.ne.s32.totalorder %s9825_s12, %s9483_s0  ;;  %p9490_p12 = scmp.lt.u32.totalorder %s9488_s20, %s9483_s0 }
  0x5e   : > { %p9492_p0 = scmp.lt.u32.totalorder %s9483_s0, %s9825_s12 }
  0x5f   : > { %p9486_p4 = pnand %p9484_p7, %p9455_p3  ;;  %p9491_p13 = por %p9490_p12, %p9489_p9 }
  0x61   : > { %p9487_p6 = pneg %p9486_p4  ;;  %p9493_p5 = por %p9492_p0, %p9491_p13 }
  0x63   : > { %p9494_p10 = pnand %p9493_p5, %p9487_p6 }
  0x65   : > { %9497 = shalt.err (!%p9494_p10)
}
  0x66   : > { %s9498_s14 = scalar_lea.vmem %s257_s18, 1280  ;;  %s9591_s11 = smov [#allocation8]  }
  0x67   : > { %p9499_p1 = scmp.ne.s32.totalorder %s257_s18, %s9498_s14  ;;  %s9503_s13 = sshll.u32 %s9591_s11, 4  ;;  %s9504_s13 = int_to_ptr.vmem [resolvable:$false] %s9503_s13 }
  0x68   : > { %s9505_s30 = scalar_lea.vmem %s9504_s13, 2560  ;;  %p9506_p4 = scmp.lt.s32.totalorder %s257_s18, %s9504_s13 }
  0x69   : > { %p9501_p2 = pnand %p9499_p1, %p9455_p3  ;;  %p9507_p8 = scmp.lt.s32.totalorder %s9505_s30, %s9498_s14 }
  0x6b   : > { %p9502_p7 = pneg %p9501_p2  ;;  %p9508_p9 = por %p9507_p8, %p9506_p4 }
  0x6d   : > { %p9509_p12 = pnand %p9508_p9, %p9502_p7 }
  0x6f   : > { %9512 = shalt.err (!%p9509_p12)
}
  0x70   : > { %7695 = dma.hbm_to_vmem [thread:$0]  (!%p9781_p11), %s9825_s12, 1280, %s257_s18, %s245_s15  }
  0x71   : > { %p13933_p6 = scmp.ne.s32.totalorder %s13919_s29, 0 }
  0x73   : > { %265 = sbr.rel (%p13933_p6) target bundleno = 1703 (0x6a7), region = 44 }
  0x7a   : > { %s9852_s0 = sand.u32 1, %s9579_s22   ;;  %p13934_p8 = scmp.ne.s32.totalorder %s13917_s27, 0 }
  0x7b   : > { %s7674_s17 = smul.u32 80, %s9852_s0  ;;  %s268_s19 = scalar_lea.sflag [#allocation6], %s9852_s0 }
  0x7d   : > { %s9856_s20 = scalar_lea.vmem [#allocation5], %s7674_s17 }
  0x7e   : > { %9558 = dma.done.wait (%p13934_p8), %s268_s19, 1280  }
  0x7f   : > { %9560 = vsyncadd (%p13934_p8), %s268_s19, 4294966016  ;;  %s276_s7 = sand.u32 1, %s9697_s25   ;;  %s9863_s12 = scalar_lea.vmem [#allocation8], %s7674_s17 }
  0x80   : > { %s277_s29 = scalar_lea.sflag [#allocation9], %s276_s7 }
  0x81   : > { %9562 = dma.done.wait (%p13934_p8), %s277_s29, 1280  }
  0x82   : > { %9564 = vsyncadd (%p13934_p8), %s277_s29, 4294966016  ;;  %p13935_p11 = scmp.eq.s32.totalorder %s9697_s25, 0 }
  0x84   : > { %9566 = dma.done.wait (%p13935_p11), [#allocation9], 128   ;;  %p13936_p3 = pmov %p13935_p11 }
  0x85   : > { %v338_v0 = vld [vmem:[%s9856_s20 + $0x20] sm:$0xff]  ;;  %v339_v1 = vld [vmem:[%s9856_s20 + $0x28] sm:$0xff]  ;;  %v9884_v5 = vld [vmem:[%s9856_s20 + $0x30] sm:$0xff]  ;;  %s13799_s27 = smov 127   ;;  %s9593_s18 = smov 126   ;;  %vm370_vm0 = vcmask 1039360  }
  0x86   : > { %9568 = vsyncadd (%p13936_p3), [#allocation9], 4294967168  ;;  %v9876_v2 = vld [vmem:[%s9856_s20] sm:$0xff]  ;;  %v9878_v3 = vpack.i.bf16 %v339_v1, %v338_v0  ;;  %v9881_v4 = vld [vmem:[%s9856_s20 + $0x8] sm:$0xff]  ;;  %s13794_s15 = smov 118   ;;  %s13781_s16 = smov 117  }
  0x87   : > { %v341_v6 = vld [vmem:[%s9856_s20 + $0x38] sm:$0xff]  ;;  %v9889_v7 = vpack.i.bf16 %v9881_v4, %v9876_v2  ;;  %v9892_v8 = vld [vmem:[%s9856_s20 + $0x10] sm:$0xff]  ;;  %v9909_v12 = vld [vmem:[%s9856_s20 + $0x40] sm:$0xff]  ;;  %s9596_s26 = smov 116   ;;  %s9597_s14 = smov 108   ;;  %vm431_vm1 = vcmask 1031168  }
  0x88   : > { %v9895_v9 = vld [vmem:[%s9856_s20 + $0x18] sm:$0xff]  ;;  %7796 = vrot.lane.b32.xlu1 %v9878_v3, %s13799_s27  ;;  %v9900_v10 = vpack.i.bf16 %v341_v6, %v9884_v5  ;;  %v2577_v13 = vld [vmem:[%s9863_s12] sm:$0xff]  ;;  %s9598_s11 = smov 107   ;;  %s9599_s13 = smov 106   ;;  %v3909_v15 = vld [vmem:[%s9863_s12 + $0x8] sm:$0xff]  ;;  %vm492_vm2 = vcmask 965632  }
  0x89   : > { %7786 = vrot.lane.b32.xlu0 %v9889_v7, %s13799_s27  ;;  %v9906_v11 = vpack.i.bf16 %v9895_v9, %v9892_v8  ;;  %v7805_v14 = vpack.i.bf16 %v2577_v13, %v9909_v12  ;;  %s13823_s30 = smov 28   ;;  %s13698_s17 = smov 27   ;;  %v10014_v16 = vpack.i.bf16 %v3909_v15, %v9909_v12  ;;  %v9607_v6 = vmov 0  }
  0x8a   : > { %s13623_s19 = smov 26   ;;  %s13569_s7 = smov 18   ;;  %8380 = vset.pattern.permute.xlu0 %v9607_v6  ;;  %vm553_vm3 = vcmask 957440   ;;  %vm614_vm4 = vcmask 949248   ;;  %v10162_v6 = vld [vmem:[%s9856_s20 + $0x28] sm:$0xff]  ;;  %vm675_vm5 = vcmask 883712  }
  0x8b   : > { %s13573_s29 = smov 17   ;;  %vm13761_vm6 = vcmask 875520   ;;  %vm13762_vm7 = vcmask 867328   ;;  %vm13695_vm8 = vcmask 228352   ;;  %vm13693_vm9 = vcmask 220160   ;;  %s13957_s3 = sld [smem:[#allocation98_spill]] }
  0x8c   : > { %7801 = vrot.lane.b32.xlu1 %v9900_v10, %s13799_s27  ;;  %vm13692_vm10 = vcmask 211968   ;;  %vm13681_vm11 = vcmask 146432   ;;  %vm13694_vm12 = vcmask 138240   ;;  %vm2144_vm13 = vcmask 719872   ;;  %s13838_s1 = smov 19   ;;  %s14297_s2 = smov 35  }
  0x8d   : > { %7791 = vrot.lane.b32.xlu0 %v9906_v11, %s13799_s27  ;;  %vm13628_vm14 = vcmask 130048   ;;  %vm13630_vm15 = vcmask 64512   ;;  %p14774_p0 = scmp.ne.s32.totalorder %s13926_s9, 0 }
  0x90   : > { %7811 = vrot.lane.b32.xlu1 %v9889_v7, %s9593_s18 }
  0x91   : > { %7806 = vrot.lane.b32.xlu0 %v7805_v14, %s13799_s27 }
  0x94   : > { %7821 = vrot.lane.b32.xlu1 %v9878_v3, %s9593_s18 }
  0x95   : > { %7816 = vrot.lane.b32.xlu0 %v9906_v11, %s9593_s18 }
  0x98   : > { %7831 = vrot.lane.b32.xlu1 %v7805_v14, %s9593_s18 }
  0x99   : > { %7826 = vrot.lane.b32.xlu0 %v9900_v10, %s9593_s18 }
  0x9c   : > { %7841 = vrot.lane.b32.xlu1 %v9906_v11, %s13794_s15 }
  0x9d   : > { %7836 = vrot.lane.b32.xlu0 %v9889_v7, %s13794_s15 }
  0xa0   : > { %7851 = vrot.lane.b32.xlu1 %v9900_v10, %s13794_s15 }
  0xa1   : > { %7846 = vrot.lane.b32.xlu0 %v9878_v3, %s13794_s15 }
  0xa4   : > { %7861 = vrot.lane.b32.xlu1 %v9889_v7, %s13781_s16 }
  0xa5   : > { %7856 = vrot.lane.b32.xlu0 %v7805_v14, %s13794_s15 }
  0xa8   : > { %7871 = vrot.lane.b32.xlu1 %v9878_v3, %s13781_s16 }
  0xa9   : > { %7866 = vrot.lane.b32.xlu0 %v9906_v11, %s13781_s16 }
  0xac   : > { %7881 = vrot.lane.b32.xlu1 %v7805_v14, %s13781_s16 }
  0xad   : > { %7876 = vrot.lane.b32.xlu0 %v9900_v10, %s13781_s16 }
  0xb0   : > { %7891 = vrot.lane.b32.xlu1 %v9906_v11, %s9596_s26 }
  0xb1   : > { %7886 = vrot.lane.b32.xlu0 %v9889_v7, %s9596_s26 }
  0xb4   : > { %7901 = vrot.lane.b32.xlu1 %v9900_v10, %s9596_s26 }
  0xb5   : > { %7896 = vrot.lane.b32.xlu0 %v9878_v3, %s9596_s26 }
  0xb8   : > { %7911 = vrot.lane.b32.xlu1 %v9889_v7, %s9597_s14 }
  0xb9   : > { %7906 = vrot.lane.b32.xlu0 %v7805_v14, %s9596_s26 }
  0xbc   : > { %7921 = vrot.lane.b32.xlu1 %v9878_v3, %s9597_s14 }
  0xbd   : > { %7916 = vrot.lane.b32.xlu0 %v9906_v11, %s9597_s14 }
  0xc0   : > { %7931 = vrot.lane.b32.xlu1 %v7805_v14, %s9597_s14 }
  0xc1   : > { %7926 = vrot.lane.b32.xlu0 %v9900_v10, %s9597_s14 }
  0xc4   : > { %7941 = vrot.lane.b32.xlu1 %v9906_v11, %s9598_s11 }
  0xc5   : > { %7936 = vrot.lane.b32.xlu0 %v9889_v7, %s9598_s11 }
  0xc8   : > { %7951 = vrot.lane.b32.xlu1 %v9900_v10, %s9598_s11 }
  0xc9   : > { %7946 = vrot.lane.b32.xlu0 %v9878_v3, %s9598_s11 }
  0xcc   : > { %7961 = vrot.lane.b32.xlu1 %v9889_v7, %s9599_s13 }
  0xcd   : > { %7956 = vrot.lane.b32.xlu0 %v7805_v14, %s9598_s11 }
  0xd0   : > { %7971 = vrot.lane.b32.xlu1 %v9878_v3, %s9599_s13 }
  0xd1   : > { %7966 = vrot.lane.b32.xlu0 %v9906_v11, %s9599_s13 }
  0xd4   : > { %7981 = vrot.lane.b32.xlu1 %v7805_v14, %s9599_s13 }
  0xd5   : > { %7976 = vrot.lane.b32.xlu0 %v9900_v10, %s9599_s13 }
  0xd8   : > { %7991 = vrot.lane.b32.xlu1 %v9906_v11, %s13823_s30 }
  0xd9   : > { %7986 = vrot.lane.b32.xlu0 %v9889_v7, %s13823_s30 }
  0xdc   : > { %8001 = vrot.lane.b32.xlu1 %v9900_v10, %s13823_s30 }
  0xdd   : > { %7996 = vrot.lane.b32.xlu0 %v9878_v3, %s13823_s30 }
  0xe0   : > { %8011 = vrot.lane.b32.xlu1 %v9889_v7, %s13698_s17 }
  0xe1   : > { %8006 = vrot.lane.b32.xlu0 %v7805_v14, %s13823_s30 }
  0xe4   : > { %8021 = vrot.lane.b32.xlu1 %v9878_v3, %s13698_s17 }
  0xe5   : > { %8016 = vrot.lane.b32.xlu0 %v9906_v11, %s13698_s17 }
  0xe8   : > { %8031 = vrot.lane.b32.xlu1 %v7805_v14, %s13698_s17 }
  0xe9   : > { %8026 = vrot.lane.b32.xlu0 %v9900_v10, %s13698_s17 }
  0xec   : > { %8041 = vrot.lane.b32.xlu1 %v9906_v11, %s13623_s19 }
  0xed   : > { %8036 = vrot.lane.b32.xlu0 %v9889_v7, %s13623_s19 }
  0xf0   : > { %8051 = vrot.lane.b32.xlu1 %v9900_v10, %s13623_s19 }
  0xf1   : > { %8046 = vrot.lane.b32.xlu0 %v9878_v3, %s13623_s19 }
  0xf4   : > { %8061 = vrot.lane.b32.xlu1 %v9889_v7, %s13569_s7 }
  0xf5   : > { %8056 = vrot.lane.b32.xlu0 %v7805_v14, %s13623_s19  ;;  %s13696_s19 = smov 34  }
  0xf8   : > { %8071 = vrot.lane.b32.xlu1 %v9878_v3, %s13569_s7 }
  0xf9   : > { %8066 = vrot.lane.b32.xlu0 %v9906_v11, %s13569_s7 }
  0xfa   : > { %v10018_v17 = vpop.permute.xlu1 %7796 }
  0xfb   : > { %v7787_v18 = vpop.permute.xlu0 %7786  ;;  %v13589_v23 = vunpack.i.l.bf16 %v10018_v17 }
  0xfc   : > { %8081 = vrot.lane.b32.xlu1 %v10014_v16, %s13569_s7  ;;  %v7789_v19 = vunpack.i.h.bf16 %v7787_v18  ;;  %v7788_v20 = vunpack.i.l.bf16 %v7787_v18 }
  0xfd   : > { %8076 = vrot.lane.b32.xlu0 %v9900_v10, %s13569_s7  ;;  %s13571_s7 = smov 16  }
  0xfe   : > { %v10024_v21 = vpop.permute.xlu1 %7801  ;;  %v371_v26 = vsel %vm370_vm0, %v7788_v20, %v7789_v19 }
  0xff   : > { %v7792_v22 = vpop.permute.xlu0 %7791  ;;  %v7024_v34 = vpack.c.bf16 %v371_v26, %v9876_v2 }
 0x100   : > { %v7794_v24 = vunpack.i.h.bf16 %v7792_v22  ;;  %v7793_v25 = vunpack.i.l.bf16 %v7792_v22  ;;  %8091 = vrot.lane.b32.xlu1 %v9906_v11, %s13573_s29 }
 0x101   : > { %8086 = vrot.lane.b32.xlu0 %v9889_v7, %s13573_s29 }
 0x102   : > { %v7812_v27 = vpop.permute.xlu1 %7811  ;;  %v372_v28 = vsel %vm370_vm0, %v7789_v19, %v7793_v25  ;;  %v374_v29 = vsel %vm370_vm0, %v7794_v24, %v13589_v23  ;;  %v373_v30 = vsel %vm370_vm0, %v7793_v25, %v7794_v24 }
 0x103   : > { %v10037_v31 = vpop.permute.xlu0 %7806  ;;  %v7022_v32 = vpack.c.bf16 %v372_v28, %v9881_v4  ;;  %v7074_v33 = vpack.c.bf16 %v374_v29, %v9895_v9  ;;  %v7076_v35 = vpack.c.bf16 %v373_v30, %v9892_v8  ;;  %v7814_v40 = vunpack.i.h.bf16 %v7812_v27 }
 0x104   : > { %13937 = vst [vmem:[#allocation16_spill] sm:$0xff] %v10037_v31  ;;  %8101 = vrot.lane.b32.xlu1 %v9900_v10, %s13573_s29  ;;  %v7813_v41 = vunpack.i.l.bf16 %v7812_v27 }
 0x105   : > { %8096 = vrot.lane.b32.xlu0 %v9878_v3, %s13573_s29  ;;  %7023 = vmatprep.subr.bf16.mxu0 %v7022_v32 }
 0x106   : > { %7075 = vmatprep.subr.bf16.mxu1 %v7074_v33  ;;  %7025 = vmatpush1.bf16.msra.mxu0 %v7024_v34  ;;  %v10047_v36 = vpop.permute.xlu1 %7821  ;;  %v432_v50 = vsel %vm431_vm1, %v7813_v41, %v7814_v40 }
 0x107   : > { %7077 = vmatpush1.bf16.msra.mxu1 %v7076_v35  ;;  %v7817_v37 = vpop.permute.xlu0 %7816  ;;  %v7823_v48 = vunpack.i.l.bf16 %v10047_v36  ;;  %v13587_v56 = vunpack.i.h.bf16 %v10047_v36 }
 0x108   : > { %8111 = vrot.lane.b32.xlu1 %v9889_v7, %s13571_s7  ;;  %v7818_v42 = vunpack.i.l.bf16 %v7817_v37  ;;  %v7819_v51 = vunpack.i.h.bf16 %v7817_v37 }
 0x109   : > { %8106 = vrot.lane.b32.xlu0 %v10014_v16, %s13573_s29  ;;  %v10092_v12 = vsel %vm431_vm1, %v7823_v48, %v13587_v56  ;;  %s13575_s29 = smov 7  }
 0x10a   : > { %v10053_v38 = vpop.permute.xlu1 %7831  ;;  %v433_v53 = vsel %vm431_vm1, %v7814_v40, %v7818_v42  ;;  %v435_v1 = vsel %vm431_vm1, %v7819_v51, %v7823_v48  ;;  %v434_v15 = vsel %vm431_vm1, %v7818_v42, %v7819_v51 }
 0x10b   : > { %v10055_v39 = vpop.permute.xlu0 %7826 }
 0x10c   : > { %8121 = vrot.lane.b32.xlu1 %v9878_v3, %s13571_s7 }
 0x10d   : > { %8116 = vrot.lane.b32.xlu0 %v9906_v11, %s13571_s7 }
 0x10e   : > { %v7842_v43 = vpop.permute.xlu1 %7841 }
 0x10f   : > { %v7843_v44 = vunpack.i.l.bf16 %v7842_v43  ;;  %v7837_v45 = vpop.permute.xlu0 %7836  ;;  %v7844_v49 = vunpack.i.h.bf16 %v7842_v43 }
 0x110   : > { %v7839_v46 = vunpack.i.h.bf16 %v7837_v45  ;;  %v7838_v47 = vunpack.i.l.bf16 %v7837_v45  ;;  %8131 = vrot.lane.b32.xlu1 %v10014_v16, %s13571_s7 }
 0x111   : > { %8126 = vrot.lane.b32.xlu0 %v9900_v10, %s13571_s7  ;;  %s13577_s7 = smov 8   ;;  %v495_v62 = vsel %vm492_vm2, %v7843_v44, %v7844_v49 }
 0x112   : > { %v10067_v52 = vpop.permute.xlu1 %7851  ;;  %v494_v54 = vsel %vm492_vm2, %v7839_v46, %v7843_v44  ;;  %v493_v55 = vsel %vm492_vm2, %v7838_v47, %v7839_v46  ;;  %v7080_v18 = vpack.c.bf16 %v495_v62, %v434_v15 }
 0x113   : > { %v10073_v57 = vpop.permute.xlu0 %7846  ;;  %v7026_v58 = vpack.c.bf16 %v494_v54, %v433_v53  ;;  %v7028_v59 = vpack.c.bf16 %v493_v55, %v432_v50 }
 0x114   : > { %v13588_v60 = vunpack.i.h.bf16 %v10073_v57  ;;  %v7848_v61 = vunpack.i.l.bf16 %v10073_v57  ;;  %8141 = vrot.lane.b32.xlu1 %v9906_v11, %s13577_s7 }
 0x115   : > { %8136 = vrot.lane.b32.xlu0 %v9889_v7, %s13577_s7  ;;  %7027 = vmatprep.subr.bf16.mxu0 %v7026_v58 }
 0x116   : > { %v10085_v63 = vsel %vm492_vm2, %v7848_v61, %v13588_v60  ;;  %7029 = vmatpush1.bf16.msra.mxu0 %v7028_v59  ;;  %v7862_v0 = vpop.permute.xlu1 %7861  ;;  %v496_v2 = vsel %vm492_vm2, %v7844_v49, %v7848_v61 }
 0x117   : > { %v10094_v13 = vpop.permute.xlu0 %7856  ;;  %v7078_v14 = vpack.c.bf16 %v496_v2, %v435_v1  ;;  %v7864_v26 = vunpack.i.h.bf16 %v7862_v0  ;;  %v7863_v27 = vunpack.i.l.bf16 %v7862_v0  ;;  %v8210_v1 = vpack.i.bf16 %v9892_v8, %v9881_v4  ;;  %v10179_v8 = vld [vmem:[%s9856_s20 + $0x48] sm:$0xff] }
 0x118   : > { %13938 = vst [vmem:[#allocation17_spill] sm:$0xff] %v10094_v13  ;;  %8151 = vrot.lane.b32.xlu1 %v9900_v10, %s13577_s7  ;;  %v8220_v4 = vpack.i.bf16 %v9884_v5, %v10162_v6 }
 0x119   : > { %8146 = vrot.lane.b32.xlu0 %v9878_v3, %s13577_s7  ;;  %7079 = vmatprep.subr.bf16.mxu1 %v7078_v14  ;;  %v554_v40 = vsel %vm553_vm3, %v7863_v27, %v7864_v26  ;;  %v10190_v27 = vld [vmem:[%s9856_s20 + $0x40] sm:$0xff] }
 0x11a   : > { %7081 = vmatpush1.bf16.msra.mxu1 %v7080_v18  ;;  %v10103_v20 = vpop.permute.xlu1 %7871  ;;  %v10182_v18 = vld [vmem:[%s9863_s12 + $0x10] sm:$0xff] }
 0x11b   : > { %v7867_v22 = vpop.permute.xlu0 %7866  ;;  %v7873_v35 = vunpack.i.l.bf16 %v10103_v20  ;;  %v13585_v46 = vunpack.i.h.bf16 %v10103_v20  ;;  %v8230_v5 = vpack.i.bf16 %v10182_v18, %v10179_v8 }
 0x11c   : > { %8161 = vrot.lane.b32.xlu1 %v9889_v7, %s13575_s29  ;;  %v7868_v28 = vunpack.i.l.bf16 %v7867_v22  ;;  %v7869_v41 = vunpack.i.h.bf16 %v7867_v22 }
 0x11d   : > { %8156 = vrot.lane.b32.xlu0 %v10014_v16, %s13577_s7  ;;  %s13579_s7 = smov 56  }
 0x11e   : > { %v10109_v24 = vpop.permute.xlu1 %7881  ;;  %v555_v43 = vsel %vm553_vm3, %v7864_v26, %v7868_v28  ;;  %v557_v58 = vsel %vm553_vm3, %v7869_v41, %v7873_v35  ;;  %v556_v62 = vsel %vm553_vm3, %v7868_v28, %v7869_v41  ;;  %v10187_v26 = vld [vmem:[%s9856_s20 + $0x38] sm:$0xff] }
 0x11f   : > { %v10111_v25 = vpop.permute.xlu0 %7876 }
 0x120   : > { %8171 = vrot.lane.b32.xlu1 %v9878_v3, %s13575_s29 }
 0x121   : > { %8166 = vrot.lane.b32.xlu0 %v9906_v11, %s13575_s29 }
 0x122   : > { %v7892_v29 = vpop.permute.xlu1 %7891 }
 0x123   : > { %v7893_v30 = vunpack.i.l.bf16 %v7892_v29  ;;  %v7887_v32 = vpop.permute.xlu0 %7886  ;;  %v7894_v37 = vunpack.i.h.bf16 %v7892_v29  ;;  %v10200_v29 = vpack.i.bf16 %v10190_v27, %v10187_v26 }
 0x124   : > { %v7889_v33 = vunpack.i.h.bf16 %v7887_v32  ;;  %v7888_v34 = vunpack.i.l.bf16 %v7887_v32  ;;  %8181 = vrot.lane.b32.xlu1 %v10014_v16, %s13575_s29 }
 0x125   : > { %8176 = vrot.lane.b32.xlu0 %v9900_v10, %s13575_s29  ;;  %s13581_s29 = smov 6   ;;  %v617_v53 = vsel %vm614_vm4, %v7893_v30, %v7894_v37 }
 0x126   : > { %v10123_v42 = vpop.permute.xlu1 %7901  ;;  %v616_v44 = vsel %vm614_vm4, %v7889_v33, %v7893_v30  ;;  %v615_v45 = vsel %vm614_vm4, %v7888_v34, %v7889_v33  ;;  %v7084_v0 = vpack.c.bf16 %v617_v53, %v556_v62  ;;  %v10203_v30 = vld [vmem:[%s9856_s20 + $0x18] sm:$0xff]  ;;  %v10207_v34 = vld [vmem:[%s9856_s20 + $0x8] sm:$0xff]  ;;  %v10232_v62 = vld [vmem:[%s9856_s20 + $0x30] sm:$0xff] }
 0x127   : > { %v10129_v47 = vpop.permute.xlu0 %7896  ;;  %v7030_v48 = vpack.c.bf16 %v616_v44, %v555_v43  ;;  %v7032_v49 = vpack.c.bf16 %v615_v45, %v554_v40 }
 0x128   : > { %v13586_v50 = vunpack.i.h.bf16 %v10129_v47  ;;  %v7898_v51 = vunpack.i.l.bf16 %v10129_v47  ;;  %8191 = vrot.lane.b32.xlu1 %v9906_v11, %s13581_s29 }
 0x129   : > { %8186 = vrot.lane.b32.xlu0 %v9889_v7, %s13581_s29  ;;  %7031 = vmatprep.subr.bf16.mxu0 %v7030_v48  ;;  %v10148_v7 = vsel %vm553_vm3, %v7873_v35, %v13585_v46  ;;  %v10210_v35 = vld [vmem:[%s9856_s20 + $0x10] sm:$0xff] }
 0x12a   : > { %v10141_v54 = vsel %vm614_vm4, %v7898_v51, %v13586_v50  ;;  %7033 = vmatpush1.bf16.msra.mxu0 %v7032_v49  ;;  %v7912_v55 = vpop.permute.xlu1 %7911  ;;  %v618_v59 = vsel %vm614_vm4, %v7894_v37, %v7898_v51  ;;  %13939 = vst [vmem:[#allocation18_spill] sm:$0xff] %v10148_v7  ;;  %v10222_v49 = vpack.i.bf16 %v10210_v35, %v10207_v34 }
 0x12b   : > { %v10150_v11 = vpop.permute.xlu0 %7906  ;;  %v7082_v61 = vpack.c.bf16 %v618_v59, %v557_v58 }
 0x12c   : > { %8201 = vrot.lane.b32.xlu1 %v9900_v10, %s13581_s29  ;;  %v10167_v10 = vld [vmem:[%s9856_s20 + $0x20] sm:$0xff] }
 0x12d   : > { %8196 = vrot.lane.b32.xlu0 %v9878_v3, %s13581_s29  ;;  %7083 = vmatprep.subr.bf16.mxu1 %v7082_v61  ;;  %v8215_v3 = vpack.i.bf16 %v10167_v10, %v9895_v9  ;;  %v7914_v9 = vunpack.i.h.bf16 %v7912_v55  ;;  %v10215_v44 = vpack.i.bf16 %v10167_v10, %v10203_v30 }
 0x12e   : > { %7085 = vmatpush1.bf16.msra.mxu1 %v7084_v0  ;;  %v10164_v14 = vpop.permute.xlu1 %7921 }
 0x12f   : > { %v10169_v15 = vpop.permute.xlu0 %7916  ;;  %v7923_v45 = vunpack.i.l.bf16 %v10164_v14  ;;  %v13583_v0 = vunpack.i.h.bf16 %v10164_v14 }
 0x130   : > { %8211 = vrot.lane.b32.xlu1 %v8210_v1, %s13579_s7  ;;  %v7918_v32 = vunpack.i.l.bf16 %v10169_v15  ;;  %v7919_v53 = vunpack.i.h.bf16 %v10169_v15 }
 0x131   : > { %8206 = vrot.lane.b32.xlu0 %v10014_v16, %s13581_s29  ;;  %v7913_v16 = vunpack.i.l.bf16 %v7912_v55  ;;  %s13591_s29 = smov 54  }
 0x132   : > { %v10184_v22 = vpop.permute.xlu1 %7931  ;;  %v677_v58 = vsel %vm675_vm5, %v7914_v9, %v7918_v32 }
 0x133   : > { %v10192_v28 = vpop.permute.xlu0 %7926  ;;  %v676_v51 = vsel %vm675_vm5, %v7913_v16, %v7914_v9  ;;  %v10245_v9 = vpack.i.bf16 %v10232_v62, %v10162_v6 }
 0x134   : > { %8221 = vrot.lane.b32.xlu1 %v8220_v4, %s13579_s7 }
 0x135   : > { %8216 = vrot.lane.b32.xlu0 %v8215_v3, %s13579_s7 }
 0x136   : > { %v7942_v33 = vpop.permute.xlu1 %7941 }
 0x137   : > { %v7943_v37 = vunpack.i.l.bf16 %v7942_v33  ;;  %v7937_v40 = vpop.permute.xlu0 %7936  ;;  %v7944_v48 = vunpack.i.h.bf16 %v7942_v33 }
 0x138   : > { %v7939_v41 = vunpack.i.h.bf16 %v7937_v40  ;;  %v7938_v43 = vunpack.i.l.bf16 %v7937_v40  ;;  %8231 = vrot.lane.b32.xlu1 %v8230_v5, %s13579_s7 }
 0x139   : > { %8226 = vrot.lane.b32.xlu0 %v10200_v29, %s13579_s7  ;;  %s13593_s7 = smov 55   ;;  %v739_v33 = vsel %vm13761_vm6, %v7943_v37, %v7944_v48 }
 0x13a   : > { %v10226_v55 = vpop.permute.xlu1 %7951  ;;  %v738_v59 = vsel %vm13761_vm6, %v7939_v41, %v7943_v37  ;;  %v737_v61 = vsel %vm13761_vm6, %v7938_v43, %v7939_v41  ;;  %v679_v43 = vsel %vm675_vm5, %v7919_v53, %v7923_v45  ;;  %v678_v37 = vsel %vm675_vm5, %v7918_v32, %v7919_v53 }
 0x13b   : > { %v10235_v1 = vpop.permute.xlu0 %7946  ;;  %v7034_v4 = vpack.c.bf16 %v738_v59, %v677_v58  ;;  %v7036_v3 = vpack.c.bf16 %v737_v61, %v676_v51  ;;  %v10258_v58 = vsel %vm675_vm5, %v7923_v45, %v13583_v0 }
 0x13c   : > { %v13584_v16 = vunpack.i.h.bf16 %v10235_v1  ;;  %v7948_v15 = vunpack.i.l.bf16 %v10235_v1  ;;  %8241 = vrot.lane.b32.xlu1 %v10215_v44, %s13593_s7  ;;  %13941 = vst [vmem:[#allocation20_spill] sm:$0xff] %v10258_v58 }
 0x13d   : > { %8236 = vrot.lane.b32.xlu0 %v10222_v49, %s13593_s7  ;;  %7035 = vmatprep.subr.bf16.mxu0 %v7034_v4  ;;  %v7088_v4 = vpack.c.bf16 %v739_v33, %v678_v37 }
 0x13e   : > { %v10251_v40 = vsel %vm13761_vm6, %v7948_v15, %v13584_v16  ;;  %7037 = vmatpush1.bf16.msra.mxu0 %v7036_v3  ;;  %v7962_v41 = vpop.permute.xlu1 %7961  ;;  %v740_v51 = vsel %vm13761_vm6, %v7944_v48, %v7948_v15 }
 0x13f   : > { %13940 = vst [vmem:[#allocation19_spill] sm:$0xff] %v10251_v40  ;;  %v10260_v59 = vpop.permute.xlu0 %7956  ;;  %v7086_v61 = vpack.c.bf16 %v740_v51, %v679_v43  ;;  %v7964_v15 = vunpack.i.h.bf16 %v7962_v41  ;;  %v7963_v33 = vunpack.i.l.bf16 %v7962_v41 }
 0x140   : > { %8251 = vrot.lane.b32.xlu1 %v10200_v29, %s13593_s7 }
 0x141   : > { %8246 = vrot.lane.b32.xlu0 %v10245_v9, %s13593_s7  ;;  %7087 = vmatprep.subr.bf16.mxu1 %v7086_v61  ;;  %v798_v41 = vsel %vm13762_vm7, %v7963_v33, %v7964_v15 }
 0x142   : > { %7089 = vmatpush1.bf16.msra.mxu1 %v7088_v4  ;;  %v10269_v48 = vpop.permute.xlu1 %7971 }
 0x143   : > { %13942 = vst [vmem:[#allocation21_spill] sm:$0xff] %v10269_v48  ;;  %v7967_v45 = vpop.permute.xlu0 %7966  ;;  %v7973_v3 = vunpack.i.l.bf16 %v10269_v48  ;;  %v13595_v50 = vunpack.i.h.bf16 %v10269_v48 }
 0x144   : > { %8261 = vrot.lane.b32.xlu1 %v10222_v49, %s13591_s29  ;;  %v7968_v43 = vunpack.i.l.bf16 %v7967_v45  ;;  %v7969_v0 = vunpack.i.h.bf16 %v7967_v45 }
 0x145   : > { %8256 = vrot.lane.b32.xlu0 %v8230_v5, %s13593_s7  ;;  %s13605_s7 = smov 45  }
 0x146   : > { %v10274_v32 = vpop.permute.xlu1 %7981  ;;  %v799_v19 = vsel %vm13762_vm7, %v7964_v15, %v7968_v43 }
 0x147   : > { %13943 = vst [vmem:[#allocation22_spill] sm:$0xff] %v10274_v32  ;;  %v10276_v53 = vpop.permute.xlu0 %7976 }
 0x148   : > { %8271 = vrot.lane.b32.xlu1 %v10245_v9, %s13591_s29 }
 0x149   : > { %8266 = vrot.lane.b32.xlu0 %v10215_v44, %s13591_s29 }
 0x14a   : > { %v7992_v51 = vpop.permute.xlu1 %7991 }
 0x14b   : > { %v7993_v61 = vunpack.i.l.bf16 %v7992_v51  ;;  %v7987_v37 = vpop.permute.xlu0 %7986  ;;  %v7994_v2 = vunpack.i.h.bf16 %v7992_v51 }
 0x14c   : > { %v7989_v4 = vunpack.i.h.bf16 %v7987_v37  ;;  %v7988_v5 = vunpack.i.l.bf16 %v7987_v37  ;;  %1527 = vrot.lane.b32.xlu1 %v10179_v8, %s13591_s29 }
 0x14d   : > { %8276 = vrot.lane.b32.xlu0 %v10200_v29, %s13591_s29  ;;  %s13607_s29 = smov 46   ;;  %v861_v45 = vsel %vm13695_vm8, %v7993_v61, %v7994_v2 }
 0x14e   : > { %v10288_v16 = vpop.permute.xlu1 %8001  ;;  %v860_v46 = vsel %vm13695_vm8, %v7989_v4, %v7993_v61  ;;  %v859_v37 = vsel %vm13695_vm8, %v7988_v5, %v7989_v4  ;;  %v10313_v4 = vsel %vm13762_vm7, %v7973_v3, %v13595_v50  ;;  %v800_v61 = vsel %vm13762_vm7, %v7968_v43, %v7969_v0 }
 0x14f   : > { %v10294_v56 = vpop.permute.xlu0 %7996  ;;  %v7038_v60 = vpack.c.bf16 %v860_v46, %v799_v19  ;;  %v7040_v51 = vpack.c.bf16 %v859_v37, %v798_v41  ;;  %v801_v46 = vsel %vm13762_vm7, %v7969_v0, %v7973_v3  ;;  %13946 = vst [vmem:[#allocation25_spill] sm:$0xff] %v10313_v4  ;;  %v7092_v41 = vpack.c.bf16 %v861_v45, %v800_v61 }
 0x150   : > { %13944 = vst [vmem:[#allocation23_spill] sm:$0xff] %v10294_v56  ;;  %v13596_v23 = vunpack.i.h.bf16 %v10294_v56  ;;  %v7998_v58 = vunpack.i.l.bf16 %v10294_v56  ;;  %8286 = vrot.lane.b32.xlu1 %v10215_v44, %s13607_s29 }
 0x151   : > { %8281 = vrot.lane.b32.xlu0 %v10222_v49, %s13607_s29  ;;  %7039 = vmatprep.subr.bf16.mxu0 %v7038_v60 }
 0x152   : > { %v10306_v15 = vsel %vm13695_vm8, %v7998_v58, %v13596_v23  ;;  %7041 = vmatpush1.bf16.msra.mxu0 %v7040_v51  ;;  %v8012_v19 = vpop.permute.xlu1 %8011  ;;  %v862_v33 = vsel %vm13695_vm8, %v7994_v2, %v7998_v58 }
 0x153   : > { %13945 = vst [vmem:[#allocation24_spill] sm:$0xff] %v10306_v15  ;;  %v10315_v5 = vpop.permute.xlu0 %8006  ;;  %v7090_v60 = vpack.c.bf16 %v862_v33, %v801_v46  ;;  %v8014_v43 = vunpack.i.h.bf16 %v8012_v19  ;;  %v8013_v51 = vunpack.i.l.bf16 %v8012_v19 }
 0x154   : > { %8296 = vrot.lane.b32.xlu1 %v10200_v29, %s13607_s29 }
 0x155   : > { %8291 = vrot.lane.b32.xlu0 %v10245_v9, %s13607_s29  ;;  %7091 = vmatprep.subr.bf16.mxu1 %v7090_v60  ;;  %v920_v19 = vsel %vm13693_vm9, %v8013_v51, %v8014_v43 }
 0x156   : > { %7093 = vmatpush1.bf16.msra.mxu1 %v7092_v41  ;;  %v10324_v2 = vpop.permute.xlu1 %8021 }
 0x157   : > { %13947 = vst [vmem:[#allocation26_spill] sm:$0xff] %v10324_v2  ;;  %v8017_v58 = vpop.permute.xlu0 %8016  ;;  %v8023_v37 = vunpack.i.l.bf16 %v10324_v2  ;;  %v13609_v40 = vunpack.i.h.bf16 %v10324_v2 }
 0x158   : > { %8301 = vrot.lane.b32.xlu1 %v10222_v49, %s13605_s7  ;;  %v8018_v45 = vunpack.i.l.bf16 %v8017_v58  ;;  %v8019_v23 = vunpack.i.h.bf16 %v8017_v58 }
 0x159   : > { %1588 = vrot.lane.b32.xlu0 %v10179_v8, %s13607_s29  ;;  %s13619_s29 = smov 36  }
 0x15a   : > { %v10330_v0 = vpop.permute.xlu1 %8031  ;;  %v921_v15 = vsel %vm13693_vm9, %v8014_v43, %v8018_v45 }
 0x15b   : > { %13948 = vst [vmem:[#allocation27_spill] sm:$0xff] %v10330_v0  ;;  %v10332_v3 = vpop.permute.xlu0 %8026 }
 0x15c   : > { %13949 = vst [vmem:[#allocation28_spill] sm:$0xff] %v10332_v3  ;;  %8311 = vrot.lane.b32.xlu1 %v10245_v9, %s13605_s7 }
 0x15d   : > { %8306 = vrot.lane.b32.xlu0 %v10215_v44, %s13605_s7 }
 0x15e   : > { %v8042_v46 = vpop.permute.xlu1 %8041 }
 0x15f   : > { %v8043_v33 = vunpack.i.l.bf16 %v8042_v46  ;;  %v8037_v60 = vpop.permute.xlu0 %8036  ;;  %v8044_v50 = vunpack.i.h.bf16 %v8042_v46 }
 0x160   : > { %v8039_v61 = vunpack.i.h.bf16 %v8037_v60  ;;  %v8038_v41 = vunpack.i.l.bf16 %v8037_v60  ;;  %1649 = vrot.lane.b32.xlu1 %v10179_v8, %s13605_s7 }
 0x161   : > { %8316 = vrot.lane.b32.xlu0 %v10200_v29, %s13605_s7  ;;  %s13621_s7 = smov 44   ;;  %v983_v58 = vsel %vm13692_vm10, %v8043_v33, %v8044_v50 }
 0x162   : > { %v10344_v4 = vpop.permute.xlu1 %8051  ;;  %v982_v0 = vsel %vm13692_vm10, %v8039_v61, %v8043_v33  ;;  %v981_v60 = vsel %vm13692_vm10, %v8038_v41, %v8039_v61  ;;  %v10369_v61 = vsel %vm13693_vm9, %v8023_v37, %v13609_v40  ;;  %v922_v33 = vsel %vm13693_vm9, %v8018_v45, %v8019_v23 }
 0x163   : > { %v10350_v48 = vpop.permute.xlu0 %8046  ;;  %v7042_v3 = vpack.c.bf16 %v982_v0, %v921_v15  ;;  %v7044_v46 = vpack.c.bf16 %v981_v60, %v920_v19  ;;  %v923_v0 = vsel %vm13693_vm9, %v8019_v23, %v8023_v37  ;;  %13952 = vst [vmem:[#allocation31_spill] sm:$0xff] %v10369_v61  ;;  %v7096_v19 = vpack.c.bf16 %v983_v58, %v922_v33 }
 0x164   : > { %13950 = vst [vmem:[#allocation29_spill] sm:$0xff] %v10350_v48  ;;  %v13610_v32 = vunpack.i.h.bf16 %v10350_v48  ;;  %v8048_v56 = vunpack.i.l.bf16 %v10350_v48  ;;  %8326 = vrot.lane.b32.xlu1 %v10215_v44, %s13621_s7 }
 0x165   : > { %8321 = vrot.lane.b32.xlu0 %v10222_v49, %s13621_s7  ;;  %7043 = vmatprep.subr.bf16.mxu0 %v7042_v3 }
 0x166   : > { %v10362_v43 = vsel %vm13692_vm10, %v8048_v56, %v13610_v32  ;;  %7045 = vmatpush1.bf16.msra.mxu0 %v7044_v46  ;;  %v8062_v15 = vpop.permute.xlu1 %8061  ;;  %v984_v51 = vsel %vm13692_vm10, %v8044_v50, %v8048_v56 }
 0x167   : > { %13951 = vst [vmem:[#allocation30_spill] sm:$0xff] %v10362_v43  ;;  %v10371_v41 = vpop.permute.xlu0 %8056  ;;  %v7094_v3 = vpack.c.bf16 %v984_v51, %v923_v0  ;;  %v8064_v45 = vunpack.i.h.bf16 %v8062_v15  ;;  %v8063_v46 = vunpack.i.l.bf16 %v8062_v15 }
 0x168   : > { %13953 = vst [vmem:[#allocation32_spill] sm:$0xff] %v10371_v41  ;;  %8336 = vrot.lane.b32.xlu1 %v10200_v29, %s13621_s7 }
 0x169   : > { %8331 = vrot.lane.b32.xlu0 %v10245_v9, %s13621_s7  ;;  %7095 = vmatprep.subr.bf16.mxu1 %v7094_v3  ;;  %v1042_v15 = vsel %vm13681_vm11, %v8063_v46, %v8064_v45 }
 0x16a   : > { %7097 = vmatpush1.bf16.msra.mxu1 %v7096_v19  ;;  %v10380_v56 = vpop.permute.xlu1 %8071 }
 0x16b   : > { %v8067_v50 = vpop.permute.xlu0 %8066  ;;  %v8073_v60 = vunpack.i.l.bf16 %v10380_v56  ;;  %v13625_v2 = vunpack.i.h.bf16 %v10380_v56 }
 0x16c   : > { %8341 = vrot.lane.b32.xlu1 %v10222_v49, %s13619_s29  ;;  %v8068_v58 = vunpack.i.l.bf16 %v8067_v50  ;;  %v8069_v32 = vunpack.i.h.bf16 %v8067_v50 }
 0x16d   : > { %1710 = vrot.lane.b32.xlu0 %v10179_v8, %s13621_s7  ;;  %s9625_s7 = smov 101  }
 0x16e   : > { %v10386_v23 = vpop.permute.xlu1 %8081  ;;  %v1043_v43 = vsel %vm13681_vm11, %v8064_v45, %v8068_v58 }
 0x16f   : > { %13954 = vst [vmem:[#allocation33_spill] sm:$0xff] %v10386_v23  ;;  %v10388_v37 = vpop.permute.xlu0 %8076 }
 0x170   : > { %13955 = vst [vmem:[#allocation34_spill] sm:$0xff] %v10388_v37  ;;  %8351 = vrot.lane.b32.xlu1 %v10245_v9, %s13619_s29 }
 0x171   : > { %8346 = vrot.lane.b32.xlu0 %v10215_v44, %s13619_s29 }
 0x172   : > { %v8092_v0 = vpop.permute.xlu1 %8091 }
 0x173   : > { %v8093_v51 = vunpack.i.l.bf16 %v8092_v0  ;;  %v8087_v3 = vpop.permute.xlu0 %8086  ;;  %v8094_v40 = vunpack.i.h.bf16 %v8092_v0 }
 0x174   : > { %v8089_v33 = vunpack.i.h.bf16 %v8087_v3  ;;  %v8088_v19 = vunpack.i.l.bf16 %v8087_v3  ;;  %1771 = vrot.lane.b32.xlu1 %v10179_v8, %s13619_s29 }
 0x175   : > { %8356 = vrot.lane.b32.xlu0 %v10200_v29, %s13619_s29  ;;  %s13626_s29 = smov 35   ;;  %v1105_v50 = vsel %vm13694_vm12, %v8093_v51, %v8094_v40 }
 0x176   : > { %v10400_v61 = vpop.permute.xlu1 %8101  ;;  %v1104_v23 = vsel %vm13694_vm12, %v8089_v33, %v8093_v51  ;;  %v1103_v3 = vsel %vm13694_vm12, %v8088_v19, %v8089_v33  ;;  %v1044_v33 = vsel %vm13681_vm11, %v8068_v58, %v8069_v32 }
 0x177   : > { %v10406_v37 = vpop.permute.xlu0 %8096  ;;  %v7046_v48 = vpack.c.bf16 %v1104_v23, %v1043_v43  ;;  %v7048_v0 = vpack.c.bf16 %v1103_v3, %v1042_v15  ;;  %v1045_v23 = vsel %vm13681_vm11, %v8069_v32, %v8073_v60 }
 0x178   : > { %v13632_v41 = vunpack.i.h.bf16 %v10406_v37  ;;  %v8098_v7 = vunpack.i.l.bf16 %v10406_v37  ;;  %8366 = vrot.lane.b32.xlu1 %v10215_v44, %s13626_s29  ;;  %v10425_v44 = vld [vmem:[%s13957_s3 + $0x8] sm:$0xff] }
 0x179   : > { %8361 = vrot.lane.b32.xlu0 %v10222_v49, %s13626_s29  ;;  %7047 = vmatprep.subr.bf16.mxu0 %v7046_v48  ;;  %v10430_v49 = vsel %vm13681_vm11, %v8073_v60, %v13625_v2  ;;  %vm13754_vm11 = vcmask 277504  }
 0x17a   : > { %v10418_v45 = vsel %vm13694_vm12, %v8098_v7, %v13632_v41  ;;  %7049 = vmatpush1.bf16.msra.mxu0 %v7048_v0  ;;  %v8112_v43 = vpop.permute.xlu1 %8111  ;;  %v1106_v46 = vsel %vm13694_vm12, %v8094_v40, %v8098_v7  ;;  %13958 = vst [vmem:[#allocation36_spill] sm:$0xff] %v10430_v49  ;;  %7008 = vmatprep.mubr.msk.f32.mxu0 %vm2144_vm13, %v10425_v44 }
 0x17b   : > { %13956 = vst [vmem:[#allocation35_spill] sm:$0xff] %v10418_v45  ;;  %v10432_v48 = vpop.permute.xlu0 %8106  ;;  %v7098_v51 = vpack.c.bf16 %v1106_v46, %v1045_v23  ;;  %7009 = vmatprep.mubr.msk.f32.mxu1 %vm2144_vm13, %v10425_v44  ;;  %v7100_v7 = vpack.c.bf16 %v1105_v50, %v1044_v33  ;;  %v8113_v19 = vunpack.i.l.bf16 %v8112_v43 }
 0x17c   : > { %13959 = vst [vmem:[#allocation37_spill] sm:$0xff] %v10432_v48  ;;  %8376 = vrot.lane.b32.xlu1 %v10200_v29, %s13626_s29 }
 0x17d   : > { %8371 = vrot.lane.b32.xlu0 %v10245_v9, %s13626_s29  ;;  %7099 = vmatprep.subr.bf16.mxu1 %v7098_v51  ;;  %v8114_v9 = vunpack.i.h.bf16 %v8112_v43 }
 0x17e   : > { %7101 = vmatpush1.bf16.msra.mxu1 %v7100_v7  ;;  %v10445_v60 = vpop.permute.xlu1 %8121 }
 0x17f   : > { %13960 = vst [vmem:[#allocation38_spill] sm:$0xff] %v10445_v60  ;;  %v8117_v32 = vpop.permute.xlu0 %8116  ;;  %v8123_v46 = vunpack.i.l.bf16 %v10445_v60 }
 0x180   : > { %1877 = vrot.lane.b32.xlu1 %v10207_v34, %s13696_s19  ;;  %v8118_v15 = vunpack.i.l.bf16 %v8117_v32 }
 0x181   : > { %1832 = vrot.lane.b32.xlu0 %v10179_v8, %s13626_s29  ;;  %s9624_s29 = smov 91  }
 0x182   : > { %v10451_v29 = vpop.permute.xlu1 %8131  ;;  %v1165_v33 = vsel %vm13628_vm14, %v8114_v9, %v8118_v15 }
 0x183   : > { %13961 = vst [vmem:[#allocation39_spill] sm:$0xff] %v10451_v29  ;;  %v10453_v58 = vpop.permute.xlu0 %8126 }
 0x184   : > { %1881 = vrot.lane.b32.xlu1 %v10203_v30, %s13696_s19  ;;  %v1164_v30 = vsel %vm13628_vm14, %v8113_v19, %v8114_v9  ;;  %v10481_v9 = vld [vmem:[%s9863_s12 + $0x8] sm:$0xff] }
 0x185   : > { %1879 = vrot.lane.b32.xlu0 %v10210_v35, %s13696_s19  ;;  %v8119_v35 = vunpack.i.h.bf16 %v8117_v32 }
 0x186   : > { %v8142_v3 = vpop.permute.xlu1 %8141 }
 0x187   : > { %v8143_v0 = vunpack.i.l.bf16 %v8142_v3  ;;  %v8137_v34 = vpop.permute.xlu0 %8136  ;;  %v8144_v51 = vunpack.i.h.bf16 %v8142_v3 }
 0x188   : > { %v8139_v50 = vunpack.i.h.bf16 %v8137_v34  ;;  %v8138_v23 = vunpack.i.l.bf16 %v8137_v34  ;;  %1885 = vrot.lane.b32.xlu1 %v10162_v6, %s13696_s19  ;;  %v13629_v6 = vunpack.i.h.bf16 %v10445_v60 }
 0x189   : > { %1883 = vrot.lane.b32.xlu0 %v10167_v10, %s13696_s19  ;;  %v1227_v32 = vsel %vm13630_vm15, %v8143_v0, %v8144_v51 }
 0x18a   : > { %v10465_v43 = vpop.permute.xlu1 %8151  ;;  %v1226_v7 = vsel %vm13630_vm15, %v8139_v50, %v8143_v0  ;;  %v1225_v34 = vsel %vm13630_vm15, %v8138_v23, %v8139_v50 }
 0x18b   : > { %v10471_v40 = vpop.permute.xlu0 %8146  ;;  %v7050_v3 = vpack.c.bf16 %v1226_v7, %v1165_v33  ;;  %v7052_v2 = vpack.c.bf16 %v1225_v34, %v1164_v30  ;;  %v1167_v30 = vsel %vm13628_vm14, %v8119_v35, %v8123_v46  ;;  %v1166_v7 = vsel %vm13628_vm14, %v8118_v15, %v8119_v35  ;;  %v2583_v15 = vld [vmem:[%s9863_s12 + $0x30] sm:$0xff] }
 0x18c   : > { %v13631_v10 = vunpack.i.h.bf16 %v10471_v40  ;;  %v8148_v19 = vunpack.i.l.bf16 %v10471_v40  ;;  %1889 = vrot.lane.b32.xlu1 %v10187_v26, %s13696_s19  ;;  %v10502_v34 = vpack.i.bf16 %v10182_v18, %v10481_v9 }
 0x18d   : > { %1887 = vrot.lane.b32.xlu0 %v10232_v62, %s13696_s19  ;;  %7051 = vmatprep.subr.bf16.mxu0 %v7050_v3  ;;  %v10493_v62 = vsel %vm13628_vm14, %v8123_v46, %v13629_v6  ;;  %v2582_v46 = vld [vmem:[%s9863_s12 + $0x28] sm:$0xff]  ;;  %vm13640_vm14 = vcmask 56320  }
 0x18e   : > { %v10486_v50 = vsel %vm13630_vm15, %v8148_v19, %v13631_v10  ;;  %7053 = vmatpush1.bf16.msra.mxu0 %v7052_v2  ;;  %v8162_v23 = vpop.permute.xlu1 %8161  ;;  %v1228_v26 = vsel %vm13630_vm15, %v8144_v51, %v8148_v19  ;;  %13963 = vst [vmem:[#allocation41_spill] sm:$0xff] %v10493_v62  ;;  %v7104_v2 = vpack.c.bf16 %v1227_v32, %v1166_v7  ;;  %v2701_v19 = vld [vmem:[%s9863_s12 + $0x18] sm:$0xff]  ;;  %v2706_v7 = vld [vmem:[%s9863_s12 + $0x40] sm:$0xff]  ;;  %vm13641_vm15 = vcmask 48128  }
 0x18f   : > { %13962 = vst [vmem:[#allocation40_spill] sm:$0xff] %v10486_v50  ;;  %v10495_v0 = vpop.permute.xlu0 %8156  ;;  %v7102_v33 = vpack.c.bf16 %v1228_v26, %v1167_v30  ;;  %v10517_v3 = vpack.i.bf16 %v2583_v15, %v2582_v46  ;;  %v8163_v51 = vunpack.i.l.bf16 %v8162_v23 }
 0x190   : > { %13964 = vst [vmem:[#allocation42_spill] sm:$0xff] %v10495_v0  ;;  %1893 = vrot.lane.b32.xlu1 %v10179_v8, %s13696_s19  ;;  %v2138_v8 = vld [vmem:[%s13561_s4] sm:$0xff] }
 0x191   : > { %1891 = vrot.lane.b32.xlu0 %v10190_v27, %s13696_s19  ;;  %7103 = vmatprep.subr.bf16.mxu1 %v7102_v33  ;;  %v2702_v27 = vld [vmem:[%s9863_s12 + $0x20] sm:$0xff]  ;;  %v2705_v33 = vld [vmem:[%s9863_s12 + $0x38] sm:$0xff]  ;;  %s9628_s19 = smov 90  }
 0x192   : > { %7105 = vmatpush1.bf16.msra.mxu1 %v7104_v2  ;;  %v10510_v35 = vpop.permute.xlu1 %8171  ;;  %v10525_v26 = vpack.i.bf16 %v2702_v27, %v2701_v19  ;;  %v8164_v2 = vunpack.i.h.bf16 %v8162_v23  ;;  %v10533_v10 = vpack.i.bf16 %v2706_v7, %v2705_v33 }
 0x193   : > { %13965 = vst [vmem:[#allocation43_spill] sm:$0xff] %v10510_v35  ;;  %v8167_v18 = vpop.permute.xlu0 %8166  ;;  %v8173_v41 = vunpack.i.l.bf16 %v10510_v35  ;;  %v13642_v7 = vunpack.i.h.bf16 %v10510_v35 }
 0x194   : > { %8382 = vrot.lane.b32.xlu1 %v10502_v34, %s13799_s27  ;;  %v8168_v46 = vunpack.i.l.bf16 %v8167_v18  ;;  %v1286_v23 = vsel %vm13640_vm14, %v8163_v51, %v8164_v2  ;;  %v8169_v50 = vunpack.i.h.bf16 %v8167_v18 }
 0x195   : > { %2141 = vperm.xlu0 %8380, %v2138_v8  }
 0x196   : > { %v10521_v32 = vpop.permute.xlu1 %8181  ;;  %v1287_v49 = vsel %vm13640_vm14, %v8164_v2, %v8168_v46 }
 0x197   : > { %13966 = vst [vmem:[#allocation44_spill] sm:$0xff] %v10521_v32  ;;  %v10523_v30 = vpop.permute.xlu0 %8176 }
 0x198   : > { %13967 = vst [vmem:[#allocation45_spill] sm:$0xff] %v10523_v30  ;;  %8392 = vrot.lane.b32.xlu1 %v10517_v3, %s13799_s27 }
 0x199   : > { %8387 = vrot.lane.b32.xlu0 %v10525_v26, %s13799_s27 }
 0x19a   : > { %v8192_v15 = vpop.permute.xlu1 %8191 }
 0x19b   : > { %v8193_v8 = vunpack.i.l.bf16 %v8192_v15  ;;  %v8187_v6 = vpop.permute.xlu0 %8186  ;;  %v8194_v62 = vunpack.i.h.bf16 %v8192_v15 }
 0x19c   : > { %v8189_v19 = vunpack.i.h.bf16 %v8187_v6  ;;  %v8188_v27 = vunpack.i.l.bf16 %v8187_v6  ;;  %8407 = vrot.lane.b32.xlu1 %v10525_v26, %s9593_s18 }
 0x19d   : > { %8397 = vrot.lane.b32.xlu0 %v10533_v10, %s13799_s27  ;;  %v1349_v18 = vsel %vm13641_vm15, %v8193_v8, %v8194_v62 }
 0x19e   : > { %v10541_v32 = vpop.permute.xlu1 %8201  ;;  %v1348_v33 = vsel %vm13641_vm15, %v8189_v19, %v8193_v8  ;;  %v1347_v6 = vsel %vm13641_vm15, %v8188_v27, %v8189_v19  ;;  %v1289_v19 = vsel %vm13640_vm14, %v8169_v50, %v8173_v41 }
 0x19f   : > { %v10547_v45 = vpop.permute.xlu0 %8196  ;;  %v7054_v60 = vpack.c.bf16 %v1348_v33, %v1287_v49  ;;  %v7056_v15 = vpack.c.bf16 %v1347_v6, %v1286_v23  ;;  %v1288_v33 = vsel %vm13640_vm14, %v8168_v46, %v8169_v50 }
 0x1a0   : > { %13968 = vst [vmem:[#allocation46_spill] sm:$0xff] %v10547_v45  ;;  %v13643_v51 = vunpack.i.h.bf16 %v10547_v45  ;;  %v8198_v30 = vunpack.i.l.bf16 %v10547_v45  ;;  %8417 = vrot.lane.b32.xlu1 %v10533_v10, %s9593_s18  ;;  %v7108_v6 = vpack.c.bf16 %v1349_v18, %v1288_v33 }
 0x1a1   : > { %7055 = vmatprep.subr.bf16.mxu0 %v7054_v60  ;;  %8402 = vrot.lane.b32.xlu0 %v10502_v34, %s9593_s18  ;;  %v10566_v60 = vsel %vm13640_vm14, %v8173_v41, %v13642_v7  ;;  %vm13651_vm14 = vcmask 457728  }
 0x1a2   : > { %v10559_v2 = vsel %vm13641_vm15, %v8198_v30, %v13643_v51  ;;  %7057 = vmatpush1.bf16.msra.mxu0 %v7056_v15  ;;  %v8212_v49 = vpop.permute.xlu1 %8211  ;;  %v1350_v27 = vsel %vm13641_vm15, %v8194_v62, %v8198_v30  ;;  %13970 = vst [vmem:[#allocation48_spill] sm:$0xff] %v10566_v60  ;;  %v3063_v30 = vld [vmem:[%s9863_s12 + $0x10] sm:$0xff]  ;;  %vm13652_vm15 = vcmask 449536  }
 0x1a3   : > { %13969 = vst [vmem:[#allocation47_spill] sm:$0xff] %v10559_v2  ;;  %v10568_v8 = vpop.permute.xlu0 %8206  ;;  %v7106_v23 = vpack.c.bf16 %v1350_v27, %v1289_v19  ;;  %v8214_v46 = vunpack.i.h.bf16 %v8212_v49  ;;  %v8213_v18 = vunpack.i.l.bf16 %v8212_v49 }
 0x1a4   : > { %13971 = vst [vmem:[#allocation49_spill] sm:$0xff] %v10568_v8  ;;  %8422 = vrot.lane.b32.xlu1 %v10502_v34, %s13794_s15 }
 0x1a5   : > { %7107 = vmatprep.subr.bf16.mxu1 %v7106_v23  ;;  %8412 = vrot.lane.b32.xlu0 %v10517_v3, %s9593_s18  ;;  %v1408_v60 = vsel %vm13651_vm14, %v8213_v18, %v8214_v46  ;;  %s9626_s18 = smov 89  }
 0x1a6   : > { %7109 = vmatpush1.bf16.msra.mxu1 %v7108_v6  ;;  %v10577_v41 = vpop.permute.xlu1 %8221  ;;  %v10593_v6 = vpack.i.bf16 %v3063_v30, %v10481_v9 }
 0x1a7   : > { %13972 = vst [vmem:[#allocation50_spill] sm:$0xff] %v10577_v41  ;;  %v8217_v62 = vpop.permute.xlu0 %8216  ;;  %v8223_v51 = vunpack.i.l.bf16 %v10577_v41 }
 0x1a8   : > { %8432 = vrot.lane.b32.xlu1 %v10517_v3, %s13794_s15  ;;  %v8218_v19 = vunpack.i.l.bf16 %v8217_v62  ;;  %v8219_v2 = vunpack.i.h.bf16 %v8217_v62 }
 0x1a9   : > { %8427 = vrot.lane.b32.xlu0 %v10525_v26, %s13794_s15 }
 0x1aa   : > { %v10583_v50 = vpop.permute.xlu1 %8231  ;;  %v1409_v35 = vsel %vm13651_vm14, %v8214_v46, %v8218_v19 }
 0x1ab   : > { %13973 = vst [vmem:[#allocation51_spill] sm:$0xff] %v10583_v50  ;;  %v10585_v34 = vpop.permute.xlu0 %8226 }
 0x1ac   : > { %13974 = vst [vmem:[#allocation52_spill] sm:$0xff] %v10585_v34  ;;  %8447 = vrot.lane.b32.xlu1 %v10525_v26, %s13781_s16 }
 0x1ad   : > { %8437 = vrot.lane.b32.xlu0 %v10533_v10, %s13794_s15 }
 0x1ae   : > { %v8242_v27 = vpop.permute.xlu1 %8241 }
 0x1af   : > { %v8243_v23 = vunpack.i.l.bf16 %v8242_v27  ;;  %v8237_v33 = vpop.permute.xlu0 %8236  ;;  %v8244_v49 = vunpack.i.h.bf16 %v8242_v27 }
 0x1b0   : > { %v8239_v15 = vunpack.i.h.bf16 %v8237_v33  ;;  %v8238_v7 = vunpack.i.l.bf16 %v8237_v33  ;;  %8457 = vrot.lane.b32.xlu1 %v10533_v10, %s13781_s16  ;;  %v13653_v33 = vunpack.i.h.bf16 %v10577_v41 }
 0x1b1   : > { %8442 = vrot.lane.b32.xlu0 %v10593_v6, %s13781_s16  ;;  %v1471_v62 = vsel %vm13652_vm15, %v8243_v23, %v8244_v49 }
 0x1b2   : > { %v10601_v50 = vpop.permute.xlu1 %8251  ;;  %v1470_v9 = vsel %vm13652_vm15, %v8239_v15, %v8243_v23  ;;  %v1469_v30 = vsel %vm13652_vm15, %v8238_v7, %v8239_v15 }
 0x1b3   : > { %13975 = vst [vmem:[#allocation53_spill] sm:$0xff] %v10601_v50  ;;  %v10607_v34 = vpop.permute.xlu0 %8246  ;;  %v7058_v45 = vpack.c.bf16 %v1470_v9, %v1409_v35  ;;  %v7060_v27 = vpack.c.bf16 %v1469_v30, %v1408_v60  ;;  %v1411_v60 = vsel %vm13651_vm14, %v8219_v2, %v8223_v51  ;;  %v1410_v9 = vsel %vm13651_vm14, %v8218_v19, %v8219_v2 }
 0x1b4   : > { %13976 = vst [vmem:[#allocation54_spill] sm:$0xff] %v10607_v34  ;;  %v13654_v18 = vunpack.i.h.bf16 %v10607_v34  ;;  %v8248_v8 = vunpack.i.l.bf16 %v10607_v34  ;;  %8462 = vrot.lane.b32.xlu1 %v10593_v6, %s9596_s26  ;;  %v7112_v30 = vpack.c.bf16 %v1471_v62, %v1410_v9 }
 0x1b5   : > { %7059 = vmatprep.subr.bf16.mxu0 %v7058_v45  ;;  %8452 = vrot.lane.b32.xlu0 %v10517_v3, %s13781_s16  ;;  %v10626_v45 = vsel %vm13651_vm14, %v8223_v51, %v13653_v33  ;;  %vm13662_vm14 = vcmask 441344  }
 0x1b6   : > { %v10619_v7 = vsel %vm13652_vm15, %v8248_v8, %v13654_v18  ;;  %7061 = vmatpush1.bf16.msra.mxu0 %v7060_v27  ;;  %v8262_v35 = vpop.permute.xlu1 %8261  ;;  %v1472_v15 = vsel %vm13652_vm15, %v8244_v49, %v8248_v8  ;;  %13978 = vst [vmem:[#allocation56_spill] sm:$0xff] %v10626_v45  ;;  %vm13663_vm15 = vcmask 375808  }
 0x1b7   : > { %13977 = vst [vmem:[#allocation55_spill] sm:$0xff] %v10619_v7  ;;  %v10628_v46 = vpop.permute.xlu0 %8256  ;;  %v7110_v23 = vpack.c.bf16 %v1472_v15, %v1411_v60  ;;  %v8264_v49 = vunpack.i.h.bf16 %v8262_v35  ;;  %v8263_v62 = vunpack.i.l.bf16 %v8262_v35 }
 0x1b8   : > { %13979 = vst [vmem:[#allocation57_spill] sm:$0xff] %v10628_v46  ;;  %8472 = vrot.lane.b32.xlu1 %v10517_v3, %s9596_s26 }
 0x1b9   : > { %7111 = vmatprep.subr.bf16.mxu1 %v7110_v23  ;;  %8467 = vrot.lane.b32.xlu0 %v10525_v26, %s9596_s26 }
 0x1ba   : > { %7113 = vmatpush1.bf16.msra.mxu1 %v7112_v30  ;;  %v10637_v8 = vpop.permute.xlu1 %8271 }
 0x1bb   : > { %13980 = vst [vmem:[#allocation58_spill] sm:$0xff] %v10637_v8  ;;  %v8267_v51 = vpop.permute.xlu0 %8266  ;;  %v8273_v33 = vunpack.i.l.bf16 %v10637_v8 }
 0x1bc   : > { %8487 = vrot.lane.b32.xlu1 %v10525_v26, %s9597_s14  ;;  %v8268_v60 = vunpack.i.l.bf16 %v8267_v51  ;;  %v8269_v35 = vunpack.i.h.bf16 %v8267_v51 }
 0x1bd   : > { %8477 = vrot.lane.b32.xlu0 %v10533_v10, %s9596_s26  ;;  %s9627_s26 = smov 99  }
 0x1be   : > { %v10643_v2 = vpop.permute.xlu1 %1527  ;;  %v1531_v7 = vsel %vm13662_vm14, %v8264_v49, %v8268_v60 }
 0x1bf   : > { %13981 = vst [vmem:[#allocation59_spill] sm:$0xff] %v10643_v2  ;;  %v10645_v19 = vpop.permute.xlu0 %8276  ;;  %v1530_v2 = vsel %vm13662_vm14, %v8263_v62, %v8264_v49 }
 0x1c0   : > { %13982 = vst [vmem:[#allocation60_spill] sm:$0xff] %v10645_v19  ;;  %8497 = vrot.lane.b32.xlu1 %v10533_v10, %s9597_s14  ;;  %v13664_v19 = vunpack.i.h.bf16 %v10637_v8 }
 0x1c1   : > { %8482 = vrot.lane.b32.xlu0 %v10593_v6, %s9597_s14 }
 0x1c2   : > { %v8287_v15 = vpop.permute.xlu1 %8286 }
 0x1c3   : > { %v8288_v23 = vunpack.i.l.bf16 %v8287_v15  ;;  %v8282_v9 = vpop.permute.xlu0 %8281  ;;  %v8289_v18 = vunpack.i.h.bf16 %v8287_v15 }
 0x1c4   : > { %v8284_v30 = vunpack.i.h.bf16 %v8282_v9  ;;  %v8283_v27 = vunpack.i.l.bf16 %v8282_v9  ;;  %8502 = vrot.lane.b32.xlu1 %v10593_v6, %s9598_s11 }
 0x1c5   : > { %8492 = vrot.lane.b32.xlu0 %v10517_v3, %s9597_s14  ;;  %v1593_v51 = vsel %vm13663_vm15, %v8288_v23, %v8289_v18  ;;  %s9621_s14 = smov 111  }
 0x1c6   : > { %v10657_v45 = vpop.permute.xlu1 %8296  ;;  %v1592_v41 = vsel %vm13663_vm15, %v8284_v30, %v8288_v23  ;;  %v1591_v9 = vsel %vm13663_vm15, %v8283_v27, %v8284_v30  ;;  %v1532_v30 = vsel %vm13662_vm14, %v8268_v60, %v8269_v35 }
 0x1c7   : > { %v10663_v34 = vpop.permute.xlu0 %8291  ;;  %v7062_v46 = vpack.c.bf16 %v1592_v41, %v1531_v7  ;;  %v7064_v15 = vpack.c.bf16 %v1591_v9, %v1530_v2  ;;  %v1533_v7 = vsel %vm13662_vm14, %v8269_v35, %v8273_v33  ;;  %v7116_v9 = vpack.c.bf16 %v1593_v51, %v1532_v30 }
 0x1c8   : > { %13983 = vst [vmem:[#allocation61_spill] sm:$0xff] %v10663_v34  ;;  %v13665_v62 = vunpack.i.h.bf16 %v10663_v34  ;;  %v8293_v50 = vunpack.i.l.bf16 %v10663_v34  ;;  %8512 = vrot.lane.b32.xlu1 %v10517_v3, %s9598_s11 }
 0x1c9   : > { %7063 = vmatprep.subr.bf16.mxu0 %v7062_v46  ;;  %8507 = vrot.lane.b32.xlu0 %v10525_v26, %s9598_s11  ;;  %v10682_v46 = vsel %vm13662_vm14, %v8273_v33, %v13664_v19  ;;  %vm13672_vm14 = vcmask 367616  }
 0x1ca   : > { %v10675_v27 = vsel %vm13663_vm15, %v8293_v50, %v13665_v62  ;;  %7065 = vmatpush1.bf16.msra.mxu0 %v7064_v15  ;;  %v8302_v41 = vpop.permute.xlu1 %8301  ;;  %v1594_v2 = vsel %vm13663_vm15, %v8289_v18, %v8293_v50  ;;  %13985 = vst [vmem:[#allocation63_spill] sm:$0xff] %v10682_v46  ;;  %vm13673_vm15 = vcmask 359424  }
 0x1cb   : > { %13984 = vst [vmem:[#allocation62_spill] sm:$0xff] %v10675_v27  ;;  %v10684_v49 = vpop.permute.xlu0 %1588  ;;  %v7114_v23 = vpack.c.bf16 %v1594_v2, %v1533_v7  ;;  %v8304_v35 = vunpack.i.h.bf16 %v8302_v41  ;;  %v8303_v51 = vunpack.i.l.bf16 %v8302_v41 }
 0x1cc   : > { %13986 = vst [vmem:[#allocation64_spill] sm:$0xff] %v10684_v49  ;;  %8527 = vrot.lane.b32.xlu1 %v10525_v26, %s9599_s13 }
 0x1cd   : > { %7115 = vmatprep.subr.bf16.mxu1 %v7114_v23  ;;  %8517 = vrot.lane.b32.xlu0 %v10533_v10, %s9598_s11  ;;  %s9622_s11 = smov 100  }
 0x1ce   : > { %7117 = vmatpush1.bf16.msra.mxu1 %v7116_v9  ;;  %v10693_v50 = vpop.permute.xlu1 %8311 }
 0x1cf   : > { %13987 = vst [vmem:[#allocation65_spill] sm:$0xff] %v10693_v50  ;;  %v8307_v33 = vpop.permute.xlu0 %8306  ;;  %v8313_v19 = vunpack.i.l.bf16 %v10693_v50  ;;  %v13671_v8 = vunpack.i.h.bf16 %v10693_v50 }
 0x1d0   : > { %8537 = vrot.lane.b32.xlu1 %v10533_v10, %s9599_s13  ;;  %v8308_v7 = vunpack.i.l.bf16 %v8307_v33  ;;  %v8309_v41 = vunpack.i.h.bf16 %v8307_v33 }
 0x1d1   : > { %8522 = vrot.lane.b32.xlu0 %v10593_v6, %s9599_s13 }
 0x1d2   : > { %v10699_v18 = vpop.permute.xlu1 %1649 }
 0x1d3   : > { %13988 = vst [vmem:[#allocation66_spill] sm:$0xff] %v10699_v18  ;;  %v10701_v60 = vpop.permute.xlu0 %8316  ;;  %v1652_v18 = vsel %vm13672_vm14, %v8303_v51, %v8304_v35 }
 0x1d4   : > { %13989 = vst [vmem:[#allocation67_spill] sm:$0xff] %v10701_v60  ;;  %8542 = vrot.lane.b32.xlu1 %v10593_v6, %s13823_s30 }
 0x1d5   : > { %8532 = vrot.lane.b32.xlu0 %v10517_v3, %s9599_s13  ;;  %v1653_v3 = vsel %vm13672_vm14, %v8304_v35, %v8308_v7  ;;  %v1654_v35 = vsel %vm13672_vm14, %v8308_v7, %v8309_v41  ;;  %s9623_s13 = smov 110  }
 0x1d6   : > { %v8327_v2 = vpop.permute.xlu1 %8326 }
 0x1d7   : > { %v8328_v23 = vunpack.i.l.bf16 %v8327_v2  ;;  %v8322_v30 = vpop.permute.xlu0 %8321  ;;  %v8329_v62 = vunpack.i.h.bf16 %v8327_v2 }
 0x1d8   : > { %v8324_v9 = vunpack.i.h.bf16 %v8322_v30  ;;  %v8323_v15 = vunpack.i.l.bf16 %v8322_v30 }
 0x1d9   : > { %8547 = vrot.lane.b32.xlu0 %v10525_v26, %s13823_s30  ;;  %v1715_v26 = vsel %vm13673_vm15, %v8328_v23, %v8329_v62 }
 0x1da   : > { %v10711_v46 = vpop.permute.xlu1 %8336  ;;  %v1714_v27 = vsel %vm13673_vm15, %v8324_v9, %v8328_v23  ;;  %v1713_v49 = vsel %vm13673_vm15, %v8323_v15, %v8324_v9  ;;  %v7120_v23 = vpack.c.bf16 %v1715_v26, %v1654_v35 }
 0x1db   : > { %v10717_v30 = vpop.permute.xlu0 %8331  ;;  %v7066_v60 = vpack.c.bf16 %v1714_v27, %v1653_v3  ;;  %v7068_v2 = vpack.c.bf16 %v1713_v49, %v1652_v18  ;;  %v1655_v49 = vsel %vm13672_vm14, %v8309_v41, %v8313_v19  ;;  %v10734_v18 = vsel %vm13672_vm14, %v8313_v19, %v13671_v8  ;;  %v3550_v3 = vld [vmem:[%s9863_s12 + $0x28] sm:$0xff]  ;;  %v3551_v19 = vld [vmem:[%s9863_s12 + $0x30] sm:$0xff] }
 0x1dc   : > { %13990 = vst [vmem:[#allocation68_spill] sm:$0xff] %v10717_v30  ;;  %v13674_v51 = vunpack.i.h.bf16 %v10717_v30  ;;  %v8333_v34 = vunpack.i.l.bf16 %v10717_v30  ;;  %13992 = vst [vmem:[#allocation70_spill] sm:$0xff] %v10734_v18  ;;  %v10748_v8 = vpack.i.bf16 %v3551_v19, %v3550_v3  ;;  %vm13760_vm14 = vcmask 293888  }
 0x1dd   : > { %7067 = vmatprep.subr.bf16.mxu0 %v7066_v60  ;;  %8557 = vrot.lane.b32.xlu0 %v10533_v10, %s13823_s30 }
 0x1de   : > { %v10727_v15 = vsel %vm13673_vm15, %v8333_v34, %v13674_v51  ;;  %7069 = vmatpush1.bf16.msra.mxu0 %v7068_v2  ;;  %v8342_v27 = vpop.permute.xlu1 %8341  ;;  %v1716_v33 = vsel %vm13673_vm15, %v8329_v62, %v8333_v34  ;;  %v3669_v2 = vld [vmem:[%s9863_s12 + $0x18] sm:$0xff]  ;;  %13995 = vst [vmem:[#allocation73_spill] sm:$0xff] %v10748_v8  ;;  %8552 = vrot.lane.b32.xlu1 %v10748_v8, %s13823_s30  ;;  %vm13757_vm15 = vcmask 285696  }
 0x1df   : > { %13991 = vst [vmem:[#allocation69_spill] sm:$0xff] %v10727_v15  ;;  %v10736_v10 = vpop.permute.xlu0 %1710  ;;  %v7118_v60 = vpack.c.bf16 %v1716_v33, %v1655_v49  ;;  %v3670_v49 = vld [vmem:[%s9863_s12 + $0x20] sm:$0xff]  ;;  %v8344_v41 = vunpack.i.h.bf16 %v8342_v27  ;;  %v8343_v26 = vunpack.i.l.bf16 %v8342_v27 }
 0x1e0   : > { %13993 = vst [vmem:[#allocation71_spill] sm:$0xff] %v10736_v10  ;;  %v10755_v7 = vpack.i.bf16 %v3670_v49, %v3669_v2  ;;  %v7799_v2 = vunpack.i.h.bf16 %v10018_v17 }
 0x1e1   : > { %7119 = vmatprep.subr.bf16.mxu1 %v7118_v60  ;;  %8562 = vrot.lane.b32.xlu0 %v10593_v6, %s13698_s17  ;;  %v1774_v51 = vsel %vm13760_vm14, %v8343_v26, %v8344_v41 }
 0x1e2   : > { %7121 = vmatpush1.bf16.msra.mxu1 %v7120_v23  ;;  %v10743_v34 = vpop.permute.xlu1 %8351  ;;  %13997 = vst [vmem:[#allocation75_spill] sm:$0xff] %v10755_v7  ;;  %8567 = vrot.lane.b32.xlu1 %v10755_v7, %s13698_s17 }
 0x1e3   : > { %13994 = vst [vmem:[#allocation72_spill] sm:$0xff] %v10743_v34  ;;  %v8347_v62 = vpop.permute.xlu0 %8346 }
 0x1e4   : > { %v8348_v60 = vunpack.i.l.bf16 %v8347_v62 }
 0x1e5   : > { %8572 = vrot.lane.b32.xlu0 %v10748_v8, %s13698_s17  ;;  %v8349_v8 = vunpack.i.h.bf16 %v8347_v62  ;;  %v7804_v62 = vunpack.i.h.bf16 %v10024_v21 }
 0x1e6   : > { %v10751_v33 = vpop.permute.xlu1 %1771  ;;  %v1775_v27 = vsel %vm13760_vm14, %v8344_v41, %v8348_v60  ;;  %v7803_v41 = vunpack.i.l.bf16 %v10024_v21 }
 0x1e7   : > { %13996 = vst [vmem:[#allocation74_spill] sm:$0xff] %v10751_v33  ;;  %v10759_v6 = vpop.permute.xlu0 %8356 }
 0x1e8   : > { %13998 = vst [vmem:[#allocation76_spill] sm:$0xff] %v10759_v6 }
 0x1ea   : > { %v8367_v35 = vpop.permute.xlu1 %8366 }
 0x1eb   : > { %v8368_v23 = vunpack.i.l.bf16 %v8367_v35  ;;  %v8362_v3 = vpop.permute.xlu0 %8361  ;;  %v8369_v49 = vunpack.i.h.bf16 %v8367_v35 }
 0x1ec   : > { %v8364_v19 = vunpack.i.h.bf16 %v8362_v3  ;;  %v8363_v9 = vunpack.i.l.bf16 %v8362_v3 }
 0x1ed   : > { %v1837_v26 = vsel %vm13757_vm15, %v8368_v23, %v8369_v49 }
 0x1ee   : > { %v10765_v33 = vpop.permute.xlu1 %8376  ;;  %v1836_v18 = vsel %vm13757_vm15, %v8364_v19, %v8368_v23  ;;  %v1835_v15 = vsel %vm13757_vm15, %v8363_v9, %v8364_v19  ;;  %v14001_v9 = vunpack.i.l.bf16 %v10743_v34  ;;  %v7853_v23 = vunpack.i.l.bf16 %v10067_v52  ;;  %v322_v34 = vld [vmem:[%s9856_s20 + $0x20] sm:$0xff] }
 0x1ef   : > { %13999 = vst [vmem:[#allocation77_spill] sm:$0xff] %v10765_v33  ;;  %v10770_v7 = vpop.permute.xlu0 %8371  ;;  %v7070_v10 = vpack.c.bf16 %v1836_v18, %v1775_v27  ;;  %v7072_v50 = vpack.c.bf16 %v1835_v15, %v1774_v51 }
 0x1f0   : > { %14000 = vst [vmem:[#allocation78_spill] sm:$0xff] %v10770_v7  ;;  %v13684_v3 = vunpack.i.l.bf16 %v10770_v7  ;;  %v1777_v19 = vsel %vm13760_vm14, %v8349_v8, %v14001_v9  ;;  %v7808_v9 = vunpack.i.l.bf16 %v10037_v31  ;;  %v10804_v31 = vld [vmem:[%s13957_s3] sm:$0xff]  ;;  %v7833_v7 = vunpack.i.l.bf16 %v10053_v38  ;;  %s14317_s3 = smov 9  }
 0x1f1   : > { %7071 = vmatprep.subr.bf16.mxu0 %v7070_v10  ;;  %v1776_v10 = vsel %vm13760_vm14, %v8348_v60, %v8349_v8  ;;  %v376_v8 = vsel %vm370_vm0, %v7799_v2, %v7803_v41  ;;  %v324_v60 = vld [vmem:[%s9856_s20 + $0x30] sm:$0xff] }
 0x1f2   : > { %7073 = vmatpush1.bf16.msra.mxu0 %v7072_v50  ;;  %v1878_v35 = vpop.permute.xlu1 %1877  ;;  %v1838_v51 = vsel %vm13757_vm15, %v8369_v49, %v13684_v3  ;;  %v7124_v21 = vpack.c.bf16 %v1837_v26, %v1776_v10  ;;  %v14003_v50 = vunpack.i.l.bf16 %v10018_v17  ;;  %v377_v49 = vsel %vm370_vm0, %v7803_v41, %v7804_v62 }
 0x1f3   : > { %v10783_v15 = vpop.permute.xlu0 %1832  ;;  %v7122_v18 = vpack.c.bf16 %v1838_v51, %v1777_v19  ;;  %v7828_v3 = vunpack.i.l.bf16 %v10055_v39  ;;  %v323_v51 = vld [vmem:[%s9856_s20 + $0x28] sm:$0xff]  ;;  %v7858_v26 = vunpack.i.l.bf16 %v10094_v13  ;;  %v7903_v17 = vunpack.i.l.bf16 %v10123_v42 }
 0x1f4   : > { %14002 = vst [vmem:[#allocation79_spill] sm:$0xff] %v10783_v15  ;;  %v375_v27 = vsel %vm370_vm0, %v14003_v50, %v7799_v2  ;;  %v14004_v15 = vunpack.i.h.bf16 %v10073_v57  ;;  %v7854_v41 = vunpack.i.h.bf16 %v10067_v52  ;;  %v7126_v13 = vpack.c.bf16 %v376_v8, %v323_v51 }
 0x1f5   : > { %7123 = vmatprep.subr.bf16.mxu1 %v7122_v18  ;;  %v378_v6 = vsel %vm370_vm0, %v7804_v62, %v7808_v9  ;;  %v7180_v30 = vpack.c.bf16 %v377_v49, %v324_v60  ;;  %v14005_v57 = vunpack.i.h.bf16 %v10047_v36  ;;  %v7908_v49 = vunpack.i.l.bf16 %v10150_v11 }
 0x1f6   : > { %7125 = vmatpush1.bf16.msra.mxu1 %v7124_v21  ;;  %v1882_v19 = vpop.permute.xlu1 %1881  ;;  %v7128_v21 = vpack.c.bf16 %v375_v27, %v322_v34  ;;  %v498_v2 = vsel %vm492_vm2, %v14004_v15, %v7853_v23  ;;  %v325_v15 = vld [vmem:[%s9856_s20 + $0x38] sm:$0xff]  ;;  %v14006_v27 = vunpack.i.h.bf16 %v10129_v47  ;;  %v7953_v51 = vunpack.i.l.bf16 %v10226_v55  ;;  %s9620_s20 = smov 109  }
 0x1f7   : > { %v1880_v10 = vpop.permute.xlu0 %1879  ;;  %v437_v34 = vsel %vm431_vm1, %v14005_v57, %v7828_v3  ;;  %v7879_v47 = vunpack.i.h.bf16 %v10111_v25  ;;  %v7904_v60 = vunpack.i.h.bf16 %v10123_v42 }
 0x1f8   : > { %v1897_v50 = vsel %vm13754_vm11, %v1880_v10, %v1882_v19  ;;  %v1896_v18 = vsel %vm13754_vm11, %v1878_v35, %v1880_v10  ;;  %v7829_v35 = vunpack.i.h.bf16 %v10055_v39  ;;  %v7878_v10 = vunpack.i.l.bf16 %v10111_v25 }
 0x1f9   : > { %2200 = vmatprep.subr.mxu0 %v1897_v50  ;;  %v7130_v62 = vpack.c.bf16 %v498_v2, %v437_v34  ;;  %v620_v9 = vsel %vm614_vm4, %v14006_v27, %v7903_v17  ;;  %v500_v39 = vsel %vm492_vm2, %v7854_v41, %v7858_v26  ;;  %v7178_v26 = vpack.c.bf16 %v378_v6, %v325_v15 }
 0x1fa   : > { %2201 = vmatpush1.msra.mxu0 %v1896_v18  ;;  %v10814_v33 = vpop.permute.xlu1 %1885  ;;  %v499_v50 = vsel %vm492_vm2, %v7853_v23, %v7854_v41  ;;  %v7928_v18 = vunpack.i.l.bf16 %v10192_v28  ;;  %v439_v2 = vsel %vm431_vm1, %v7829_v35, %v7833_v7  ;;  %v438_v57 = vsel %vm431_vm1, %v7828_v3, %v7829_v35 }
 0x1fb   : > { %v1884_v52 = vpop.permute.xlu0 %1883  ;;  %2213 = vmatmul.mubr.f32.vlgmr.msra.gmra.mrb[0].mxu0 %v10804_v31  ;;  %7127 = vmatprep.subr.bf16.mxu0 %v7126_v13  ;;  %v7883_v13 = vunpack.i.l.bf16 %v10109_v24  ;;  %v7182_v42 = vpack.c.bf16 %v500_v39, %v439_v2  ;;  %v7958_v6 = vunpack.i.l.bf16 %v10260_v59  ;;  %v8003_v23 = vunpack.i.l.bf16 %v10288_v16 }
 0x1fc   : > { %7129 = vmatpush1.bf16.msra.mxu0 %v7128_v21  ;;  %v1899_v36 = vsel %vm13754_vm11, %v1884_v52, %v10814_v33  ;;  %v1898_v8 = vsel %vm13754_vm11, %v1882_v19, %v1884_v52  ;;  %7010 = vmatprep.mubr.msk.f32.mxu0 %vm2144_vm13, %v10425_v44  ;;  %v14007_v21 = vunpack.i.h.bf16 %v10103_v20  ;;  %v14008_v41 = vpack.c.bf16 %v10085_v63, %v10092_v12 }
 0x1fd   : > { %2271 = vmatprep.subr.mxu1 %v1899_v36  ;;  %7131 = vmatprep.subr.bf16.mxu0 %v7130_v62  ;;  %v14009_v20 = vunpack.i.h.bf16 %v10235_v1  ;;  %v622_v3 = vsel %vm614_vm4, %v7904_v60, %v7908_v49  ;;  %v621_v35 = vsel %vm614_vm4, %v7903_v17, %v7904_v60  ;;  %v7933_v34 = vunpack.i.l.bf16 %v10184_v22  ;;  %v14013_v36 = vld [vmem:[#allocation23_spill] sm:$0xff] }
 0x1fe   : > { %2272 = vmatpush1.msra.mxu1 %v1898_v8  ;;  %v559_v19 = vsel %vm553_vm3, %v14007_v21, %v7878_v10  ;;  %v7184_v15 = vpack.c.bf16 %v499_v50, %v438_v57  ;;  %v561_v52 = vsel %vm553_vm3, %v7879_v47, %v7883_v13  ;;  %v7929_v62 = vunpack.i.h.bf16 %v10192_v28  ;;  %v14011_v28 = vld [vmem:[#allocation18_spill] sm:$0xff] }
 0x1ff   : > { %2284 = vmatmul.mubr.f32.vlgmr.msra.gmra.mrb[0].mxu1 %v10804_v31  ;;  %7179 = vmatprep.subr.bf16.mxu1 %v7178_v26  ;;  %v7134_v25 = vpack.c.bf16 %v620_v9, %v559_v19  ;;  %v742_v7 = vsel %vm13761_vm6, %v14009_v20, %v7953_v51  ;;  %v7954_v63 = vunpack.i.h.bf16 %v10226_v55  ;;  %v7978_v12 = vunpack.i.l.bf16 %v10276_v53  ;;  %v14017_v19 = vld [vmem:[#allocation21_spill] sm:$0xff] }
 0x200   : > { %7133 = vmatpush1.bf16.msra.mxu0 %v14008_v41  ;;  %7181 = vmatpush1.bf16.msra.mxu1 %v7180_v30  ;;  %v14010_v1 = vunpack.i.h.bf16 %v10164_v14  ;;  %v560_v17 = vsel %vm553_vm3, %v7878_v10, %v7879_v47  ;;  %v7186_v9 = vpack.c.bf16 %v622_v3, %v561_v52  ;;  %v8008_v39 = vunpack.i.l.bf16 %v10315_v5  ;;  %v14021_v3 = vld [vmem:[#allocation20_spill] sm:$0xff] }
 0x201   : > { %7135 = vmatprep.subr.bf16.mxu0 %v7134_v25  ;;  %7183 = vmatprep.subr.bf16.mxu1 %v7182_v42  ;;  %v8053_v49 = vunpack.i.l.bf16 %v10344_v4  ;;  %v14012_v55 = vpack.c.bf16 %v10141_v54, %v14011_v28  ;;  %v14014_v14 = vunpack.i.h.bf16 %v14013_v36  ;;  %v744_v13 = vsel %vm13761_vm6, %v7954_v63, %v7958_v6  ;;  %v14016_v54 = vld [vmem:[#allocation28_spill] sm:$0xff] }
 0x202   : > { %v681_v30 = vsel %vm675_vm5, %v14010_v1, %v7928_v18  ;;  %7011 = vmatprep.mubr.msk.f32.mxu1 %vm2144_vm13, %v10425_v44  ;;  %v14015_v44 = vld [vmem:[#allocation22_spill] sm:$0xff]  ;;  %v7979_v10 = vunpack.i.h.bf16 %v10276_v53  ;;  %v8004_v47 = vunpack.i.h.bf16 %v10288_v16  ;;  %v7188_v26 = vpack.c.bf16 %v621_v35, %v560_v17  ;;  %v14019_v53 = vld [vmem:[#allocation32_spill] sm:$0xff] }
 0x203   : > { %v7138_v27 = vpack.c.bf16 %v742_v7, %v681_v30  ;;  %v864_v8 = vsel %vm13695_vm8, %v14014_v14, %v8003_v23  ;;  %v7983_v60 = vunpack.i.l.bf16 %v14015_v44  ;;  %v743_v50 = vsel %vm13761_vm6, %v7953_v51, %v7954_v63  ;;  %v14020_v7 = vld [vmem:[#allocation19_spill] sm:$0xff]  ;;  %v14023_v51 = vld [vmem:[#allocation29_spill] sm:$0xff] }
 0x204   : > { %7137 = vmatpush1.bf16.msra.mxu0 %v14012_v55  ;;  %7185 = vmatpush1.bf16.msra.mxu1 %v7184_v15  ;;  %v8028_v21 = vunpack.i.l.bf16 %v14016_v54  ;;  %v14018_v2 = vunpack.i.h.bf16 %v14017_v19  ;;  %v683_v25 = vsel %vm675_vm5, %v7929_v62, %v7933_v34  ;;  %v682_v42 = vsel %vm675_vm5, %v7928_v18, %v7929_v62  ;;  %v14025_v18 = vld [vmem:[#allocation27_spill] sm:$0xff]  ;;  %v14027_v55 = vld [vmem:[#allocation26_spill] sm:$0xff] }
 0x205   : > { %7139 = vmatprep.subr.bf16.mxu0 %v7138_v27  ;;  %7187 = vmatprep.subr.bf16.mxu1 %v7186_v9  ;;  %v7190_v41 = vpack.c.bf16 %v744_v13, %v683_v25  ;;  %v8058_v20 = vunpack.i.l.bf16 %v14019_v53  ;;  %v8103_v16 = vunpack.i.l.bf16 %v10400_v61  ;;  %v14022_v35 = vpack.c.bf16 %v14020_v7, %v14021_v3  ;;  %v14026_v9 = vld [vmem:[#allocation34_spill] sm:$0xff] }
 0x206   : > { %v803_v57 = vsel %vm13762_vm7, %v14018_v2, %v7978_v12  ;;  %v14024_v15 = vunpack.i.h.bf16 %v14023_v51  ;;  %v866_v63 = vsel %vm13695_vm8, %v8004_v47, %v8008_v39  ;;  %v865_v34 = vsel %vm13695_vm8, %v8003_v23, %v8004_v47  ;;  %v14033_v2 = vld [vmem:[#allocation33_spill] sm:$0xff] }
 0x207   : > { %v7142_v6 = vpack.c.bf16 %v864_v8, %v803_v57  ;;  %v8033_v62 = vunpack.i.l.bf16 %v14025_v18  ;;  %v7192_v1 = vpack.c.bf16 %v743_v50, %v682_v42  ;;  %v805_v30 = vsel %vm13762_vm7, %v7979_v10, %v7983_v60  ;;  %v14030_v60 = vld [vmem:[#allocation25_spill] sm:$0xff] }
 0x208   : > { %7141 = vmatpush1.bf16.msra.mxu0 %v14022_v35  ;;  %7189 = vmatpush1.bf16.msra.mxu1 %v7188_v26  ;;  %v986_v52 = vsel %vm13692_vm10, %v14024_v15, %v8053_v49  ;;  %v8029_v17 = vunpack.i.h.bf16 %v14016_v54  ;;  %v8054_v27 = vunpack.i.h.bf16 %v10344_v4  ;;  %v8078_v28 = vunpack.i.l.bf16 %v14026_v9  ;;  %v14029_v26 = vld [vmem:[#allocation24_spill] sm:$0xff]  ;;  %v14036_v15 = vld [vmem:[#allocation30_spill] sm:$0xff] }
 0x209   : > { %7143 = vmatprep.subr.bf16.mxu0 %v7142_v6  ;;  %7191 = vmatprep.subr.bf16.mxu1 %v7190_v41  ;;  %v14028_v36 = vunpack.i.h.bf16 %v14027_v55  ;;  %v804_v39 = vsel %vm13762_vm7, %v7978_v12, %v7979_v10  ;;  %v7194_v8 = vpack.c.bf16 %v866_v63, %v805_v30  ;;  %v8108_v13 = vunpack.i.l.bf16 %v10432_v48 }
 0x20a   : > { %v8153_v47 = vunpack.i.l.bf16 %v10465_v43  ;;  %v14031_v50 = vpack.c.bf16 %v14029_v26, %v14030_v60  ;;  %v14032_v4 = vunpack.i.h.bf16 %v10406_v37  ;;  %v988_v19 = vsel %vm13692_vm10, %v8054_v27, %v8058_v20  ;;  %v14047_v26 = vld [vmem:[#allocation53_spill] sm:$0xff] }
 0x20b   : > { %v925_v14 = vsel %vm13693_vm9, %v14028_v36, %v8028_v21  ;;  %v8083_v57 = vunpack.i.l.bf16 %v14033_v2  ;;  %v8079_v12 = vunpack.i.h.bf16 %v14026_v9  ;;  %v8104_v10 = vunpack.i.h.bf16 %v10400_v61  ;;  %v14041_v9 = vld [vmem:[#allocation45_spill] sm:$0xff] }
 0x20c   : > { %v7146_v23 = vpack.c.bf16 %v986_v52, %v925_v14  ;;  %7145 = vmatpush1.bf16.msra.mxu0 %v14031_v50  ;;  %7193 = vmatpush1.bf16.msra.mxu1 %v7192_v1  ;;  %v1108_v54 = vsel %vm13694_vm12, %v14032_v4, %v8103_v16  ;;  %v7196_v25 = vpack.c.bf16 %v865_v34, %v804_v39  ;;  %v8128_v6 = vunpack.i.l.bf16 %v10453_v58  ;;  %v14037_v52 = vld [vmem:[#allocation31_spill] sm:$0xff]  ;;  %v14049_v4 = vld [vmem:[#allocation36_spill] sm:$0xff] }
 0x20d   : > { %7195 = vmatprep.subr.bf16.mxu1 %v7194_v8  ;;  %v987_v42 = vsel %vm13692_vm10, %v8053_v49, %v8054_v27  ;;  %v14034_v41 = vunpack.i.h.bf16 %v10380_v56  ;;  %vm14035_vm13 = vcmask 146432   ;;  %v927_v7 = vsel %vm13693_vm9, %v8029_v17, %v8033_v62  ;;  %v14046_v8 = vld [vmem:[#allocation49_spill] sm:$0xff]  ;;  %v14048_v50 = vld [vmem:[#allocation35_spill] sm:$0xff] }
 0x20e   : > { %7147 = vmatprep.subr.bf16.mxu0 %v7146_v23  ;;  %v926_v20 = vsel %vm13693_vm9, %v8028_v21, %v8029_v17  ;;  %v7198_v35 = vpack.c.bf16 %v988_v19, %v927_v7  ;;  %v8158_v51 = vunpack.i.l.bf16 %v10495_v0  ;;  %v8203_v61 = vunpack.i.l.bf16 %v10541_v32  ;;  %vm14045_vm9 = vmmov %vm14035_vm13 }
 0x20f   : > { %v1047_v37 = vsel %vm14035_vm13, %v14034_v41, %v8078_v28  ;;  %v14038_v63 = vpack.c.bf16 %v14036_v15, %v14037_v52  ;;  %v14039_v49 = vunpack.i.h.bf16 %v10471_v40  ;;  %vm14040_vm10 = vcmask 64512   ;;  %v14042_v40 = vld [vmem:[#allocation38_spill] sm:$0xff] }
 0x210   : > { %v7150_v3 = vpack.c.bf16 %v1108_v54, %v1047_v37  ;;  %7197 = vmatpush1.bf16.msra.mxu1 %v7196_v25  ;;  %v1110_v34 = vsel %vm13694_vm12, %v8104_v10, %v8108_v13  ;;  %v1109_v62 = vsel %vm13694_vm12, %v8103_v16, %v8104_v10  ;;  %v8133_v21 = vunpack.i.l.bf16 %v10451_v29  ;;  %v14055_v10 = vld [vmem:[#allocation44_spill] sm:$0xff] }
 0x211   : > { %7149 = vmatpush1.bf16.msra.mxu0 %v14038_v63  ;;  %v1230_v56 = vsel %vm14040_vm10, %v14039_v49, %v8153_v47  ;;  %7199 = vmatprep.subr.bf16.mxu1 %v7198_v35  ;;  %v7200_v1 = vpack.c.bf16 %v987_v42, %v926_v20  ;;  %v1049_v30 = vsel %vm14035_vm13, %v8079_v12, %v8083_v57  ;;  %v8129_v17 = vunpack.i.h.bf16 %v10453_v58  ;;  %v14051_v58 = vld [vmem:[#allocation46_spill] sm:$0xff]  ;;  %v14057_v37 = vld [vmem:[#allocation52_spill] sm:$0xff]  ;;  %v14058_v20 = vld [vmem:[#allocation43_spill] sm:$0xff] }
 0x212   : > { %7151 = vmatprep.subr.bf16.mxu0 %v7150_v3  ;;  %v8154_v27 = vunpack.i.h.bf16 %v10465_v43  ;;  %v8178_v55 = vunpack.i.l.bf16 %v14041_v9  ;;  %v14043_v36 = vunpack.i.h.bf16 %v14042_v40  ;;  %vm14044_vm10 = vcmask 130048   ;;  %v14063_v49 = vld [vmem:[#allocation57_spill] sm:$0xff]  ;;  %v14164_v29 = vld [vmem:[#allocation16_spill] sm:$0xff] }
 0x213   : > { %v1048_v39 = vsel %vm14045_vm9, %v8078_v28, %v8079_v12  ;;  %v7202_v23 = vpack.c.bf16 %v1110_v34, %v1049_v30  ;;  %v8208_v13 = vunpack.i.l.bf16 %v14046_v8  ;;  %v8253_v60 = vunpack.i.l.bf16 %v14047_v26  ;;  %v14064_v34 = vld [vmem:[#allocation40_spill] sm:$0xff]  ;;  %v3908_v8 = vld [vmem:[%s9863_s12] sm:$0xff] }
 0x214   : > { %v1169_v14 = vsel %vm14044_vm10, %v14043_v36, %v8128_v6  ;;  %v14050_v54 = vpack.c.bf16 %v14048_v50, %v14049_v4  ;;  %7201 = vmatpush1.bf16.msra.mxu1 %v7200_v1  ;;  %v14052_v43 = vunpack.i.h.bf16 %v14051_v58  ;;  %vm14053_vm13 = vcmask 48128   ;;  %v14075_v50 = vld [vmem:[#allocation50_spill] sm:$0xff] }
 0x215   : > { %v7154_v16 = vpack.c.bf16 %v1230_v56, %v1169_v14  ;;  %vm14054_vm12 = vcmask 64512   ;;  %v8183_v25 = vunpack.i.l.bf16 %v14055_v10  ;;  %v8179_v28 = vunpack.i.h.bf16 %v14041_v9  ;;  %7203 = vmatprep.subr.bf16.mxu1 %v7202_v23 }
 0x216   : > { %7153 = vmatpush1.bf16.msra.mxu0 %v14050_v54  ;;  %v1352_v19 = vsel %vm14053_vm13, %v14052_v43, %v8203_v61  ;;  %v1232_v57 = vsel %vm14054_vm12, %v8154_v27, %v8158_v51  ;;  %v8204_v12 = vunpack.i.h.bf16 %v10541_v32  ;;  %v7204_v42 = vpack.c.bf16 %v1109_v62, %v1048_v39  ;;  %vm14056_vm9 = vmmov %vm14054_vm12  ;;  %v14065_v62 = vld [vmem:[#allocation41_spill] sm:$0xff] }
 0x217   : > { %7155 = vmatprep.subr.bf16.mxu0 %v7154_v16  ;;  %v1231_v41 = vsel %vm14056_vm9, %v8153_v47, %v8154_v27  ;;  %v8228_v7 = vunpack.i.l.bf16 %v14057_v37  ;;  %v14059_v3 = vunpack.i.h.bf16 %v14058_v20  ;;  %vm14060_vm10 = vcmask 56320   ;;  %v14067_v47 = vld [vmem:[#allocation54_spill] sm:$0xff]  ;;  %v14074_v16 = vld [vmem:[#allocation60_spill] sm:$0xff] }
 0x218   : > { %vm14061_vm13 = vcmask 130048   ;;  %v8258_v56 = vunpack.i.l.bf16 %v14063_v49  ;;  %v8298_v32 = vunpack.i.l.bf16 %v10657_v45  ;;  %v14066_v1 = vpack.c.bf16 %v14064_v34, %v14065_v62  ;;  %7205 = vmatpush1.bf16.msra.mxu1 %v7204_v42 }
 0x219   : > { %v1291_v35 = vsel %vm14060_vm10, %v14059_v3, %v8178_v55  ;;  %v1171_v15 = vsel %vm14061_vm13, %v8129_v17, %v8133_v21  ;;  %vm14062_vm12 = vmmov %vm14061_vm13  ;;  %v14068_v30 = vunpack.i.h.bf16 %v14067_v47  ;;  %vm14069_vm9 = vcmask 449536   ;;  %v14087_v3 = vld [vmem:[#allocation67_spill] sm:$0xff]  ;;  %v14095_v47 = vld [vmem:[#allocation77_spill] sm:$0xff] }
 0x21a   : > { %v1170_v51 = vsel %vm14062_vm12, %v8128_v6, %v8129_v17  ;;  %v7158_v52 = vpack.c.bf16 %v1352_v19, %v1291_v35  ;;  %v7206_v63 = vpack.c.bf16 %v1232_v57, %v1171_v15  ;;  %7157 = vmatpush1.bf16.msra.mxu0 %v14066_v1  ;;  %vm14070_vm10 = vcmask 48128   ;;  %v14072_v6 = vld [vmem:[#allocation51_spill] sm:$0xff]  ;;  %v14080_v57 = vld [vmem:[#allocation48_spill] sm:$0xff]  ;;  %v14088_v15 = vld [vmem:[#allocation58_spill] sm:$0xff] }
 0x21b   : > { %v1474_v27 = vsel %vm14069_vm9, %v14068_v30, %v8253_v60  ;;  %v1354_v9 = vsel %vm14070_vm10, %v8204_v12, %v8208_v13  ;;  %vm14071_vm13 = vmmov %vm14070_vm10  ;;  %v8233_v17 = vunpack.i.l.bf16 %v14072_v6  ;;  %v7208_v40 = vpack.c.bf16 %v1231_v41, %v1170_v51  ;;  %v14079_v19 = vld [vmem:[#allocation47_spill] sm:$0xff]  ;;  %v14093_v1 = vld [vmem:[#allocation64_spill] sm:$0xff] }
 0x21c   : > { %v1353_v21 = vsel %vm14071_vm13, %v8203_v61, %v8204_v12  ;;  %7159 = vmatprep.subr.bf16.mxu0 %v7158_v52  ;;  %7207 = vmatprep.subr.bf16.mxu1 %v7206_v63  ;;  %vm14073_vm12 = vcmask 56320   ;;  %v8229_v14 = vunpack.i.h.bf16 %v14057_v37  ;;  %v8254_v39 = vunpack.i.h.bf16 %v14047_v26 }
 0x21d   : > { %v1293_v36 = vsel %vm14073_vm12, %v8179_v28, %v8183_v25  ;;  %v8278_v23 = vunpack.i.l.bf16 %v14074_v16  ;;  %v14076_v4 = vunpack.i.h.bf16 %v14075_v50  ;;  %vm14077_vm9 = vcmask 457728   ;;  %vm14078_vm10 = vmmov %vm14073_vm12  ;;  %7209 = vmatpush1.bf16.msra.mxu1 %v7208_v40  ;;  %v14082_v25 = vld [vmem:[#allocation61_spill] sm:$0xff] }
 0x21e   : > { %v7210_v58 = vpack.c.bf16 %v1354_v9, %v1293_v36  ;;  %v1292_v61 = vsel %vm14078_vm10, %v8178_v55, %v8179_v28  ;;  %v8338_v43 = vunpack.i.l.bf16 %v10711_v46  ;;  %v14081_v12 = vpack.c.bf16 %v14079_v19, %v14080_v57  ;;  %v14100_v36 = vld [vmem:[#allocation68_spill] sm:$0xff] }
 0x21f   : > { %v1413_v54 = vsel %vm14077_vm9, %v14076_v4, %v8228_v7  ;;  %v14083_v42 = vunpack.i.h.bf16 %v14082_v25  ;;  %vm14084_vm13 = vcmask 375808   ;;  %vm14085_vm12 = vcmask 449536  }
 0x220   : > { %v7162_v13 = vpack.c.bf16 %v1474_v27, %v1413_v54  ;;  %7161 = vmatpush1.bf16.msra.mxu0 %v14081_v12  ;;  %v1476_v41 = vsel %vm14085_vm12, %v8254_v39, %v8258_v56  ;;  %v8279_v37 = vunpack.i.h.bf16 %v14074_v16  ;;  %v8299_v20 = vunpack.i.h.bf16 %v10657_v45  ;;  %7211 = vmatprep.subr.bf16.mxu1 %v7210_v58  ;;  %vm14086_vm9 = vmmov %vm14085_vm12  ;;  %v14096_v27 = vld [vmem:[#allocation78_spill] sm:$0xff] }
 0x221   : > { %v1596_v26 = vsel %vm14084_vm13, %v14083_v42, %v8298_v32  ;;  %v7212_v55 = vpack.c.bf16 %v1353_v21, %v1292_v61  ;;  %v1475_v28 = vsel %vm14086_vm9, %v8253_v60, %v8254_v39  ;;  %v8318_v35 = vunpack.i.l.bf16 %v14087_v3  ;;  %v14097_v60 = vld [vmem:[#allocation55_spill] sm:$0xff]  ;;  %v14098_v21 = vld [vmem:[#allocation56_spill] sm:$0xff]  ;;  %v14106_v61 = vld [vmem:[#allocation65_spill] sm:$0xff] }
 0x222   : > { %7163 = vmatprep.subr.bf16.mxu0 %v7162_v13  ;;  %v14089_v51 = vunpack.i.h.bf16 %v14088_v15  ;;  %vm14090_vm10 = vcmask 441344   ;;  %vm14091_vm8 = vcmask 457728   ;;  %vm14094_vm12 = vcmask 375808   ;;  %v14105_v13 = vld [vmem:[#allocation76_spill] sm:$0xff]  ;;  %v14110_v42 = vld [vmem:[#allocation71_spill] sm:$0xff] }
 0x223   : > { %v1415_v63 = vsel %vm14091_vm8, %v8229_v14, %v8233_v17  ;;  %vm14092_vm13 = vmmov %vm14091_vm8  ;;  %v1598_v45 = vsel %vm14094_vm12, %v8299_v20, %v14093_v1  ;;  %v8378_v30 = vunpack.i.l.bf16 %v14095_v47  ;;  %v8374_v9 = vunpack.i.h.bf16 %v14096_v27  ;;  %7213 = vmatpush1.bf16.msra.mxu1 %v7212_v55  ;;  %v14112_v55 = vld [vmem:[#allocation62_spill] sm:$0xff] }
 0x224   : > { %v1535_v52 = vsel %vm14090_vm10, %v14089_v51, %v8278_v23  ;;  %v1414_v34 = vsel %vm14092_vm13, %v8228_v7, %v8229_v14  ;;  %v7214_v62 = vpack.c.bf16 %v1476_v41, %v1415_v63  ;;  %v14099_v40 = vpack.c.bf16 %v14097_v60, %v14098_v21  ;;  %vm14103_vm8 = vmmov %vm14094_vm12  ;;  %v14104_v14 = vld [vmem:[#allocation59_spill] sm:$0xff]  ;;  %v14111_v41 = vld [vmem:[#allocation72_spill] sm:$0xff]  ;;  %v1888_v60 = vpop.permute.xlu0 %1887 }
 0x225   : > { %v7166_v56 = vpack.c.bf16 %v1596_v26, %v1535_v52  ;;  %v14101_v39 = vunpack.i.h.bf16 %v14100_v36  ;;  %vm14102_vm9 = vcmask 359424   ;;  %v1597_v7 = vsel %vm14103_vm8, %v8298_v32, %v8299_v20  ;;  %vm14109_vm12 = vmmov %vm14090_vm10  ;;  %v14115_v51 = vld [vmem:[#allocation66_spill] sm:$0xff] }
 0x226   : > { %7165 = vmatpush1.bf16.msra.mxu0 %v14099_v40  ;;  %v1537_v16 = vsel %vm14090_vm10, %v8279_v37, %v14104_v14  ;;  %7215 = vmatprep.subr.bf16.mxu1 %v7214_v62  ;;  %v7216_v50 = vpack.c.bf16 %v1475_v28, %v1414_v34  ;;  %v8319_v4 = vunpack.i.h.bf16 %v14087_v3  ;;  %v8339_v54 = vunpack.i.h.bf16 %v10711_v46  ;;  %v14113_v28 = vld [vmem:[#allocation63_spill] sm:$0xff]  ;;  %vm14117_vm10 = vmmov %vm14102_vm9 }
 0x227   : > { %v1718_v17 = vsel %vm14102_vm9, %v14101_v39, %v8338_v43  ;;  %7167 = vmatprep.subr.bf16.mxu0 %v7166_v56  ;;  %v8358_v58 = vunpack.i.l.bf16 %v14105_v13  ;;  %v14107_v19 = vunpack.i.h.bf16 %v14106_v61  ;;  %vm14108_vm13 = vcmask 367616   ;;  %v14119_v40 = vld [vmem:[#allocation79_spill] sm:$0xff]  ;;  %v14120_v39 = vld [vmem:[#allocation69_spill] sm:$0xff] }
 0x228   : > { %v7218_v12 = vpack.c.bf16 %v1598_v45, %v1537_v16  ;;  %v1536_v32 = vsel %vm14109_vm12, %v8278_v23, %v8279_v37  ;;  %v1720_v26 = vsel %vm14102_vm9, %v8339_v54, %v14110_v42  ;;  %v8354_v20 = vunpack.i.h.bf16 %v14111_v41  ;;  %7217 = vmatpush1.bf16.msra.mxu1 %v7216_v50  ;;  %vm14116_vm8 = vmmov %vm14108_vm13  ;;  %v1890_v45 = vpop.permute.xlu1 %1889 }
 0x229   : > { %v1657_v57 = vsel %vm14108_vm13, %v14107_v19, %v8318_v35  ;;  %v14114_v3 = vpack.c.bf16 %v14112_v55, %v14113_v28  ;;  %v1840_v46 = vsel %vm13757_vm15, %v8374_v9, %v8378_v30  ;;  %v7220_v15 = vpack.c.bf16 %v1597_v7, %v1536_v32  ;;  %vm14123_vm13 = vmmov %vm14116_vm8  ;;  %v1892_v19 = vpop.permute.xlu0 %1891  ;;  %v3674_v32 = vld [vmem:[%s9863_s12 + $0x40] sm:$0xff] }
 0x22a   : > { %v7170_v25 = vpack.c.bf16 %v1718_v17, %v1657_v57  ;;  %7219 = vmatprep.subr.bf16.mxu1 %v7218_v12  ;;  %v1659_v52 = vsel %vm14116_vm8, %v8319_v4, %v14115_v51  ;;  %v8359_v23 = vunpack.i.h.bf16 %v14105_v13  ;;  %v8379_v37 = vunpack.i.h.bf16 %v14095_v47  ;;  %v14121_v17 = vld [vmem:[#allocation70_spill] sm:$0xff] }
 0x22b   : > { %7169 = vmatpush1.bf16.msra.mxu0 %v14114_v3  ;;  %v1779_v63 = vsel %vm13760_vm14, %v8354_v20, %v8358_v58  ;;  %v1719_v34 = vsel %vm14117_vm10, %v8338_v43, %v8339_v54  ;;  %v7222_v56 = vpack.c.bf16 %v1720_v26, %v1659_v52  ;;  %v14118_v62 = vunpack.i.l.bf16 %v14096_v27  ;;  %v14125_v27 = vld [vmem:[#allocation74_spill] sm:$0xff] }
 0x22c   : > { %7171 = vmatprep.subr.bf16.mxu0 %v7170_v25  ;;  %v7174_v21 = vpack.c.bf16 %v1840_v46, %v1779_v63  ;;  %v1842_v36 = vsel %vm13757_vm15, %v8379_v37, %v14119_v40  ;;  %v14122_v7 = vpack.c.bf16 %v14120_v39, %v14121_v17  ;;  %7221 = vmatpush1.bf16.msra.mxu1 %v7220_v15  ;;  %v14124_v43 = vunpack.i.l.bf16 %v14111_v41 }
 0x22d   : > { %v1839_v1 = vsel %vm13757_vm15, %v14118_v62, %v8374_v9  ;;  %v1658_v47 = vsel %vm14123_vm13, %v8318_v35, %v8319_v4  ;;  %7223 = vmatprep.subr.bf16.mxu1 %v7222_v56  ;;  %v1781_v9 = vsel %vm13760_vm14, %v8359_v23, %v14125_v27  ;;  %v1901_v54 = vsel %vm13754_vm11, %v1888_v60, %v1890_v45  ;;  %v1894_v4 = vpop.permute.xlu1 %1893  ;;  %v11062_v55 = vpop.permute.xlu0 %2141 }
 0x22e   : > { %v1778_v14 = vsel %vm13760_vm14, %v14124_v43, %v8354_v20  ;;  %v7224_v50 = vpack.c.bf16 %v1719_v34, %v1658_v47  ;;  %v1841_v13 = vsel %vm13757_vm15, %v8378_v30, %v8379_v37  ;;  %v7226_v61 = vpack.c.bf16 %v1842_v36, %v1781_v9  ;;  %v11060_v20 = vld [vmem:[#allocation10] sm:$0xff] }
 0x22f   : > { %7173 = vmatpush1.bf16.msra.mxu0 %v14122_v7  ;;  %v7176_v16 = vpack.c.bf16 %v1839_v1, %v1778_v14  ;;  %v1780_v35 = vsel %vm13760_vm14, %v8358_v58, %v8359_v23  ;;  %v1903_v12 = vsel %vm13754_vm11, %v1892_v19, %v1894_v4  ;;  %v1900_v25 = vsel %vm13754_vm11, %v10814_v33, %v1888_v60  ;;  %v3673_v58 = vld [vmem:[%s9863_s12 + $0x38] sm:$0xff] }
 0x230   : > { %7175 = vmatprep.subr.bf16.mxu0 %v7174_v21  ;;  %7225 = vmatpush1.bf16.msra.mxu1 %v7224_v50  ;;  %v7228_v57 = vpack.c.bf16 %v1841_v13, %v1780_v35  ;;  %v1902_v30 = vsel %vm13754_vm11, %v1890_v45, %v1892_v19  ;;  %v11053_v42 = vpack.i.bf16 %v3674_v32, %v3673_v58  ;;  %v2434_v26 = vlaneseq }
 0x231   : > { %7227 = vmatprep.subr.bf16.mxu1 %v7226_v61  ;;  %v11068_v15 = vpop.permute.xlu1 %8382  ;;  %v11070_v51 = vpop.permute.xlu0 %8387  ;;  %v13708_v63 = vmov 0.0   ;;  %v14163_v6 = vmov 0.0   ;;  %vm2552_vm12 = vcmask 908288   ;;  %vm13772_vm9 = vcmask 900096  }
 0x232   : > { %8577 = vrot.lane.b32.xlu1 %v11053_v42, %s13698_s17  ;;  %v11057_v41 = vshrl.u32 %v2434_v26, 7  ;;  %s9629_s17 = smov 11   ;;  %vm2794_vm8 = vcmask 891904   ;;  %vm2915_vm10 = vcmask 826368   ;;  %vm3036_vm13 = vcmask 818176  }
 0x233   : > { %7177 = vmatpush1.bf16.msra.mxu0 %v7176_v16  ;;  %vm13879_vm11 = vcmask 809984   ;;  %vm13834_vm15 = vcmask 744448   ;;  %vm13796_vm14 = vcmask 736256  }
 0x234   : > { %2342 = vmatprep.subr.mxu0 %v1901_v54  ;;  %7229 = vmatpush1.bf16.msra.mxu1 %v7228_v57  ;;  %14126 = vst [vmem:[#allocation18_spill] sm:$0xff] %v11057_v41  ;;  %v13707_v33 = vsub.s32 0, %v11057_v41  ;;  %v13703_v1 = vsub.s32 2, %v11057_v41  ;;  %v13704_v45 = vsub.s32 1, %v11057_v41  ;;  %v13701_v19 = vsub.s32 3, %v11057_v41 }
 0x235   : > { %2413 = vmatprep.subr.mxu1 %v1903_v12  ;;  %v11082_v56 = vpop.permute.xlu1 %8392  ;;  %v11084_v62 = vpop.permute.xlu0 %8397  ;;  %v13700_v57 = vsub.s32 4, %v11057_v41  ;;  %v13702_v12 = vsub.s32 5, %v11057_v41 }
 0x236   : > { %14127 = vst [vmem:[#allocation23_spill] sm:$0xff] %v11082_v56  ;;  %14128 = vst [vmem:[#allocation22_spill] sm:$0xff] %v11084_v62  ;;  %v2445_v21 = vrot.slane %v11060_v20, %v13703_v1  ;;  %v2441_v17 = vrot.slane %v11060_v20, %v13704_v45  ;;  %v2449_v32 = vrot.slane %v11060_v20, %v13701_v19  ;;  %v14161_v62 = vld [vmem:[#allocation75_spill] sm:$0xff] }
 0x237   : > { %2343 = vmatpush1.msra.mxu0 %v1900_v25  ;;  %v2453_v26 = vrot.slane %v11060_v20, %v13700_v57 }
 0x238   : > { %2355 = vmatmul.mubr.f32.vlgmr.msra.gmra.mrb[2].mxu0 %v10804_v31  ;;  %2414 = vmatpush1.msra.mxu1 %v1902_v30 }
 0x239   : > { %2426 = vmatmul.mubr.f32.vlgmr.msra.gmra.mrb[2].mxu1 %v10804_v31  ;;  %v2437_v31 = vrot.slane %v11060_v20, %v13707_v33  ;;  %v11096_v40 = vpop.permute.xlu1 %8407  ;;  %v11098_v36 = vpop.permute.xlu0 %8402 }
 0x23d   : > { %v11116_v43 = vpop.permute.xlu1 %8417  ;;  %v11118_v14 = vpop.permute.xlu0 %8412 }
 0x23e   : > { %14131 = vst [vmem:[#allocation19_spill] sm:$0xff] %v11116_v43  ;;  %14132 = vst [vmem:[#allocation20_spill] sm:$0xff] %v11118_v14  ;;  %v14162_v43 = vld [vmem:[#allocation73_spill] sm:$0xff] }
 0x241   : > { %v11128_v9 = vpop.permute.xlu1 %8422  ;;  %v11130_v16 = vpop.permute.xlu0 %8427 }
 0x245   : > { %v11140_v50 = vpop.permute.xlu1 %8432  ;;  %v11142_v54 = vpop.permute.xlu0 %8437 }
 0x246   : > { %14133 = vst [vmem:[#allocation29_spill] sm:$0xff] %v11140_v50  ;;  %14134 = vst [vmem:[#allocation34_spill] sm:$0xff] %v11142_v54 }
 0x249   : > { %v11148_v13 = vpop.permute.xlu1 %8447  ;;  %v11150_v61 = vpop.permute.xlu0 %8442 }
 0x24d   : > { %v11158_v35 = vpop.permute.xlu1 %8457  ;;  %v11160_v4 = vpop.permute.xlu0 %8452 }
 0x24e   : > { %14135 = vst [vmem:[#allocation26_spill] sm:$0xff] %v11158_v35  ;;  %14136 = vst [vmem:[#allocation24_spill] sm:$0xff] %v11160_v4  ;;  %v11320_v4 = vld [vmem:[%s9863_s12 + $0x8] sm:$0xff]  ;;  %v11323_v35 = vld [vmem:[%s9863_s12 + $0x10] sm:$0xff] }
 0x24f   : > { %14159 = vst [vmem:[#allocation77_spill] sm:$0xff] %v11320_v4 }
 0x251   : > { %v11167_v25 = vpop.permute.xlu1 %8462  ;;  %v11169_v30 = vpop.permute.xlu0 %8467 }
 0x252   : > { %14137 = vst [vmem:[#allocation25_spill] sm:$0xff] %v11169_v30 }
 0x2ce   : > { %v2214_v28 = vpop.f32.mrb[0].mxu0 }
 0x2cf   : > { %v2215_v3 = vadd.f32 %v2214_v28, %v11062_v55  ;;  %v2216_v46 = vpop.f32.mrb[1].mxu0 }
 0x2d0   : > { %v2217_v39 = vadd.f32 %v2216_v46, %v11062_v55  ;;  %v13705_v46 = vsub.s32 7, %v11057_v41 }
 0x2d1   : > { %v11072_v52 = vmul.f32 %v2437_v31, %v2215_v3  ;;  %v13706_v31 = vsub.s32 6, %v11057_v41  ;;  %v2457_v3 = vrot.slane %v11060_v20, %v13702_v12 }
 0x2d2   : > { %v2285_v23 = vpop.f32.mrb[0].mxu1  ;;  %v11110_v47 = vmul.f32 %v2441_v17, %v2217_v39  ;;  %v11187_v39 = vpop.permute.xlu0 %8477 }
 0x2d3   : > { %v2287_v37 = vpop.f32.mrb[1].mxu1  ;;  %v11076_v34 = vpack.i.bf16 %v11072_v52, %v13708_v63  ;;  %v2286_v60 = vadd.f32 %v2285_v23, %v11062_v55  ;;  %14139 = vst [vmem:[#allocation31_spill] sm:$0xff] %v11187_v39  ;;  %v2461_v19 = vrot.slane %v11060_v20, %v13706_v31 }
 0x2d4   : > { %14130 = vst [vmem:[#allocation21_spill] sm:$0xff] %v11110_v47  ;;  %v2288_v58 = vadd.f32 %v2287_v37, %v11062_v55  ;;  %v8821_v49 = vpack.i.bf16 %v11110_v47, %v11072_v52 }
 0x2d5   : > { %8592 = vrot.lane.b32.xlu0 %v11076_v34, %s9620_s20  ;;  %8582 = vrot.lane.b32.xlu1 %v11076_v34, %s9621_s14  ;;  %v11108_v7 = vmul.f32 %v2445_v21, %v2286_v60  ;;  %v11185_v21 = vpop.permute.xlu1 %8472 }
 0x2d6   : > { %14138 = vst [vmem:[#allocation30_spill] sm:$0xff] %v11185_v21  ;;  %v11189_v17 = vmul.f32 %v2449_v32, %v2288_v58 }
 0x2d7   : > { %14129 = vst [vmem:[#allocation28_spill] sm:$0xff] %v11108_v7  ;;  %v11122_v27 = vpack.i.bf16 %v11108_v7, %v11110_v47  ;;  %v7809_v47 = vunpack.i.h.bf16 %v14164_v29 }
 0x2d9   : > { %8602 = vrot.lane.b32.xlu0 %v11076_v34, %s9622_s11  ;;  %8587 = vrot.lane.b32.xlu1 %v11076_v34, %s9623_s13 }
 0x2dd   : > { %8612 = vrot.lane.b32.xlu0 %v11076_v34, %s9624_s29  ;;  %8597 = vrot.lane.b32.xlu1 %v11076_v34, %s9625_s7 }
 0x2e1   : > { %8622 = vrot.lane.b32.xlu0 %v11076_v34, %s9626_s18  ;;  %8607 = vrot.lane.b32.xlu1 %v11076_v34, %s9627_s26 }
 0x2e5   : > { %8637 = vrot.lane.b32.xlu0 %v11122_v27, %s9623_s13  ;;  %8617 = vrot.lane.b32.xlu1 %v11076_v34, %s9628_s19 }
 0x2e9   : > { %8647 = vrot.lane.b32.xlu0 %v11122_v27, %s9625_s7  ;;  %8627 = vrot.lane.b32.xlu1 %v11076_v34, %s9629_s17 }
 0x2ed   : > { %8657 = vrot.lane.b32.xlu0 %v11122_v27, %s9627_s26  ;;  %8632 = vrot.lane.b32.xlu1 %v11122_v27, %s9621_s14 }
 0x2f1   : > { %8667 = vrot.lane.b32.xlu0 %v11122_v27, %s9628_s19  ;;  %8642 = vrot.lane.b32.xlu1 %v11122_v27, %s9620_s20 }
 0x2f5   : > { %8677 = vrot.lane.b32.xlu0 %v11122_v27, %s9629_s17  ;;  %8652 = vrot.lane.b32.xlu1 %v11122_v27, %s9622_s11 }
 0x2f9   : > { %8662 = vrot.lane.b32.xlu1 %v11122_v27, %s9624_s29 }
 0x2fd   : > { %8672 = vrot.lane.b32.xlu1 %v11122_v27, %s9626_s18 }
 0x30b   : > { %v2356_v28 = vpop.f32.mrb[2].mxu0 }
 0x30c   : > { %v2357_v23 = vadd.f32 %v2356_v28, %v11062_v55  ;;  %v2358_v37 = vpop.f32.mrb[3].mxu0  ;;  %v2427_v1 = vpop.f32.mrb[2].mxu1  ;;  %v2465_v28 = vrot.slane %v11060_v20, %v13705_v46 }
 0x30d   : > { %v2359_v60 = vadd.f32 %v2358_v37, %v11062_v55  ;;  %v2428_v37 = vadd.f32 %v2427_v1, %v11062_v55  ;;  %v2429_v45 = vpop.f32.mrb[3].mxu1  ;;  %v11215_v20 = vpop.permute.xlu1 %8487 }
 0x30e   : > { %v11191_v57 = vmul.f32 %v2453_v26, %v2357_v23  ;;  %v2430_v32 = vadd.f32 %v2429_v45, %v11062_v55  ;;  %14144 = vst [vmem:[#allocation36_spill] sm:$0xff] %v11215_v20  ;;  %v11217_v1 = vpop.permute.xlu0 %8482 }
 0x30f   : > { %v11196_v12 = vmul.f32 %v2457_v3, %v2359_v60  ;;  %v11207_v26 = vmul.f32 %v2461_v19, %v2428_v37 }
 0x310   : > { %14140 = vst [vmem:[#allocation45_spill] sm:$0xff] %v11191_v57  ;;  %v11204_v58 = vpack.i.bf16 %v11191_v57, %v11189_v17  ;;  %v11213_v3 = vmul.f32 %v2465_v28, %v2430_v32 }
 0x311   : > { %14141 = vst [vmem:[#allocation38_spill] sm:$0xff] %v11196_v12  ;;  %14142 = vst [vmem:[#allocation53_spill] sm:$0xff] %v11207_v26  ;;  %v11223_v55 = vpop.permute.xlu1 %8497  ;;  %v11245_v60 = vpack.i.bf16 %v11207_v26, %v11196_v12 }
 0x312   : > { %8682 = vrot.lane.b32.xlu0 %v11204_v58, %s9621_s14  ;;  %8687 = vrot.lane.b32.xlu1 %v11204_v58, %s9623_s13  ;;  %14143 = vst [vmem:[#allocation35_spill] sm:$0xff] %v11213_v3  ;;  %14145 = vst [vmem:[#allocation46_spill] sm:$0xff] %v11223_v55  ;;  %v11225_v45 = vpop.permute.xlu0 %8492 }
 0x313   : > { %14146 = vst [vmem:[#allocation52_spill] sm:$0xff] %v11225_v45  ;;  %14148 = vst [vmem:[#allocation40_spill] sm:$0xff] %v11245_v60 }
 0x315   : > { %v11235_v19 = vpop.permute.xlu1 %8502 }
 0x316   : > { %8692 = vrot.lane.b32.xlu0 %v11204_v58, %s9620_s20  ;;  %8697 = vrot.lane.b32.xlu1 %v11204_v58, %s9625_s7  ;;  %v11237_v23 = vpop.permute.xlu0 %8507 }
 0x317   : > { %14147 = vst [vmem:[#allocation43_spill] sm:$0xff] %v11237_v23 }
 0x319   : > { %v11247_v28 = vpop.permute.xlu1 %8512 }
 0x31a   : > { %8702 = vrot.lane.b32.xlu0 %v11204_v58, %s9622_s11  ;;  %8707 = vrot.lane.b32.xlu1 %v11204_v58, %s9627_s26  ;;  %14149 = vst [vmem:[#allocation41_spill] sm:$0xff] %v11247_v28  ;;  %v11249_v37 = vpop.permute.xlu0 %8517 }
 0x31b   : > { %14150 = vst [vmem:[#allocation54_spill] sm:$0xff] %v11249_v37 }
 0x31d   : > { %v11259_v32 = vpop.permute.xlu1 %8527 }
 0x31e   : > { %8712 = vrot.lane.b32.xlu0 %v11204_v58, %s9624_s29  ;;  %8717 = vrot.lane.b32.xlu1 %v11204_v58, %s9628_s19  ;;  %14151 = vst [vmem:[#allocation60_spill] sm:$0xff] %v11259_v32  ;;  %v11261_v46 = vpop.permute.xlu0 %8522  ;;  %v8424_v32 = vunpack.i.l.bf16 %v11128_v9 }
 0x321   : > { %v11267_v31 = vpop.permute.xlu1 %8537 }
 0x322   : > { %8722 = vrot.lane.b32.xlu0 %v11204_v58, %s9626_s18  ;;  %8727 = vrot.lane.b32.xlu1 %v11204_v58, %s9629_s17  ;;  %14152 = vst [vmem:[#allocation50_spill] sm:$0xff] %v11267_v31  ;;  %v11269_v33 = vpop.permute.xlu0 %8532 }
 0x323   : > { %14153 = vst [vmem:[#allocation47_spill] sm:$0xff] %v11269_v33 }
 0x325   : > { %v11279_v63 = vpop.permute.xlu1 %8542 }
 0x326   : > { %2550 = vrot.lane.b32.xlu0 %v11213_v3, %s9621_s14  ;;  %8732 = vrot.lane.b32.xlu1 %v11245_v60, %s9621_s14  ;;  %v11281_v37 = vpop.permute.xlu0 %8547  ;;  %s14166_s14 = smov 18  }
 0x329   : > { %v11287_v33 = vpop.permute.xlu1 %8552 }
 0x32a   : > { %8737 = vrot.lane.b32.xlu0 %v11245_v60, %s9623_s13  ;;  %2671 = vrot.lane.b32.xlu1 %v11213_v3, %s9623_s13  ;;  %v11289_v45 = vpop.permute.xlu0 %8557  ;;  %s14169_s13 = smov 17  }
 0x32b   : > { %14154 = vst [vmem:[#allocation48_spill] sm:$0xff] %v11289_v45 }
 0x32d   : > { %v11299_v31 = vpop.permute.xlu1 %8567 }
 0x32e   : > { %2792 = vrot.lane.b32.xlu0 %v11213_v3, %s9620_s20  ;;  %8742 = vrot.lane.b32.xlu1 %v11245_v60, %s9620_s20  ;;  %14155 = vst [vmem:[#allocation61_spill] sm:$0xff] %v11299_v31  ;;  %v11301_v39 = vpop.permute.xlu0 %8562  ;;  %s13829_s20 = smov 9  }
 0x32f   : > { %14156 = vst [vmem:[#allocation67_spill] sm:$0xff] %v11301_v39  ;;  %v8384_v39 = vunpack.i.l.bf16 %v11068_v15 }
 0x331   : > { %v11307_v45 = vpop.permute.xlu1 %8577 }
 0x332   : > { %8747 = vrot.lane.b32.xlu0 %v11245_v60, %s9625_s7  ;;  %2913 = vrot.lane.b32.xlu1 %v11213_v3, %s9625_s7  ;;  %14157 = vst [vmem:[#allocation58_spill] sm:$0xff] %v11307_v45  ;;  %v11309_v28 = vpop.permute.xlu0 %8572  ;;  %s14176_s7 = smov 8  }
 0x333   : > { %14158 = vst [vmem:[#allocation64_spill] sm:$0xff] %v11309_v28 }
 0x336   : > { %3034 = vrot.lane.b32.xlu0 %v11213_v3, %s9622_s11  ;;  %8752 = vrot.lane.b32.xlu1 %v11245_v60, %s9622_s11  ;;  %s13803_s11 = smov 1  }
 0x33a   : > { %8757 = vrot.lane.b32.xlu0 %v11245_v60, %s9627_s26  ;;  %3155 = vrot.lane.b32.xlu1 %v11213_v3, %s9627_s26  ;;  %s14183_s26 = smov 7  }
 0x33e   : > { %3276 = vrot.lane.b32.xlu0 %v11213_v3, %s9624_s29  ;;  %8762 = vrot.lane.b32.xlu1 %v11245_v60, %s9624_s29  ;;  %s14170_s29 = smov 16  }
 0x342   : > { %8767 = vrot.lane.b32.xlu0 %v11245_v60, %s9628_s19  ;;  %3397 = vrot.lane.b32.xlu1 %v11213_v3, %s9628_s19  ;;  %s9630_s19 = smov 10  }
 0x346   : > { %3518 = vrot.lane.b32.xlu0 %v11213_v3, %s9626_s18  ;;  %8772 = vrot.lane.b32.xlu1 %v11245_v60, %s9626_s18  ;;  %s13797_s18 = smov 119  }
 0x347   : > { %v11316_v55 = vpop.permute.xlu0 %8592  ;;  %v8583_v21 = vpop.permute.xlu1 %8582 }
 0x348   : > { %v8585_v10 = vunpack.i.h.bf16 %v8583_v21  ;;  %v8584_v0 = vunpack.i.l.bf16 %v8583_v21  ;;  %v8595_v23 = vunpack.i.h.bf16 %v11316_v55  ;;  %v8594_v20 = vunpack.i.l.bf16 %v11316_v55 }
 0x34a   : > { %8777 = vrot.lane.b32.xlu0 %v11245_v60, %s9629_s17  ;;  %3639 = vrot.lane.b32.xlu1 %v11213_v3, %s9629_s17  ;;  %s14160_s17 = smov 26  }
 0x34b   : > { %v11326_v45 = vpop.permute.xlu0 %8602  ;;  %v8588_v54 = vpop.permute.xlu1 %8587 }
 0x34c   : > { %v8590_v31 = vunpack.i.h.bf16 %v8588_v54  ;;  %v8589_v2 = vunpack.i.l.bf16 %v8588_v54 }
 0x34e   : > { %8782 = vrot.lane.b32.xlu0 %v11076_v34, %s9630_s19  ;;  %8787 = vrot.lane.b32.xlu1 %v11122_v27, %s9630_s19  ;;  %v8801_v34 = vpack.i.bf16 %v11323_v35, %v11320_v4 }
 0x34f   : > { %v11333_v14 = vpop.permute.xlu1 %8597  ;;  %v11335_v50 = vpop.permute.xlu0 %8612 }
 0x352   : > { %8792 = vrot.lane.b32.xlu0 %v11204_v58, %s9630_s19  ;;  %8797 = vrot.lane.b32.xlu1 %v11245_v60, %s9630_s19  ;;  %v11361_v60 = vpack.i.bf16 %v3908_v8, %v11323_v35 }
 0x353   : > { %v11341_v56 = vpop.permute.xlu1 %8607  ;;  %v11345_v26 = vpop.permute.xlu0 %8622 }
 0x356   : > { %3760 = vrot.lane.b32.xlu0 %v11213_v3, %s9630_s19  ;;  %8802 = vrot.lane.b32.xlu1 %v8801_v34, %s14160_s17  ;;  %v8826_v3 = vpack.i.bf16 %v11108_v7, %v14163_v6  ;;  %v7834_v6 = vunpack.i.h.bf16 %v10053_v38  ;;  %v14165_v7 = vld [vmem:[#allocation17_spill] sm:$0xff]  ;;  %s14202_s19 = smov 6  }
 0x357   : > { %v11350_v34 = vpop.permute.xlu1 %8617  ;;  %v7859_v48 = vunpack.i.h.bf16 %v14165_v7  ;;  %v2553_v7 = vsel %vm2552_vm12, %v8584_v0, %v8585_v10 }
 0x358   : > { %v7232_v21 = vpack.c.bf16 %v2553_v7, %v3908_v8  ;;  %v13750_v8 = vunpack.i.h.bf16 %v11098_v36  ;;  %v8404_v7 = vunpack.i.l.bf16 %v11098_v36 }
 0x35a   : > { %8807 = vrot.lane.b32.xlu0 %v14161_v62, %s14160_s17  ;;  %8812 = vrot.lane.b32.xlu1 %v14162_v43, %s14160_s17 }
 0x35b   : > { %v11358_v43 = vpop.permute.xlu1 %8627 }
 0x35e   : > { %8817 = vrot.lane.b32.xlu0 %v11053_v42, %s14160_s17  ;;  %8822 = vrot.lane.b32.xlu1 %v8821_v49, %s13829_s20  ;;  %v11363_v42 = vpop.permute.xlu0 %8637  ;;  %s14214_s17 = smov 56  }
 0x35f   : > { %v11372_v53 = vpop.permute.xlu1 %8632  ;;  %v14167_v18 = vunpack.i.l.bf16 %v11363_v42 }
 0x360   : > { %v13743_v38 = vunpack.i.l.bf16 %v11372_v53 }
 0x361   : > { %v2675_v29 = vsel %vm13772_vm9, %v8590_v31, %v14167_v18  ;;  %v2613_v18 = vsel %vm370_vm0, %v7809_v47, %v8384_v39  ;;  %v8610_v47 = vunpack.i.h.bf16 %v11341_v56 }
 0x362   : > { %8827 = vrot.lane.b32.xlu0 %v8826_v3, %s13829_s20  ;;  %8832 = vrot.lane.b32.xlu1 %v11204_v58, %s13829_s20  ;;  %s14284_s20 = smov 36  }
 0x363   : > { %v11389_v0 = vpop.permute.xlu1 %8642 }
 0x366   : > { %8837 = vrot.lane.b32.xlu0 %v11361_v60, %s14166_s14  ;;  %8842 = vrot.lane.b32.xlu1 %v8821_v49, %s13803_s11  ;;  %v2554_v49 = vsel %vm2552_vm12, %v8585_v10, %v13743_v38  ;;  %v11396_v10 = vpop.permute.xlu0 %8647  ;;  %v13749_v38 = vunpack.i.l.bf16 %v11389_v0 }
 0x367   : > { %v7230_v54 = vpack.c.bf16 %v2554_v49, %v11320_v4  ;;  %v2674_v49 = vsel %vm13772_vm9, %v8589_v2, %v8590_v31  ;;  %v13752_v31 = vunpack.i.h.bf16 %v11128_v9  ;;  %v11420_v55 = vpop.permute.xlu1 %8652  ;;  %v8504_v4 = vunpack.i.l.bf16 %v11235_v19 }
 0x368   : > { %v2796_v2 = vsel %vm2794_vm8, %v8595_v23, %v13749_v38  ;;  %v14173_v38 = vunpack.i.h.bf16 %v10260_v59 }
 0x369   : > { %7231 = vmatprep.subr.bf16.mxu0 %v7230_v54  ;;  %v2735_v54 = vsel %vm431_vm1, %v8404_v7, %v13750_v8  ;;  %v11451_v8 = vpack.i.bf16 %v11189_v17, %v11072_v52 }
 0x36a   : > { %8847 = vrot.lane.b32.xlu0 %v8826_v3, %s13803_s11  ;;  %8852 = vrot.lane.b32.xlu1 %v14161_v62, %s14166_s14  ;;  %v14168_v3 = vunpack.i.h.bf16 %v11068_v15 }
 0x36b   : > { %7233 = vmatpush1.bf16.msra.mxu0 %v7232_v21  ;;  %v2795_v21 = vsel %vm2794_vm8, %v8594_v20, %v8595_v23  ;;  %v13753_v20 = vunpack.i.l.bf16 %v11420_v55  ;;  %v8444_v23 = vunpack.i.l.bf16 %v11150_v61 }
 0x36c   : > { %v2614_v28 = vsel %vm370_vm0, %v8384_v39, %v14168_v3  ;;  %v13751_v3 = vunpack.i.l.bf16 %v11396_v10  ;;  %v2855_v39 = vsel %vm492_vm2, %v7859_v48, %v8424_v32  ;;  %v7238_v48 = vpack.c.bf16 %v2796_v2, %v2735_v54 }
 0x36d   : > { %v7234_v30 = vpack.c.bf16 %v2675_v29, %v2614_v28  ;;  %v7236_v28 = vpack.c.bf16 %v2674_v49, %v2613_v18  ;;  %v8599_v29 = vunpack.i.l.bf16 %v11333_v14  ;;  %v8464_v49 = vunpack.i.l.bf16 %v11167_v25  ;;  %v11441_v18 = vpop.permute.xlu0 %8657 }
 0x36e   : > { %8857 = vrot.lane.b32.xlu0 %v11204_v58, %s13803_s11  ;;  %8862 = vrot.lane.b32.xlu1 %v11361_v60, %s14169_s13  ;;  %v8600_v58 = vunpack.i.h.bf16 %v11333_v14  ;;  %v8605_v2 = vunpack.i.h.bf16 %v11326_v45  ;;  %s13814_s11 = smov 29  }
 0x36f   : > { %7235 = vmatprep.subr.bf16.mxu0 %v7234_v30  ;;  %v2734_v30 = vsel %vm431_vm1, %v7834_v6, %v8404_v7  ;;  %v2856_v7 = vsel %vm492_vm2, %v8424_v32, %v13752_v31  ;;  %v14171_v32 = vunpack.i.h.bf16 %v10150_v11  ;;  %v8484_v11 = vunpack.i.l.bf16 %v11217_v1 }
 0x370   : > { %7237 = vmatpush1.bf16.msra.mxu0 %v7236_v28  ;;  %v2917_v14 = vsel %vm2915_vm10, %v8600_v58, %v13751_v3  ;;  %v7240_v6 = vpack.c.bf16 %v2795_v21, %v2734_v30  ;;  %v8604_v28 = vunpack.i.l.bf16 %v11326_v45  ;;  %v2916_v54 = vsel %vm2915_vm10, %v8599_v29, %v8600_v58 }
 0x371   : > { %7239 = vmatprep.subr.bf16.mxu0 %v7238_v48  ;;  %v13755_v3 = vunpack.i.h.bf16 %v11150_v61  ;;  %v7242_v21 = vpack.c.bf16 %v2917_v14, %v2856_v7  ;;  %v13758_v48 = vunpack.i.h.bf16 %v11167_v25  ;;  %v3097_v30 = vsel %vm614_vm4, %v14171_v32, %v8464_v49 }
 0x372   : > { %8867 = vrot.lane.b32.xlu0 %v14161_v62, %s14169_s13  ;;  %8872 = vrot.lane.b32.xlu1 %v11361_v60, %s14170_s29  ;;  %v13756_v45 = vunpack.i.l.bf16 %v11441_v18  ;;  %v3038_v58 = vsel %vm3036_vm13, %v8605_v2, %v13753_v20  ;;  %v14172_v29 = vunpack.i.h.bf16 %v10109_v24  ;;  %v7244_v7 = vpack.c.bf16 %v2916_v54, %v2855_v39  ;;  %v11491_v54 = vpop.permute.xlu0 %8667 }
 0x373   : > { %v2977_v32 = vsel %vm553_vm3, %v8444_v23, %v13755_v3  ;;  %v3037_v31 = vsel %vm3036_vm13, %v8604_v28, %v8605_v2  ;;  %v8609_v20 = vunpack.i.l.bf16 %v11341_v56  ;;  %v11481_v24 = vpack.i.bf16 %v11196_v12, %v11191_v57 }
 0x374   : > { %7241 = vmatpush1.bf16.msra.mxu0 %v7240_v6  ;;  %v2976_v14 = vsel %vm553_vm3, %v14172_v29, %v8444_v23  ;;  %v11471_v6 = vpop.permute.xlu1 %8662  ;;  %v11487_v39 = vsel %vm13761_vm6, %v14173_v38, %v8504_v4  ;;  %v7246_v23 = vpack.c.bf16 %v3038_v58, %v2977_v32  ;;  %v8524_v28 = vunpack.i.l.bf16 %v11261_v46 }
 0x375   : > { %7243 = vmatprep.subr.bf16.mxu0 %v7242_v21  ;;  %v13759_v56 = vunpack.i.l.bf16 %v11471_v6  ;;  %v3159_v59 = vsel %vm13879_vm11, %v8610_v47, %v13756_v45  ;;  %v14174_v38 = vunpack.i.h.bf16 %v10184_v22  ;;  %v13765_v58 = vunpack.i.h.bf16 %v11279_v63 }
 0x376   : > { %8877 = vrot.lane.b32.xlu0 %v11122_v27, %s13799_s27  ;;  %8882 = vrot.lane.b32.xlu1 %v11451_v8, %s13799_s27  ;;  %v3098_v32 = vsel %vm614_vm4, %v8464_v49, %v13758_v48  ;;  %v8615_v3 = vunpack.i.h.bf16 %v11335_v50  ;;  %v8614_v29 = vunpack.i.l.bf16 %v11335_v50  ;;  %v3158_v2 = vsel %vm13879_vm11, %v8609_v20, %v8610_v47 }
 0x377   : > { %v3218_v21 = vsel %vm675_vm5, %v14174_v38, %v8484_v11  ;;  %v13763_v22 = vunpack.i.h.bf16 %v11261_v46  ;;  %v7250_v38 = vpack.c.bf16 %v3159_v59, %v3098_v32  ;;  %v13764_v49 = vunpack.i.l.bf16 %v11491_v54 }
 0x378   : > { %7245 = vmatpush1.bf16.msra.mxu0 %v7244_v7  ;;  %v7248_v7 = vpack.c.bf16 %v3037_v31, %v2976_v14  ;;  %v3280_v50 = vsel %vm13834_vm15, %v8615_v3, %v13759_v56  ;;  %v14177_v47 = vunpack.i.h.bf16 %v11070_v51  ;;  %v11533_v14 = vpop.permute.xlu1 %8672  ;;  %v7252_v59 = vpack.c.bf16 %v3158_v2, %v3097_v30 }
 0x379   : > { %7247 = vmatprep.subr.bf16.mxu0 %v7246_v23  ;;  %v14175_v23 = vunpack.i.h.bf16 %v14015_v44  ;;  %v14178_v44 = vunpack.i.l.bf16 %v11070_v51  ;;  %v3461_v56 = vsel %vm13762_vm7, %v8524_v28, %v13763_v22  ;;  %v3279_v45 = vsel %vm13834_vm15, %v8614_v29, %v8615_v3 }
 0x37a   : > { %8887 = vrot.lane.b32.xlu0 %v14161_v62, %s14170_s29  ;;  %8892 = vrot.lane.b32.xlu1 %v11481_v24, %s13799_s27  ;;  %v8625_v30 = vunpack.i.h.bf16 %v11345_v26  ;;  %v8635_v29 = vunpack.i.h.bf16 %v11372_v53  ;;  %s13812_s27 = smov 37  }
 0x37b   : > { %v11516_v31 = vsel %vm13762_vm7, %v14175_v23, %v8524_v28  ;;  %v11531_v20 = vsel %vm370_vm0, %v14178_v44, %v14177_v47  ;;  %v14180_v23 = vunpack.i.h.bf16 %v11235_v19  ;;  %v8620_v47 = vunpack.i.h.bf16 %v11350_v34 }
 0x37c   : > { %7249 = vmatpush1.bf16.msra.mxu0 %v7248_v7  ;;  %v14179_v7 = vunpack.i.h.bf16 %v11217_v1  ;;  %v8619_v44 = vunpack.i.l.bf16 %v11350_v34  ;;  %vm14182_vm7 = vcmask 228352   ;;  %v7256_v28 = vpack.c.bf16 %v3279_v45, %v3218_v21 }
 0x37d   : > { %7251 = vmatprep.subr.bf16.mxu0 %v7250_v38  ;;  %v3340_v48 = vsel %vm13761_vm6, %v8504_v4, %v14180_v23  ;;  %v11547_v38 = vpop.permute.xlu0 %8677  ;;  %vm13821_vm6 = vcmask 728064   ;;  %v3401_v34 = vsel %vm13796_vm14, %v8620_v47, %v13764_v49  ;;  %v14184_v21 = vunpack.i.l.bf16 %v11533_v14 }
 0x37e   : > { %8897 = vrot.lane.b32.xlu0 %v11361_v60, %s14176_s7  ;;  %8902 = vrot.lane.b32.xlu1 %v11122_v27, %s13797_s18  ;;  %v3219_v32 = vsel %vm675_vm5, %v8484_v11, %v14179_v7  ;;  %v8624_v11 = vunpack.i.l.bf16 %v11345_v26  ;;  %v14181_v26 = vunpack.i.l.bf16 %v11279_v63  ;;  %v13768_v45 = vunpack.i.l.bf16 %v11547_v38 }
 0x37f   : > { %v7254_v2 = vpack.c.bf16 %v3280_v50, %v3219_v32  ;;  %v3400_v50 = vsel %vm13796_vm14, %v8619_v44, %v8620_v47  ;;  %v9634_v32 = vmov 1983009808   ;;  %v3522_v47 = vsel %vm13821_vm6, %v8625_v30, %v14184_v21 }
 0x380   : > { %7253 = vmatpush1.bf16.msra.mxu0 %v7252_v59  ;;  %v11564_v3 = vsel %vm14182_vm7, %v14181_v26, %v13765_v58  ;;  %v6107_v23 = vunpack.c.l.s4 %v9634_v32  ;;  %v3521_v22 = vsel %vm13821_vm6, %v8624_v11, %v8625_v30  ;;  %v7258_v26 = vpack.c.bf16 %v3401_v34, %v3340_v48  ;;  %v11595_v58 = vld [vmem:[%s13562_s5] sm:$0xff] }
 0x381   : > { %7255 = vmatprep.subr.bf16.mxu0 %v7254_v2  ;;  %v8640_v2 = vunpack.i.h.bf16 %v11363_v42  ;;  %v8630_v11 = vunpack.i.h.bf16 %v11358_v43  ;;  %v14185_v48 = vunpack.i.l.bf16 %v11372_v53  ;;  %v8629_v30 = vunpack.i.l.bf16 %v11358_v43  ;;  %v11603_v53 = vld [vmem:[%s9863_s12 + $0x18] sm:$0xff] }
 0x382   : > { %8907 = vrot.lane.b32.xlu0 %v11451_v8, %s13797_s18  ;;  %8912 = vrot.lane.b32.xlu1 %v14161_v62, %s14176_s7  ;;  %v6108_v44 = vunpack.c.0.s8 %v6107_v23  ;;  %vm13806_vm7 = vcmask 89088   ;;  %v7262_v43 = vpack.c.bf16 %v3522_v47, %v3461_v56  ;;  %v8009_v56 = vunpack.i.h.bf16 %v10315_v5 }
 0x383   : > { %v2555_v34 = vsel %vm2552_vm12, %v14185_v48, %v8635_v29  ;;  %v8645_v48 = vunpack.i.h.bf16 %v11389_v0  ;;  %v14188_v47 = vunpack.i.l.bf16 %v11363_v42 }
 0x384   : > { %v11568_v59 = vpop.permute.xlu0 %8682  ;;  %v11570_v7 = vpop.permute.xlu1 %8687  ;;  %7257 = vmatpush1.bf16.msra.mxu0 %v7256_v28  ;;  %v7260_v28 = vpack.c.bf16 %v3400_v50, %v11487_v39  ;;  %v3642_v50 = vsel %vm13806_vm7, %v8629_v30, %v8630_v11 }
 0x385   : > { %v13767_v49 = vunpack.i.l.bf16 %v11568_v59  ;;  %v13766_v4 = vunpack.i.l.bf16 %v11570_v7  ;;  %7259 = vmatprep.subr.bf16.mxu0 %v7258_v26 }
 0x386   : > { %8917 = vrot.lane.b32.xlu0 %v11481_v24, %s13797_s18  ;;  %8922 = vrot.lane.b32.xlu1 %v11361_v60, %s14183_s26  ;;  %s14242_s18 = smov 54  }
 0x387   : > { %v2556_v32 = vsel %vm2552_vm12, %v8635_v29, %v13767_v49  ;;  %v2677_v39 = vsel %vm13772_vm9, %v8640_v2, %v13766_v4  ;;  %v11610_v29 = vsub.s32 %v6108_v44, %v11057_v41  ;;  %v3643_v44 = vsel %vm13806_vm7, %v8630_v11, %v13768_v45 }
 0x388   : > { %v11598_v23 = vpop.permute.xlu0 %8692  ;;  %v11600_v21 = vpop.permute.xlu1 %8697  ;;  %v7338_v26 = vpack.c.bf16 %v2556_v32, %v11603_v53  ;;  %7261 = vmatpush1.bf16.msra.mxu0 %v7260_v28  ;;  %v7340_v32 = vpack.c.bf16 %v2555_v34, %v11323_v35  ;;  %v2676_v28 = vsel %vm13772_vm9, %v14188_v47, %v8640_v2  ;;  %v7342_v49 = vpack.c.bf16 %v2677_v39, %v11531_v20 }
 0x389   : > { %14186 = vst [vmem:[#allocation78_spill] sm:$0xff] %v11610_v29  ;;  %v11624_v4 = vrot.slane %v11595_v58, %v11610_v29  ;;  %7263 = vmatprep.subr.bf16.mxu0 %v7262_v43  ;;  %v7264_v34 = vpack.c.bf16 %v3521_v22, %v11516_v31  ;;  %v13775_v45 = vunpack.i.l.bf16 %v11600_v21  ;;  %v14190_v5 = vunpack.i.l.bf16 %v11598_v23 }
 0x38a   : > { %8927 = vrot.lane.b32.xlu0 %v11122_v27, %s13794_s15  ;;  %8932 = vrot.lane.b32.xlu1 %v11451_v8, %s13794_s15  ;;  %v14191_v20 = vunpack.i.l.bf16 %v11070_v51  ;;  %v14192_v22 = vunpack.i.h.bf16 %v11068_v15  ;;  %v13779_v11 = vunpack.i.h.bf16 %v11130_v16  ;;  %v7266_v30 = vpack.c.bf16 %v3643_v44, %v11564_v3 }
 0x38b   : > { %14187 = vst [vmem:[#allocation55_spill] sm:$0xff] %v11624_v4  ;;  %7339 = vmatprep.subr.bf16.mxu1 %v7338_v26  ;;  %v2798_v42 = vsel %vm2794_vm8, %v8645_v48, %v14190_v5  ;;  %v11643_v2 = vcombine.high %v11624_v4, %v11624_v4  ;;  %v14193_v26 = vunpack.i.l.bf16 %v11279_v63  ;;  %vm14194_vm9 = vcmask 228352  }
 0x38c   : > { %7341 = vmatpush1.bf16.msra.mxu1 %v7340_v32  ;;  %v11634_v41 = vpop.permute.xlu0 %8702  ;;  %v11636_v12 = vpop.permute.xlu1 %8707  ;;  %v2615_v31 = vsel %vm370_vm0, %v14192_v22, %v14191_v20  ;;  %7265 = vmatpush1.bf16.msra.mxu0 %v7264_v34  ;;  %v8650_v43 = vunpack.i.h.bf16 %v11396_v10  ;;  %v14195_v32 = vunpack.i.h.bf16 %v11096_v40  ;;  %v14197_v3 = vunpack.i.l.bf16 %v11389_v0 }
 0x38d   : > { %14189 = vst [vmem:[#allocation56_spill] sm:$0xff] %v11636_v12  ;;  %7343 = vmatprep.subr.bf16.mxu1 %v7342_v49  ;;  %v3581_v39 = vsel %vm14194_vm9, %v8009_v56, %v14193_v26  ;;  %v7344_v15 = vpack.c.bf16 %v2676_v28, %v2615_v31  ;;  %v14196_v49 = vunpack.i.l.bf16 %v11096_v40  ;;  %7267 = vmatprep.subr.bf16.mxu0 %v7266_v30  ;;  %v8429_v5 = vunpack.i.l.bf16 %v11130_v16 }
 0x38e   : > { %8937 = vrot.lane.b32.xlu0 %v14161_v62, %s14183_s26  ;;  %8942 = vrot.lane.b32.xlu1 %v11481_v24, %s13794_s15  ;;  %v2797_v44 = vsel %vm2794_vm8, %v14197_v3, %v8645_v48  ;;  %v7268_v34 = vpack.c.bf16 %v3642_v50, %v3581_v39  ;;  %v13773_v20 = vunpack.i.l.bf16 %v11634_v41  ;;  %v2919_v31 = vsel %vm2915_vm10, %v8650_v43, %v13775_v45  ;;  %s13801_s15 = smov 38  }
 0x38f   : > { %v2737_v47 = vsel %vm431_vm1, %v14196_v49, %v14195_v32  ;;  %6192 = vmatprep.mubr.f32.mxu0 %v11643_v2  ;;  %v13777_v0 = vunpack.i.h.bf16 %v11148_v13  ;;  %v14200_v48 = vmov %v14196_v49  ;;  %v14201_v50 = vunpack.i.h.bf16 %v11098_v36  ;;  %6334 = vmatprep.mubr.f32.mxu1 %v11643_v2 }
 0x390   : > { %v7346_v56 = vpack.c.bf16 %v2798_v42, %v2737_v47  ;;  %7345 = vmatpush1.bf16.msra.mxu1 %v7344_v15  ;;  %v11670_v22 = vpop.permute.xlu0 %8712  ;;  %v11672_v28 = vpop.permute.xlu1 %8717  ;;  %7269 = vmatpush1.bf16.msra.mxu0 %v7268_v34  ;;  %v8449_v30 = vunpack.i.l.bf16 %v11148_v13  ;;  %v8655_v26 = vunpack.i.h.bf16 %v11420_v55  ;;  %v2858_v15 = vsel %vm492_vm2, %v8429_v5, %v13779_v11 }
 0x391   : > { %14198 = vst [vmem:[#allocation68_spill] sm:$0xff] %v11670_v22  ;;  %14199 = vst [vmem:[#allocation59_spill] sm:$0xff] %v11672_v28  ;;  %v2736_v42 = vsel %vm431_vm1, %v14201_v50, %v14200_v48  ;;  %v13780_v36 = vunpack.i.h.bf16 %v11281_v37  ;;  %v14203_v32 = vunpack.i.l.bf16 %v11396_v10  ;;  %v7350_v47 = vpack.c.bf16 %v2919_v31, %v2858_v15  ;;  %v14207_v31 = vld [vmem:[#allocation25_spill] sm:$0xff] }
 0x392   : > { %7347 = vmatprep.subr.bf16.mxu1 %v7346_v56  ;;  %8947 = vrot.lane.b32.xlu0 %v11361_v60, %s14202_s19  ;;  %v7348_v39 = vpack.c.bf16 %v2797_v44, %v2736_v42  ;;  %v13776_v3 = vunpack.i.l.bf16 %v11287_v33  ;;  %v13778_v60 = vunpack.i.l.bf16 %v11636_v12  ;;  %v3040_v34 = vsel %vm3036_vm13, %v8655_v26, %v13773_v20 }
 0x393   : > { %8952 = vrot.lane.b32.xlu1 %v11122_v27, %s13781_s16  ;;  %v2918_v49 = vsel %vm2915_vm10, %v14203_v32, %v8650_v43  ;;  %v14206_v10 = vunpack.i.h.bf16 %v11128_v9  ;;  %v13784_v48 = vunpack.i.h.bf16 %v14207_v31  ;;  %v2979_v9 = vsel %vm553_vm3, %v8449_v30, %v13777_v0 }
 0x394   : > { %7349 = vmatpush1.bf16.msra.mxu1 %v7348_v39  ;;  %v11700_v56 = vpop.permute.xlu0 %8722  ;;  %v11702_v44 = vpop.permute.xlu1 %8727  ;;  %v8660_v39 = vunpack.i.h.bf16 %v11441_v18  ;;  %v8665_v0 = vunpack.i.h.bf16 %v11471_v6  ;;  %v13787_v11 = vunpack.i.l.bf16 %v11672_v28  ;;  %v8680_v28 = vunpack.i.h.bf16 %v11547_v38 }
 0x395   : > { %14204 = vst [vmem:[#allocation76_spill] sm:$0xff] %v11700_v56  ;;  %14205 = vst [vmem:[#allocation65_spill] sm:$0xff] %v11702_v44  ;;  %v2857_v43 = vsel %vm492_vm2, %v14206_v10, %v8429_v5  ;;  %v13774_v50 = vunpack.i.h.bf16 %v11702_v44  ;;  %v13785_v42 = vunpack.i.l.bf16 %v11702_v44  ;;  %7351 = vmatprep.subr.bf16.mxu1 %v7350_v47  ;;  %v14208_v5 = vld [vmem:[#allocation77_spill] sm:$0xff]  ;;  %v8469_v10 = vunpack.i.l.bf16 %v14207_v31 }
 0x396   : > { %8957 = vrot.lane.b32.xlu0 %v11451_v8, %s13781_s16  ;;  %v7352_v15 = vpack.c.bf16 %v2918_v49, %v2857_v43  ;;  %v8971_v32 = vpack.i.bf16 %v14208_v5, %v11603_v53  ;;  %v14209_v47 = vunpack.i.l.bf16 %v11420_v55  ;;  %v7354_v49 = vpack.c.bf16 %v3040_v34, %v2979_v9  ;;  %v14212_v34 = vld [vmem:[#allocation36_spill] sm:$0xff] }
 0x397   : > { %8962 = vrot.lane.b32.xlu1 %v14161_v62, %s14202_s19  ;;  %v11732_v62 = vsel %vm13806_vm7, %v13785_v42, %v13774_v50  ;;  %v11739_v53 = vsel %vm14194_vm9, %v13780_v36, %v13776_v3  ;;  %v13783_v43 = vunpack.i.l.bf16 %v11670_v22  ;;  %v13786_v9 = vunpack.i.h.bf16 %v14212_v34  ;;  %v11767_v3 = vld [vmem:[%s9863_s12 + $0x20] sm:$0xff] }
 0x398   : > { %v3039_v20 = vsel %vm3036_vm13, %v14209_v47, %v8655_v26  ;;  %14210 = vst [vmem:[#allocation71_spill] sm:$0xff] %v11732_v62  ;;  %14211 = vst [vmem:[#allocation72_spill] sm:$0xff] %v11739_v53  ;;  %7353 = vmatpush1.bf16.msra.mxu1 %v7352_v15  ;;  %v11742_v55 = vpop.permute.xlu0 %2550  ;;  %v11744_v26 = vpop.permute.xlu1 %8732  ;;  %v3161_v47 = vsel %vm13879_vm11, %v8660_v39, %v13778_v60  ;;  %v14213_v50 = vunpack.i.h.bf16 %v11150_v61  ;;  %v8489_v15 = vunpack.i.l.bf16 %v14212_v34 }
 0x399   : > { %7355 = vmatprep.subr.bf16.mxu1 %v7354_v49  ;;  %v3100_v61 = vsel %vm614_vm4, %v8469_v10, %v13784_v48  ;;  %vm14222_vm9 = vcmask 875520   ;;  %v14225_v62 = vunpack.i.l.bf16 %v11700_v56 }
 0x39a   : > { %v2978_v45 = vsel %vm553_vm3, %v14213_v50, %v8449_v30  ;;  %8967 = vrot.lane.b32.xlu0 %v11481_v24, %s13781_s16  ;;  %v14215_v30 = vunpack.i.l.bf16 %v11441_v18  ;;  %v7358_v49 = vpack.c.bf16 %v3161_v47, %v3100_v61  ;;  %v11782_v47 = vld [vmem:[%s9863_s12 + $0x28] sm:$0xff]  ;;  %s13792_s16 = smov 39  }
 0x39b   : > { %8972 = vrot.lane.b32.xlu1 %v8971_v32, %s14214_s17  ;;  %v7356_v60 = vpack.c.bf16 %v3039_v20, %v2978_v45  ;;  %v3282_v45 = vsel %vm13834_vm15, %v8665_v0, %v13783_v43  ;;  %v14216_v20 = vunpack.i.h.bf16 %v11167_v25  ;;  %v3221_v25 = vsel %vm675_vm5, %v8489_v15, %v13786_v9  ;;  %v11798_v43 = vld [vmem:[%s9863_s12 + $0x18] sm:$0xff] }
 0x39c   : > { %v3160_v50 = vsel %vm13879_vm11, %v14215_v30, %v8660_v39  ;;  %v11770_v36 = vpop.permute.xlu0 %8737  ;;  %v11772_v24 = vpop.permute.xlu1 %2671  ;;  %v14217_v39 = vld [vmem:[#allocation43_spill] sm:$0xff]  ;;  %v14218_v30 = vunpack.i.l.bf16 %v11471_v6  ;;  %v14219_v32 = vld [vmem:[#allocation60_spill] sm:$0xff]  ;;  %v8991_v6 = vpack.i.bf16 %v14208_v5, %v11798_v43 }
 0x39d   : > { %7357 = vmatpush1.bf16.msra.mxu1 %v7356_v60  ;;  %v3099_v18 = vsel %vm614_vm4, %v14216_v20, %v8469_v10  ;;  %v8670_v60 = vunpack.i.h.bf16 %v11491_v54  ;;  %v8986_v10 = vpack.i.bf16 %v11782_v47, %v11767_v3  ;;  %v7362_v20 = vpack.c.bf16 %v3282_v45, %v3221_v25 }
 0x39e   : > { %7359 = vmatprep.subr.bf16.mxu1 %v7358_v49  ;;  %8977 = vrot.lane.b32.xlu0 %v11122_v27, %s13792_s16  ;;  %v7360_v61 = vpack.c.bf16 %v3160_v50, %v3099_v18  ;;  %v3281_v49 = vsel %vm13834_vm15, %v14218_v30, %v8665_v0  ;;  %v8509_v48 = vunpack.i.l.bf16 %v14217_v39  ;;  %v8529_v0 = vunpack.i.l.bf16 %v14219_v32 }
 0x39f   : > { %8982 = vrot.lane.b32.xlu1 %v11451_v8, %s13792_s16  ;;  %v3403_v9 = vsel %vm13796_vm14, %v8670_v60, %v13787_v11  ;;  %v14220_v45 = vunpack.i.h.bf16 %v11217_v1  ;;  %v8675_v30 = vunpack.i.h.bf16 %v11533_v14  ;;  %v14221_v42 = vunpack.i.h.bf16 %v14217_v39 }
 0x3a0   : > { %v11802_v50 = vpop.permute.xlu0 %2792  ;;  %v11804_v18 = vpop.permute.xlu1 %8742  ;;  %v14223_v1 = vunpack.i.l.bf16 %v11491_v54 }
 0x3a1   : > { %7361 = vmatpush1.bf16.msra.mxu1 %v7360_v61  ;;  %v3220_v25 = vsel %vm675_vm5, %v14220_v45, %v8489_v15  ;;  %v3342_v11 = vsel %vm14222_vm9, %v8509_v48, %v14221_v42 }
 0x3a2   : > { %7363 = vmatprep.subr.bf16.mxu1 %v7362_v20  ;;  %8987 = vrot.lane.b32.xlu0 %v8986_v10, %s14214_s17  ;;  %v7364_v61 = vpack.c.bf16 %v3281_v49, %v3220_v25  ;;  %v3402_v15 = vsel %vm13796_vm14, %v14223_v1, %v8670_v60  ;;  %v7366_v20 = vpack.c.bf16 %v3403_v9, %v3342_v11  ;;  %v14226_v25 = vunpack.i.h.bf16 %v11235_v19 }
 0x3a3   : > { %4672 = vrot.lane.b32.xlu1 %v11191_v57, %s13792_s16  ;;  %v3524_v49 = vsel %vm13821_vm6, %v8675_v30, %v14225_v62  ;;  %s14227_s16 = smov 55   ;;  %v14228_v11 = vunpack.i.h.bf16 %v14219_v32  ;;  %vm14229_vm14 = vcmask 867328   ;;  %v14230_v62 = vunpack.i.l.bf16 %v11533_v14 }
 0x3a4   : > { %v11826_v45 = vpop.permute.xlu0 %8747  ;;  %v11828_v53 = vpop.permute.xlu1 %2913  ;;  %v3341_v42 = vsel %vm14222_vm9, %v14226_v25, %v8509_v48  ;;  %v8549_v48 = vunpack.i.l.bf16 %v11281_v37  ;;  %v14232_v1 = vunpack.i.l.bf16 %v11702_v44  ;;  %vm14234_vm9 = vmmov %vm14229_vm14 }
 0x3a5   : > { %7365 = vmatpush1.bf16.msra.mxu1 %v7364_v61  ;;  %14224 = vst [vmem:[#allocation62_spill] sm:$0xff] %v11828_v53  ;;  %v7368_v54 = vpack.c.bf16 %v3402_v15, %v3341_v42  ;;  %v3463_v9 = vsel %vm14229_vm14, %v8529_v0, %v14228_v11  ;;  %v3523_v19 = vsel %vm13821_vm6, %v14230_v62, %v8675_v30  ;;  %v14235_v30 = vunpack.i.h.bf16 %v11281_v37 }
 0x3a6   : > { %7367 = vmatprep.subr.bf16.mxu1 %v7366_v20  ;;  %8992 = vrot.lane.b32.xlu0 %v8991_v6, %s14227_s16  ;;  %v7370_v60 = vpack.c.bf16 %v3524_v49, %v3463_v9  ;;  %v3645_v15 = vsel %vm13806_vm7, %v8680_v28, %v14232_v1  ;;  %v14233_v20 = vunpack.i.h.bf16 %v11261_v46  ;;  %vm14236_vm14 = vcmask 228352  }
 0x3a7   : > { %8997 = vrot.lane.b32.xlu1 %v11122_v27, %s13801_s15  ;;  %v3584_v49 = vsel %vm14236_vm14, %v8549_v48, %v14235_v30  ;;  %v9011_v42 = vpack.i.bf16 %v11798_v43, %v11323_v35  ;;  %v9021_v37 = vpack.i.bf16 %v11767_v3, %v14208_v5 }
 0x3a8   : > { %v11847_v61 = vpop.permute.xlu0 %3034  ;;  %v11849_v6 = vpop.permute.xlu1 %8752  ;;  %v3462_v25 = vsel %vm14234_vm9, %v14233_v20, %v8529_v0  ;;  %v7374_v11 = vpack.c.bf16 %v3645_v15, %v3584_v49  ;;  %vm14241_vm9 = vmmov %vm14236_vm14  ;;  %v14252_v15 = vld [vmem:[#allocation67_spill] sm:$0xff]  ;;  %vm13820_vm14 = vcmask 80896  }
 0x3a9   : > { %7369 = vmatpush1.bf16.msra.mxu1 %v7368_v54  ;;  %14231 = vst [vmem:[#allocation63_spill] sm:$0xff] %v11847_v61  ;;  %v7372_v14 = vpack.c.bf16 %v3523_v19, %v3462_v25  ;;  %v14237_v54 = vunpack.i.l.bf16 %v11547_v38  ;;  %v8564_v20 = vunpack.i.l.bf16 %v14252_v15  ;;  %v14253_v25 = vld [vmem:[#allocation27_spill] sm:$0xff] }
 0x3aa   : > { %7371 = vmatprep.subr.bf16.mxu1 %v7370_v60  ;;  %9002 = vrot.lane.b32.xlu0 %v11451_v8, %s13801_s15 }
 0x3ab   : > { %9007 = vrot.lane.b32.xlu1 %v8986_v10, %s14227_s16  ;;  %v3644_v46 = vsel %vm13806_vm7, %v14237_v54, %v8680_v28  ;;  %v14240_v10 = vunpack.i.h.bf16 %v11279_v63  ;;  %v8565_v54 = vunpack.i.h.bf16 %v14252_v15 }
 0x3ac   : > { %v11868_v0 = vpop.permute.xlu0 %8757  ;;  %v11870_v9 = vpop.permute.xlu1 %3155 }
 0x3ad   : > { %7373 = vmatpush1.bf16.msra.mxu1 %v7372_v14  ;;  %14238 = vst [vmem:[#allocation66_spill] sm:$0xff] %v11868_v0  ;;  %14239 = vst [vmem:[#allocation79_spill] sm:$0xff] %v11870_v9  ;;  %v3583_v62 = vsel %vm14241_vm9, %v14240_v10, %v8549_v48  ;;  %v8034_v14 = vunpack.i.h.bf16 %v14253_v25  ;;  %vm14254_vm9 = vcmask 220160  }
 0x3ae   : > { %7375 = vmatprep.subr.bf16.mxu1 %v7374_v11  ;;  %4793 = vrot.lane.b32.xlu0 %v11191_v57, %s13801_s15  ;;  %v7376_v35 = vpack.c.bf16 %v3644_v46, %v3583_v62  ;;  %s14249_s15 = smov 46   ;;  %vm14257_vm7 = vmmov %vm14254_vm9 }
 0x3af   : > { %9012 = vrot.lane.b32.xlu1 %v9011_v42, %s14242_s18  ;;  %v3702_v62 = vsel %vm14254_vm9, %v8034_v14, %v8564_v20  ;;  %vm14261_vm9 = vmmov %vm14257_vm7 }
 0x3b0   : > { %v11880_v38 = vpop.permute.xlu0 %3276  ;;  %v11882_v28 = vpop.permute.xlu1 %8762 }
 0x3b1   : > { %7377 = vmatpush1.bf16.msra.mxu1 %v7376_v35  ;;  %14243 = vst [vmem:[#allocation69_spill] sm:$0xff] %v11880_v38  ;;  %14244 = vst [vmem:[#allocation70_spill] sm:$0xff] %v11882_v28  ;;  %v14255_v35 = vld [vmem:[#allocation61_spill] sm:$0xff] }
 0x3b2   : > { %9017 = vrot.lane.b32.xlu0 %v11122_v27, %s13812_s27  ;;  %v8570_v44 = vunpack.i.h.bf16 %v14255_v35 }
 0x3b3   : > { %9022 = vrot.lane.b32.xlu1 %v9021_v37, %s14242_s18 }
 0x3b4   : > { %v11887_v63 = vpop.permute.xlu0 %8767  ;;  %v11889_v19 = vpop.permute.xlu1 %3397 }
 0x3b5   : > { %14245 = vst [vmem:[#allocation74_spill] sm:$0xff] %v11887_v63  ;;  %14246 = vst [vmem:[#allocation75_spill] sm:$0xff] %v11889_v19 }
 0x3b6   : > { %9027 = vrot.lane.b32.xlu0 %v11451_v8, %s13812_s27 }
 0x3b7   : > { %4854 = vrot.lane.b32.xlu1 %v11782_v47, %s14242_s18 }
 0x3b8   : > { %v11895_v5 = vpop.permute.xlu0 %3518  ;;  %v11897_v60 = vpop.permute.xlu1 %8772 }
 0x3b9   : > { %14247 = vst [vmem:[#allocation73_spill] sm:$0xff] %v11895_v5  ;;  %14248 = vst [vmem:[#allocation16_spill] sm:$0xff] %v11897_v60  ;;  %v14256_v5 = vld [vmem:[#allocation64_spill] sm:$0xff] }
 0x3ba   : > { %4914 = vrot.lane.b32.xlu0 %v11191_v57, %s13812_s27  ;;  %v14260_v63 = vunpack.i.l.bf16 %v14256_v5  ;;  %s14263_s27 = smov 45  }
 0x3bb   : > { %9032 = vrot.lane.b32.xlu1 %v9011_v42, %s14249_s15 }
 0x3bc   : > { %v11902_v48 = vpop.permute.xlu0 %8777  ;;  %v11904_v1 = vpop.permute.xlu1 %3639  ;;  %v11932_v9 = vsel %vm14261_vm9, %v8570_v44, %v14260_v63  ;;  %vm14266_vm9 = vmmov %vm14257_vm7 }
 0x3bd   : > { %14250 = vst [vmem:[#allocation17_spill] sm:$0xff] %v11902_v48  ;;  %14251 = vst [vmem:[#allocation25_spill] sm:$0xff] %v11904_v1  ;;  %v8569_v1 = vunpack.i.l.bf16 %v14255_v35 }
 0x3be   : > { %9037 = vrot.lane.b32.xlu0 %v11122_v27, %s13814_s11  ;;  %14262 = vst [vmem:[#allocation43_spill] sm:$0xff] %v11932_v9 }
 0x3bf   : > { %9042 = vrot.lane.b32.xlu1 %v9021_v37, %s14249_s15 }
 0x3c0   : > { %v8783_v30 = vpop.permute.xlu0 %8782  ;;  %v8788_v49 = vpop.permute.xlu1 %8787 }
 0x3c1   : > { %v8785_v46 = vunpack.i.h.bf16 %v8783_v30  ;;  %v8784_v11 = vunpack.i.l.bf16 %v8783_v30  ;;  %v8789_v10 = vunpack.i.l.bf16 %v8788_v49  ;;  %v8790_v15 = vunpack.i.h.bf16 %v8788_v49 }
 0x3c2   : > { %9047 = vrot.lane.b32.xlu0 %v11451_v8, %s13814_s11  ;;  %v3703_v30 = vsel %vm14257_vm7, %v8564_v20, %v8565_v54  ;;  %v3705_v49 = vsel %vm14257_vm7, %v8569_v1, %v8570_v44  ;;  %v5191_v44 = vld [vmem:[%s9863_s12 + $0x10] sm:$0xff]  ;;  %vm13833_vm7 = vcmask 72704  }
 0x3c3   : > { %4975 = vrot.lane.b32.xlu1 %v11782_v47, %s14249_s15  ;;  %v3763_v25 = vsel %vm13820_vm14, %v8784_v11, %v8785_v46  ;;  %v3764_v48 = vsel %vm13820_vm14, %v8785_v46, %v8789_v10  ;;  %v3765_v20 = vsel %vm13820_vm14, %v8789_v10, %v8790_v15  ;;  %v3704_v10 = vsel %vm14266_vm9, %v8565_v54, %v8569_v1 }
 0x3c4   : > { %v11923_v14 = vpop.permute.xlu0 %8792  ;;  %v11925_v38 = vpop.permute.xlu1 %8797  ;;  %v7270_v35 = vpack.c.bf16 %v3764_v48, %v3703_v30  ;;  %v7272_v60 = vpack.c.bf16 %v3763_v25, %v3702_v62  ;;  %v7380_v25 = vpack.c.bf16 %v3765_v20, %v3704_v10  ;;  %v11961_v1 = vpack.i.bf16 %v11798_v43, %v5191_v44  ;;  %v14270_v10 = vld [vmem:[#allocation32_spill] sm:$0xff] }
 0x3c5   : > { %14258 = vst [vmem:[#allocation77_spill] sm:$0xff] %v11923_v14  ;;  %14259 = vst [vmem:[#allocation36_spill] sm:$0xff] %v11925_v38  ;;  %v13816_v19 = vunpack.i.h.bf16 %v11923_v14  ;;  %v8794_v56 = vunpack.i.l.bf16 %v11923_v14  ;;  %vm14271_vm9 = vcmask 211968  }
 0x3c6   : > { %5035 = vrot.lane.b32.xlu0 %v11191_v57, %s13814_s11  ;;  %7271 = vmatprep.subr.bf16.mxu0 %v7270_v35  ;;  %s14269_s11 = smov 44   ;;  %vm14275_vm6 = vmmov %vm14271_vm9 }
 0x3c7   : > { %9052 = vrot.lane.b32.xlu1 %v9011_v42, %s14263_s27  ;;  %v11941_v48 = vsel %vm13820_vm14, %v8794_v56, %v13816_v19  ;;  %v3766_v46 = vsel %vm13820_vm14, %v8790_v15, %v8794_v56  ;;  %7273 = vmatpush1.bf16.msra.mxu0 %v7272_v60  ;;  %v5190_v15 = vld [vmem:[%s9863_s12 + $0x8] sm:$0xff]  ;;  %vm14274_vm14 = vmmov %vm14271_vm9 }
 0x3c8   : > { %14264 = vst [vmem:[#allocation60_spill] sm:$0xff] %v11941_v48  ;;  %v11945_v63 = vpop.permute.xlu0 %3760  ;;  %v8803_v11 = vpop.permute.xlu1 %8802  ;;  %v7378_v62 = vpack.c.bf16 %v3766_v46, %v3705_v49  ;;  %v11971_v43 = vpack.i.bf16 %v11767_v3, %v5190_v15  ;;  %v14273_v3 = vld [vmem:[#allocation33_spill] sm:$0xff] }
 0x3c9   : > { %14265 = vst [vmem:[#allocation67_spill] sm:$0xff] %v11945_v63  ;;  %v8805_v54 = vunpack.i.h.bf16 %v8803_v11  ;;  %v8804_v35 = vunpack.i.l.bf16 %v8803_v11  ;;  %v8084_v15 = vunpack.i.h.bf16 %v14273_v3 }
 0x3ca   : > { %9057 = vrot.lane.b32.xlu0 %v11122_v27, %s13823_s30  ;;  %7379 = vmatprep.subr.bf16.mxu1 %v7378_v62 }
 0x3cb   : > { %9062 = vrot.lane.b32.xlu1 %v9021_v37, %s14263_s27  ;;  %7381 = vmatpush1.bf16.msra.mxu1 %v7380_v25  ;;  %v8059_v25 = vunpack.i.h.bf16 %v14270_v10  ;;  %v3824_v44 = vsel %vm14271_vm9, %v8804_v35, %v8805_v54  ;;  %vm14277_vm9 = vmmov %vm14275_vm6 }
 0x3cc   : > { %v8808_v56 = vpop.permute.xlu0 %8807  ;;  %v11954_v60 = vpop.permute.xlu1 %8812 }
 0x3cd   : > { %14267 = vst [vmem:[#allocation27_spill] sm:$0xff] %v11954_v60  ;;  %v8810_v46 = vunpack.i.h.bf16 %v8808_v56  ;;  %v8809_v62 = vunpack.i.l.bf16 %v8808_v56  ;;  %v3823_v10 = vsel %vm14274_vm14, %v8059_v25, %v8804_v35  ;;  %vm14280_vm14 = vmmov %vm14277_vm9 }
 0x3ce   : > { %9067 = vrot.lane.b32.xlu0 %v11451_v8, %s13823_s30 }
 0x3cf   : > { %5096 = vrot.lane.b32.xlu1 %v11782_v47, %s14263_s27 }
 0x3d0   : > { %v11964_v30 = vpop.permute.xlu0 %8817  ;;  %v8823_v37 = vpop.permute.xlu1 %8822 }
 0x3d1   : > { %14268 = vst [vmem:[#allocation61_spill] sm:$0xff] %v11964_v30  ;;  %v8825_v20 = vunpack.i.h.bf16 %v8823_v37  ;;  %v8824_v49 = vunpack.i.l.bf16 %v8823_v37  ;;  %v3825_v30 = vsel %vm14275_vm6, %v8805_v54, %v8809_v62  ;;  %vm13877_vm6 = vcmask 7168  }
 0x3d2   : > { %5156 = vrot.lane.b32.xlu0 %v11191_v57, %s13823_s30  ;;  %s14276_s30 = smov 27  }
 0x3d3   : > { %9072 = vrot.lane.b32.xlu1 %v11961_v1, %s14269_s11  ;;  %v3885_v42 = vsel %vm13833_vm7, %v8824_v49, %v8825_v20 }
 0x3d4   : > { %v8828_v37 = vpop.permute.xlu0 %8827  ;;  %v11977_v19 = vpop.permute.xlu1 %8832  ;;  %v7274_v56 = vpack.c.bf16 %v3885_v42, %v3824_v44  ;;  %v3826_v42 = vsel %vm14277_vm9, %v8809_v62, %v8810_v46  ;;  %v14279_v62 = vunpack.i.l.bf16 %v11954_v60  ;;  %vm14282_vm9 = vcmask 146432  }
 0x3d5   : > { %14272 = vst [vmem:[#allocation64_spill] sm:$0xff] %v11977_v19  ;;  %v8830_v9 = vunpack.i.h.bf16 %v8828_v37  ;;  %v8829_v48 = vunpack.i.l.bf16 %v8828_v37  ;;  %v13831_v63 = vunpack.i.h.bf16 %v11977_v19  ;;  %v8834_v14 = vunpack.i.l.bf16 %v11977_v19 }
 0x3d6   : > { %9077 = vrot.lane.b32.xlu0 %v11122_v27, %s14276_s30  ;;  %7275 = vmatprep.subr.bf16.mxu0 %v7274_v56  ;;  %v14422_v60 = vunpack.i.h.bf16 %v11148_v13 }
 0x3d7   : > { %9082 = vrot.lane.b32.xlu1 %v11971_v43, %s14269_s11  ;;  %v3884_v44 = vsel %vm13833_vm7, %v8829_v48, %v8824_v49  ;;  %v3886_v37 = vsel %vm13833_vm7, %v8825_v20, %v8830_v9  ;;  %v11994_v3 = vsel %vm13833_vm7, %v8834_v14, %v13831_v63  ;;  %v3887_v54 = vsel %vm13833_vm7, %v8830_v9, %v8834_v14 }
 0x3d8   : > { %14278 = vst [vmem:[#allocation32_spill] sm:$0xff] %v11994_v3  ;;  %v8838_v35 = vpop.permute.xlu0 %8837  ;;  %v8843_v25 = vpop.permute.xlu1 %8842  ;;  %v7276_v11 = vpack.c.bf16 %v3884_v44, %v3823_v10  ;;  %v7382_v38 = vpack.c.bf16 %v3887_v54, %v3826_v42  ;;  %v7384_v22 = vpack.c.bf16 %v3886_v37, %v3825_v30  ;;  %v12000_v48 = vsel %vm14280_vm14, %v8810_v46, %v14279_v62  ;;  %vm14285_vm14 = vmmov %vm14282_vm9 }
 0x3d9   : > { %14281 = vst [vmem:[#allocation33_spill] sm:$0xff] %v12000_v48  ;;  %v8839_v20 = vunpack.i.l.bf16 %v8838_v35  ;;  %v8845_v49 = vunpack.i.h.bf16 %v8843_v25  ;;  %v8844_v19 = vunpack.i.l.bf16 %v8843_v25  ;;  %v8840_v14 = vunpack.i.h.bf16 %v8838_v35  ;;  %v14286_v35 = vld [vmem:[#allocation37_spill] sm:$0xff] }
 0x3da   : > { %9087 = vrot.lane.b32.xlu0 %v11451_v8, %s14276_s30  ;;  %7277 = vmatpush1.bf16.msra.mxu0 %v7276_v11  ;;  %v8109_v25 = vunpack.i.h.bf16 %v14286_v35  ;;  %vm14289_vm7 = vcmask 138240  }
 0x3db   : > { %5216 = vrot.lane.b32.xlu1 %v11782_v47, %s14269_s11  ;;  %7383 = vmatprep.subr.bf16.mxu1 %v7382_v38  ;;  %v3945_v30 = vsel %vm14282_vm9, %v8084_v15, %v8839_v20  ;;  %v4006_v46 = vsel %vm13877_vm6, %v8844_v19, %v8845_v49  ;;  %v3944_v38 = vsel %vm14285_vm14, %v8840_v14, %v8084_v15  ;;  %vm14288_vm14 = vmmov %vm14282_vm9 }
 0x3dc   : > { %7385 = vmatpush1.bf16.msra.mxu1 %v7384_v22  ;;  %v8848_v56 = vpop.permute.xlu0 %8847  ;;  %v12010_v10 = vpop.permute.xlu1 %8852  ;;  %v7278_v42 = vpack.c.bf16 %v4006_v46, %v3945_v30  ;;  %vm14290_vm15 = vmmov %vm14289_vm7 }
 0x3dd   : > { %14283 = vst [vmem:[#allocation80_spill] sm:$0xff] %v12010_v10  ;;  %v8849_v44 = vunpack.i.l.bf16 %v8848_v56  ;;  %v13835_v37 = vunpack.i.h.bf16 %v12010_v10  ;;  %v8850_v54 = vunpack.i.h.bf16 %v8848_v56  ;;  %v8854_v22 = vunpack.i.l.bf16 %v12010_v10 }
 0x3de   : > { %5276 = vrot.lane.b32.xlu0 %v11191_v57, %s14276_s30  ;;  %7279 = vmatprep.subr.bf16.mxu0 %v7278_v42 }
 0x3df   : > { %9092 = vrot.lane.b32.xlu1 %v11961_v1, %s14284_s20  ;;  %v4005_v11 = vsel %vm13877_vm6, %v8849_v44, %v8844_v19  ;;  %v3947_v48 = vsel %vm14282_vm9, %v8854_v22, %v13835_v37  ;;  %v4007_v15 = vsel %vm13877_vm6, %v8845_v49, %v8850_v54  ;;  %v3946_v19 = vsel %vm14288_vm14, %v8839_v20, %v8854_v22 }
 0x3e0   : > { %v12021_v62 = vpop.permute.xlu0 %8857  ;;  %v8863_v30 = vpop.permute.xlu1 %8862  ;;  %v7280_v46 = vpack.c.bf16 %v4005_v11, %v3944_v38  ;;  %v14292_v11 = vld [vmem:[#allocation21_spill] sm:$0xff]  ;;  %vm14296_vm9 = vcmask 130048  }
 0x3e1   : > { %14287 = vst [vmem:[#allocation37_spill] sm:$0xff] %v12021_v62  ;;  %v13837_v56 = vunpack.i.l.bf16 %v12021_v62  ;;  %v8865_v9 = vunpack.i.h.bf16 %v8863_v30  ;;  %v8864_v63 = vunpack.i.l.bf16 %v8863_v30  ;;  %vm14298_vm14 = vmmov %vm14296_vm9 }
 0x3e2   : > { %9097 = vrot.lane.b32.xlu0 %v11122_v27, %s13838_s1  ;;  %7281 = vmatpush1.bf16.msra.mxu0 %v7280_v46 }
 0x3e3   : > { %9102 = vrot.lane.b32.xlu1 %v11971_v43, %s14284_s20  ;;  %v4065_v14 = vsel %vm14289_vm7, %v8865_v9, %v8109_v25  ;;  %v4066_v42 = vsel %vm14290_vm15, %v8109_v25, %v8864_v63  ;;  %v4008_v44 = vsel %vm13877_vm6, %v8850_v54, %v13837_v56  ;;  %v7388_v54 = vpack.c.bf16 %v4007_v15, %v3946_v19  ;;  %vm14293_vm15 = vmmov %vm14289_vm7 }
 0x3e4   : > { %v12038_v38 = vpop.permute.xlu0 %8867  ;;  %v8873_v49 = vpop.permute.xlu1 %8872  ;;  %v7282_v35 = vpack.c.bf16 %v14292_v11, %v4066_v42  ;;  %v7386_v30 = vpack.c.bf16 %v4008_v44, %v3947_v48  ;;  %v7284_v37 = vpack.c.bf16 %v11072_v52, %v4065_v14  ;;  %v14294_v48 = vld [vmem:[#allocation39_spill] sm:$0xff]  ;;  %v14295_v11 = vld [vmem:[#allocation28_spill] sm:$0xff] }
 0x3e5   : > { %14291 = vst [vmem:[#allocation81_spill] sm:$0xff] %v12038_v38  ;;  %v13841_v3 = vunpack.i.h.bf16 %v12038_v38  ;;  %v8869_v20 = vunpack.i.l.bf16 %v12038_v38  ;;  %v8875_v9 = vunpack.i.h.bf16 %v8873_v49  ;;  %v8874_v25 = vunpack.i.l.bf16 %v8873_v49 }
 0x3e6   : > { %9107 = vrot.lane.b32.xlu0 %v11451_v8, %s13838_s1  ;;  %7283 = vmatprep.subr.bf16.mxu0 %v7282_v35  ;;  %v8134_v46 = vunpack.i.h.bf16 %v14294_v48 }
 0x3e7   : > { %5336 = vrot.lane.b32.xlu1 %v11782_v47, %s14284_s20  ;;  %v4067_v22 = vsel %vm14293_vm15, %v8864_v63, %v8869_v20  ;;  %7387 = vmatprep.subr.bf16.mxu1 %v7386_v30  ;;  %v4068_v52 = vsel %vm14289_vm7, %v8869_v20, %v13841_v3  ;;  %vm14301_vm15 = vmmov %vm14296_vm9 }
 0x3e8   : > { %7285 = vmatpush1.bf16.msra.mxu0 %v7284_v37  ;;  %7389 = vmatpush1.bf16.msra.mxu1 %v7388_v54  ;;  %v8878_v14 = vpop.permute.xlu0 %8877  ;;  %v8883_v42 = vpop.permute.xlu1 %8882  ;;  %v7390_v44 = vpack.c.bf16 %v11189_v17, %v4068_v52  ;;  %v7392_v56 = vpack.c.bf16 %v14295_v11, %v4067_v22  ;;  %v4141_v49 = vsel %vm14296_vm9, %v8875_v9, %v8134_v46  ;;  %vm14302_vm7 = vmmov %vm14296_vm9  ;;  %vm13864_vm9 = vcmask 973824  }
 0x3e9   : > { %v8880_v15 = vunpack.i.h.bf16 %v8878_v14  ;;  %v8879_v19 = vunpack.i.l.bf16 %v8878_v14  ;;  %v8884_v63 = vunpack.i.l.bf16 %v8883_v42  ;;  %v8885_v35 = vunpack.i.h.bf16 %v8883_v42 }
 0x3ea   : > { %5396 = vrot.lane.b32.xlu0 %v11191_v57, %s13838_s1  ;;  %7391 = vmatprep.subr.bf16.mxu1 %v7390_v44  ;;  %v4142_v30 = vsel %vm14298_vm14, %v8134_v46, %v8874_v25  ;;  %vm14304_vm14 = vcmask 64512   ;;  %s14306_s1 = smov 34  }
 0x3eb   : > { %9112 = vrot.lane.b32.xlu1 %v11961_v1, %s14297_s2  ;;  %v4201_v37 = vsel %vm370_vm0, %v8884_v63, %v8879_v19  ;;  %v4202_v17 = vsel %vm370_vm0, %v8879_v19, %v8880_v15 }
 0x3ec   : > { %7393 = vmatpush1.bf16.msra.mxu1 %v7392_v56  ;;  %v12063_v20 = vpop.permute.xlu0 %8887  ;;  %v12065_v54 = vpop.permute.xlu1 %8892  ;;  %v7286_v9 = vpack.c.bf16 %v4202_v17, %v4142_v30  ;;  %v7288_v22 = vpack.c.bf16 %v4201_v37, %v4141_v49  ;;  %v4203_v56 = vsel %vm370_vm0, %v8880_v15, %v8885_v35  ;;  %v14303_v37 = vld [vmem:[#allocation42_spill] sm:$0xff] }
 0x3ed   : > { %14299 = vst [vmem:[#allocation21_spill] sm:$0xff] %v12063_v20  ;;  %14300 = vst [vmem:[#allocation39_spill] sm:$0xff] %v12065_v54  ;;  %v13840_v52 = vunpack.i.h.bf16 %v12063_v20  ;;  %v8889_v48 = vunpack.i.l.bf16 %v12063_v20  ;;  %v13842_v14 = vunpack.i.l.bf16 %v12065_v54  ;;  %v8159_v30 = vunpack.i.h.bf16 %v14303_v37 }
 0x3ee   : > { %9117 = vrot.lane.b32.xlu0 %v11122_v27, %s14166_s14  ;;  %7287 = vmatprep.subr.bf16.mxu0 %v7286_v9  ;;  %v14411_v54 = vunpack.i.h.bf16 %v11130_v16  ;;  %v14417_v16 = vld [vmem:[#allocation46_spill] sm:$0xff] }
 0x3ef   : > { %9122 = vrot.lane.b32.xlu1 %v11971_v43, %s14297_s2  ;;  %v4143_v46 = vsel %vm14301_vm15, %v8874_v25, %v8889_v48  ;;  %v4144_v42 = vsel %vm14302_vm7, %v8889_v48, %v13840_v52  ;;  %v4204_v44 = vsel %vm370_vm0, %v8885_v35, %v13842_v14  ;;  %7289 = vmatpush1.bf16.msra.mxu0 %v7288_v22  ;;  %vm14307_vm15 = vmmov %vm14304_vm14 }
 0x3f0   : > { %v8898_v11 = vpop.permute.xlu0 %8897  ;;  %v8903_v19 = vpop.permute.xlu1 %8902  ;;  %v7394_v63 = vpack.c.bf16 %v4204_v44, %v4144_v42  ;;  %v7396_v49 = vpack.c.bf16 %v4203_v56, %v4143_v46  ;;  %v9131_v46 = vpack.i.bf16 %v11782_v47, %v11191_v57  ;;  %vm14309_vm7 = vmmov %vm14304_vm14 }
 0x3f1   : > { %v8899_v15 = vunpack.i.l.bf16 %v8898_v11  ;;  %v8905_v17 = vunpack.i.h.bf16 %v8903_v19  ;;  %v8904_v25 = vunpack.i.l.bf16 %v8903_v19  ;;  %v8900_v9 = vunpack.i.h.bf16 %v8898_v11 }
 0x3f2   : > { %9127 = vrot.lane.b32.xlu0 %v11451_v8, %s14166_s14  ;;  %7395 = vmatprep.subr.bf16.mxu1 %v7394_v63 }
 0x3f3   : > { %5457 = vrot.lane.b32.xlu1 %v11782_v47, %s14297_s2  ;;  %v4262_v35 = vsel %vm14304_vm14, %v8159_v30, %v8899_v15  ;;  %v4323_v22 = vsel %vm13864_vm9, %v8904_v25, %v8905_v17  ;;  %7397 = vmatpush1.bf16.msra.mxu1 %v7396_v49  ;;  %v4261_v11 = vsel %vm14307_vm15, %v8900_v9, %v8159_v30  ;;  %vm14310_vm14 = vmmov %vm14309_vm7  ;;  %vm14312_vm15 = vcmask 56320  }
 0x3f4   : > { %v8908_v48 = vpop.permute.xlu0 %8907  ;;  %v12089_v56 = vpop.permute.xlu1 %8912  ;;  %v7290_v42 = vpack.c.bf16 %v4323_v22, %v4262_v35 }
 0x3f5   : > { %14305 = vst [vmem:[#allocation28_spill] sm:$0xff] %v12089_v56  ;;  %v8909_v44 = vunpack.i.l.bf16 %v8908_v48  ;;  %v13844_v19 = vunpack.i.h.bf16 %v12089_v56  ;;  %v8910_v63 = vunpack.i.h.bf16 %v8908_v48  ;;  %v8914_v37 = vunpack.i.l.bf16 %v12089_v56  ;;  %v14311_v48 = vld [vmem:[#allocation44_spill] sm:$0xff] }
 0x3f6   : > { %9132 = vrot.lane.b32.xlu0 %v9131_v46, %s14166_s14  ;;  %7291 = vmatprep.subr.bf16.mxu0 %v7290_v42  ;;  %v8184_v42 = vunpack.i.h.bf16 %v14311_v48 }
 0x3f7   : > { %9137 = vrot.lane.b32.xlu1 %v11961_v1, %s14306_s1  ;;  %v4322_v49 = vsel %vm13864_vm9, %v8909_v44, %v8904_v25  ;;  %v4264_v14 = vsel %vm14309_vm7, %v8914_v37, %v13844_v19  ;;  %v4324_v1 = vsel %vm13864_vm9, %v8905_v17, %v8910_v63  ;;  %v4263_v30 = vsel %vm14310_vm14, %v8899_v15, %v8914_v37  ;;  %vm14313_vm7 = vmmov %vm14312_vm15 }
 0x3f8   : > { %v12100_v52 = vpop.permute.xlu0 %8917  ;;  %v8923_v3 = vpop.permute.xlu1 %8922  ;;  %v7292_v35 = vpack.c.bf16 %v4322_v49, %v4261_v11  ;;  %v7400_v15 = vpack.c.bf16 %v4324_v1, %v4263_v30  ;;  %vm13863_vm14 = vcmask 392192  }
 0x3f9   : > { %14308 = vst [vmem:[#allocation42_spill] sm:$0xff] %v12100_v52  ;;  %v13845_v22 = vunpack.i.l.bf16 %v12100_v52  ;;  %v8925_v20 = vunpack.i.h.bf16 %v8923_v3  ;;  %v8924_v25 = vunpack.i.l.bf16 %v8923_v3 }
 0x3fa   : > { %9142 = vrot.lane.b32.xlu0 %v11122_v27, %s14169_s13  ;;  %7293 = vmatpush1.bf16.msra.mxu0 %v7292_v35  ;;  %v6105_v27 = vcombine.high %v11595_v58, %v11595_v58 }
 0x3fb   : > { %9147 = vrot.lane.b32.xlu1 %v11971_v43, %s14306_s1  ;;  %v4325_v9 = vsel %vm13864_vm9, %v8910_v63, %v13845_v22  ;;  %v4382_v3 = vsel %vm14312_vm15, %v8925_v20, %v8184_v42  ;;  %v4383_v58 = vsel %vm14313_vm7, %v8184_v42, %v8924_v25  ;;  %v12131_v20 = vld [vmem:[%s9863_s12 + $0x30] sm:$0xff]  ;;  %vm14319_vm15 = vmmov %vm14313_vm7  ;;  %vm13873_vm9 = vcmask 310272  }
 0x3fc   : > { %v8928_v44 = vpop.permute.xlu0 %8927  ;;  %v8933_v11 = vpop.permute.xlu1 %8932  ;;  %v7398_v49 = vpack.c.bf16 %v4325_v9, %v4264_v14  ;;  %v12124_v63 = vrot.slane %v6105_v27, %v11610_v29 }
 0x3fd   : > { %v8930_v43 = vunpack.i.h.bf16 %v8928_v44  ;;  %v8929_v17 = vunpack.i.l.bf16 %v8928_v44  ;;  %v8934_v19 = vunpack.i.l.bf16 %v8933_v11  ;;  %v8935_v14 = vunpack.i.h.bf16 %v8933_v11  ;;  %6193 = vmatmul.mubr.f32.vlgmr.msra.gmra.mrb[4].mxu0 %v11624_v4 }
 0x3fe   : > { %9152 = vrot.lane.b32.xlu0 %v11451_v8, %s14169_s13  ;;  %7399 = vmatprep.subr.bf16.mxu1 %v7398_v49  ;;  %v12134_v8 = vld [vmem:[%s9863_s12 + $0x38] sm:$0xff]  ;;  %v12145_v11 = vcombine.high %v12124_v63, %v12124_v63 }
 0x3ff   : > { %5577 = vrot.lane.b32.xlu1 %v11782_v47, %s14306_s1  ;;  %v4442_v37 = vsel %vm492_vm2, %v8934_v19, %v8929_v17  ;;  %v4443_v35 = vsel %vm492_vm2, %v8929_v17, %v8930_v43  ;;  %7401 = vmatpush1.bf16.msra.mxu1 %v7400_v15  ;;  %v14318_v49 = vld [vmem:[#allocation40_spill] sm:$0xff]  ;;  %v12152_v27 = vpack.i.bf16 %v12134_v8, %v12131_v20 }
 0x400   : > { %v12136_v9 = vpop.permute.xlu0 %8937  ;;  %v12138_v1 = vpop.permute.xlu1 %8942  ;;  %v7294_v30 = vpack.c.bf16 %v4443_v35, %v4383_v58  ;;  %v7296_v48 = vpack.c.bf16 %v4442_v37, %v4382_v3  ;;  %14316 = vst [vmem:[#allocation83_spill] sm:$0xff] %v12145_v11  ;;  %v4444_v17 = vsel %vm492_vm2, %v8930_v43, %v8935_v14  ;;  %v14320_v43 = vld [vmem:[#allocation49_spill] sm:$0xff]  ;;  %7012 = vmatprep.mubr.msk.f32.mxu0 %vm13863_vm14, %v12145_v11 }
 0x401   : > { %14314 = vst [vmem:[#allocation44_spill] sm:$0xff] %v12136_v9  ;;  %14315 = vst [vmem:[#allocation82_spill] sm:$0xff] %v12138_v1  ;;  %v13849_v19 = vunpack.i.h.bf16 %v12136_v9  ;;  %v8939_v44 = vunpack.i.l.bf16 %v12136_v9  ;;  %v13850_v42 = vunpack.i.l.bf16 %v12138_v1  ;;  %v8209_v29 = vunpack.i.h.bf16 %v14320_v43 }
 0x402   : > { %9157 = vrot.lane.b32.xlu0 %v9131_v46, %s14169_s13  ;;  %7295 = vmatprep.subr.bf16.mxu0 %v7294_v30 }
 0x403   : > { %9162 = vrot.lane.b32.xlu1 %v14318_v49, %s14317_s3  ;;  %v4384_v3 = vsel %vm14319_vm15, %v8924_v25, %v8939_v44  ;;  %v4385_v15 = vsel %vm14313_vm7, %v8939_v44, %v13849_v19  ;;  %v4445_v46 = vsel %vm492_vm2, %v8935_v14, %v13850_v42  ;;  %7297 = vmatpush1.bf16.msra.mxu0 %v7296_v48  ;;  %v14321_v14 = vld [vmem:[#allocation35_spill] sm:$0xff]  ;;  %vm14322_vm15 = vcmask 48128  }
 0x404   : > { %v8948_v37 = vpop.permute.xlu0 %8947  ;;  %v7402_v35 = vpack.c.bf16 %v4445_v46, %v4385_v15  ;;  %6335 = vmatmul.mubr.f32.vlgmr.msra.gmra.mrb[4].mxu1 %v11624_v4  ;;  %v7404_v22 = vpack.c.bf16 %v4444_v17, %v4384_v3  ;;  %v12173_v44 = vld [vmem:[%s9863_s12 + $0x40] sm:$0xff]  ;;  %vm14325_vm7 = vmmov %vm14322_vm15 }
 0x405   : > { %v8953_v58 = vpop.permute.xlu1 %8952  ;;  %v8949_v25 = vunpack.i.l.bf16 %v8948_v37  ;;  %7013 = vmatprep.mubr.msk.f32.mxu1 %vm13863_vm14, %v12145_v11  ;;  %v8950_v48 = vunpack.i.h.bf16 %v8948_v37  ;;  %vm14330_vm14 = vcmask 457728  }
 0x406   : > { %v8955_v30 = vunpack.i.h.bf16 %v8953_v58  ;;  %v8954_v56 = vunpack.i.l.bf16 %v8953_v58  ;;  %3881 = vrot.lane.b32.xlu0 %v14321_v14, %s14317_s3  ;;  %7403 = vmatprep.subr.bf16.mxu1 %v7402_v35  ;;  %s14324_s3 = smov 1  }
 0x407   : > { %9167 = vrot.lane.b32.xlu1 %v12152_v27, %s14166_s14  ;;  %v4503_v17 = vsel %vm14322_vm15, %v8209_v29, %v8949_v25  ;;  %7405 = vmatpush1.bf16.msra.mxu1 %v7404_v22  ;;  %v4502_v37 = vsel %vm14325_vm7, %v8950_v48, %v8209_v29  ;;  %vm14328_vm15 = vmmov %vm14325_vm7  ;;  %v9181_v29 = vpack.i.bf16 %v12131_v20, %v11782_v47 }
 0x408   : > { %v4563_v3 = vsel %vm553_vm3, %v8954_v56, %v8955_v30  ;;  %v8958_v15 = vpop.permute.xlu0 %8957 }
 0x409   : > { %v12177_v46 = vpop.permute.xlu1 %8962  ;;  %v7298_v58 = vpack.c.bf16 %v4563_v3, %v4503_v17  ;;  %v8959_v43 = vunpack.i.l.bf16 %v8958_v15  ;;  %v8960_v35 = vunpack.i.h.bf16 %v8958_v15  ;;  %v14329_v15 = vld [vmem:[#allocation51_spill] sm:$0xff] }
 0x40a   : > { %14323 = vst [vmem:[#allocation40_spill] sm:$0xff] %v12177_v46  ;;  %9172 = vrot.lane.b32.xlu0 %v14318_v49, %s14324_s3  ;;  %v8964_v22 = vunpack.i.l.bf16 %v12177_v46  ;;  %v14327_v4 = vunpack.i.h.bf16 %v12177_v46 }
 0x40b   : > { %3942 = vrot.lane.b32.xlu1 %v12173_v44, %s14166_s14  ;;  %v4562_v42 = vsel %vm553_vm3, %v8959_v43, %v8954_v56  ;;  %7299 = vmatprep.subr.bf16.mxu0 %v7298_v58  ;;  %v4564_v56 = vsel %vm553_vm3, %v8955_v30, %v8960_v35  ;;  %v8234_v58 = vunpack.i.h.bf16 %v14329_v15  ;;  %v12211_v30 = vpack.i.bf16 %v12173_v44, %v12134_v8 }
 0x40c   : > { %v12187_v11 = vpop.permute.xlu0 %8967  ;;  %v7300_v3 = vpack.c.bf16 %v4562_v42, %v4502_v37  ;;  %v4505_v9 = vsel %vm14328_vm15, %v8964_v22, %v14327_v4  ;;  %v4504_v42 = vsel %vm14325_vm7, %v8949_v25, %v8964_v22  ;;  %vm13866_vm15 = vcmask 318464   ;;  %vm14331_vm7 = vmmov %vm14330_vm14 }
 0x40d   : > { %14326 = vst [vmem:[#allocation49_spill] sm:$0xff] %v12187_v11  ;;  %v8973_v17 = vpop.permute.xlu1 %8972  ;;  %v13865_v19 = vunpack.i.l.bf16 %v12187_v11  ;;  %v7408_v25 = vpack.c.bf16 %v4564_v56, %v4504_v42 }
 0x40e   : > { %v8975_v57 = vunpack.i.h.bf16 %v8973_v17  ;;  %4002 = vrot.lane.b32.xlu0 %v14321_v14, %s14324_s3  ;;  %v8974_v48 = vunpack.i.l.bf16 %v8973_v17  ;;  %7301 = vmatpush1.bf16.msra.mxu0 %v7300_v3  ;;  %s14335_s3 = smov 127  }
 0x40f   : > { %9177 = vrot.lane.b32.xlu1 %v12152_v27, %s14169_s13  ;;  %v4565_v4 = vsel %vm553_vm3, %v8960_v35, %v13865_v19 }
 0x410   : > { %v8978_v43 = vpop.permute.xlu0 %8977  ;;  %v7406_v46 = vpack.c.bf16 %v4565_v4, %v4505_v9  ;;  %v4622_v47 = vsel %vm14330_vm14, %v8975_v57, %v8234_v58  ;;  %v4623_v9 = vsel %vm14331_vm7, %v8234_v58, %v8974_v48  ;;  %vm14336_vm14 = vmmov %vm14331_vm7 }
 0x411   : > { %v8983_v37 = vpop.permute.xlu1 %8982  ;;  %v8980_v38 = vunpack.i.h.bf16 %v8978_v43  ;;  %v8979_v10 = vunpack.i.l.bf16 %v8978_v43 }
 0x412   : > { %v8984_v1 = vunpack.i.l.bf16 %v8983_v37  ;;  %4063 = vrot.lane.b32.xlu0 %v12173_v44, %s14169_s13  ;;  %v8985_v35 = vunpack.i.h.bf16 %v8983_v37  ;;  %7407 = vmatprep.subr.bf16.mxu1 %v7406_v46  ;;  %v12227_v46 = vld [vmem:[%s9863_s12 + $0x28] sm:$0xff] }
 0x413   : > { %9182 = vrot.lane.b32.xlu1 %v9181_v29, %s14170_s29  ;;  %v4684_v17 = vsel %vm13866_vm15, %v8979_v10, %v8980_v38  ;;  %7409 = vmatpush1.bf16.msra.mxu1 %v7408_v25  ;;  %v14334_v29 = vld [vmem:[#allocation53_spill] sm:$0xff] }
 0x414   : > { %v4683_v22 = vsel %vm13866_vm15, %v8984_v1, %v8979_v10  ;;  %v12216_v57 = vpop.permute.xlu0 %8987  ;;  %v12222_v56 = vpack.i.bf16 %v14321_v14, %v14334_v29  ;;  %v7302_v42 = vpack.c.bf16 %v4684_v17, %v4623_v9  ;;  %v12235_v10 = vpack.i.bf16 %v12131_v20, %v12227_v46  ;;  %v14337_v20 = vld [vmem:[#allocation57_spill] sm:$0xff] }
 0x415   : > { %14332 = vst [vmem:[#allocation51_spill] sm:$0xff] %v12216_v57  ;;  %v12218_v3 = vpop.permute.xlu1 %4672  ;;  %v7304_v8 = vpack.c.bf16 %v4683_v22, %v4622_v47  ;;  %v13867_v4 = vunpack.i.h.bf16 %v12216_v57  ;;  %v8989_v1 = vunpack.i.l.bf16 %v12216_v57  ;;  %v4685_v15 = vsel %vm13866_vm15, %v8980_v38, %v8985_v35 }
 0x416   : > { %14333 = vst [vmem:[#allocation84_spill] sm:$0xff] %v12218_v3  ;;  %9187 = vrot.lane.b32.xlu0 %v12222_v56, %s14335_s3  ;;  %v4686_v43 = vsel %vm13866_vm15, %v8985_v35, %v12218_v3  ;;  %7303 = vmatprep.subr.bf16.mxu0 %v7302_v42  ;;  %v8259_v17 = vunpack.i.h.bf16 %v14337_v20 }
 0x417   : > { %9192 = vrot.lane.b32.xlu1 %v12211_v30, %s14170_s29  ;;  %v4624_v58 = vsel %vm14336_vm14, %v8974_v48, %v8989_v1  ;;  %v4625_v37 = vsel %vm14331_vm7, %v8989_v1, %v13867_v4  ;;  %7305 = vmatpush1.bf16.msra.mxu0 %v7304_v8  ;;  %v14338_v48 = vmov 0.0   ;;  %vm14339_vm14 = vcmask 449536   ;;  %s14341_s29 = smov 119  }
 0x418   : > { %v8993_v47 = vpop.permute.xlu0 %8992  ;;  %v7410_v22 = vpack.c.bf16 %v4686_v43, %v4625_v37  ;;  %v7412_v9 = vpack.c.bf16 %v4685_v15, %v4624_v58  ;;  %vm14342_vm7 = vmmov %vm14339_vm14 }
 0x419   : > { %v8998_v25 = vpop.permute.xlu1 %8997  ;;  %v8994_v19 = vunpack.i.l.bf16 %v8993_v47  ;;  %v8995_v35 = vunpack.i.h.bf16 %v8993_v47  ;;  %vm14344_vm15 = vmmov %vm14342_vm7 }
 0x41a   : > { %v9000_v38 = vunpack.i.h.bf16 %v8998_v25  ;;  %v8999_v29 = vunpack.i.l.bf16 %v8998_v25  ;;  %4199 = vrot.lane.b32.xlu0 %v14338_v48, %s14335_s3  ;;  %7411 = vmatprep.subr.bf16.mxu1 %v7410_v22  ;;  %s9640_s3 = smov [#allocation11]  }
 0x41b   : > { %9197 = vrot.lane.b32.xlu1 %v12235_v10, %s14176_s7  ;;  %v4744_v42 = vsel %vm14339_vm14, %v8259_v17, %v8994_v19  ;;  %7413 = vmatpush1.bf16.msra.mxu1 %v7412_v9  ;;  %v4743_v47 = vsel %vm14342_vm7, %v8995_v35, %v8259_v17  ;;  %vm14343_vm14 = vmmov %vm14342_vm7  ;;  %vm14346_vm7 = vcmask 441344  }
 0x41c   : > { %v4805_v8 = vsel %vm13873_vm9, %v8999_v29, %v9000_v38  ;;  %v9003_v1 = vpop.permute.xlu0 %9002 }
 0x41d   : > { %v12251_v15 = vpop.permute.xlu1 %9007  ;;  %v7306_v58 = vpack.c.bf16 %v4805_v8, %v4744_v42  ;;  %v9005_v43 = vunpack.i.h.bf16 %v9003_v1  ;;  %v9004_v37 = vunpack.i.l.bf16 %v9003_v1 }
 0x41e   : > { %14340 = vst [vmem:[#allocation57_spill] sm:$0xff] %v12251_v15  ;;  %v13872_v25 = vunpack.i.h.bf16 %v12251_v15  ;;  %v9009_v20 = vunpack.i.l.bf16 %v12251_v15  ;;  %9202 = vrot.lane.b32.xlu0 %v12222_v56, %s14341_s29 }
 0x41f   : > { %9207 = vrot.lane.b32.xlu1 %v12211_v30, %s14176_s7  ;;  %v4804_v22 = vsel %vm13873_vm9, %v9004_v37, %v8999_v29  ;;  %7307 = vmatprep.subr.bf16.mxu0 %v7306_v58  ;;  %v4806_v42 = vsel %vm13873_vm9, %v9000_v38, %v9005_v43  ;;  %s14347_s7 = smov 118  }
 0x420   : > { %v4746_v9 = vsel %vm14343_vm14, %v9009_v20, %v13872_v25  ;;  %v4745_v8 = vsel %vm14344_vm15, %v8994_v19, %v9009_v20  ;;  %v12266_v1 = vpop.permute.xlu0 %4793  ;;  %v7308_v3 = vpack.c.bf16 %v4804_v22, %v4743_v47  ;;  %vm13875_vm15 = vcmask 302080   ;;  %vm14349_vm14 = vmmov %vm14346_vm7 }
 0x421   : > { %14345 = vst [vmem:[#allocation85_spill] sm:$0xff] %v12266_v1  ;;  %v9013_v4 = vpop.permute.xlu1 %9012  ;;  %v4807_v57 = vsel %vm13873_vm9, %v9005_v43, %v12266_v1  ;;  %v7416_v38 = vpack.c.bf16 %v4806_v42, %v4745_v8  ;;  %vm14351_vm9 = vmmov %vm14346_vm7 }
 0x422   : > { %v9015_v11 = vunpack.i.h.bf16 %v9013_v4  ;;  %v9014_v17 = vunpack.i.l.bf16 %v9013_v4  ;;  %4319 = vrot.lane.b32.xlu0 %v14338_v48, %s14341_s29  ;;  %v7414_v29 = vpack.c.bf16 %v4807_v57, %v4746_v9  ;;  %7309 = vmatpush1.bf16.msra.mxu0 %v7308_v3  ;;  %s9517_s29 = sshll.u32 %s9640_s3, 4  ;;  %s9518_s29 = int_to_ptr.vmem [resolvable:$false] %s9517_s29 }
 0x423   : > { %9212 = vrot.lane.b32.xlu1 %v12235_v10, %s14183_s26 }
 0x424   : > { %v9018_v35 = vpop.permute.xlu0 %9017  ;;  %7415 = vmatprep.subr.bf16.mxu1 %v7414_v29  ;;  %v4865_v43 = vsel %vm14346_vm7, %v9014_v17, %v9015_v11 }
 0x425   : > { %v9023_v19 = vpop.permute.xlu1 %9022  ;;  %v9020_v58 = vunpack.i.h.bf16 %v9018_v35  ;;  %v9019_v37 = vunpack.i.l.bf16 %v9018_v35  ;;  %7417 = vmatpush1.bf16.msra.mxu1 %v7416_v38 }
 0x426   : > { %9217 = vrot.lane.b32.xlu0 %v12222_v56, %s14347_s7  ;;  %v9024_v4 = vunpack.i.l.bf16 %v9023_v19  ;;  %v9025_v42 = vunpack.i.h.bf16 %v9023_v19 }
 0x427   : > { %9222 = vrot.lane.b32.xlu1 %v12211_v30, %s14183_s26  ;;  %v4926_v57 = vsel %vm13875_vm15, %v9019_v37, %v9020_v58  ;;  %s14352_s26 = smov 117  }
 0x428   : > { %v9028_v3 = vpop.permute.xlu0 %9027  ;;  %v7310_v47 = vpack.c.bf16 %v4926_v57, %v4865_v43  ;;  %v4864_v8 = vsel %vm14349_vm14, %v9024_v4, %v9014_v17  ;;  %v4866_v17 = vsel %vm14351_vm9, %v9015_v11, %v9025_v42  ;;  %v4594_v4 = vld [vmem:[%s9863_s12 + $0x48] sm:$0xff]  ;;  %vm13874_vm14 = vcmask 236544  }
 0x429   : > { %v12280_v20 = vpop.permute.xlu1 %4854  ;;  %v9030_v22 = vunpack.i.h.bf16 %v9028_v3  ;;  %v9029_v9 = vunpack.i.l.bf16 %v9028_v3  ;;  %v12307_v11 = vpack.i.bf16 %v4594_v4, %v12173_v44 }
 0x42a   : > { %14348 = vst [vmem:[#allocation86_spill] sm:$0xff] %v12280_v20  ;;  %4440 = vrot.lane.b32.xlu0 %v14338_v48, %s14347_s7  ;;  %7311 = vmatprep.subr.bf16.mxu0 %v7310_v47  ;;  %v4867_v19 = vsel %vm14346_vm7, %v9025_v42, %v12280_v20  ;;  %vm14353_vm7 = vcmask 375808   ;;  %s9519_s7 = scalar_lea.vmem %s9518_s29, 512 }
 0x42b   : > { %9227 = vrot.lane.b32.xlu1 %v12235_v10, %s14202_s19  ;;  %v4925_v29 = vsel %vm13875_vm15, %v9029_v9, %v9019_v37  ;;  %v4927_v38 = vsel %vm13875_vm15, %v9020_v58, %v9030_v22  ;;  %vm14356_vm9 = vmmov %vm14353_vm7 }
 0x42c   : > { %v12289_v35 = vpop.permute.xlu0 %4914  ;;  %v7312_v57 = vpack.c.bf16 %v4925_v29, %v4864_v8  ;;  %v7420_v37 = vpack.c.bf16 %v4927_v38, %v4866_v17 }
 0x42d   : > { %14350 = vst [vmem:[#allocation87_spill] sm:$0xff] %v12289_v35  ;;  %v9033_v43 = vpop.permute.xlu1 %9032  ;;  %v4928_v3 = vsel %vm13875_vm15, %v9030_v22, %v12289_v35 }
 0x42e   : > { %v9035_v25 = vunpack.i.h.bf16 %v9033_v43  ;;  %v9034_v10 = vunpack.i.l.bf16 %v9033_v43  ;;  %9232 = vrot.lane.b32.xlu0 %v12222_v56, %s14352_s26  ;;  %v7418_v58 = vpack.c.bf16 %v4928_v3, %v4867_v19  ;;  %7313 = vmatpush1.bf16.msra.mxu0 %v7312_v57 }
 0x42f   : > { %9237 = vrot.lane.b32.xlu1 %v12211_v30, %s14202_s19  ;;  %s14355_s19 = smov 39  }
 0x430   : > { %v9038_v47 = vpop.permute.xlu0 %9037  ;;  %7419 = vmatprep.subr.bf16.mxu1 %v7418_v58  ;;  %v4986_v29 = vsel %vm14353_vm7, %v9034_v10, %v9035_v25 }
 0x431   : > { %v9043_v9 = vpop.permute.xlu1 %9042  ;;  %v9040_v8 = vunpack.i.h.bf16 %v9038_v47  ;;  %v9039_v22 = vunpack.i.l.bf16 %v9038_v47  ;;  %7421 = vmatpush1.bf16.msra.mxu1 %v7420_v37 }
 0x432   : > { %4560 = vrot.lane.b32.xlu0 %v14338_v48, %s14352_s26  ;;  %v9044_v30 = vunpack.i.l.bf16 %v9043_v9  ;;  %v9045_v3 = vunpack.i.h.bf16 %v9043_v9  ;;  %v12323_v9 = vpack.i.bf16 %v14338_v48, %v14321_v14 }
 0x433   : > { %9242 = vrot.lane.b32.xlu1 %v12152_v27, %s14214_s17  ;;  %v5047_v56 = vsel %vm13874_vm14, %v9039_v22, %v9040_v8 }
 0x434   : > { %v9048_v42 = vpop.permute.xlu0 %9047  ;;  %v7314_v43 = vpack.c.bf16 %v5047_v56, %v4986_v29  ;;  %v4985_v17 = vsel %vm14356_vm9, %v9044_v30, %v9034_v10  ;;  %vm14358_vm9 = vmmov %vm14353_vm7 }
 0x435   : > { %v12310_v38 = vpop.permute.xlu1 %4975  ;;  %v9050_v57 = vunpack.i.h.bf16 %v9048_v42  ;;  %v9049_v19 = vunpack.i.l.bf16 %v9048_v42 }
 0x436   : > { %14354 = vst [vmem:[#allocation88_spill] sm:$0xff] %v12310_v38  ;;  %9247 = vrot.lane.b32.xlu0 %v14318_v49, %s14355_s19  ;;  %7315 = vmatprep.subr.bf16.mxu0 %v7314_v43  ;;  %v4988_v29 = vsel %vm14353_vm7, %v9045_v3, %v12310_v38  ;;  %vm14359_vm7 = vcmask 367616  }
 0x437   : > { %9252 = vrot.lane.b32.xlu1 %v12307_v11, %s14214_s17  ;;  %v5046_v44 = vsel %vm13874_vm14, %v9049_v19, %v9039_v22  ;;  %v5048_v58 = vsel %vm13874_vm14, %v9040_v8, %v9050_v57  ;;  %v4987_v22 = vsel %vm14358_vm9, %v9035_v25, %v9045_v3  ;;  %s14360_s17 = smov 38   ;;  %vm14361_vm9 = vcmask 228352   ;;  %vm14368_vm11 = vmmov %vm14359_vm7 }
 0x438   : > { %v7316_v37 = vpack.c.bf16 %v5046_v44, %v4985_v17  ;;  %v12319_v4 = vpop.permute.xlu0 %5035  ;;  %v7424_v8 = vpack.c.bf16 %v5048_v58, %v4987_v22  ;;  %vm14364_vm15 = vmmov %vm14361_vm9 }
 0x439   : > { %14357 = vst [vmem:[#allocation89_spill] sm:$0xff] %v12319_v4  ;;  %v9053_v47 = vpop.permute.xlu1 %9052  ;;  %v5049_v56 = vsel %vm13874_vm14, %v9050_v57, %v12319_v4  ;;  %vm14363_vm14 = vmmov %vm14361_vm9 }
 0x43a   : > { %v9055_v10 = vunpack.i.h.bf16 %v9053_v47  ;;  %v9054_v30 = vunpack.i.l.bf16 %v9053_v47  ;;  %v7422_v42 = vpack.c.bf16 %v5049_v56, %v4988_v29  ;;  %9257 = vrot.lane.b32.xlu0 %v12323_v9, %s14355_s19  ;;  %7317 = vmatpush1.bf16.msra.mxu0 %v7316_v37  ;;  %vm14367_vm6 = vmmov %vm14363_vm14 }
 0x43b   : > { %9262 = vrot.lane.b32.xlu1 %v12152_v27, %s14227_s16 }
 0x43c   : > { %v9058_v48 = vpop.permute.xlu0 %9057  ;;  %7423 = vmatprep.subr.bf16.mxu1 %v7422_v42  ;;  %v5107_v57 = vsel %vm14359_vm7, %v9054_v30, %v9055_v10 }
 0x43d   : > { %v9063_v43 = vpop.permute.xlu1 %9062  ;;  %v9060_v19 = vunpack.i.h.bf16 %v9058_v48  ;;  %v9059_v17 = vunpack.i.l.bf16 %v9058_v48  ;;  %7425 = vmatpush1.bf16.msra.mxu1 %v7424_v8 }
 0x43e   : > { %9267 = vrot.lane.b32.xlu0 %v14318_v49, %s14360_s17  ;;  %v9064_v25 = vunpack.i.l.bf16 %v9063_v43  ;;  %v9065_v56 = vunpack.i.h.bf16 %v9063_v43 }
 0x43f   : > { %9272 = vrot.lane.b32.xlu1 %v12307_v11, %s14227_s16  ;;  %v5167_v3 = vsel %vm14361_vm9, %v9059_v17, %v9060_v19  ;;  %vm14366_vm9 = vmmov %vm14359_vm7  ;;  %s14369_s16 = smov 37  }
 0x440   : > { %v9068_v44 = vpop.permute.xlu0 %9067  ;;  %v7318_v37 = vpack.c.bf16 %v5167_v3, %v5107_v57  ;;  %v5106_v22 = vsel %vm14359_vm7, %v9064_v25, %v9054_v30  ;;  %v5108_v20 = vsel %vm14368_vm11, %v9055_v10, %v9065_v56  ;;  %vm14371_vm11 = vcmask 220160  }
 0x441   : > { %v12340_v58 = vpop.permute.xlu1 %5096  ;;  %v9070_v47 = vunpack.i.h.bf16 %v9068_v44  ;;  %v9069_v29 = vunpack.i.l.bf16 %v9068_v44  ;;  %vm14376_vm7 = vmmov %vm14371_vm11 }
 0x442   : > { %14362 = vst [vmem:[#allocation90_spill] sm:$0xff] %v12340_v58  ;;  %9277 = vrot.lane.b32.xlu0 %v12323_v9, %s14360_s17  ;;  %7319 = vmatprep.subr.bf16.mxu0 %v7318_v37  ;;  %v5109_v43 = vsel %vm14366_vm9, %v9065_v56, %v12340_v58 }
 0x443   : > { %9282 = vrot.lane.b32.xlu1 %v12152_v27, %s14242_s18  ;;  %v5166_v42 = vsel %vm14363_vm14, %v9069_v29, %v9059_v17  ;;  %v5168_v8 = vsel %vm14364_vm15, %v9060_v19, %v9070_v47  ;;  %vm14375_vm14 = vmmov %vm14371_vm11 }
 0x444   : > { %v7320_v48 = vpack.c.bf16 %v5166_v42, %v5106_v22  ;;  %v12349_v38 = vpop.permute.xlu0 %5156  ;;  %v7428_v19 = vpack.c.bf16 %v5168_v8, %v5108_v20 }
 0x445   : > { %14365 = vst [vmem:[#allocation91_spill] sm:$0xff] %v12349_v38  ;;  %v9073_v57 = vpop.permute.xlu1 %9072  ;;  %v5169_v3 = vsel %vm14367_vm6, %v9070_v47, %v12349_v38  ;;  %vm14370_vm6 = vcmask 359424  }
 0x446   : > { %v9075_v44 = vunpack.i.h.bf16 %v9073_v57  ;;  %v9074_v4 = vunpack.i.l.bf16 %v9073_v57  ;;  %v7426_v30 = vpack.c.bf16 %v5169_v3, %v5109_v43  ;;  %9287 = vrot.lane.b32.xlu0 %v14318_v49, %s14369_s16  ;;  %7321 = vmatpush1.bf16.msra.mxu0 %v7320_v48  ;;  %vm14374_vm15 = vmmov %vm14370_vm6 }
 0x447   : > { %9292 = vrot.lane.b32.xlu1 %v12307_v11, %s14242_s18  ;;  %s14373_s18 = smov 29   ;;  %vm14378_vm9 = vmmov %vm14370_vm6 }
 0x448   : > { %v9078_v17 = vpop.permute.xlu0 %9077  ;;  %7427 = vmatprep.subr.bf16.mxu1 %v7426_v30  ;;  %v5227_v47 = vsel %vm14370_vm6, %v9074_v4, %v9075_v44  ;;  %vm14379_vm6 = vmmov %vm14376_vm7 }
 0x449   : > { %v9083_v25 = vpop.permute.xlu1 %9082  ;;  %v9080_v37 = vunpack.i.h.bf16 %v9078_v17  ;;  %v9079_v29 = vunpack.i.l.bf16 %v9078_v17  ;;  %7429 = vmatpush1.bf16.msra.mxu1 %v7428_v19 }
 0x44a   : > { %9297 = vrot.lane.b32.xlu0 %v12323_v9, %s14369_s16  ;;  %v9084_v10 = vunpack.i.l.bf16 %v9083_v25  ;;  %v9085_v57 = vunpack.i.h.bf16 %v9083_v25 }
 0x44b   : > { %9302 = vrot.lane.b32.xlu1 %v12152_v27, %s14249_s15  ;;  %v5287_v56 = vsel %vm14371_vm11, %v9079_v29, %v9080_v37  ;;  %vm14380_vm11 = vmmov %vm14378_vm9 }
 0x44c   : > { %v9088_v22 = vpop.permute.xlu0 %9087  ;;  %v7322_v42 = vpack.c.bf16 %v5287_v56, %v5227_v47  ;;  %v5226_v43 = vsel %vm14374_vm15, %v9084_v10, %v9074_v4  ;;  %v5228_v38 = vsel %vm14380_vm11, %v9075_v44, %v9085_v57  ;;  %vm5406_vm15 = vcmask 154624  }
 0x44d   : > { %v12366_v20 = vpop.permute.xlu1 %5216  ;;  %v9090_v8 = vunpack.i.h.bf16 %v9088_v22  ;;  %v9089_v48 = vunpack.i.l.bf16 %v9088_v22  ;;  %vm14400_vm11 = vcmask 285696  }
 0x44e   : > { %14372 = vst [vmem:[#allocation92_spill] sm:$0xff] %v12366_v20  ;;  %9307 = vrot.lane.b32.xlu0 %v14318_v49, %s14373_s18  ;;  %7323 = vmatprep.subr.bf16.mxu0 %v7322_v42  ;;  %v5229_v25 = vsel %vm14378_vm9, %v9085_v57, %v12366_v20 }
 0x44f   : > { %9312 = vrot.lane.b32.xlu1 %v12307_v11, %s14249_s15  ;;  %v5286_v3 = vsel %vm14375_vm14, %v9089_v48, %v9079_v29  ;;  %v5288_v30 = vsel %vm14376_vm7, %v9080_v37, %v9090_v8  ;;  %vm14381_vm14 = vcmask 293888   ;;  %s14382_s15 = smov 28  }
 0x450   : > { %v7324_v19 = vpack.c.bf16 %v5286_v3, %v5226_v43  ;;  %v12375_v17 = vpop.permute.xlu0 %5276  ;;  %v7432_v37 = vpack.c.bf16 %v5288_v30, %v5228_v38  ;;  %vm14386_vm7 = vmmov %vm14381_vm14 }
 0x451   : > { %14377 = vst [vmem:[#allocation93_spill] sm:$0xff] %v12375_v17  ;;  %v9093_v47 = vpop.permute.xlu1 %9092  ;;  %v5289_v56 = vsel %vm14379_vm6, %v9090_v8, %v12375_v17  ;;  %vm14389_vm9 = vmmov %vm14386_vm7 }
 0x452   : > { %v9095_v22 = vunpack.i.h.bf16 %v9093_v47  ;;  %v9094_v58 = vunpack.i.l.bf16 %v9093_v47  ;;  %v7430_v4 = vpack.c.bf16 %v5289_v56, %v5229_v25  ;;  %9317 = vrot.lane.b32.xlu0 %v12323_v9, %s14373_s18  ;;  %7325 = vmatpush1.bf16.msra.mxu0 %v7324_v19  ;;  %v14384_v47 = vld [vmem:[#allocation23_spill] sm:$0xff]  ;;  %vm14392_vm6 = vmmov %vm14386_vm7 }
 0x453   : > { %9322 = vrot.lane.b32.xlu1 %v12152_v27, %s14263_s27 }
 0x454   : > { %v9098_v29 = vpop.permute.xlu0 %9097  ;;  %7431 = vmatprep.subr.bf16.mxu1 %v7430_v4  ;;  %v5347_v8 = vsel %vm14381_vm14, %v9094_v58, %v9095_v22  ;;  %v14394_v4 = vld [vmem:[#allocation20_spill] sm:$0xff]  ;;  %vm14407_vm14 = vcmask 146432  }
 0x455   : > { %v9103_v10 = vpop.permute.xlu1 %9102  ;;  %v9100_v42 = vunpack.i.h.bf16 %v9098_v29  ;;  %v9099_v48 = vunpack.i.l.bf16 %v9098_v29  ;;  %7433 = vmatpush1.bf16.msra.mxu1 %v7432_v37  ;;  %v14385_v37 = vld [vmem:[#allocation19_spill] sm:$0xff] }
 0x456   : > { %9327 = vrot.lane.b32.xlu0 %v14318_v49, %s14382_s15  ;;  %v9104_v44 = vunpack.i.l.bf16 %v9103_v10  ;;  %v9105_v56 = vunpack.i.h.bf16 %v9103_v10 }
 0x457   : > { %9332 = vrot.lane.b32.xlu1 %v12307_v11, %s14263_s27  ;;  %v5408_v57 = vsel %vm5406_vm15, %v9099_v48, %v9100_v42  ;;  %s14424_s27 = smov 19  }
 0x458   : > { %v9108_v38 = vpop.permute.xlu0 %9107  ;;  %v7326_v3 = vpack.c.bf16 %v5408_v57, %v5347_v8  ;;  %v5346_v17 = vsel %vm14386_vm7, %v9104_v44, %v9094_v58  ;;  %v14387_v8 = vld [vmem:[#allocation22_spill] sm:$0xff]  ;;  %v14409_v44 = vunpack.i.h.bf16 %v11096_v40  ;;  %vm14428_vm7 = vmmov %vm14400_vm11 }
 0x459   : > { %v12392_v43 = vpop.permute.xlu1 %5336  ;;  %v9110_v30 = vunpack.i.h.bf16 %v9108_v38  ;;  %v9109_v19 = vunpack.i.l.bf16 %v9108_v38  ;;  %v14398_v58 = vld [vmem:[#allocation34_spill] sm:$0xff] }
 0x45a   : > { %14383 = vst [vmem:[#allocation94_spill] sm:$0xff] %v12392_v43  ;;  %9337 = vrot.lane.b32.xlu0 %v12323_v9, %s14382_s15  ;;  %7327 = vmatprep.subr.bf16.mxu0 %v7326_v3  ;;  %v5349_v1 = vsel %vm14389_vm9, %v9105_v56, %v12392_v43  ;;  %v14390_v3 = vunpack.i.l.bf16 %v14384_v47  ;;  %v14414_v40 = vunpack.i.l.bf16 %v14398_v58  ;;  %vm14429_vm9 = vmmov %vm14407_vm14 }
 0x45b   : > { %9342 = vrot.lane.b32.xlu1 %v12152_v27, %s14269_s11  ;;  %v5407_v20 = vsel %vm5406_vm15, %v9109_v19, %v9099_v48  ;;  %v5409_v38 = vsel %vm5406_vm15, %v9100_v42, %v9110_v30  ;;  %v5348_v42 = vsel %vm14392_vm6, %v9095_v22, %v9105_v56  ;;  %v14408_v56 = vunpack.i.l.bf16 %v14394_v4  ;;  %vm14435_vm6 = vmmov %vm14429_vm9 }
 0x45c   : > { %v7328_v10 = vpack.c.bf16 %v5407_v20, %v5346_v17  ;;  %v12405_v25 = vpop.permute.xlu0 %5396  ;;  %v14391_v20 = vunpack.i.h.bf16 %v11070_v51  ;;  %v14401_v51 = vld [vmem:[#allocation26_spill] sm:$0xff] }
 0x45d   : > { %14388 = vst [vmem:[#allocation23_spill] sm:$0xff] %v12405_v25  ;;  %v12407_v35 = vpop.permute.xlu1 %9112  ;;  %v5410_v29 = vsel %vm5406_vm15, %v9110_v30, %v12405_v25  ;;  %v14393_v30 = vld [vmem:[#allocation29_spill] sm:$0xff]  ;;  %v7436_v25 = vpack.c.bf16 %v5409_v38, %v5348_v42  ;;  %v12469_v14 = vsel %vm431_vm1, %v14409_v44, %v14408_v56 }
 0x45e   : > { %v9114_v48 = vunpack.i.l.bf16 %v12407_v35  ;;  %v12421_v17 = vsel %vm370_vm0, %v14391_v20, %v14390_v3  ;;  %v7434_v19 = vpack.c.bf16 %v5410_v29, %v5349_v1  ;;  %9347 = vrot.lane.b32.xlu0 %v14318_v49, %s14276_s30  ;;  %7329 = vmatpush1.bf16.msra.mxu0 %v7328_v10  ;;  %v14395_v3 = vunpack.i.l.bf16 %v14387_v8 }
 0x45f   : > { %9352 = vrot.lane.b32.xlu1 %v12307_v11, %s14269_s11  ;;  %v14396_v1 = vunpack.i.h.bf16 %v14384_v47  ;;  %v14399_v10 = vunpack.i.h.bf16 %v12407_v35  ;;  %v14410_v52 = vunpack.i.l.bf16 %v14393_v30  ;;  %v14415_v44 = vunpack.i.h.bf16 %v14393_v30 }
 0x460   : > { %v9118_v29 = vpop.permute.xlu0 %9117  ;;  %7435 = vmatprep.subr.bf16.mxu1 %v7434_v19  ;;  %v14404_v19 = vunpack.i.h.bf16 %v14394_v4 }
 0x461   : > { %v12437_v22 = vsel %vm370_vm0, %v14396_v1, %v14395_v3  ;;  %v12440_v20 = vpop.permute.xlu1 %9122  ;;  %v9120_v57 = vunpack.i.h.bf16 %v9118_v29  ;;  %v9119_v38 = vunpack.i.l.bf16 %v9118_v29  ;;  %7437 = vmatpush1.bf16.msra.mxu1 %v7436_v25  ;;  %v5468_v42 = vsel %vm14400_vm11, %v9114_v48, %v14399_v10  ;;  %v14402_v1 = vld [vmem:[#allocation24_spill] sm:$0xff]  ;;  %v14406_v10 = vld [vmem:[#allocation30_spill] sm:$0xff]  ;;  %vm14436_vm11 = vmmov %vm14428_vm7 }
 0x462   : > { %14397 = vst [vmem:[#allocation19_spill] sm:$0xff] %v12437_v22  ;;  %9357 = vrot.lane.b32.xlu0 %v12323_v9, %s14276_s30  ;;  %v14403_v25 = vunpack.i.l.bf16 %v14385_v37  ;;  %v9124_v3 = vunpack.i.l.bf16 %v12440_v20  ;;  %v12487_v56 = vsel %vm492_vm2, %v14415_v44, %v14414_v40  ;;  %v14421_v61 = vunpack.i.l.bf16 %v14402_v1 }
 0x463   : > { %9362 = vrot.lane.b32.xlu1 %v12152_v27, %s14284_s20  ;;  %v5528_v15 = vsel %vm14407_vm14, %v9119_v38, %v9120_v57  ;;  %14416 = vst [vmem:[#allocation34_spill] sm:$0xff] %v12487_v56  ;;  %v14425_v40 = vunpack.i.l.bf16 %v14406_v10  ;;  %v14426_v44 = vunpack.i.h.bf16 %v14207_v31  ;;  %v9125_v31 = vunpack.i.h.bf16 %v12440_v20  ;;  %vm14437_vm14 = vmmov %vm14435_vm6 }
 0x464   : > { %v12459_v29 = vsel %vm431_vm1, %v14404_v19, %v14403_v25  ;;  %v12476_v25 = vsel %vm492_vm2, %v14411_v54, %v14410_v52  ;;  %v9128_v19 = vpop.permute.xlu0 %9127  ;;  %v7330_v62 = vpack.c.bf16 %v5528_v15, %v5468_v42  ;;  %v14418_v52 = vunpack.i.l.bf16 %v14401_v51 }
 0x465   : > { %14405 = vst [vmem:[#allocation22_spill] sm:$0xff] %v12459_v29  ;;  %14412 = vst [vmem:[#allocation29_spill] sm:$0xff] %v12476_v25  ;;  %v12478_v43 = vpop.permute.xlu1 %5457  ;;  %v9129_v28 = vunpack.i.l.bf16 %v9128_v19  ;;  %v14419_v15 = vunpack.i.h.bf16 %v14402_v1  ;;  %v12503_v25 = vsel %vm553_vm3, %v14422_v60, %v14421_v61  ;;  %v9130_v29 = vunpack.i.h.bf16 %v9128_v19  ;;  %v14430_v61 = vld [vmem:[#allocation41_spill] sm:$0xff]  ;;  %v14434_v60 = vld [vmem:[#allocation52_spill] sm:$0xff] }
 0x466   : > { %14413 = vst [vmem:[#allocation20_spill] sm:$0xff] %v12478_v43  ;;  %14423 = vst [vmem:[#allocation24_spill] sm:$0xff] %v12503_v25  ;;  %9367 = vrot.lane.b32.xlu0 %v14318_v49, %s14424_s27  ;;  %7331 = vmatprep.subr.bf16.mxu0 %v7330_v62  ;;  %v5470_v54 = vsel %vm14436_vm11, %v9125_v31, %v12478_v43  ;;  %v14438_v19 = vld [vmem:[#allocation54_spill] sm:$0xff]  ;;  %v14439_v62 = vld [vmem:[#allocation47_spill] sm:$0xff]  ;;  %v14440_v20 = vunpack.i.h.bf16 %v12407_v35  ;;  %vm14454_vm11 = vcmask 875520  }
 0x467   : > { %v12496_v42 = vsel %vm553_vm3, %v14419_v15, %v14418_v52  ;;  %9372 = vrot.lane.b32.xlu1 %v12307_v11, %s14284_s20  ;;  %v12514_v52 = vsel %vm614_vm4, %v14426_v44, %v14425_v40  ;;  %v5467_v15 = vsel %vm14428_vm7, %v9124_v3, %v9114_v48  ;;  %v5527_v13 = vsel %vm14429_vm9, %v9129_v28, %v9119_v38  ;;  %v14432_v3 = vld [vmem:[#allocation31_spill] sm:$0xff]  ;;  %v14433_v38 = vld [vmem:[#allocation50_spill] sm:$0xff] }
 0x468   : > { %14420 = vst [vmem:[#allocation26_spill] sm:$0xff] %v12496_v42  ;;  %14427 = vst [vmem:[#allocation30_spill] sm:$0xff] %v12514_v52  ;;  %v7332_v42 = vpack.c.bf16 %v5527_v13, %v5467_v15  ;;  %v12520_v56 = vpop.permute.xlu0 %9132  ;;  %v5529_v13 = vsel %vm14435_vm6, %v9120_v57, %v9130_v29  ;;  %v5469_v57 = vsel %vm14428_vm7, %v14440_v20, %v9125_v31  ;;  %vm14442_vm9 = vcmask 277504  }
 0x469   : > { %14431 = vst [vmem:[#allocation46_spill] sm:$0xff] %v12520_v56  ;;  %v12522_v25 = vpop.permute.xlu1 %9137  ;;  %v13904_v40 = vunpack.i.l.bf16 %v12520_v56  ;;  %v7440_v35 = vpack.c.bf16 %v5529_v13, %v5469_v57  ;;  %v14447_v31 = vunpack.i.h.bf16 %v14434_v60  ;;  %vm14449_vm6 = vcmask 138240  }
 0x46a   : > { %v9139_v48 = vunpack.i.l.bf16 %v12522_v25  ;;  %9377 = vrot.lane.b32.xlu0 %v12323_v9, %s14424_s27  ;;  %7333 = vmatpush1.bf16.msra.mxu0 %v7332_v42  ;;  %v14441_v42 = vunpack.i.h.bf16 %v12522_v25  ;;  %v14450_v57 = vunpack.i.l.bf16 %v14434_v60  ;;  %v14452_v15 = vunpack.i.l.bf16 %v14430_v61 }
 0x46b   : > { %9382 = vrot.lane.b32.xlu1 %v12152_v27, %s14297_s2  ;;  %v5530_v28 = vsel %vm14437_vm14, %v9130_v29, %v13904_v40  ;;  %v14443_v29 = vunpack.i.l.bf16 %v14432_v3  ;;  %v14444_v40 = vunpack.i.h.bf16 %v14406_v10  ;;  %vm14459_vm14 = vmmov %vm14454_vm11  ;;  %vm14463_vm7 = vcmask 867328  }
 0x46c   : > { %v9143_v52 = vpop.permute.xlu0 %9142  ;;  %v7438_v0 = vpack.c.bf16 %v5530_v28, %v5470_v54  ;;  %v5588_v43 = vsel %vm14442_vm9, %v9139_v48, %v14441_v42  ;;  %v14451_v42 = vunpack.i.h.bf16 %v14212_v34  ;;  %v14453_v54 = vunpack.i.h.bf16 %v14217_v39  ;;  %vm14466_vm9 = vmmov %vm14463_vm7 }
 0x46d   : > { %v12545_v12 = vpop.permute.xlu1 %9147  ;;  %v9145_v53 = vunpack.i.h.bf16 %v9143_v52  ;;  %v9144_v22 = vunpack.i.l.bf16 %v9143_v52  ;;  %v12558_v44 = vsel %vm614_vm4, %v14444_v40, %v14443_v29  ;;  %v14446_v52 = vunpack.i.l.bf16 %v14417_v16 }
 0x46e   : > { %14445 = vst [vmem:[#allocation41_spill] sm:$0xff] %v12558_v44  ;;  %9387 = vrot.lane.b32.xlu0 %v14318_v49, %s14166_s14  ;;  %v8734_v40 = vunpack.i.l.bf16 %v11744_v26  ;;  %v9149_v20 = vunpack.i.l.bf16 %v12545_v12  ;;  %7439 = vmatprep.subr.bf16.mxu1 %v7438_v0  ;;  %v12581_v29 = vsel %vm675_vm5, %v14451_v42, %v14450_v57  ;;  %v14458_v44 = vunpack.i.h.bf16 %v14430_v61 }
 0x46f   : > { %9392 = vrot.lane.b32.xlu1 %v12307_v11, %s14297_s2  ;;  %v12571_v28 = vsel %vm675_vm5, %v14447_v31, %v14446_v52  ;;  %v5648_v13 = vsel %vm14449_vm6, %v9144_v22, %v9145_v53  ;;  %v12588_v52 = vsel %vm14454_vm11, %v14453_v54, %v14452_v15  ;;  %7441 = vmatpush1.bf16.msra.mxu1 %v7440_v35  ;;  %v14461_v57 = vunpack.i.l.bf16 %v14433_v38  ;;  %s7021_s2 = sshll.u32 %s9697_s25, 8  ;;  %s6883_s25 = scalar_lea.sflag [#allocation7], %s9852_s0 }
 0x470   : > { %14448 = vst [vmem:[#allocation31_spill] sm:$0xff] %v12571_v28  ;;  %14455 = vst [vmem:[#allocation50_spill] sm:$0xff] %v12588_v52  ;;  %v9153_v31 = vpop.permute.xlu0 %9152  ;;  %v7334_v0 = vpack.c.bf16 %v5648_v13, %v5588_v43  ;;  %v14457_v28 = vunpack.i.l.bf16 %v14438_v19  ;;  %v14462_v42 = vunpack.i.h.bf16 %v14439_v62  ;;  %v8685_v15 = vunpack.i.h.bf16 %v11568_v59  ;;  %s13513_s11 = scalar_lea.hbm %s13563_s6, %s7021_s2 }
 0x471   : > { %v12590_v56 = vpop.permute.xlu1 %5577  ;;  %v9154_v54 = vunpack.i.l.bf16 %v9153_v31  ;;  %v14464_v35 = vunpack.i.l.bf16 %v14439_v62  ;;  %v14465_v43 = vunpack.i.h.bf16 %v14219_v32  ;;  %v14468_v52 = vunpack.i.l.bf16 %v14387_v8 }
 0x472   : > { %14456 = vst [vmem:[#allocation52_spill] sm:$0xff] %v12590_v56  ;;  %v12597_v34 = vsel %vm14459_vm14, %v14458_v44, %v14457_v28  ;;  %v12604_v39 = vsel %vm14463_vm7, %v14462_v42, %v14461_v57  ;;  %v8735_v44 = vunpack.i.h.bf16 %v11744_v26  ;;  %9397 = vrot.lane.b32.xlu0 %v12323_v9, %s14166_s14  ;;  %vm14469_vm6 = vcmask 277504   ;;  %7335 = vmatprep.subr.bf16.mxu0 %v7334_v0 }
 0x473   : > { %14460 = vst [vmem:[#allocation54_spill] sm:$0xff] %v12597_v34  ;;  %v12612_v13 = vsel %vm14466_vm9, %v14465_v43, %v14464_v35  ;;  %v14467_v34 = vunpack.i.h.bf16 %v14387_v8  ;;  %9402 = vrot.lane.b32.xlu1 %v12152_v27, %s14306_s1  ;;  %v5587_v32 = vsel %vm14469_vm6, %v9149_v20, %v9139_v48  ;;  %v9155_v42 = vunpack.i.h.bf16 %v9153_v31  ;;  %vm14479_vm9 = vmmov %vm14469_vm6 }
 0x474   : > { %vm14470_vm11 = vcmask 138240   ;;  %v2558_v35 = vsel %vm2552_vm12, %v8685_v15, %v8734_v40  ;;  %v8690_v8 = vunpack.i.h.bf16 %v11570_v7  ;;  %v14471_v28 = vunpack.i.h.bf16 %v14384_v47 }
 0x475   : > { %v12621_v57 = vsel %vm370_vm0, %v14468_v52, %v14467_v34  ;;  %v5647_v26 = vsel %vm14470_vm11, %v9154_v54, %v9144_v22  ;;  %v12631_v52 = vpop.permute.xlu0 %9157  ;;  %v12633_v34 = vpop.permute.xlu1 %9162  ;;  %v14472_v27 = vunpack.i.l.bf16 %v14384_v47  ;;  %v14473_v20 = vunpack.i.l.bf16 %v11568_v59  ;;  %vm14478_vm7 = vmmov %vm14470_vm11 }
 0x476   : > { %v7336_v43 = vpack.c.bf16 %v5647_v26, %v5587_v32  ;;  %v9150_v31 = vunpack.i.h.bf16 %v12545_v12  ;;  %v13908_v0 = vunpack.i.l.bf16 %v12631_v52  ;;  %v14474_v54 = vunpack.i.h.bf16 %v14385_v37  ;;  %9407 = vrot.lane.b32.xlu0 %v14318_v49, %s14169_s13  ;;  %v2504_v12 = vld [vmem:[%s9863_s12 + $0x20] sm:$0xff]  ;;  %vm14480_vm6 = vmmov %vm14478_vm7 }
 0x477   : > { %v2618_v48 = vsel %vm370_vm0, %v14472_v27, %v14471_v28  ;;  %v2557_v22 = vsel %vm2552_vm12, %v14473_v20, %v8685_v15  ;;  %v14475_v32 = vunpack.i.l.bf16 %v14385_v37  ;;  %v8740_v47 = vunpack.i.h.bf16 %v11770_v36  ;;  %9412 = vrot.lane.b32.xlu1 %v12307_v11, %s14306_s1  ;;  %v2507_v11 = vld [vmem:[%s9863_s12 + $0x38] sm:$0xff]  ;;  %s7007_s1 = sshll.u32 %s9852_s0, 4 }
 0x478   : > { %v7446_v59 = vpack.c.bf16 %v2558_v35, %v12227_v46  ;;  %v14476_v15 = vunpack.i.l.bf16 %v11770_v36  ;;  %vm14477_vm14 = vcmask 900096   ;;  %v2560_v37 = vsel %vm2552_vm12, %v8735_v44, %v11742_v55  ;;  %7337 = vmatpush1.bf16.msra.mxu0 %v7336_v43 }
 0x479   : > { %v12650_v26 = vsel %vm431_vm1, %v14475_v32, %v14474_v54  ;;  %v5649_v20 = vsel %vm14478_vm7, %v9145_v53, %v9155_v42  ;;  %v5590_v49 = vsel %vm14479_vm9, %v9150_v31, %v12590_v56  ;;  %v5650_v46 = vsel %vm14480_vm6, %v9155_v42, %v13908_v0  ;;  %vm14482_vm11 = vmmov %vm14477_vm14  ;;  %v12675_v32 = vpop.permute.xlu0 %3881  ;;  %v12677_v55 = vpop.permute.xlu1 %9167 }
 0x47a   : > { %v2679_v28 = vsel %vm14477_vm14, %v8690_v8, %v14476_v15  ;;  %v14481_v35 = vunpack.i.l.bf16 %v11570_v7  ;;  %7447 = vmatprep.subr.bf16.mxu0 %v7446_v59  ;;  %v7442_v15 = vpack.c.bf16 %v5650_v46, %v5590_v49  ;;  %v14483_v53 = vunpack.i.h.bf16 %v14394_v4  ;;  %vm14486_vm14 = vmmov %vm14479_vm9  ;;  %9417 = vrot.lane.b32.xlu0 %v12323_v9, %s14169_s13 }
 0x47b   : > { %v14484_v27 = vunpack.i.l.bf16 %v14394_v4  ;;  %v8695_v56 = vunpack.i.h.bf16 %v11598_v23  ;;  %v2559_v42 = vsel %vm2552_vm12, %v8734_v40, %v8735_v44  ;;  %v14485_v7 = vunpack.i.h.bf16 %v12522_v25  ;;  %6264 = vmatmul.mubr.f32.vlgmr.msra.gmra.mrb[4].mxu0 %v12124_v63 }
 0x47c   : > { %v2678_v54 = vsel %vm14482_vm11, %v14481_v35, %v8690_v8  ;;  %v7448_v59 = vpack.c.bf16 %v2557_v22, %v2504_v12  ;;  %v8520_v35 = vunpack.i.h.bf16 %v14438_v19  ;;  %v7450_v4 = vpack.c.bf16 %v2679_v28, %v2618_v48  ;;  %7443 = vmatprep.subr.bf16.mxu1 %v7442_v15  ;;  %v14489_v12 = vld [vmem:[#allocation48_spill] sm:$0xff]  ;;  %6476 = vmatprep.mubr.f32.mxu0 %v11643_v2 }
 0x47d   : > { %v2739_v43 = vsel %vm431_vm1, %v14484_v27, %v14483_v53  ;;  %v5589_v8 = vsel %vm14486_vm14, %v14485_v7, %v9150_v31  ;;  %v7554_v27 = vpack.c.bf16 %v2560_v37, %v2507_v11  ;;  %vm14487_vm1 = vmmov %vm14482_vm11  ;;  %v8745_v40 = vunpack.i.h.bf16 %v11804_v18  ;;  %v2506_v31 = vld [vmem:[%s9863_s12 + $0x30] sm:$0xff]  ;;  %v12711_v37 = vpop.permute.xlu1 %3942  ;;  %s317_s12 = scalar_lea.vmem [#allocation11], %s7007_s1 }
 0x47e   : > { %v7444_v0 = vpack.c.bf16 %v5649_v20, %v5589_v8  ;;  %v2681_v49 = vsel %vm14487_vm1, %v8740_v47, %v11772_v24  ;;  %v8749_v25 = vunpack.i.l.bf16 %v11826_v45  ;;  %7449 = vmatpush1.bf16.msra.mxu0 %v7448_v59  ;;  %v14488_v44 = vunpack.i.l.bf16 %v11804_v18  ;;  %v12709_v24 = vpop.permute.xlu0 %9172  ;;  %vm14500_vm12 = vmmov %vm14487_vm1  ;;  %s6897_s30 = sshll.u32 %s317_s12, 4  ;;  %s13515_s30 = int_to_ptr.vmem [resolvable:$true] %s6897_s30 }
 0x47f   : > { %v8559_v20 = vunpack.i.l.bf16 %v14489_v12  ;;  %v14490_v9 = vunpack.i.h.bf16 %v14398_v58  ;;  %v14491_v48 = vunpack.i.l.bf16 %v14398_v58  ;;  %7451 = vmatprep.subr.bf16.mxu0 %v7450_v4  ;;  %v14492_v46 = vunpack.i.h.bf16 %v14393_v30  ;;  %s9513_s13 = scalar_lea.vmem %s13515_s30, 256  ;;  %p9520_p1 = scmp.lt.s32.totalorder %s13515_s30, %s9518_s29 }
 0x480   : > { %v2800_v22 = vsel %vm2794_vm8, %v8695_v56, %v14488_v44  ;;  %7445 = vmatpush1.bf16.msra.mxu1 %v7444_v0  ;;  %v14493_v11 = vunpack.i.l.bf16 %v14393_v30  ;;  %v14494_v53 = vunpack.i.h.bf16 %v14401_v51  ;;  %v14495_v7 = vunpack.i.l.bf16 %v14401_v51  ;;  %p9514_p13 = scmp.ne.s32.totalorder %s13515_s30, %s9513_s13  ;;  %p9521_p2 = scmp.lt.s32.totalorder %s9519_s7, %s9513_s13 }
 0x481   : > { %v12707_v28 = vsel %vm492_vm2, %v14491_v48, %v14490_v9  ;;  %v14496_v0 = vunpack.i.l.bf16 %v11598_v23  ;;  %v8700_v59 = vunpack.i.h.bf16 %v11600_v21  ;;  %7555 = vmatprep.subr.bf16.mxu1 %v7554_v27  ;;  %v7452_v4 = vpack.c.bf16 %v2678_v54, %v12421_v17 }
 0x482   : > { %v2860_v15 = vsel %vm492_vm2, %v14493_v11, %v14492_v46  ;;  %v12723_v58 = vsel %vm553_vm3, %v14495_v7, %v14494_v53  ;;  %v14497_v30 = vunpack.i.h.bf16 %v14402_v1  ;;  %v14498_v44 = vunpack.i.l.bf16 %v14402_v1  ;;  %v14505_v53 = vld [vmem:[#allocation58_spill] sm:$0xff]  ;;  %p9515_p5 = pnand %p9514_p13, %p14774_p0  ;;  %p9522_p7 = por %p9521_p2, %p9520_p1 }
 0x483   : > { %v2799_v8 = vsel %vm2794_vm8, %v14496_v0, %v8695_v56  ;;  %v14499_v51 = vunpack.i.l.bf16 %v11770_v36  ;;  %v7558_v23 = vpack.c.bf16 %v2681_v49, %v12621_v57  ;;  %v7454_v56 = vpack.c.bf16 %v2800_v22, %v2739_v43  ;;  %6406 = vmatmul.mubr.f32.vlgmr.msra.gmra.mrb[4].mxu1 %v12124_v63  ;;  %7453 = vmatpush1.bf16.msra.mxu0 %v7452_v4  ;;  %v12757_v49 = vpop.permute.xlu0 %4002  ;;  %v12759_v22 = vpop.permute.xlu1 %9177 }
 0x484   : > { %v2981_v9 = vsel %vm553_vm3, %v14498_v44, %v14497_v30  ;;  %v7556_v46 = vpack.c.bf16 %v2559_v42, %v2506_v31  ;;  %v8750_v27 = vunpack.i.h.bf16 %v11826_v45  ;;  %v8754_v17 = vunpack.i.l.bf16 %v11849_v6  ;;  %6618 = vmatprep.mubr.f32.mxu1 %v11643_v2  ;;  %p9516_p10 = pneg %p9515_p5 }
 0x485   : > { %v2680_v48 = vsel %vm14500_vm12, %v14499_v51, %v8740_v47  ;;  %v2921_v1 = vsel %vm2915_vm10, %v8700_v59, %v8749_v25  ;;  %v2802_v36 = vsel %vm2794_vm8, %v8745_v40, %v11802_v50  ;;  %v8555_v47 = vunpack.i.h.bf16 %v11287_v33  ;;  %7455 = vmatprep.subr.bf16.mxu0 %v7454_v56  ;;  %v14508_v56 = vld [vmem:[#allocation19_spill] sm:$0xff] }
 0x486   : > { %v13909_v57 = vunpack.i.h.bf16 %v14256_v5  ;;  %v14501_v54 = vunpack.i.h.bf16 %v14432_v3  ;;  %v14502_v43 = vunpack.i.l.bf16 %v14432_v3  ;;  %7557 = vmatpush1.bf16.msra.mxu1 %v7556_v46  ;;  %v14503_v31 = vunpack.i.h.bf16 %v14406_v10  ;;  %p9523_p4 = pnand %p9522_p7, %p9516_p10 }
 0x487   : > { %v14504_v50 = vunpack.i.l.bf16 %v14406_v10  ;;  %v8579_v7 = vunpack.i.l.bf16 %v14505_v53  ;;  %v14506_v3 = vunpack.i.l.bf16 %v11600_v21  ;;  %v8705_v4 = vunpack.i.h.bf16 %v11634_v41  ;;  %7559 = vmatprep.subr.bf16.mxu1 %v7558_v23 }
 0x488   : > { %v12755_v42 = vsel %vm614_vm4, %v14502_v43, %v14501_v54  ;;  %v7456_v30 = vpack.c.bf16 %v2799_v8, %v12469_v14  ;;  %v14507_v44 = vunpack.i.l.bf16 %v11804_v18  ;;  %v7458_v51 = vpack.c.bf16 %v2921_v1, %v2860_v15  ;;  %v14509_v43 = vld [vmem:[#allocation62_spill] sm:$0xff] }
 0x489   : > { %v12766_v11 = vsel %vm614_vm4, %v14504_v50, %v14503_v31  ;;  %v2920_v0 = vsel %vm2915_vm10, %v14506_v3, %v8700_v59  ;;  %v7560_v46 = vpack.c.bf16 %v2680_v48, %v14508_v56  ;;  %v7562_v54 = vpack.c.bf16 %v2802_v36, %v12650_v26  ;;  %v14510_v31 = vld [vmem:[#allocation66_spill] sm:$0xff]  ;;  %v12795_v26 = vpop.permute.xlu0 %4063  ;;  %v14519_v56 = vld [vmem:[#allocation29_spill] sm:$0xff] }
 0x48a   : > { %v2801_v10 = vsel %vm2794_vm8, %v14507_v44, %v8745_v40  ;;  %v2923_v21 = vsel %vm2915_vm10, %v8750_v27, %v14509_v43  ;;  %v8755_v59 = vunpack.i.h.bf16 %v11849_v6  ;;  %v8759_v23 = vunpack.i.l.bf16 %v14510_v31  ;;  %7457 = vmatpush1.bf16.msra.mxu0 %v7456_v30  ;;  %v12797_v40 = vpop.permute.xlu1 %9182 }
 0x48b   : > { %v3042_v2 = vsel %vm3036_vm13, %v8705_v4, %v8754_v17  ;;  %v8560_v18 = vunpack.i.h.bf16 %v14489_v12  ;;  %vm14511_vm4 = vcmask 228352   ;;  %7459 = vmatprep.subr.bf16.mxu0 %v7458_v51  ;;  %7561 = vmatpush1.bf16.msra.mxu1 %v7560_v46  ;;  %v14512_v15 = vunpack.i.h.bf16 %v14434_v60  ;;  %v14518_v51 = vld [vmem:[#allocation56_spill] sm:$0xff] }
 0x48c   : > { %v12793_v14 = vsel %vm14511_vm4, %v8555_v47, %v8559_v20  ;;  %v14513_v8 = vunpack.i.l.bf16 %v14434_v60  ;;  %v14514_v1 = vunpack.i.h.bf16 %v14417_v16  ;;  %v14515_v36 = vunpack.i.l.bf16 %v14417_v16  ;;  %7563 = vmatprep.subr.bf16.mxu1 %v7562_v54  ;;  %vm14535_vm11 = vmmov %vm14511_vm4 }
 0x48d   : > { %vm14516_vm8 = vcmask 220160   ;;  %v14517_v30 = vunpack.i.l.bf16 %v11634_v41  ;;  %v8710_v60 = vunpack.i.h.bf16 %v14518_v51  ;;  %v7460_v46 = vpack.c.bf16 %v2920_v0, %v14519_v56  ;;  %v14534_v56 = vld [vmem:[#allocation68_spill] sm:$0xff] }
 0x48e   : > { %v3223_v48 = vsel %vm675_vm5, %v14513_v8, %v14512_v15  ;;  %v12809_v50 = vsel %vm675_vm5, %v14515_v36, %v14514_v1  ;;  %v12814_v3 = vsel %vm14516_vm8, %v13909_v57, %v8579_v7  ;;  %v2922_v16 = vsel %vm2915_vm10, %v8749_v25, %v8750_v27  ;;  %v14520_v8 = vld [vmem:[#allocation22_spill] sm:$0xff]  ;;  %vm14543_vm12 = vmmov %vm14516_vm8 }
 0x48f   : > { %v3041_v44 = vsel %vm3036_vm13, %v14517_v30, %v8705_v4  ;;  %v7566_v43 = vpack.c.bf16 %v2923_v21, %v12707_v28  ;;  %v7462_v15 = vpack.c.bf16 %v3042_v2, %v2981_v9  ;;  %v7564_v1 = vpack.c.bf16 %v2801_v10, %v14520_v8  ;;  %v14521_v57 = vld [vmem:[#allocation70_spill] sm:$0xff]  ;;  %7461 = vmatpush1.bf16.msra.mxu0 %v7460_v46  ;;  %v14523_v30 = vld [vmem:[#allocation63_spill] sm:$0xff]  ;;  %v12839_v28 = vpop.permute.xlu0 %9187  ;;  %v12841_v9 = vpop.permute.xlu1 %9192 }
 0x490   : > { %v8760_v36 = vunpack.i.h.bf16 %v14510_v31  ;;  %v8764_v41 = vunpack.i.l.bf16 %v14521_v57  ;;  %vm14522_vm5 = vcmask 809984   ;;  %v3044_v54 = vsel %vm3036_vm13, %v8755_v59, %v14523_v30  ;;  %v14537_v30 = vld [vmem:[#allocation34_spill] sm:$0xff] }
 0x491   : > { %v3163_v4 = vsel %vm14522_vm5, %v8710_v60, %v8759_v23  ;;  %v8580_v0 = vunpack.i.h.bf16 %v14505_v53  ;;  %v14524_v45 = vunpack.i.l.bf16 %v14438_v19  ;;  %vm14525_vm10 = vcmask 875520   ;;  %7463 = vmatprep.subr.bf16.mxu0 %v7462_v15  ;;  %7565 = vmatpush1.bf16.msra.mxu1 %v7564_v1  ;;  %vm14533_vm6 = vmmov %vm14522_vm5 }
 0x492   : > { %v14526_v27 = vunpack.i.h.bf16 %v14430_v61  ;;  %v14527_v10 = vunpack.i.l.bf16 %v14430_v61  ;;  %vm14528_vm7 = vmmov %vm14525_vm10  ;;  %v14529_v53 = vunpack.i.h.bf16 %v14433_v38  ;;  %v14530_v31 = vunpack.i.l.bf16 %v14433_v38  ;;  %7567 = vmatprep.subr.bf16.mxu1 %v7566_v43  ;;  %v14536_v61 = vld [vmem:[#allocation24_spill] sm:$0xff]  ;;  %v14542_v43 = vld [vmem:[#allocation59_spill] sm:$0xff] }
 0x493   : > { %v12837_v25 = vsel %vm14525_vm10, %v14524_v45, %v8520_v35  ;;  %vm14531_vm9 = vcmask 867328   ;;  %v14532_v35 = vunpack.i.l.bf16 %v14518_v51  ;;  %v8715_v46 = vunpack.i.h.bf16 %v14534_v56  ;;  %v14538_v45 = vld [vmem:[#allocation79_spill] sm:$0xff]  ;;  %vm14539_vm14 = vmmov %vm14522_vm5 }
 0x494   : > { %v3344_v21 = vsel %vm14528_vm7, %v14527_v10, %v14526_v27  ;;  %v12853_v19 = vsel %vm14531_vm9, %v14530_v31, %v14529_v53  ;;  %v12862_v15 = vsel %vm14535_vm11, %v8559_v20, %v8560_v18  ;;  %v7464_v8 = vpack.c.bf16 %v3041_v44, %v14536_v61  ;;  %v14540_v20 = vld [vmem:[#allocation74_spill] sm:$0xff]  ;;  %v14550_v10 = vld [vmem:[#allocation76_spill] sm:$0xff] }
 0x495   : > { %v3162_v2 = vsel %vm14533_vm6, %v14532_v35, %v8710_v60  ;;  %v3043_v38 = vsel %vm3036_vm13, %v8754_v17, %v8755_v59  ;;  %v7466_v1 = vpack.c.bf16 %v3163_v4, %v12766_v11  ;;  %v7568_v51 = vpack.c.bf16 %v2922_v16, %v14537_v30  ;;  %v12880_v11 = vpop.permute.xlu0 %4199  ;;  %vm14546_vm13 = vmmov %vm14531_vm9  ;;  %v14551_v31 = vld [vmem:[#allocation30_spill] sm:$0xff] }
 0x496   : > { %v7570_v60 = vpack.c.bf16 %v3044_v54, %v12723_v58  ;;  %v3165_v27 = vsel %vm14539_vm14, %v8760_v36, %v14538_v45  ;;  %v8765_v12 = vunpack.i.h.bf16 %v14521_v57  ;;  %v8769_v18 = vunpack.i.l.bf16 %v14540_v20  ;;  %7465 = vmatpush1.bf16.msra.mxu0 %v7464_v8  ;;  %v12882_v58 = vpop.permute.xlu1 %9197  ;;  %v14555_v45 = vld [vmem:[#allocation69_spill] sm:$0xff]  ;;  %vm14562_vm6 = vmmov %vm14543_vm12 }
 0x497   : > { %vm14541_vm1 = vcmask 744448   ;;  %v8720_v6 = vunpack.i.h.bf16 %v14542_v43  ;;  %v12878_v17 = vsel %vm14543_vm12, %v8579_v7, %v8580_v0  ;;  %7467 = vmatprep.subr.bf16.mxu0 %v7466_v1  ;;  %7569 = vmatpush1.bf16.msra.mxu1 %v7568_v51  ;;  %v14544_v59 = vunpack.i.h.bf16 %v14439_v62 }
 0x498   : > { %v3284_v44 = vsel %vm14541_vm1, %v8715_v46, %v8764_v41  ;;  %v14545_v57 = vunpack.i.l.bf16 %v14439_v62  ;;  %v14547_v4 = vunpack.i.l.bf16 %v11287_v33  ;;  %v14548_v54 = vunpack.i.l.bf16 %v14534_v56  ;;  %vm14549_vm8 = vmmov %vm14541_vm1  ;;  %7571 = vmatprep.subr.bf16.mxu1 %v7570_v60  ;;  %v14552_v62 = vld [vmem:[#allocation26_spill] sm:$0xff] }
 0x499   : > { %v8725_v53 = vunpack.i.h.bf16 %v14550_v10  ;;  %v7468_v35 = vpack.c.bf16 %v3162_v2, %v14551_v31  ;;  %v7572_v61 = vpack.c.bf16 %v3043_v38, %v14552_v62  ;;  %v3164_v8 = vsel %vm14522_vm5, %v8759_v23, %v8760_v36  ;;  %vm14556_vm7 = vmmov %vm14541_vm1  ;;  %v14559_v23 = vld [vmem:[#allocation17_spill] sm:$0xff] }
 0x49a   : > { %v12889_v16 = vsel %vm14546_vm13, %v14545_v57, %v14544_v59  ;;  %v12896_v7 = vsel %vm14511_vm4, %v14547_v4, %v8555_v47  ;;  %v3283_v0 = vsel %vm14549_vm8, %v14548_v54, %v8715_v46  ;;  %v7574_v1 = vpack.c.bf16 %v3165_v27, %v12755_v42  ;;  %v14553_v47 = vld [vmem:[#allocation16_spill] sm:$0xff]  ;;  %v12916_v42 = vpop.permute.xlu0 %9202  ;;  %vm14565_vm14 = vmmov %vm14541_vm1  ;;  %v14566_v54 = vld [vmem:[#allocation41_spill] sm:$0xff] }
 0x49b   : > { %v8770_v33 = vunpack.i.h.bf16 %v14540_v20  ;;  %v7470_v30 = vpack.c.bf16 %v3284_v44, %v3223_v48  ;;  %v8775_v51 = vunpack.i.h.bf16 %v14553_v47  ;;  %v8774_v56 = vunpack.i.l.bf16 %v14553_v47  ;;  %7469 = vmatpush1.bf16.msra.mxu0 %v7468_v35  ;;  %7573 = vmatpush1.bf16.msra.mxu1 %v7572_v61  ;;  %v12918_v48 = vpop.permute.xlu1 %9207  ;;  %v14577_v47 = vld [vmem:[#allocation50_spill] sm:$0xff] }
 0x49c   : > { %vm14554_vm10 = vcmask 736256   ;;  %v3286_v60 = vsel %vm14556_vm7, %v8765_v12, %v14555_v45  ;;  %v14557_v2 = vunpack.i.l.bf16 %v14542_v43  ;;  %v8780_v36 = vunpack.i.h.bf16 %v14559_v23  ;;  %7575 = vmatprep.subr.bf16.mxu1 %v7574_v1 }
 0x49d   : > { %v3405_v46 = vsel %vm14554_vm10, %v8720_v6, %v8769_v18  ;;  %vm14558_vm9 = vmmov %vm14554_vm10  ;;  %7471 = vmatprep.subr.bf16.mxu0 %v7470_v30  ;;  %v7472_v27 = vpack.c.bf16 %v3283_v0, %v12581_v29  ;;  %v14560_v20 = vunpack.i.h.bf16 %v14256_v5  ;;  %v14561_v44 = vunpack.i.l.bf16 %v14256_v5  ;;  %v14568_v0 = vld [vmem:[#allocation75_spill] sm:$0xff] }
 0x49e   : > { %v3404_v38 = vsel %vm14558_vm9, %v14557_v2, %v8720_v6  ;;  %v14563_v43 = vunpack.i.l.bf16 %v14550_v10  ;;  %vm14564_vm11 = vcmask 728064   ;;  %v3285_v57 = vsel %vm14565_vm14, %v8764_v41, %v8765_v12  ;;  %vm14567_vm1 = vmmov %vm14558_vm9  ;;  %v14571_v10 = vld [vmem:[#allocation36_spill] sm:$0xff]  ;;  %v14573_v12 = vld [vmem:[#allocation73_spill] sm:$0xff] }
 0x49f   : > { %v12926_v59 = vsel %vm14562_vm6, %v14561_v44, %v14560_v20  ;;  %v8779_v4 = vunpack.i.l.bf16 %v14559_v23  ;;  %v7576_v31 = vpack.c.bf16 %v3164_v8, %v14566_v54  ;;  %v3406_v29 = vsel %vm14567_vm1, %v8769_v18, %v8770_v33  ;;  %vm14569_vm12 = vmmov %vm14567_vm1  ;;  %7473 = vmatpush1.bf16.msra.mxu0 %v7472_v27  ;;  %v14575_v8 = vld [vmem:[#allocation25_spill] sm:$0xff]  ;;  %v14582_v27 = vld [vmem:[#allocation54_spill] sm:$0xff] }
 0x4a0   : > { %v3525_v6 = vsel %vm14564_vm11, %v14563_v43, %v8725_v53  ;;  %v3407_v35 = vsel %vm14569_vm12, %v8770_v33, %v14568_v0  ;;  %v7474_v5 = vpack.c.bf16 %v3405_v46, %v3344_v21  ;;  %v7578_v62 = vpack.c.bf16 %v3286_v60, %v12809_v50  ;;  %vm14570_vm13 = vmmov %vm14564_vm11  ;;  %v12950_v50 = vpop.permute.xlu0 %4319  ;;  %v12952_v21 = vpop.permute.xlu1 %9212  ;;  %v14579_v60 = vld [vmem:[#allocation65_spill] sm:$0xff] }
 0x4a1   : > { %v12939_v61 = vsel %vm14570_vm13, %v8774_v56, %v8775_v51  ;;  %v8799_v30 = vunpack.i.l.bf16 %v14571_v10  ;;  %vm14572_vm4 = vmmov %vm14564_vm11  ;;  %vm14576_vm5 = vcmask 89088   ;;  %v8800_v33 = vunpack.i.h.bf16 %v14571_v10  ;;  %7577 = vmatpush1.bf16.msra.mxu1 %v7576_v31  ;;  %v14585_v54 = vld [vmem:[#allocation61_spill] sm:$0xff]  ;;  %v14593_v10 = vld [vmem:[#allocation39_spill] sm:$0xff] }
 0x4a2   : > { %v3526_v41 = vsel %vm14572_vm4, %v8725_v53, %v8774_v56  ;;  %vm14574_vm8 = vmmov %vm14572_vm4  ;;  %v12947_v18 = vsel %vm14576_vm5, %v8780_v36, %v14575_v8  ;;  %7475 = vmatprep.subr.bf16.mxu0 %v7474_v5  ;;  %v7476_v46 = vpack.c.bf16 %v3404_v38, %v14577_v47  ;;  %v7480_v45 = vpack.c.bf16 %v3525_v6, %v12612_v13  ;;  %v14584_v6 = vld [vmem:[#allocation27_spill] sm:$0xff]  ;;  %v14586_v0 = vld [vmem:[#allocation77_spill] sm:$0xff] }
 0x4a3   : > { %v3528_v1 = vsel %vm14574_vm8, %v8775_v51, %v14573_v12  ;;  %v7582_v53 = vpack.c.bf16 %v3407_v35, %v12837_v25  ;;  %7579 = vmatprep.subr.bf16.mxu1 %v7578_v62  ;;  %v14578_v51 = vld [vmem:[#allocation31_spill] sm:$0xff]  ;;  %v14580_v2 = vunpack.i.h.bf16 %v14579_v60  ;;  %vm14581_vm10 = vmmov %vm14576_vm5  ;;  %v7584_v20 = vpack.c.bf16 %v3406_v29, %v14582_v27  ;;  %v14592_v62 = vld [vmem:[#allocation37_spill] sm:$0xff] }
 0x4a4   : > { %v7580_v56 = vpack.c.bf16 %v3285_v57, %v14578_v51  ;;  %vm14583_vm7 = vmmov %vm14576_vm5  ;;  %v7478_v43 = vpack.c.bf16 %v3526_v41, %v12889_v16  ;;  %v7586_v38 = vpack.c.bf16 %v3528_v1, %v12853_v19  ;;  %v7588_v13 = vpack.c.bf16 %v12939_v61, %v12604_v39  ;;  %7477 = vmatpush1.bf16.msra.mxu0 %v7476_v46  ;;  %v14590_v16 = vld [vmem:[#allocation67_spill] sm:$0xff]  ;;  %v12986_v35 = vpop.permute.xlu1 %9222 }
 0x4a5   : > { %v3647_v23 = vsel %vm14581_vm10, %v14580_v2, %v8779_v4  ;;  %v12963_v44 = vsel %vm14583_vm7, %v8779_v4, %v8780_v36  ;;  %v7590_v25 = vpack.c.bf16 %v12947_v18, %v12862_v15  ;;  %v8815_v57 = vunpack.i.h.bf16 %v14584_v6  ;;  %v12984_v15 = vpop.permute.xlu0 %9217 }
 0x4a6   : > { %v8819_v31 = vunpack.i.l.bf16 %v14585_v54  ;;  %v14587_v29 = vunpack.i.h.bf16 %v14586_v0  ;;  %vm14588_vm9 = vcmask 80896   ;;  %v8820_v39 = vunpack.i.h.bf16 %v14585_v54  ;;  %7479 = vmatprep.subr.bf16.mxu0 %v7478_v43  ;;  %7581 = vmatpush1.bf16.msra.mxu1 %v7580_v56  ;;  %v14605_v54 = vld [vmem:[#allocation80_spill] sm:$0xff]  ;;  %v14608_v0 = vld [vmem:[#allocation81_spill] sm:$0xff] }
 0x4a7   : > { %vm14589_vm6 = vmmov %vm14588_vm9  ;;  %v7482_v5 = vpack.c.bf16 %v3647_v23, %v12896_v7  ;;  %v8860_v61 = vunpack.i.h.bf16 %v14592_v62  ;;  %v8895_v41 = vunpack.i.h.bf16 %v14593_v10  ;;  %v9160_v1 = vunpack.i.h.bf16 %v12631_v52  ;;  %7583 = vmatprep.subr.bf16.mxu1 %v7582_v53  ;;  %v14600_v23 = vld [vmem:[#allocation49_spill] sm:$0xff] }
 0x4a8   : > { %v3768_v36 = vsel %vm14588_vm9, %v14587_v29, %v8799_v30  ;;  %v12977_v4 = vsel %vm14589_vm6, %v8799_v30, %v8800_v33  ;;  %vm14591_vm11 = vmmov %vm14589_vm6  ;;  %v14594_v30 = vld [vmem:[#allocation46_spill] sm:$0xff]  ;;  %v9165_v8 = vunpack.i.h.bf16 %v12633_v34  ;;  %v9164_v18 = vunpack.i.l.bf16 %v12633_v34  ;;  %7481 = vmatpush1.bf16.msra.mxu0 %v7480_v45  ;;  %v13016_v45 = vpop.permute.xlu1 %9227 }
 0x4a9   : > { %v12981_v19 = vsel %vm14591_vm11, %v8800_v33, %v14590_v16  ;;  %v9135_v12 = vunpack.i.h.bf16 %v14594_v30  ;;  %v7486_v33 = vpack.c.bf16 %v3768_v36, %v12926_v59  ;;  %v7592_v47 = vpack.c.bf16 %v12963_v44, %v12793_v14  ;;  %v14598_v34 = vld [vmem:[#allocation42_spill] sm:$0xff]  ;;  %7483 = vmatprep.subr.bf16.mxu0 %v7482_v5  ;;  %v14612_v5 = vld [vmem:[#allocation64_spill] sm:$0xff] }
 0x4aa   : > { %v7594_v7 = vpack.c.bf16 %v12981_v19, %v12878_v17  ;;  %vm14595_vm14 = vcmask 211968   ;;  %v14596_v51 = vunpack.i.l.bf16 %v14584_v6  ;;  %v7596_v56 = vpack.c.bf16 %v12977_v4, %v12814_v3  ;;  %v14599_v59 = vld [vmem:[#allocation82_spill] sm:$0xff]  ;;  %7585 = vmatpush1.bf16.msra.mxu1 %v7584_v20  ;;  %v13014_v17 = vpop.permute.xlu0 %4440 }
 0x4ab   : > { %v13001_v46 = vsel %vm14595_vm14, %v8815_v57, %v8819_v31  ;;  %vm14597_vm1 = vmmov %vm14595_vm14  ;;  %v13911_v60 = vunpack.i.h.bf16 %v14598_v34  ;;  %v13910_v2 = vunpack.i.h.bf16 %v14599_v59  ;;  %v13912_v14 = vunpack.i.h.bf16 %v14600_v23  ;;  %7587 = vmatprep.subr.bf16.mxu1 %v7586_v38  ;;  %v14615_v38 = vld [vmem:[#allocation71_spill] sm:$0xff] }
 0x4ac   : > { %v3828_v53 = vsel %vm14597_vm1, %v14596_v51, %v8815_v57  ;;  %vm14601_vm12 = vmmov %vm14597_vm1  ;;  %v14602_v44 = vunpack.i.l.bf16 %v14592_v62  ;;  %vm14603_vm13 = vcmask 7168   ;;  %v14604_v6 = vunpack.i.l.bf16 %v14593_v10 }
 0x4ad   : > { %v13012_v27 = vsel %vm14601_vm12, %v8819_v31, %v8820_v39  ;;  %v14606_v31 = vunpack.i.h.bf16 %v14605_v54  ;;  %vm14607_vm4 = vcmask 146432   ;;  %v14609_v29 = vunpack.i.h.bf16 %v14608_v0  ;;  %v14616_v0 = vld [vmem:[#allocation72_spill] sm:$0xff]  ;;  %vm14627_vm1 = vmmov %vm14603_vm13 }
 0x4ae   : > { %v13021_v43 = vsel %vm14603_vm13, %v14602_v44, %v8860_v61  ;;  %v13028_v57 = vsel %vm370_vm0, %v14604_v6, %v8895_v41  ;;  %vm14610_vm8 = vcmask 138240   ;;  %vm14611_vm5 = vcmask 72704   ;;  %7589 = vmatpush1.bf16.msra.mxu1 %v7588_v13  ;;  %vm14624_vm6 = vmmov %vm14607_vm4 }
 0x4af   : > { %v13033_v20 = vsel %vm14607_vm4, %v14606_v31, %v9135_v12  ;;  %v13038_v36 = vsel %vm14610_vm8, %v14609_v29, %v9160_v1  ;;  %v13041_v16 = vsel %vm14611_vm5, %v9164_v18, %v9165_v8  ;;  %v9170_v19 = vunpack.i.h.bf16 %v12677_v55  ;;  %vm14614_vm10 = vmmov %vm14611_vm5  ;;  %7591 = vmatprep.subr.bf16.mxu1 %v7590_v25 }
 0x4b0   : > { %v9169_v39 = vunpack.i.l.bf16 %v12677_v55  ;;  %v14613_v62 = vunpack.i.h.bf16 %v14612_v5  ;;  %v9175_v44 = vunpack.i.h.bf16 %v12709_v24  ;;  %v9174_v6 = vunpack.i.l.bf16 %v12709_v24  ;;  %vm14623_vm9 = vmmov %vm14611_vm5 }
 0x4b1   : > { %v9180_v54 = vunpack.i.h.bf16 %v12759_v22  ;;  %v9179_v31 = vunpack.i.l.bf16 %v12759_v22  ;;  %v14617_v29 = vpack.c.bf16 %v14615_v38, %v14616_v0  ;;  %v14618_v55 = vunpack.i.l.bf16 %v14598_v34  ;;  %v13076_v38 = vpop.permute.xlu0 %9232  ;;  %v13078_v0 = vpop.permute.xlu1 %9237  ;;  %vm14625_vm11 = vmmov %vm14607_vm4 }
 0x4b2   : > { %v3889_v51 = vsel %vm14614_vm10, %v14613_v62, %v9164_v18  ;;  %vm14619_vm7 = vcmask 973824   ;;  %v14620_v18 = vunpack.i.l.bf16 %v14599_v59  ;;  %v14621_v22 = vunpack.i.l.bf16 %v14600_v23  ;;  %vm14626_vm14 = vmmov %vm14607_vm4  ;;  %7593 = vmatpush1.bf16.msra.mxu1 %v7592_v47 }
 0x4b3   : > { %7485 = vmatpush1.bf16.msra.mxu0 %v14617_v29  ;;  %v13060_v5 = vsel %vm14619_vm7, %v14618_v55, %v13911_v60  ;;  %v7496_v29 = vpack.c.bf16 %v13021_v43, %v13033_v20  ;;  %v14622_v55 = vld [vmem:[#allocation45_spill] sm:$0xff]  ;;  %v7490_v60 = vpack.c.bf16 %v3889_v51, %v3828_v53  ;;  %v13089_v13 = vsel %vm14624_vm6, %v9169_v39, %v9170_v19  ;;  %vm14628_vm12 = vmmov %vm14627_vm1  ;;  %v14631_v53 = vld [vmem:[#allocation43_spill] sm:$0xff] }
 0x4b4   : > { %v13067_v24 = vsel %vm492_vm2, %v14620_v18, %v13910_v2  ;;  %v13074_v62 = vsel %vm553_vm3, %v14621_v22, %v13912_v14  ;;  %7487 = vmatprep.subr.bf16.mxu0 %v7486_v33  ;;  %v7600_v2 = vpack.c.bf16 %v13041_v16, %v13001_v46  ;;  %v3891_v22 = vsel %vm14623_vm9, %v9165_v8, %v12675_v32  ;;  %vm14629_vm13 = vmmov %vm14610_vm8  ;;  %v14630_v46 = vld [vmem:[#allocation60_spill] sm:$0xff]  ;;  %v14641_v18 = vld [vmem:[#allocation21_spill] sm:$0xff] }
 0x4b5   : > { %v3951_v33 = vsel %vm14625_vm11, %v9170_v19, %v12711_v37  ;;  %v3949_v14 = vsel %vm14626_vm14, %v9135_v12, %v9169_v39  ;;  %v13095_v43 = vsel %vm14627_vm1, %v9174_v6, %v9175_v44  ;;  %v4012_v20 = vsel %vm14628_vm12, %v9175_v44, %v12757_v49  ;;  %vm14633_vm4 = vmmov %vm14627_vm1  ;;  %v13112_v49 = vpop.permute.xlu0 %4560  ;;  %v13114_v19 = vpop.permute.xlu1 %9242  ;;  %7595 = vmatprep.subr.bf16.mxu1 %v7594_v7 }
 0x4b6   : > { %v13100_v25 = vsel %vm14629_vm13, %v9179_v31, %v9180_v54  ;;  %v14632_v32 = vpack.c.bf16 %v14630_v46, %v14631_v53  ;;  %v4010_v8 = vsel %vm14633_vm4, %v8860_v61, %v9174_v6  ;;  %v13108_v37 = vsel %vm14610_vm8, %v9180_v54, %v12795_v26  ;;  %vm14634_vm5 = vmmov %vm14610_vm8  ;;  %v14635_v54 = vld [vmem:[#allocation53_spill] sm:$0xff]  ;;  %7597 = vmatpush1.bf16.msra.mxu1 %v7596_v56 }
 0x4b7   : > { %v9185_v12 = vunpack.i.h.bf16 %v12797_v40  ;;  %v9184_v16 = vunpack.i.l.bf16 %v12797_v40  ;;  %v4070_v39 = vsel %vm14634_vm5, %v9160_v1, %v9179_v31  ;;  %v9190_v51 = vunpack.i.h.bf16 %v12839_v28  ;;  %v14637_v53 = vld [vmem:[#allocation33_spill] sm:$0xff] }
 0x4b8   : > { %7489 = vmatpush1.bf16.msra.mxu0 %v14632_v32  ;;  %v9189_v61 = vunpack.i.l.bf16 %v12839_v28  ;;  %v9195_v44 = vunpack.i.h.bf16 %v12841_v9  ;;  %v9194_v26 = vunpack.i.l.bf16 %v12841_v9  ;;  %v7598_v6 = vpack.c.bf16 %v3891_v22, %v13012_v27  ;;  %v14636_v28 = vld [vmem:[#allocation32_spill] sm:$0xff]  ;;  %v14639_v9 = vld [vmem:[#allocation38_spill] sm:$0xff]  ;;  %v14640_v27 = vld [vmem:[#allocation35_spill] sm:$0xff] }
 0x4b9   : > { %7491 = vmatprep.subr.bf16.mxu0 %v7490_v60  ;;  %v7604_v40 = vpack.c.bf16 %v13095_v43, %v13089_v13  ;;  %v7602_v47 = vpack.c.bf16 %v4012_v20, %v3951_v33  ;;  %v7494_v60 = vpack.c.bf16 %v4010_v8, %v3949_v14  ;;  %v7608_v46 = vpack.c.bf16 %v14635_v54, %v13100_v25  ;;  %v13140_v33 = vpop.permute.xlu0 %9247  ;;  %v13142_v43 = vpop.permute.xlu1 %9252 }
 0x4ba   : > { %v9200_v1 = vunpack.i.h.bf16 %v12882_v58  ;;  %v9204_v31 = vunpack.i.l.bf16 %v12916_v42  ;;  %v14638_v32 = vpack.c.bf16 %v14636_v28, %v14637_v53  ;;  %v7498_v7 = vpack.c.bf16 %v14639_v9, %v4070_v39  ;;  %7599 = vmatprep.subr.bf16.mxu1 %v7598_v6 }
 0x4bb   : > { %v7606_v22 = vpack.c.bf16 %v14640_v27, %v13108_v37  ;;  %v14642_v13 = vunpack.i.h.bf16 %v14641_v18  ;;  %vm14643_vm10 = vcmask 130048   ;;  %v13146_v8 = vsel %vm370_vm0, %v9189_v61, %v9190_v51  ;;  %7601 = vmatpush1.bf16.msra.mxu1 %v7600_v2 }
 0x4bc   : > { %7493 = vmatpush1.bf16.msra.mxu0 %v14638_v32  ;;  %vm14644_vm7 = vmmov %vm14643_vm10  ;;  %v9199_v39 = vunpack.i.l.bf16 %v12882_v58  ;;  %v13157_v3 = vsel %vm370_vm0, %v9190_v51, %v12880_v11  ;;  %v9205_v4 = vunpack.i.h.bf16 %v12916_v42  ;;  %v9209_v56 = vunpack.i.l.bf16 %v12918_v48  ;;  %7603 = vmatprep.subr.bf16.mxu1 %v7602_v47  ;;  %v14657_v47 = vld [vmem:[#allocation44_spill] sm:$0xff] }
 0x4bd   : > { %v4145_v14 = vsel %vm14643_vm10, %v14642_v13, %v9184_v16  ;;  %7495 = vmatprep.subr.bf16.mxu0 %v7494_v60  ;;  %v4146_v20 = vsel %vm14644_vm7, %v9184_v16, %v9185_v12  ;;  %vm14645_vm9 = vmmov %vm14644_vm7  ;;  %v4206_v16 = vsel %vm370_vm0, %v8895_v41, %v9189_v61  ;;  %vm14647_vm11 = vcmask 64512   ;;  %v13176_v41 = vpop.permute.xlu1 %9262  ;;  %v14650_v60 = vld [vmem:[#allocation28_spill] sm:$0xff] }
 0x4be   : > { %v13149_v37 = vsel %vm14645_vm9, %v9185_v12, %v9194_v26  ;;  %vm14646_vm6 = vmmov %vm14644_vm7  ;;  %v9210_v12 = vunpack.i.h.bf16 %v12918_v48  ;;  %v4266_v58 = vsel %vm14647_vm11, %v9199_v39, %v9200_v1  ;;  %vm14649_vm14 = vcmask 973824   ;;  %v13174_v48 = vpop.permute.xlu0 %9257 }
 0x4bf   : > { %v13152_v18 = vsel %vm14646_vm6, %v9194_v26, %v9195_v44  ;;  %v9214_v44 = vunpack.i.l.bf16 %v12952_v21  ;;  %v14648_v26 = vunpack.i.h.bf16 %v14598_v34  ;;  %v9215_v51 = vunpack.i.h.bf16 %v12952_v21  ;;  %vm14652_vm0 = vmmov %vm14647_vm11  ;;  %7605 = vmatpush1.bf16.msra.mxu1 %v7604_v40 }
 0x4c0   : > { %7497 = vmatpush1.bf16.msra.mxu0 %v7496_v29  ;;  %v9220_v42 = vunpack.i.h.bf16 %v12984_v15  ;;  %v9219_v6 = vunpack.i.l.bf16 %v12984_v15  ;;  %v9224_v10 = vunpack.i.l.bf16 %v12986_v35  ;;  %v7504_v29 = vpack.c.bf16 %v13028_v57, %v4145_v14  ;;  %vm14653_vm1 = vmmov %vm14649_vm14  ;;  %7607 = vmatprep.subr.bf16.mxu1 %v7606_v22 }
 0x4c1   : > { %v4327_v11 = vsel %vm14649_vm14, %v14648_v26, %v9204_v31  ;;  %7499 = vmatprep.subr.bf16.mxu0 %v7498_v7  ;;  %v7612_v34 = vpack.c.bf16 %v13146_v8, %v13149_v37  ;;  %v9225_v61 = vunpack.i.h.bf16 %v12986_v35  ;;  %v7502_v21 = vpack.c.bf16 %v4206_v16, %v4146_v20  ;;  %vm14654_vm12 = vmmov %vm14652_vm0 }
 0x4c2   : > { %v7610_v15 = vpack.c.bf16 %v13157_v3, %v13152_v18  ;;  %v14651_v28 = vunpack.i.h.bf16 %v14650_v60  ;;  %v13188_v53 = vsel %vm14653_vm1, %v9204_v31, %v9205_v4  ;;  %v13191_v32 = vsel %vm14654_vm12, %v9200_v1, %v9209_v56  ;;  %vm14655_vm13 = vmmov %vm14652_vm0  ;;  %v13210_v14 = vpop.permute.xlu0 %9267 }
 0x4c3   : > { %v4268_v57 = vsel %vm14655_vm13, %v9209_v56, %v9210_v12  ;;  %vm14656_vm4 = vmmov %vm14653_vm1  ;;  %v14658_v9 = vunpack.i.h.bf16 %v14657_v47  ;;  %vm14659_vm8 = vcmask 56320   ;;  %v14660_v27 = vpack.c.bf16 %v14622_v55, %v13038_v36  ;;  %7609 = vmatpush1.bf16.msra.mxu1 %v7608_v46 }
 0x4c4   : > { %v4265_v2 = vsel %vm14652_vm0, %v14651_v28, %v9199_v39  ;;  %v4329_v35 = vsel %vm14656_vm4, %v9205_v4, %v12950_v50  ;;  %v7506_v13 = vpack.c.bf16 %v4327_v11, %v4266_v58  ;;  %v13205_v31 = vsel %vm492_vm2, %v9219_v6, %v9220_v42  ;;  %vm14661_vm5 = vmmov %vm14659_vm8  ;;  %v13212_v50 = vpop.permute.xlu1 %9272  ;;  %v14665_v58 = vld [vmem:[#allocation40_spill] sm:$0xff]  ;;  %7611 = vmatprep.subr.bf16.mxu1 %v7610_v15 }
 0x4c5   : > { %v13199_v7 = vsel %vm14659_vm8, %v14658_v9, %v9214_v44  ;;  %7501 = vmatpush1.bf16.msra.mxu0 %v14660_v27  ;;  %v13208_v1 = vsel %vm14661_vm5, %v9215_v51, %v9224_v10  ;;  %vm14662_vm10 = vmmov %vm14661_vm5  ;;  %v13220_v36 = vsel %vm492_vm2, %v9220_v42, %v13014_v17  ;;  %v9229_v55 = vunpack.i.l.bf16 %v13016_v45 }
 0x4c6   : > { %7503 = vmatprep.subr.bf16.mxu0 %v7502_v21  ;;  %v4387_v20 = vsel %vm14662_vm10, %v9214_v44, %v9215_v51  ;;  %vm14663_vm7 = vmmov %vm14661_vm5  ;;  %v14664_v37 = vunpack.i.h.bf16 %v14599_v59  ;;  %v9230_v18 = vunpack.i.h.bf16 %v13016_v45  ;;  %v9235_v39 = vunpack.i.h.bf16 %v13076_v38 }
 0x4c7   : > { %v13216_v8 = vsel %vm14663_vm7, %v9224_v10, %v9225_v61  ;;  %v9234_v3 = vunpack.i.l.bf16 %v13076_v38  ;;  %v9239_v4 = vunpack.i.l.bf16 %v13078_v0  ;;  %v7508_v56 = vpack.c.bf16 %v13060_v5, %v4265_v2  ;;  %v13242_v5 = vpop.permute.xlu0 %9277  ;;  %7613 = vmatpush1.bf16.msra.mxu1 %v7612_v34 }
 0x4c8   : > { %v4447_v40 = vsel %vm492_vm2, %v14664_v37, %v9219_v6  ;;  %v7616_v17 = vpack.c.bf16 %v13188_v53, %v13191_v32  ;;  %v7614_v16 = vpack.c.bf16 %v4329_v35, %v4268_v57  ;;  %v9240_v22 = vunpack.i.h.bf16 %v13078_v0  ;;  %v13244_v38 = vpop.permute.xlu1 %9282  ;;  %v14674_v35 = vld [vmem:[#allocation55_spill] sm:$0xff] }
 0x4c9   : > { %7505 = vmatpush1.bf16.msra.mxu0 %v7504_v29  ;;  %v7512_v59 = vpack.c.bf16 %v13067_v24, %v13199_v7  ;;  %v7620_v45 = vpack.c.bf16 %v13205_v31, %v13208_v1  ;;  %v9245_v12 = vunpack.i.h.bf16 %v13114_v19  ;;  %v7510_v44 = vpack.c.bf16 %v4447_v40, %v4387_v20  ;;  %v14675_v7 = vld [vmem:[#allocation51_spill] sm:$0xff] }
 0x4ca   : > { %7507 = vmatprep.subr.bf16.mxu0 %v7506_v13  ;;  %v7618_v0 = vpack.c.bf16 %v13220_v36, %v13216_v8  ;;  %v14666_v24 = vunpack.i.h.bf16 %v14665_v58  ;;  %vm14667_vm2 = vcmask 48128   ;;  %v9250_v11 = vunpack.i.h.bf16 %v13140_v33  ;;  %7615 = vmatprep.subr.bf16.mxu1 %v7614_v16  ;;  %v14678_v13 = vld [vmem:[#allocation84_spill] sm:$0xff] }
 0x4cb   : > { %v9249_v51 = vunpack.i.l.bf16 %v13140_v33  ;;  %v13254_v25 = vsel %vm553_vm3, %v9234_v3, %v9235_v39  ;;  %vm14668_vm9 = vmmov %vm14667_vm2  ;;  %v9244_v46 = vunpack.i.l.bf16 %v13114_v19  ;;  %v4569_v10 = vsel %vm553_vm3, %v9235_v39, %v13112_v49  ;;  %v13271_v60 = vpop.permute.xlu0 %9287  ;;  %7617 = vmatpush1.bf16.msra.mxu1 %v7616_v17 }
 0x4cc   : > { %v4506_v26 = vsel %vm14667_vm2, %v14666_v24, %v9229_v55  ;;  %v13257_v54 = vsel %vm14668_vm9, %v9230_v18, %v9239_v4  ;;  %vm14669_vm6 = vmmov %vm14667_vm2  ;;  %v9255_v29 = vunpack.i.h.bf16 %v13142_v43  ;;  %v14671_v33 = vunpack.i.h.bf16 %v14600_v23  ;;  %v13273_v28 = vpop.permute.xlu1 %9292  ;;  %7619 = vmatprep.subr.bf16.mxu1 %v7618_v0 }
 0x4cd   : > { %v4507_v42 = vsel %vm14669_vm6, %v9229_v55, %v9230_v18  ;;  %vm14670_vm11 = vmmov %vm14667_vm2  ;;  %7509 = vmatpush1.bf16.msra.mxu0 %v7508_v56  ;;  %v9254_v21 = vunpack.i.l.bf16 %v13142_v43  ;;  %v9259_v15 = vunpack.i.l.bf16 %v13174_v48  ;;  %v9265_v19 = vunpack.i.h.bf16 %v13176_v41 }
 0x4ce   : > { %v4509_v6 = vsel %vm14670_vm11, %v9239_v4, %v9240_v22  ;;  %v4567_v61 = vsel %vm553_vm3, %v14671_v33, %v9234_v3  ;;  %7511 = vmatprep.subr.bf16.mxu0 %v7510_v44  ;;  %vm14672_vm14 = vcmask 457728   ;;  %v9260_v2 = vunpack.i.h.bf16 %v13174_v48  ;;  %v14685_v4 = vld [vmem:[#allocation83_spill] sm:$0xff]  ;;  %v14688_v44 = vld [vmem:[#allocation57_spill] sm:$0xff]  ;;  %6619 = vmatmul.mubr.f32.vlgmr.msra.gmra.mrb[6].mxu1 %v14674_v35 }
 0x4cf   : > { %v4627_v49 = vsel %vm14672_vm14, %v9244_v46, %v9245_v12  ;;  %v9270_v23 = vunpack.i.h.bf16 %v13210_v14  ;;  %v9269_v53 = vunpack.i.l.bf16 %v13210_v14  ;;  %vm14673_vm3 = vcmask 318464   ;;  %vm14677_vm0 = vmmov %vm14672_vm14  ;;  %7621 = vmatpush1.bf16.msra.mxu1 %v7620_v45 }
 0x4d0   : > { %v4688_v43 = vsel %vm14673_vm3, %v9249_v51, %v9250_v11  ;;  %v7516_v32 = vpack.c.bf16 %v13074_v62, %v4506_v26  ;;  %v7624_v34 = vpack.c.bf16 %v13254_v25, %v13257_v54  ;;  %v9264_v57 = vunpack.i.l.bf16 %v13176_v41  ;;  %6477 = vmatmul.mubr.f32.vlgmr.msra.gmra.mrb[6].mxu0 %v14674_v35  ;;  %vm14679_vm1 = vmmov %vm14673_vm3  ;;  %v13294_v41 = vpop.permute.xlu0 %9297  ;;  %v13296_v36 = vpop.permute.xlu1 %9302  ;;  %v14702_v35 = vld [vmem:[#allocation86_spill] sm:$0xff] }
 0x4d1   : > { %v7514_v47 = vpack.c.bf16 %v4567_v61, %v4507_v42  ;;  %v7622_v9 = vpack.c.bf16 %v4569_v10, %v4509_v6  ;;  %v14676_v48 = vunpack.i.h.bf16 %v14675_v7  ;;  %v4687_v20 = vsel %vm14679_vm1, %v14678_v13, %v9249_v51  ;;  %7513 = vmatpush1.bf16.msra.mxu0 %v7512_v59  ;;  %vm14680_vm12 = vmmov %vm14677_vm0  ;;  %v14696_v10 = vld [vmem:[#allocation87_spill] sm:$0xff] }
 0x4d2   : > { %v4629_v8 = vsel %vm14680_vm12, %v9254_v21, %v9255_v29  ;;  %vm14681_vm13 = vmmov %vm14679_vm1  ;;  %v7518_v55 = vpack.c.bf16 %v4688_v43, %v4627_v49  ;;  %vm14682_vm4 = vcmask 449536   ;;  %v9275_v40 = vunpack.i.h.bf16 %v13212_v50 }
 0x4d3   : > { %v4626_v27 = vsel %vm14677_vm0, %v14676_v48, %v9244_v46  ;;  %v13292_v62 = vsel %vm14681_vm13, %v9250_v11, %v9259_v15  ;;  %7515 = vmatprep.subr.bf16.mxu0 %v7514_v47  ;;  %v4748_v37 = vsel %vm14682_vm4, %v9264_v57, %v9265_v19  ;;  %v9274_v18 = vunpack.i.l.bf16 %v13212_v50  ;;  %vm14684_vm5 = vmmov %vm14679_vm1  ;;  %v14691_v11 = vld [vmem:[#allocation85_spill] sm:$0xff]  ;;  %7623 = vmatprep.subr.bf16.mxu1 %v7622_v9 }
 0x4d4   : > { %vm14683_vm8 = vcmask 310272   ;;  %v4690_v3 = vsel %vm14684_vm5, %v9259_v15, %v9260_v2  ;;  %vm14686_vm10 = vcmask 392192   ;;  %v9280_v56 = vunpack.i.h.bf16 %v13242_v5  ;;  %vm14687_vm7 = vmmov %vm14677_vm0  ;;  %v13326_v25 = vpop.permute.xlu1 %9312  ;;  %7625 = vmatpush1.bf16.msra.mxu1 %v7624_v34 }
 0x4d5   : > { %v4809_v39 = vsel %vm14683_vm8, %v9269_v53, %v9270_v23  ;;  %7014 = vmatprep.mubr.msk.f32.mxu0 %vm14686_vm10, %v14685_v4  ;;  %v9279_v17 = vunpack.i.l.bf16 %v13242_v5  ;;  %v9285_v16 = vunpack.i.h.bf16 %v13244_v38  ;;  %v9289_v22 = vunpack.i.l.bf16 %v13271_v60  ;;  %vm14690_vm2 = vmmov %vm14682_vm4  ;;  %7517 = vmatpush1.bf16.msra.mxu0 %v7516_v32 }
 0x4d6   : > { %v7520_v59 = vpack.c.bf16 %v4687_v20, %v4626_v27  ;;  %v4628_v50 = vsel %vm14687_vm7, %v9245_v12, %v9254_v21  ;;  %v14689_v0 = vunpack.i.h.bf16 %v14688_v44  ;;  %v9290_v24 = vunpack.i.h.bf16 %v13271_v60  ;;  %vm14692_vm9 = vmmov %vm14683_vm8  ;;  %7519 = vmatprep.subr.bf16.mxu0 %v7518_v55  ;;  %v13324_v12 = vpop.permute.xlu0 %9307  ;;  %v14713_v44 = vld [vmem:[#allocation88_spill] sm:$0xff] }
 0x4d7   : > { %v7628_v26 = vpack.c.bf16 %v13292_v62, %v4628_v50  ;;  %v4808_v5 = vsel %vm14692_vm9, %v14691_v11, %v9269_v53  ;;  %v9284_v51 = vunpack.i.l.bf16 %v13244_v38  ;;  %v7626_v54 = vpack.c.bf16 %v4690_v3, %v4629_v8  ;;  %vm14693_vm6 = vmmov %vm14690_vm2 }
 0x4d8   : > { %v4747_v58 = vsel %vm14690_vm2, %v14689_v0, %v9264_v57  ;;  %v4749_v46 = vsel %vm14693_vm6, %v9265_v19, %v9274_v18  ;;  %v7522_v42 = vpack.c.bf16 %v4809_v39, %v4748_v37  ;;  %vm14694_vm11 = vmmov %vm14690_vm2  ;;  %vm14697_vm3 = vcmask 302080   ;;  %v13348_v32 = vpop.permute.xlu1 %9322 }
 0x4d9   : > { %v4750_v6 = vsel %vm14694_vm11, %v9274_v18, %v9275_v40  ;;  %vm14695_vm14 = vmmov %vm14686_vm10  ;;  %v4929_v29 = vsel %vm14697_vm3, %v14696_v10, %v9289_v22  ;;  %v9295_v31 = vunpack.i.h.bf16 %v13273_v28  ;;  %vm14698_vm0 = vcmask 441344   ;;  %7521 = vmatpush1.bf16.msra.mxu0 %v7520_v59  ;;  %7627 = vmatprep.subr.bf16.mxu1 %v7626_v54  ;;  %v14708_v18 = vld [vmem:[#allocation89_spill] sm:$0xff] }
 0x4da   : > { %7015 = vmatprep.mubr.msk.f32.mxu1 %vm14695_vm14, %v14685_v4  ;;  %v4869_v1 = vsel %vm14698_vm0, %v9284_v51, %v9285_v16  ;;  %vm14699_vm1 = vmmov %vm14683_vm8  ;;  %v9305_v33 = vunpack.i.h.bf16 %v13296_v36  ;;  %v9310_v61 = vunpack.i.h.bf16 %v13324_v12  ;;  %v9309_v21 = vunpack.i.l.bf16 %v13324_v12  ;;  %7523 = vmatprep.subr.bf16.mxu0 %v7522_v42  ;;  %v9318_v43 = vpop.permute.xlu0 %9317 }
 0x4db   : > { %v4811_v45 = vsel %vm14699_vm1, %v9279_v17, %v9280_v56  ;;  %vm14700_vm12 = vmmov %vm14697_vm3  ;;  %v7524_v19 = vpack.c.bf16 %v4808_v5, %v4747_v58  ;;  %v9294_v49 = vunpack.i.l.bf16 %v13273_v28  ;;  %v9300_v2 = vunpack.i.h.bf16 %v13294_v41  ;;  %7629 = vmatpush1.bf16.msra.mxu1 %v7628_v26 }
 0x4dc   : > { %v4930_v15 = vsel %vm14700_vm12, %v9289_v22, %v9290_v24  ;;  %v9299_v53 = vunpack.i.l.bf16 %v13294_v41  ;;  %vm14701_vm13 = vmmov %vm14699_vm1  ;;  %v9304_v9 = vunpack.i.l.bf16 %v13296_v36  ;;  %v9325_v28 = vunpack.i.h.bf16 %v13348_v32  ;;  %v9333_v37 = vpop.permute.xlu1 %9332 }
 0x4dd   : > { %v4810_v57 = vsel %vm14701_vm13, %v9270_v23, %v9279_v17  ;;  %vm14703_vm4 = vmmov %vm14698_vm0  ;;  %v7526_v48 = vpack.c.bf16 %v4930_v15, %v4869_v1  ;;  %v7630_v27 = vpack.c.bf16 %v4811_v45, %v4750_v6  ;;  %v9315_v13 = vunpack.i.h.bf16 %v13326_v25  ;;  %7525 = vmatpush1.bf16.msra.mxu0 %v7524_v19 }
 0x4de   : > { %v4868_v47 = vsel %vm14703_vm4, %v14702_v35, %v9284_v51  ;;  %vm14704_vm8 = vmmov %vm14698_vm0  ;;  %v9324_v20 = vunpack.i.l.bf16 %v13348_v32  ;;  %vm14705_vm5 = vcmask 375808   ;;  %vm14706_vm10 = vcmask 236544   ;;  %v9328_v55 = vpop.permute.xlu0 %9327 }
 0x4df   : > { %v7528_v7 = vpack.c.bf16 %v4929_v29, %v4868_v47  ;;  %v4871_v34 = vsel %vm14704_vm8, %v9294_v49, %v9295_v31  ;;  %v4990_v14 = vsel %vm14705_vm5, %v9304_v9, %v9305_v33  ;;  %v5051_v23 = vsel %vm14706_vm10, %v9309_v21, %v9310_v61  ;;  %7527 = vmatprep.subr.bf16.mxu0 %v7526_v48  ;;  %vm14707_vm7 = vmmov %vm14697_vm3  ;;  %v14730_v48 = vld [vmem:[#allocation93_spill] sm:$0xff] }
 0x4e0   : > { %v9314_v8 = vunpack.i.l.bf16 %v13326_v25  ;;  %v9320_v62 = vunpack.i.h.bf16 %v9318_v43  ;;  %v9319_v41 = vunpack.i.l.bf16 %v9318_v43  ;;  %v4932_v40 = vsel %vm14707_vm7, %v9299_v53, %v9300_v2  ;;  %vm14709_vm2 = vmmov %vm14706_vm10  ;;  %7631 = vmatprep.subr.bf16.mxu1 %v7630_v27 }
 0x4e1   : > { %v5050_v39 = vsel %vm14709_vm2, %v14708_v18, %v9309_v21  ;;  %v9330_v3 = vunpack.i.h.bf16 %v9328_v55  ;;  %v9329_v4 = vunpack.i.l.bf16 %v9328_v55  ;;  %vm14710_vm9 = vcmask 367616   ;;  %vm14711_vm6 = vmmov %vm14698_vm0  ;;  %7529 = vmatpush1.bf16.msra.mxu0 %v7528_v7  ;;  %v14722_v21 = vld [vmem:[#allocation90_spill] sm:$0xff] }
 0x4e2   : > { %v5111_v56 = vsel %vm14710_vm9, %v9324_v20, %v9325_v28  ;;  %v7632_v17 = vpack.c.bf16 %v4810_v57, %v4749_v46  ;;  %v4870_v22 = vsel %vm14711_vm6, %v9285_v16, %v9294_v49  ;;  %vm14712_vm11 = vmmov %vm14697_vm3  ;;  %v7530_v50 = vpack.c.bf16 %v5051_v23, %v4990_v14  ;;  %v9338_v38 = vpop.permute.xlu0 %9337  ;;  %v9343_v16 = vpop.permute.xlu1 %9342 }
 0x4e3   : > { %v4931_v59 = vsel %vm14712_vm11, %v9290_v24, %v9299_v53  ;;  %vm14714_vm14 = vmmov %vm14705_vm5  ;;  %v7634_v58 = vpack.c.bf16 %v4932_v40, %v4871_v34  ;;  %vm14715_vm3 = vcmask 228352   ;;  %v9335_v51 = vunpack.i.h.bf16 %v9333_v37  ;;  %v14718_v24 = vld [vmem:[#allocation91_spill] sm:$0xff] }
 0x4e4   : > { %v4989_v0 = vsel %vm14714_vm14, %v14713_v44, %v9304_v9  ;;  %v5171_v26 = vsel %vm14715_vm3, %v9329_v4, %v9330_v3  ;;  %vm14716_vm0 = vmmov %vm14705_vm5  ;;  %7531 = vmatprep.subr.bf16.mxu0 %v7530_v50  ;;  %7633 = vmatpush1.bf16.msra.mxu1 %v7632_v17  ;;  %v9340_v46 = vunpack.i.h.bf16 %v9338_v38  ;;  %v9339_v42 = vunpack.i.l.bf16 %v9338_v38  ;;  %v14728_v9 = vld [vmem:[#allocation92_spill] sm:$0xff] }
 0x4e5   : > { %v4992_v11 = vsel %vm14716_vm0, %v9314_v8, %v9315_v13  ;;  %v7532_v5 = vpack.c.bf16 %v5050_v39, %v4989_v0  ;;  %v7534_v25 = vpack.c.bf16 %v5171_v26, %v5111_v56  ;;  %vm14717_vm1 = vmmov %vm14709_vm2  ;;  %v9345_v6 = vunpack.i.h.bf16 %v9343_v16  ;;  %7635 = vmatprep.subr.bf16.mxu1 %v7634_v58  ;;  %v14739_v26 = vld [vmem:[#allocation94_spill] sm:$0xff] }
 0x4e6   : > { %v5053_v60 = vsel %vm14717_vm1, %v9319_v41, %v9320_v62  ;;  %vm14719_vm12 = vmmov %vm14715_vm3  ;;  %v7636_v10 = vpack.c.bf16 %v4931_v59, %v4870_v22  ;;  %v9334_v29 = vunpack.i.l.bf16 %v9333_v37  ;;  %v9344_v31 = vunpack.i.l.bf16 %v9343_v16  ;;  %v9348_v2 = vpop.permute.xlu0 %9347  ;;  %v9353_v53 = vpop.permute.xlu1 %9352 }
 0x4e7   : > { %v5170_v54 = vsel %vm14719_vm12, %v14718_v24, %v9329_v4  ;;  %vm14720_vm13 = vmmov %vm14716_vm0  ;;  %7533 = vmatpush1.bf16.msra.mxu0 %v7532_v5  ;;  %v7638_v19 = vpack.c.bf16 %v5053_v60, %v4992_v11  ;;  %v9350_v57 = vunpack.i.h.bf16 %v9348_v2  ;;  %v9355_v35 = vunpack.i.h.bf16 %v9353_v53  ;;  %v14741_v5 = vld [vmem:[#allocation23_spill] sm:$0xff] }
 0x4e8   : > { %v4991_v1 = vsel %vm14720_vm13, %v9305_v33, %v9314_v8  ;;  %vm14721_vm4 = vmmov %vm14717_vm1  ;;  %7535 = vmatprep.subr.bf16.mxu0 %v7534_v25  ;;  %7637 = vmatpush1.bf16.msra.mxu1 %v7636_v10  ;;  %v9349_v33 = vunpack.i.l.bf16 %v9348_v2  ;;  %vm14726_vm7 = vcmask 359424   ;;  %vm14731_vm6 = vcmask 220160  }
 0x4e9   : > { %v5052_v45 = vsel %vm14721_vm4, %v9310_v61, %v9319_v41  ;;  %vm14723_vm8 = vmmov %vm14710_vm9  ;;  %7639 = vmatprep.subr.bf16.mxu1 %v7638_v19  ;;  %v5231_v12 = vsel %vm14726_vm7, %v9344_v31, %v9345_v6  ;;  %v9354_v34 = vunpack.i.l.bf16 %v9353_v53  ;;  %vm14738_vm13 = vcmask 293888  }
 0x4ea   : > { %v5110_v15 = vsel %vm14723_vm8, %v14722_v21, %v9324_v20  ;;  %vm14724_vm5 = vmmov %vm14723_vm8  ;;  %v7640_v61 = vpack.c.bf16 %v5052_v45, %v4991_v1  ;;  %v5290_v27 = vsel %vm14731_vm6, %v14730_v48, %v9349_v33  ;;  %v9358_v8 = vpop.permute.xlu0 %9357  ;;  %v9363_v62 = vpop.permute.xlu1 %9362 }
 0x4eb   : > { %v7536_v49 = vpack.c.bf16 %v5170_v54, %v5110_v15  ;;  %v5113_v43 = vsel %vm14724_vm5, %v9334_v29, %v9335_v51  ;;  %vm14725_vm10 = vmmov %vm14715_vm3  ;;  %v9360_v55 = vunpack.i.h.bf16 %v9358_v8  ;;  %v9359_v37 = vunpack.i.l.bf16 %v9358_v8 }
 0x4ec   : > { %v5173_v36 = vsel %vm14725_vm10, %v9339_v42, %v9340_v46  ;;  %vm14727_vm2 = vmmov %vm14715_vm3  ;;  %7641 = vmatpush1.bf16.msra.mxu1 %v7640_v61  ;;  %v9365_v40 = vunpack.i.h.bf16 %v9363_v62  ;;  %v9364_v32 = vunpack.i.l.bf16 %v9363_v62  ;;  %vm14744_vm10 = vcmask 285696  }
 0x4ed   : > { %v5172_v47 = vsel %vm14727_vm2, %v9330_v3, %v9339_v42  ;;  %vm14729_vm9 = vmmov %vm14726_vm7  ;;  %7537 = vmatpush1.bf16.msra.mxu0 %v7536_v49  ;;  %v7642_v13 = vpack.c.bf16 %v5173_v36, %v5113_v43  ;;  %vm14748_vm2 = vcmask 146432  }
 0x4ee   : > { %v5230_v7 = vsel %vm14729_vm9, %v14728_v9, %v9344_v31  ;;  %vm14732_vm11 = vmmov %vm14731_vm6  ;;  %v9368_v17 = vpop.permute.xlu0 %9367  ;;  %v9373_v22 = vpop.permute.xlu1 %9372  ;;  %v5351_v58 = vsel %vm14738_vm13, %v9364_v32, %v9365_v40 }
 0x4ef   : > { %v5291_v20 = vsel %vm14732_vm11, %v9349_v33, %v9350_v57  ;;  %vm14733_vm14 = vmmov %vm14724_vm5  ;;  %v7540_v23 = vpack.c.bf16 %v5290_v27, %v5230_v7  ;;  %7643 = vmatprep.subr.bf16.mxu1 %v7642_v13  ;;  %v9370_v50 = vunpack.i.h.bf16 %v9368_v17  ;;  %v9369_v44 = vunpack.i.l.bf16 %v9368_v17 }
 0x4f0   : > { %v5112_v14 = vsel %vm14733_vm14, %v9325_v28, %v9334_v29  ;;  %v7538_v41 = vpack.c.bf16 %v5291_v20, %v5231_v12  ;;  %vm14734_vm3 = vmmov %vm14726_vm7  ;;  %v9375_v0 = vunpack.i.h.bf16 %v9373_v22  ;;  %v9374_v38 = vunpack.i.l.bf16 %v9373_v22 }
 0x4f1   : > { %v5233_v18 = vsel %vm14734_vm3, %v9354_v34, %v9355_v35  ;;  %v7644_v39 = vpack.c.bf16 %v5172_v47, %v5112_v14  ;;  %vm14735_vm0 = vmmov %vm14734_vm3  ;;  %v5411_v51 = vsel %vm5406_vm15, %v14741_v5, %v9369_v44  ;;  %v5412_v16 = vsel %vm5406_vm15, %v9369_v44, %v9370_v50 }
 0x4f2   : > { %7539 = vmatprep.subr.bf16.mxu0 %v7538_v41  ;;  %v5232_v3 = vsel %vm14735_vm0, %v9345_v6, %v9354_v34  ;;  %vm14736_vm1 = vmmov %vm14731_vm6  ;;  %v9378_v60 = vpop.permute.xlu0 %9377  ;;  %v9383_v24 = vpop.permute.xlu1 %9382  ;;  %v7542_v54 = vpack.c.bf16 %v5412_v16, %v5351_v58  ;;  %v14747_v35 = vunpack.i.l.bf16 %v14594_v30  ;;  %vm14754_vm3 = vcmask 277504  }
 0x4f3   : > { %v5292_v4 = vsel %vm14736_vm1, %v9350_v57, %v9359_v37  ;;  %7541 = vmatpush1.bf16.msra.mxu0 %v7540_v23  ;;  %vm14737_vm12 = vmmov %vm14736_vm1  ;;  %7645 = vmatpush1.bf16.msra.mxu1 %v7644_v39  ;;  %v9380_v46 = vunpack.i.h.bf16 %v9378_v60  ;;  %v9379_v42 = vunpack.i.l.bf16 %v9378_v60  ;;  %v9385_v6 = vunpack.i.h.bf16 %v9383_v24  ;;  %v14745_v57 = vld [vmem:[#allocation20_spill] sm:$0xff]  ;;  %v14764_v60 = vld [vmem:[#allocation18_spill] sm:$0xff] }
 0x4f4   : > { %v5293_v28 = vsel %vm14737_vm12, %v9359_v37, %v9360_v55  ;;  %v7648_v56 = vpack.c.bf16 %v5292_v4, %v5232_v3  ;;  %vm14740_vm4 = vmmov %vm14738_vm13  ;;  %7543 = vmatprep.subr.bf16.mxu0 %v7542_v54  ;;  %v9384_v1 = vunpack.i.l.bf16 %v9383_v24  ;;  %vm14758_vm1 = vcmask 138240  }
 0x4f5   : > { %v7646_v59 = vpack.c.bf16 %v5293_v28, %v5233_v18  ;;  %v5350_v11 = vsel %vm14740_vm4, %v14739_v26, %v9364_v32  ;;  %vm14742_vm8 = vmmov %vm14740_vm4  ;;  %v5413_v31 = vsel %vm5406_vm15, %v9370_v50, %v9379_v42  ;;  %v5414_v45 = vsel %vm5406_vm15, %v9379_v42, %v9380_v46  ;;  %v14755_v32 = vld [vmem:[#allocation52_spill] sm:$0xff] }
 0x4f6   : > { %v7544_v25 = vpack.c.bf16 %v5411_v51, %v5350_v11  ;;  %v5353_v10 = vsel %vm14742_vm8, %v9374_v38, %v9375_v0  ;;  %vm14743_vm5 = vmmov %vm14740_vm4  ;;  %v9388_v15 = vpop.permute.xlu0 %9387  ;;  %v9393_v19 = vpop.permute.xlu1 %9392  ;;  %v5472_v36 = vsel %vm14744_vm10, %v9384_v1, %v9385_v6  ;;  %v14765_v24 = vsub.s32 0, %v14764_v60 }
 0x4f7   : > { %7647 = vmatprep.subr.bf16.mxu1 %v7646_v59  ;;  %v5352_v29 = vsel %vm14743_vm5, %v9365_v40, %v9374_v38  ;;  %v7650_v49 = vpack.c.bf16 %v5414_v45, %v5353_v10  ;;  %v9390_v2 = vunpack.i.h.bf16 %v9388_v15  ;;  %v9389_v53 = vunpack.i.l.bf16 %v9388_v15  ;;  %vm14746_vm7 = vmmov %vm14744_vm10 }
 0x4f8   : > { %7649 = vmatpush1.bf16.msra.mxu1 %v7648_v56  ;;  %7545 = vmatpush1.bf16.msra.mxu0 %v7544_v25  ;;  %v7652_v21 = vpack.c.bf16 %v5413_v31, %v5352_v29  ;;  %v9395_v43 = vunpack.i.h.bf16 %v9393_v19  ;;  %v5471_v33 = vsel %vm14746_vm7, %v14745_v57, %v9384_v1  ;;  %v9394_v61 = vunpack.i.l.bf16 %v9393_v19  ;;  %vm14749_vm15 = vmmov %vm14748_vm2  ;;  %v6696_v25 = vld [vmem:[#allocation10] sm:$0xff] }
 0x4f9   : > { %7651 = vmatprep.subr.bf16.mxu1 %v7650_v49  ;;  %v5531_v12 = vsel %vm14748_vm2, %v14747_v35, %v9389_v53  ;;  %v5532_v47 = vsel %vm14749_vm15, %v9389_v53, %v9390_v2  ;;  %vm14750_vm9 = vmmov %vm14746_vm7  ;;  %v14757_v56 = vunpack.i.l.bf16 %v12631_v52  ;;  %v6701_v54 = vrot.slane %v6696_v25, %v14765_v24 }
 0x4fa   : > { %v7548_v9 = vpack.c.bf16 %v5531_v12, %v5471_v33  ;;  %v9398_v7 = vpop.permute.xlu0 %9397  ;;  %v9403_v48 = vpop.permute.xlu1 %9402  ;;  %v7546_v27 = vpack.c.bf16 %v5532_v47, %v5472_v36  ;;  %v5474_v14 = vsel %vm14750_vm9, %v9394_v61, %v9395_v43  ;;  %vm14751_vm6 = vmmov %vm14746_vm7  ;;  %v14766_v46 = vsub.s32 1, %v14764_v60 }
 0x4fb   : > { %v9400_v34 = vunpack.i.h.bf16 %v9398_v7  ;;  %v9399_v13 = vunpack.i.l.bf16 %v9398_v7  ;;  %v9405_v20 = vunpack.i.h.bf16 %v9403_v48  ;;  %v5473_v23 = vsel %vm14751_vm6, %v9385_v6, %v9394_v61  ;;  %vm14752_vm11 = vmmov %vm14748_vm2 }
 0x4fc   : > { %7653 = vmatpush1.bf16.msra.mxu1 %v7652_v21  ;;  %7547 = vmatprep.subr.bf16.mxu0 %v7546_v27  ;;  %v9404_v8 = vunpack.i.l.bf16 %v9403_v48  ;;  %vm14753_vm14 = vmmov %vm14748_vm2  ;;  %v6705_v42 = vrot.slane %v6696_v25, %v14766_v46  ;;  %vm6746_vm10 = vcmask 1041408   ;;  %v14767_v1 = vsub.s32 2, %v14764_v60 }
 0x4fd   : > { %v5533_v30 = vsel %vm14752_vm11, %v9390_v2, %v9399_v13  ;;  %7549 = vmatpush1.bf16.msra.mxu0 %v7548_v9  ;;  %v5534_v62 = vsel %vm14753_vm14, %v9399_v13, %v9400_v34  ;;  %vm14756_vm0 = vmmov %vm14754_vm3  ;;  %v14768_v15 = vsub.s32 3, %v14764_v60 }
 0x4fe   : > { %v7656_v41 = vpack.c.bf16 %v5533_v30, %v5473_v23  ;;  %v9408_v55 = vpop.permute.xlu0 %9407  ;;  %v9413_v37 = vpop.permute.xlu1 %9412  ;;  %v7654_v40 = vpack.c.bf16 %v5534_v62, %v5474_v14  ;;  %v5592_v4 = vsel %vm14754_vm3, %v9404_v8, %v9405_v20  ;;  %v5591_v28 = vsel %vm14756_vm0, %v14755_v32, %v9404_v8  ;;  %vm14759_vm12 = vmmov %vm14758_vm1 }
 0x4ff   : > { %v9410_v18 = vunpack.i.h.bf16 %v9408_v55  ;;  %v9409_v39 = vunpack.i.l.bf16 %v9408_v55  ;;  %v9415_v3 = vunpack.i.h.bf16 %v9413_v37  ;;  %v9414_v22 = vunpack.i.l.bf16 %v9413_v37  ;;  %vm14760_vm13 = vmmov %vm14756_vm0 }
 0x500   : > { %7655 = vmatprep.subr.bf16.mxu1 %v7654_v40  ;;  %vm14761_vm4 = vmmov %vm14756_vm0  ;;  %v6709_v45 = vrot.slane %v6696_v25, %v14767_v1  ;;  %v6713_v19 = vrot.slane %v6696_v25, %v14768_v15  ;;  %v14769_v30 = vsub.s32 4, %v14764_v60  ;;  %v14770_v62 = vsub.s32 5, %v14764_v60 }
 0x501   : > { %v5651_v17 = vsel %vm14758_vm1, %v14757_v56, %v9409_v39  ;;  %7657 = vmatpush1.bf16.msra.mxu1 %v7656_v41  ;;  %v5652_v59 = vsel %vm14759_vm12, %v9409_v39, %v9410_v18  ;;  %v5594_v11 = vsel %vm14760_vm13, %v9414_v22, %v9415_v3  ;;  %v5593_v5 = vsel %vm14761_vm4, %v9405_v20, %v9414_v22  ;;  %vm14762_vm8 = vmmov %vm14758_vm1 }
 0x502   : > { %v7552_v50 = vpack.c.bf16 %v5651_v17, %v5591_v28  ;;  %v9418_v44 = vpop.permute.xlu0 %9417  ;;  %v7550_v0 = vpack.c.bf16 %v5652_v59, %v5592_v4  ;;  %vm14763_vm5 = vmmov %vm14758_vm1  ;;  %v6717_v8 = vrot.slane %v6696_v25, %v14769_v30  ;;  %v6721_v41 = vrot.slane %v6696_v25, %v14770_v62 }
 0x503   : > { %v9420_v58 = vunpack.i.h.bf16 %v9418_v44  ;;  %v9419_v26 = vunpack.i.l.bf16 %v9418_v44  ;;  %v14772_v4 = vsub.s32 7, %v14764_v60 }
 0x504   : > { %7551 = vmatprep.subr.bf16.mxu0 %v7550_v0 }
 0x505   : > { %v5653_v51 = vsel %vm14762_vm8, %v9410_v18, %v9419_v26  ;;  %7553 = vmatpush1.bf16.msra.mxu0 %v7552_v50  ;;  %v5654_v52 = vsel %vm14763_vm5, %v9419_v26, %v9420_v58  ;;  %v14771_v18 = vsub.s32 6, %v14764_v60  ;;  %v6729_v32 = vrot.slane %v6696_v25, %v14772_v4 }
 0x506   : > { %v7660_v38 = vpack.c.bf16 %v5653_v51, %v5593_v5  ;;  %v7658_v16 = vpack.c.bf16 %v5654_v52, %v5594_v11 }
 0x507   : > { %v6725_v39 = vrot.slane %v6696_v25, %v14771_v18 }
 0x508   : > { %6548 = vmatmul.mubr.f32.vlgmr.msra.gmra.mrb[6].mxu0 %v12124_v63  ;;  %7659 = vmatprep.subr.bf16.mxu1 %v7658_v16 }
 0x509   : > { %7661 = vmatpush1.bf16.msra.mxu1 %v7660_v38 }
 0x50c   : > { %6690 = vmatmul.mubr.f32.vlgmr.msra.gmra.mrb[6].mxu1 %v12124_v63 }
 0x54e   : > { %v13448_v6 = vpop.f32.mrb[4].mxu0 }
 0x54f   : > { %v6738_v10 = vmul.f32 %v6701_v54, %v13448_v6  ;;  %v13451_v29 = vpop.f32.mrb[5].mxu0 }
 0x550   : > { %v6739_v31 = vmul.f32 %v6705_v42, %v13451_v29 }
 0x551   : > { %v6747_v63 = vsel %vm6746_vm10, %v6738_v10, 0.0  ;;  %v6764_v21 = vmul.f32 %v6738_v10, %v13448_v6 }
 0x552   : > { %v6748_v49 = vsel %vm6746_vm10, %v6739_v31, 0.0  ;;  %v6765_v2 = vmul.f32 %v6739_v31, %v13451_v29 }
 0x553   : > { %v6772_v53 = vsel %vm6746_vm10, %v6764_v21, 0.0  ;;  %v6749_v43 = vadd.f32 %v6748_v49, %v6747_v63 }
 0x554   : > { %v6773_v57 = vsel %vm6746_vm10, %v6765_v2, 0.0 }
 0x555   : > { %v6774_v12 = vadd.f32 %v6773_v57, %v6772_v53 }
 0x556   : > { %v13463_v36 = vpop.f32.mrb[4].mxu1 }
 0x557   : > { %v6740_v33 = vmul.f32 %v6709_v45, %v13463_v36  ;;  %v13467_v35 = vpop.f32.mrb[5].mxu1 }
 0x558   : > { %v6741_v61 = vmul.f32 %v6713_v19, %v13467_v35 }
 0x559   : > { %v6750_v47 = vsel %vm6746_vm10, %v6740_v33, 0.0  ;;  %v6766_v9 = vmul.f32 %v6740_v33, %v13463_v36 }
 0x55a   : > { %v6751_v7 = vadd.f32 %v6750_v47, %v6749_v43  ;;  %v6752_v48 = vsel %vm6746_vm10, %v6741_v61, 0.0  ;;  %v6767_v27 = vmul.f32 %v6741_v61, %v13467_v35 }
 0x55b   : > { %v6775_v34 = vsel %vm6746_vm10, %v6766_v9, 0.0 }
 0x55c   : > { %v6776_v13 = vadd.f32 %v6775_v34, %v6774_v12  ;;  %v6753_v20 = vadd.f32 %v6752_v48, %v6751_v7  ;;  %v6777_v14 = vsel %vm6746_vm10, %v6767_v27, 0.0 }
 0x55e   : > { %v6778_v23 = vadd.f32 %v6777_v14, %v6776_v13 }
 0x5db   : > { %v6549_v55 = vpop.f32.mrb[6].mxu0 }
 0x5dc   : > { %v6742_v37 = vmul.f32 %v6717_v8, %v6549_v55  ;;  %v6551_v40 = vpop.f32.mrb[7].mxu0 }
 0x5dd   : > { %v6743_v3 = vmul.f32 %v6721_v41, %v6551_v40 }
 0x5de   : > { %v6754_v28 = vsel %vm6746_vm10, %v6742_v37, 0.0  ;;  %v6768_v56 = vmul.f32 %v6742_v37, %v6549_v55 }
 0x5df   : > { %v6755_v17 = vadd.f32 %v6754_v28, %v6753_v20  ;;  %v6756_v22 = vsel %vm6746_vm10, %v6743_v3, 0.0  ;;  %v6769_v59 = vmul.f32 %v6743_v3, %v6551_v40  ;;  %v6691_v50 = vpop.f32.mrb[6].mxu1 }
 0x5e0   : > { %v6779_v44 = vsel %vm6746_vm10, %v6768_v56, 0.0  ;;  %v6744_v0 = vmul.f32 %v6725_v39, %v6691_v50  ;;  %v6693_v58 = vpop.f32.mrb[7].mxu1 }
 0x5e1   : > { %v6780_v26 = vadd.f32 %v6779_v44, %v6778_v23  ;;  %v6757_v11 = vadd.f32 %v6756_v22, %v6755_v17  ;;  %v6781_v5 = vsel %vm6746_vm10, %v6769_v59, 0.0  ;;  %v6745_v51 = vmul.f32 %v6729_v32, %v6693_v58 }
 0x5e2   : > { %v6758_v52 = vsel %vm6746_vm10, %v6744_v0, 0.0  ;;  %v6770_v38 = vmul.f32 %v6744_v0, %v6691_v50 }
 0x5e3   : > { %v6782_v16 = vadd.f32 %v6781_v5, %v6780_v26  ;;  %v6760_v25 = vsel %vm6746_vm10, %v6745_v51, 0.0  ;;  %v6771_v60 = vmul.f32 %v6745_v51, %v6693_v58  ;;  %v6759_v24 = vadd.f32 %v6758_v52, %v6757_v11 }
 0x5e4   : > { %v6783_v54 = vsel %vm6746_vm10, %v6770_v38, 0.0 }
 0x5e5   : > { %v6785_v46 = vsel %vm6746_vm10, %v6771_v60, 0.0  ;;  %v6761_v42 = vadd.f32 %v6760_v25, %v6759_v24  ;;  %v6784_v10 = vadd.f32 %v6783_v54, %v6782_v16 }
 0x5e7   : > { %6762 = vadd.xlane.f32.xlu1 %v6761_v42  ;;  %v6786_v31 = vadd.f32 %v6785_v46, %v6784_v10 }
 0x5e9   : > { %6787 = vadd.xlane.f32.xlu0 %v6786_v31 }
 0x674   : > { %v6763_v1 = vpop.xlane.xlu1 %6762 }
 0x675   : > { %v6789_v45 = vmul.f32 0.001953125, %v6763_v1 }
 0x676   : > { %v6788_v63 = vpop.xlane.xlu0 %6787 }
 0x677   : > { %v6790_v21 = vmul.f32 0.001953125, %v6788_v63  ;;  %v6791_v15 = vmul.f32 %v6789_v45, %v6789_v45  ;;  %v6794_v53 = vsub.f32 %v13448_v6, %v6789_v45  ;;  %v6795_v43 = vsub.f32 %v13451_v29, %v6789_v45 }
 0x678   : > { %v6796_v57 = vsub.f32 %v13463_v36, %v6789_v45  ;;  %v6797_v33 = vsub.f32 %v13467_v35, %v6789_v45  ;;  %v6798_v61 = vsub.f32 %v6549_v55, %v6789_v45  ;;  %v6799_v47 = vsub.f32 %v6551_v40, %v6789_v45 }
 0x679   : > { %v6792_v19 = vsub.f32 %v6790_v21, %v6791_v15  ;;  %v6800_v9 = vsub.f32 %v6691_v50, %v6789_v45  ;;  %v6801_v7 = vsub.f32 %v6693_v58, %v6789_v45  ;;  %v14773_v50 = vld [vmem:[#allocation78_spill] sm:$0xff] }
 0x67b   : > { %v6793_v49 = vmax.f32 %v6792_v19, 0.0 }
 0x67d   : > { %v6802_v2 = vadd.f32 1e-05, %v6793_v49 }
 0x67f   : > { %9422 = vrsqrt.f32 %v6802_v2 }
 0x689   : > { %v9423_v12 = vpop.eup %9422 }
 0x68a   : > { %v6804_v48 = vmul.f32 %v9423_v12, %v6794_v53  ;;  %v6805_v27 = vmul.f32 %v9423_v12, %v6795_v43  ;;  %v6806_v34 = vmul.f32 %v9423_v12, %v6796_v57  ;;  %v6807_v13 = vmul.f32 %v9423_v12, %v6797_v33 }
 0x68b   : > { %v6808_v20 = vmul.f32 %v9423_v12, %v6798_v61  ;;  %v6809_v14 = vmul.f32 %v9423_v12, %v6799_v47  ;;  %v6810_v23 = vmul.f32 %v9423_v12, %v6800_v9  ;;  %v6811_v6 = vmul.f32 %v9423_v12, %v6801_v7 }
 0x68c   : > { %vm6812_vm7 = vcmp.ge.f32.partialorder %v6804_v48, 0.0  ;;  %vm6813_vm2 = vcmp.ge.f32.partialorder %v6805_v27, 0.0  ;;  %vm6814_vm15 = vcmp.ge.f32.partialorder %v6806_v34, 0.0  ;;  %vm6815_vm9 = vcmp.ge.f32.partialorder %v6807_v13, 0.0 }
 0x68d   : > { %vm6816_vm6 = vcmp.ge.f32.partialorder %v6808_v20, 0.0  ;;  %vm6817_vm11 = vcmp.ge.f32.partialorder %v6809_v14, 0.0  ;;  %vm6818_vm14 = vcmp.ge.f32.partialorder %v6810_v23, 0.0  ;;  %vm6819_vm3 = vcmp.ge.f32.partialorder %v6811_v6, 0.0 }
 0x68e   : > { %v6820_v29 = vmul.f32 0.2, %v6804_v48  ;;  %v6821_v36 = vmul.f32 0.2, %v6805_v27  ;;  %v6822_v35 = vmul.f32 0.2, %v6806_v34 }
 0x68f   : > { %v6823_v30 = vmul.f32 0.2, %v6807_v13  ;;  %v6824_v8 = vmul.f32 0.2, %v6808_v20  ;;  %v6825_v62 = vmul.f32 0.2, %v6809_v14 }
 0x690   : > { %v6826_v41 = vmul.f32 0.2, %v6810_v23  ;;  %v6827_v55 = vmul.f32 0.2, %v6811_v6  ;;  %v6828_v37 = vsel %vm6812_vm7, %v6804_v48, %v6820_v29  ;;  %v6829_v40 = vsel %vm6813_vm2, %v6805_v27, %v6821_v36 }
 0x691   : > { %v6830_v18 = vsel %vm6814_vm15, %v6806_v34, %v6822_v35  ;;  %v6831_v39 = vsel %vm6815_vm9, %v6807_v13, %v6823_v30  ;;  %v6832_v3 = vsel %vm6816_vm6, %v6808_v20, %v6824_v8  ;;  %v6833_v4 = vsel %vm6817_vm11, %v6809_v14, %v6825_v62 }
 0x692   : > { %v6834_v32 = vsel %vm6818_vm14, %v6810_v23, %v6826_v41  ;;  %v6835_v28 = vsel %vm6819_vm3, %v6811_v6, %v6827_v55  ;;  %v6844_v56 = vcombine.low %v6828_v37, %v6829_v40  ;;  %v6845_v17 = vcombine.low %v6830_v18, %v6831_v39 }
 0x693   : > { %v6861_v22 = vcombine.low %v6832_v3, %v6833_v4  ;;  %v6862_v59 = vcombine.low %v6834_v32, %v6835_v28 }
 0x694   : > { %v6852_v44 = vrot.slane %v6844_v56, %v14773_v50  ;;  %v6859_v0 = vrot.slane %v6845_v17, %v14773_v50 }
 0x695   : > { %v6869_v58 = vrot.slane %v6861_v22, %v14773_v50  ;;  %v6876_v26 = vrot.slane %v6862_v59, %v14773_v50 }
 0x696   : > { %v6860_v11 = vcombine.low %v6852_v44, %v6859_v0 }
 0x697   : > { %v6877_v5 = vcombine.low %v6869_v58, %v6876_v26 }
 0x698   : > { %6880 = vst [vmem:[%s317_s12] sm:$0xff] %v6860_v11 }
 0x699   : > { %6881 = vst [vmem:[%s317_s12 + $0x8] sm:$0xff] %v6877_v5 }
 0x69a   : > { %9526 = shalt.err (!%p9523_p4)
}
 0x69b   : > { %s9527_s0 = scalar_lea.hbm %s13513_s11, 256  ;;  %s9531_s17 = scalar_lea.hbm %s13563_s6, 512 }
 0x69c   : > { %p9528_p9 = scmp.ne.s32.totalorder %s13513_s11, %s9527_s0  ;;  %p9532_p8 = scmp.lt.u32.totalorder %s13513_s11, %s13563_s6 }
 0x69d   : > { %p9533_p11 = scmp.lt.u32.totalorder %s9531_s17, %s9527_s0  ;;  %p9535_p13 = scmp.lt.u32.totalorder %s9527_s0, %s13513_s11 }
 0x69e   : > { %p9529_p12 = pnand %p9528_p9, %p14774_p0 }
 0x69f   : > { %p9534_p3 = por %p9533_p11, %p9532_p8 }
 0x6a0   : > { %p9530_p6 = pneg %p9529_p12 }
 0x6a1   : > { %p9536_p5 = por %p9535_p13, %p9534_p3 }
 0x6a3   : > { %p9537_p10 = pnand %p9536_p5, %p9530_p6 }
 0x6a5   : > { %9540 = shalt.err (!%p9537_p10)
}
 0x6a6   : > { %7683 = dma.vmem_to_hbm [thread:$0]  (%p14774_p0), %s13515_s30, 256, %s13513_s11, %s6883_s25  }
 0x6a7 PF: > { %s6909_s15 = sand.u32 1, %s9575_s21   ;;  %p14775_p1 = scmp.ne.s32.totalorder %s13918_s28, 0 }
 0x6a8   : > { %p14776_p2 = scmp.ge.s32.totalorder %s9587_s24, 2  ;;  %s6910_s27 = scalar_lea.sflag [#allocation7], %s6909_s15 }
 0x6aa   : > { %p7697_p7 = pnand %p14776_p2, %p14775_p1 }
 0x6ac   : > { %9570 = dma.done.wait (!%p7697_p7), %s6910_s27, 256  }
 0x6ad   : > { %9572 = vsyncadd (!%p7697_p7), %s6910_s27, 4294967040  ;;  %p22_p4 = scmp.ge.s32.totalorder %s9724_s8, 4   ;;  %s14777_s21 = smov %s9579_s22 }
 0x6ae   : > { %s14778_s22 = smov %s9583_s23  ;;  %s14779_s23 = smov %s9760_s10 }
 0x6af   : > { %s14780_s24 = smov %s9724_s8  ;;  %24 = sbr.rel (!%p22_p4) target bundleno = 12 (0xc), region = 106 }
 0x6b6   :  { %6915 = vsyncpa [#allocation6], 1 }
 0x6b7   :  { %6917 = vsyncpa [#allocation6 + $0x1], 1 }
 0x6b8   :  { %6918 = vsyncpa [#allocation9], 1 }
 0x6b9   :  { %6920 = vsyncpa [#allocation9 + $0x1], 1 }
 0x6ba   :  { %6921 = vsyncpa [#allocation7], 1 }
 0x6bb   :  { %6923 = vsyncpa [#allocation7 + $0x1], 1 }

</bundles_post_ra>
